<compile_context>
chip_gen: v6e
topology: v6e:2x2x1
jax: 0.10.0
libtpu: 0.0.40
codegen_flags: <defaults>
</compile_context>

<pallas_src>
import math
import functools

import jax
import jax.numpy as jnp
from jax.experimental import pallas as pl
from jax.experimental.pallas import tpu as pltpu


_BN_EPS = 1e-5
_NEG_LARGE = -1e30                      # finite "-inf" for maxpool padding
_VMEM_LIMIT = 32 * 1024 * 1024          # safe on v5e/v6e (128MiB) & v7x (64MiB)

# (planes, n_blocks, first-block stride) for layer1..layer3 (layer4 unused)
_LAYER_CFG = [(64, 2, 1), (128, 2, 2), (256, 2, 2)]


def _round_up(v, m):
    return ((v + m - 1) // m) * m


# --------------------------- fused conv+BN(+res)(+ReLU) ----------------------

def _conv_bn_act_kernel(x_ref, w_ref, g_ref, b_ref, *rest,
                        relu, has_res, m_valid, count):
    """One Cout tile: [M_pad, K_pad] @ [K_pad, TJ] -> BN -> (+res) -> (ReLU).

    x_ref: [M_pad, K_pad] bf16 im2col operand (valid output rows only)
    w_ref: [K_pad, TJ]    bf16 K-stacked weights for this Cout tile
    g_ref, b_ref: [1, TJ] f32 gamma/beta
    rest: ([M_pad, TJ] f32 residual,) o_ref [M_pad, TJ] f32
    """
    if has_res:
        r_ref, o_ref = rest
    else:
        (o_ref,) = rest

    acc = jnp.dot(x_ref[...], w_ref[...],
                  preferred_element_type=jnp.float32)          # [M_pad, TJ]
    m_pad = acc.shape[0]

    # Batch statistics over the valid rows (all rows are valid unless M was
    # padded up to a sublane multiple; the mask branch is trace-time gated).
    if m_valid < m_pad:
        row = jax.lax.broadcasted_iota(jnp.int32, (m_pad, 1), 0)
        vm = jnp.where(row < m_valid, acc, 0.0)
    else:
        vm = acc
    inv = 1.0 / count
    s0 = jnp.sum(vm, axis=0, keepdims=True)
    s1 = jnp.sum(vm * vm, axis=0, keepdims=True)
    mean = s0 * inv
    var = jnp.maximum(s1 * inv - mean * mean, 0.0)
    scale = jax.lax.rsqrt(var + _BN_EPS) * g_ref[...]
    shift = b_ref[...] - mean * scale

    v = acc * scale + shift
    if has_res:
        v = v + r_ref[...]
    if relu:
        v = jnp.maximum(v, 0.0)
    o_ref[...] = v                                              # single store


def _im2col(x4d, KH, KW, stride, padding, pad_value=0.0):
    """Extract conv patches: returns ([N*Hout*Wout, KH*KW*C], Hout, Wout)."""
    N, H, W, C = x4d.shape
    Hout = (H + 2 * padding - KH) // stride + 1
    Wout = (W + 2 * padding - KW) // stride + 1
    if padding:
        x4d = jnp.pad(x4d, ((0, 0), (padding, padding),
                            (padding, padding), (0, 0)),
                      constant_values=pad_value)
    taps = []
    for kh in range(KH):
        for kw in range(KW):
            taps.append(x4d[:, kh:kh + stride * (Hout - 1) + 1:stride,
                            kw:kw + stride * (Wout - 1) + 1:stride, :])
    col = taps[0] if len(taps) == 1 else jnp.concatenate(taps, axis=-1)
    return col.reshape(N * Hout * Wout, KH * KW * C), Hout, Wout


def conv_bn_act(x4d, w_pad, gamma, beta, *, KH, KW, stride, padding,
                relu, cout, residual=None):
    """Fused Conv2d(bias=False) + training-mode BatchNorm2d
    (+ optional residual add) (+ optional ReLU) on NHWC activations.

    x4d:   [N, H, W, Cin] f32
    w_pad: [K_pad, Cout_pad] bf16   (tap-major rows, zero-padded, prebuilt)
    gamma/beta: [1, Cout_pad] f32
    residual: optional [N, Hout, Wout, cout] f32
    returns [N, Hout, Wout, cout] f32
    """
    N, H, W, Cin = x4d.shape
    x_col, Hout, Wout = _im2col(x4d, KH, KW, stride, padding)
    M = N * Hout * Wout
    K = KH * KW * Cin
    K_pad, Cout_pad = w_pad.shape
    M_pad = _round_up(max(M, 8), 8)

    x_col = x_col.astype(jnp.bfloat16)
    if M_pad != M or K_pad != K:
        x_col = jnp.pad(x_col, ((0, M_pad - M), (0, K_pad - K)))

    TJ = 128                      # lane-dense output tiles; layer3 -> 2 tiles
    n_j = Cout_pad // TJ

    in_specs = [
        pl.BlockSpec((M_pad, K_pad), lambda j: (0, 0)),   # resident operand
        pl.BlockSpec((K_pad, TJ), lambda j: (0, j)),      # all taps resident
        pl.BlockSpec((1, TJ), lambda j: (0, j)),          # gamma
        pl.BlockSpec((1, TJ), lambda j: (0, j)),          # beta
    ]
    args = [x_col, w_pad, gamma, beta]

    has_res = residual is not None
    if has_res:
        r = residual.reshape(M, residual.shape[-1])
        if M_pad != M or Cout_pad != r.shape[1]:
            r = jnp.pad(r, ((0, M_pad - M), (0, Cout_pad - r.shape[1])))
        args.append(r)
        in_specs.append(pl.BlockSpec((M_pad, TJ), lambda j: (0, j)))

    kern = functools.partial(_conv_bn_act_kernel, relu=relu, has_res=has_res,
                             m_valid=M, count=float(M))

    out = pl.pallas_call(
        kern,
        out_shape=jax.ShapeDtypeStruct((M_pad, Cout_pad), jnp.float32),
        grid=(n_j,),
        in_specs=in_specs,
        out_specs=pl.BlockSpec((M_pad, TJ), lambda j: (0, j)),
        compiler_params=pltpu.CompilerParams(
            dimension_semantics=("parallel",),
            vmem_limit_bytes=_VMEM_LIMIT),
    )(*args)

    return out[:M, :cout].reshape(N, Hout, Wout, cout)


# ------------------------------- maxpool -------------------------------------

def _maxpool_kernel(x_ref, o_ref):
    """x_ref: [T, M_pad, C]; single maximum tree + single store."""
    v = x_ref[0]
    for t in range(1, x_ref.shape[0]):
        v = jnp.maximum(v, x_ref[t])
    o_ref[...] = v


def maxpool_3x3_s2_p1(x4d):
    N, H, W, C = x4d.shape
    KH = KW = 3
    stride, padding = 2, 1
    Hout = (H + 2 * padding - KH) // stride + 1
    Wout = (W + 2 * padding - KW) // stride + 1
    xp = jnp.pad(x4d, ((0, 0), (padding, padding), (padding, padding), (0, 0)),
                 constant_values=_NEG_LARGE)
    taps = []
    for kh in range(KH):
        for kw in range(KW):
            taps.append(xp[:, kh:kh + stride * (Hout - 1) + 1:stride,
                           kw:kw + stride * (Wout - 1) + 1:stride, :])
    T = KH * KW
    M = N * Hout * Wout
    M_pad = _round_up(max(M, 8), 8)
    stack = jnp.stack(taps, axis=0).reshape(T, M, C)
    if M_pad != M:
        stack = jnp.pad(stack, ((0, 0), (0, M_pad - M), (0, 0)),
                        constant_values=_NEG_LARGE)

    out = pl.pallas_call(
        _maxpool_kernel,
        out_shape=jax.ShapeDtypeStruct((M_pad, C), jnp.float32),
        grid=(1,),
        in_specs=[pl.BlockSpec((T, M_pad, C), lambda i: (0, 0, 0))],
        out_specs=pl.BlockSpec((M_pad, C), lambda i: (0, 0)),
        compiler_params=pltpu.CompilerParams(
            dimension_semantics=("arbitrary",),
            vmem_limit_bytes=_VMEM_LIMIT),
    )(stack)

    return out[:M].reshape(N, Hout, Wout, C)


# ------------------------------- parameters ----------------------------------

def _kaiming_conv(key, cout, cin, kh, kw):
    # kaiming_normal_(mode='fan_out', nonlinearity='relu')
    fan_out = cout * kh * kw
    std = math.sqrt(2.0 / fan_out)
    return (std * jax.random.normal(key, (cout, cin, kh, kw))).astype(jnp.float32)


def _prep_conv_w(w):
    """[Cout, Cin, KH, KW] f32 -> [K_pad, Cout_pad] bf16, tap-major rows.

    Row order (kh, kw, cin) matches the im2col tap-concatenation order.
    Cached once at parameter creation (no per-call cast/reshape).
    """
    cout, cin, kh, kw = w.shape
    K = kh * kw * cin
    w_mat = w.transpose(2, 3, 1, 0).reshape(K, cout)
    K_pad = _round_up(K, 128)
    Cout_pad = _round_up(cout, 128)
    w_mat = jnp.pad(w_mat, ((0, K_pad - K), (0, Cout_pad - cout)))
    return w_mat.astype(jnp.bfloat16)


def _bn_params(c):
    # nn.init.constant_(weight, 1); nn.init.constant_(bias, 0); lane-padded.
    cp = _round_up(c, 128)
    return jnp.ones((1, cp), jnp.float32), jnp.zeros((1, cp), jnp.float32)


def make_params(key):
    # ResNet(BasicBlock, [2, 2, 2, 2]); forward only uses conv1..layer3.
    # TODO(synk): layer4 / avgpool / fc are initialized in __init__ but never
    # used by forward(), so their parameters are not materialized here.
    keys = iter(jax.random.split(key, 64))
    params = {'conv1_w': _prep_conv_w(_kaiming_conv(next(keys), 64, 3, 7, 7))}
    params['bn1_g'], params['bn1_b'] = _bn_params(64)
    inplanes = 64
    for li, (planes, n_blocks, stride) in enumerate(_LAYER_CFG, start=1):
        blocks = []
        for bi in range(n_blocks):
            s = stride if bi == 0 else 1
            blk = {
                'conv1_w': _prep_conv_w(
                    _kaiming_conv(next(keys), planes, inplanes, 3, 3)),
                'conv2_w': _prep_conv_w(
                    _kaiming_conv(next(keys), planes, planes, 3, 3)),
            }
            blk['bn1_g'], blk['bn1_b'] = _bn_params(planes)
            blk['bn2_g'], blk['bn2_b'] = _bn_params(planes)
            if s != 1 or inplanes != planes:       # BasicBlock.expansion == 1
                blk['down_w'] = _prep_conv_w(
                    _kaiming_conv(next(keys), planes, inplanes, 1, 1))
                blk['down_g'], blk['down_b'] = _bn_params(planes)
            blocks.append(blk)
            inplanes = planes
        params[f'layer{li}'] = blocks
    return params


# -------------------------------- forward ------------------------------------

def _basic_block_forward(x4d, blk, *, planes, stride):
    out = conv_bn_act(x4d, blk['conv1_w'], blk['bn1_g'], blk['bn1_b'],
                      KH=3, KW=3, stride=stride, padding=1,
                      relu=True, cout=planes)
    if 'down_w' in blk:
        identity = conv_bn_act(x4d, blk['down_w'], blk['down_g'], blk['down_b'],
                               KH=1, KW=1, stride=stride, padding=0,
                               relu=False, cout=planes)
    else:
        identity = x4d
    # conv2 + bn2 + residual add + relu fully fused in one kernel
    out = conv_bn_act(out, blk['conv2_w'], blk['bn2_g'], blk['bn2_b'],
                      KH=3, KW=3, stride=1, padding=1,
                      relu=True, cout=planes, residual=identity)
    return out


def resnet_forward(x_nchw, params):
    x = x_nchw.transpose(0, 2, 3, 1)                 # NCHW -> NHWC (once)
    x = conv_bn_act(x, params['conv1_w'], params['bn1_g'], params['bn1_b'],
                    KH=7, KW=7, stride=2, padding=3, relu=True, cout=64)
    x = maxpool_3x3_s2_p1(x)
    outs = []
    for li, (planes, n_blocks, stride) in enumerate(_LAYER_CFG, start=1):
        blocks = params[f'layer{li}']
        for bi in range(n_blocks):
            s = stride if bi == 0 else 1
            x = _basic_block_forward(x, blocks[bi], planes=planes, stride=s)
        outs.append(x)
    # back to NCHW only at the module boundary, matching the PyTorch forward
    return [o.transpose(0, 3, 1, 2) for o in outs]


resnet_forward_jit = jax.jit(resnet_forward)


# ---------------------------------- main --------------------------------------

if __name__ == "__main__":
    key = jax.random.PRNGKey(0)
    kx, kp = jax.random.split(key)
    x = jax.random.normal(kx, (2, 3, 32, 32), jnp.float32)
    params = make_params(kp)

    outs = resnet_forward_jit(x, params)
    outs = jax.block_until_ready(outs)

    assert outs[0].shape == (2, 64, 8, 8)
    assert outs[1].shape == (2, 128, 4, 4)
    assert outs[2].shape == (2, 256, 2, 2)
    assert all(bool(jnp.isfinite(o).all()) for o in outs)
    print("KERNEL_OK")
</pallas_src>

<mosaic_0001>
module attributes {stable_mosaic.version = 11 : i64} {
  func.func @_conv_bn_act_kernel(%arg0: i32, %arg1: memref<512x256xbf16, #tpu.memory_space<vmem>>, %arg2: memref<256x128xbf16, #tpu.memory_space<vmem>>, %arg3: memref<1x128xf32, #tpu.memory_space<vmem>>, %arg4: memref<1x128xf32, #tpu.memory_space<vmem>>, %arg5: memref<512x128xf32, #tpu.memory_space<vmem>>) attributes {dimension_semantics = [#tpu.dimension_semantics<parallel>], iteration_bounds = array<i64: 1>, scalar_prefetch = 0 : i64, scratch_operands = 0 : i64, tpu.core_type = #tpu.core_type<tc>, window_params = [{pipeline_mode = #tpu.pipeline_mode<synchronous>, transform_indices = @transform_0, window_bounds = array<i64: 512, 256>}, {transform_indices = @transform_1, window_bounds = array<i64: 256, 128>}, {transform_indices = @transform_2, window_bounds = array<i64: 1, 128>}, {transform_indices = @transform_3, window_bounds = array<i64: 1, 128>}, {transform_indices = @transform_4, window_bounds = array<i64: 512, 128>}]} {
    %c0 = arith.constant 0 : index
    %c0_0 = arith.constant 0 : index
    %0 = vector.load %arg1[%c0, %c0_0] : memref<512x256xbf16, #tpu.memory_space<vmem>>, vector<512x256xbf16>
    %c0_1 = arith.constant 0 : index
    %c0_2 = arith.constant 0 : index
    %1 = vector.load %arg2[%c0_1, %c0_2] : memref<256x128xbf16, #tpu.memory_space<vmem>>, vector<256x128xbf16>
    %cst = arith.constant dense<0.000000e+00> : vector<512x128xf32>
    %2 = tpu.matmul %0, %1, %cst {dimension_numbers = #tpu.dot_dimension_numbers<[1], [0], [0], [1], [0, 0, 1, 1], [], []>} : vector<512x256xbf16>, vector<256x128xbf16>, vector<512x128xf32> -> vector<512x128xf32>
    %cst_3 = arith.constant dense<0.000000e+00> : vector<128xf32>
    %3 = vector.multi_reduction <add>, %2, %cst_3 [0] : vector<512x128xf32> to vector<128xf32>
    %4 = vector.shape_cast %3 : vector<128xf32> to vector<1x128xf32>
    %5 = arith.mulf %2, %2 : vector<512x128xf32>
    %cst_4 = arith.constant dense<0.000000e+00> : vector<128xf32>
    %6 = vector.multi_reduction <add>, %5, %cst_4 [0] : vector<512x128xf32> to vector<128xf32>
    %7 = vector.shape_cast %6 : vector<128xf32> to vector<1x128xf32>
    %cst_5 = arith.constant 0.001953125 : f32
    %8 = vector.broadcast %cst_5 : f32 to vector<1x128xf32>
    %9 = arith.mulf %4, %8 : vector<1x128xf32>
    %cst_6 = arith.constant 0.001953125 : f32
    %10 = vector.broadcast %cst_6 : f32 to vector<1x128xf32>
    %11 = arith.mulf %7, %10 : vector<1x128xf32>
    %12 = arith.mulf %9, %9 : vector<1x128xf32>
    %13 = arith.subf %11, %12 : vector<1x128xf32>
    %cst_7 = arith.constant 0.000000e+00 : f32
    %14 = vector.broadcast %cst_7 : f32 to vector<1x128xf32>
    %15 = arith.maximumf %13, %14 : vector<1x128xf32>
    %cst_8 = arith.constant 9.99999974E-6 : f32
    %16 = vector.broadcast %cst_8 : f32 to vector<1x128xf32>
    %17 = arith.addf %15, %16 : vector<1x128xf32>
    %18 = math.rsqrt %17 : vector<1x128xf32>
    %c0_9 = arith.constant 0 : index
    %c0_10 = arith.constant 0 : index
    %19 = vector.load %arg3[%c0_9, %c0_10] : memref<1x128xf32, #tpu.memory_space<vmem>>, vector<1x128xf32>
    %20 = arith.mulf %18, %19 : vector<1x128xf32>
    %c0_11 = arith.constant 0 : index
    %c0_12 = arith.constant 0 : index
    %21 = vector.load %arg4[%c0_11, %c0_12] : memref<1x128xf32, #tpu.memory_space<vmem>>, vector<1x128xf32>
    %22 = arith.mulf %9, %20 : vector<1x128xf32>
    %23 = arith.subf %21, %22 : vector<1x128xf32>
    %24 = vector.broadcast %20 : vector<1x128xf32> to vector<512x128xf32>
    %25 = arith.mulf %2, %24 : vector<512x128xf32>
    %26 = vector.broadcast %23 : vector<1x128xf32> to vector<512x128xf32>
    %27 = arith.addf %25, %26 : vector<512x128xf32>
    %cst_13 = arith.constant 0.000000e+00 : f32
    %28 = vector.broadcast %cst_13 : f32 to vector<512x128xf32>
    %29 = arith.maximumf %27, %28 : vector<512x128xf32>
    %c0_14 = arith.constant 0 : index
    %c0_15 = arith.constant 0 : index
    %30 = vector.load %arg5[%c0_14, %c0_15] : memref<512x128xf32, #tpu.memory_space<vmem>>, vector<512x128xf32>
    tpu.vector_store %arg5[%c0_14, %c0_15], %29 {strides = array<i32>} : memref<512x128xf32, #tpu.memory_space<vmem>>, vector<512x128xf32>,
    return
  }
  func.func @transform_0(%arg0: i32) -> (i32, i32) {
    %c0_i32 = arith.constant 0 : i32
    %c0_i32_0 = arith.constant 0 : i32
    %c0_i32_1 = arith.constant 0 : i32
    return %c0_i32, %c0_i32_0 : i32, i32
  }
  func.func @transform_1(%arg0: i32) -> (i32, i32) {
    %c0_i32 = arith.constant 0 : i32
    %c0_i32_0 = arith.constant 0 : i32
    return %c0_i32, %arg0 : i32, i32
  }
  func.func @transform_2(%arg0: i32) -> (i32, i32) {
    %c0_i32 = arith.constant 0 : i32
    %c0_i32_0 = arith.constant 0 : i32
    return %c0_i32, %arg0 : i32, i32
  }
  func.func @transform_3(%arg0: i32) -> (i32, i32) {
    %c0_i32 = arith.constant 0 : i32
    %c0_i32_0 = arith.constant 0 : i32
    return %c0_i32, %arg0 : i32, i32
  }
  func.func @transform_4(%arg0: i32) -> (i32, i32) {
    %c0_i32 = arith.constant 0 : i32
    %c0_i32_0 = arith.constant 0 : i32
    return %c0_i32, %arg0 : i32, i32
  }
}

module attributes {stable_mosaic.version = 11 : i64} {
  func.func @_maxpool_kernel(%arg0: i32, %arg1: memref<9x128x64xf32, #tpu.memory_space<vmem>>, %arg2: memref<128x64xf32, #tpu.memory_space<vmem>>) attributes {dimension_semantics = [#tpu.dimension_semantics<arbitrary>], iteration_bounds = array<i64: 1>, scalar_prefetch = 0 : i64, scratch_operands = 0 : i64, tpu.core_type = #tpu.core_type<tc>, window_params = [{pipeline_mode = #tpu.pipeline_mode<synchronous>, transform_indices = @transform_0, window_bounds = array<i64: 9, 128, 64>}, {pipeline_mode = #tpu.pipeline_mode<synchronous>, transform_indices = @transform_1, window_bounds = array<i64: 128, 64>}]} {
    %c0 = arith.constant 0 : index
    %c0_0 = arith.constant 0 : index
    %c0_1 = arith.constant 0 : index
    %0 = vector.load %arg1[%c0, %c0_0, %c0_1] : memref<9x128x64xf32, #tpu.memory_space<vmem>>, vector<1x128x64xf32>
    %1 = vector.shape_cast %0 : vector<1x128x64xf32> to vector<128x64xf32>
    %c1 = arith.constant 1 : index
    %c0_2 = arith.constant 0 : index
    %c0_3 = arith.constant 0 : index
    %2 = vector.load %arg1[%c1, %c0_2, %c0_3] : memref<9x128x64xf32, #tpu.memory_space<vmem>>, vector<1x128x64xf32>
    %3 = vector.shape_cast %2 : vector<1x128x64xf32> to vector<128x64xf32>
    %4 = arith.maximumf %1, %3 : vector<128x64xf32>
    %c2 = arith.constant 2 : index
    %c0_4 = arith.constant 0 : index
    %c0_5 = arith.constant 0 : index
    %5 = vector.load %arg1[%c2, %c0_4, %c0_5] : memref<9x128x64xf32, #tpu.memory_space<vmem>>, vector<1x128x64xf32>
    %6 = vector.shape_cast %5 : vector<1x128x64xf32> to vector<128x64xf32>
    %7 = arith.maximumf %4, %6 : vector<128x64xf32>
    %c3 = arith.constant 3 : index
    %c0_6 = arith.constant 0 : index
    %c0_7 = arith.constant 0 : index
    %8 = vector.load %arg1[%c3, %c0_6, %c0_7] : memref<9x128x64xf32, #tpu.memory_space<vmem>>, vector<1x128x64xf32>
    %9 = vector.shape_cast %8 : vector<1x128x64xf32> to vector<128x64xf32>
    %10 = arith.maximumf %7, %9 : vector<128x64xf32>
    %c4 = arith.constant 4 : index
    %c0_8 = arith.constant 0 : index
    %c0_9 = arith.constant 0 : index
    %11 = vector.load %arg1[%c4, %c0_8, %c0_9] : memref<9x128x64xf32, #tpu.memory_space<vmem>>, vector<1x128x64xf32>
    %12 = vector.shape_cast %11 : vector<1x128x64xf32> to vector<128x64xf32>
    %13 = arith.maximumf %10, %12 : vector<128x64xf32>
    %c5 = arith.constant 5 : index
    %c0_10 = arith.constant 0 : index
    %c0_11 = arith.constant 0 : index
    %14 = vector.load %arg1[%c5, %c0_10, %c0_11] : memref<9x128x64xf32, #tpu.memory_space<vmem>>, vector<1x128x64xf32>
    %15 = vector.shape_cast %14 : vector<1x128x64xf32> to vector<128x64xf32>
    %16 = arith.maximumf %13, %15 : vector<128x64xf32>
    %c6 = arith.constant 6 : index
    %c0_12 = arith.constant 0 : index
    %c0_13 = arith.constant 0 : index
    %17 = vector.load %arg1[%c6, %c0_12, %c0_13] : memref<9x128x64xf32, #tpu.memory_space<vmem>>, vector<1x128x64xf32>
    %18 = vector.shape_cast %17 : vector<1x128x64xf32> to vector<128x64xf32>
    %19 = arith.maximumf %16, %18 : vector<128x64xf32>
    %c7 = arith.constant 7 : index
    %c0_14 = arith.constant 0 : index
    %c0_15 = arith.constant 0 : index
    %20 = vector.load %arg1[%c7, %c0_14, %c0_15] : memref<9x128x64xf32, #tpu.memory_space<vmem>>, vector<1x128x64xf32>
    %21 = vector.shape_cast %20 : vector<1x128x64xf32> to vector<128x64xf32>
    %22 = arith.maximumf %19, %21 : vector<128x64xf32>
    %c8 = arith.constant 8 : index
    %c0_16 = arith.constant 0 : index
    %c0_17 = arith.constant 0 : index
    %23 = vector.load %arg1[%c8, %c0_16, %c0_17] : memref<9x128x64xf32, #tpu.memory_space<vmem>>, vector<1x128x64xf32>
    %24 = vector.shape_cast %23 : vector<1x128x64xf32> to vector<128x64xf32>
    %25 = arith.maximumf %22, %24 : vector<128x64xf32>
    %c0_18 = arith.constant 0 : index
    %c0_19 = arith.constant 0 : index
    %26 = vector.load %arg2[%c0_18, %c0_19] : memref<128x64xf32, #tpu.memory_space<vmem>>, vector<128x64xf32>
    tpu.vector_store %arg2[%c0_18, %c0_19], %25 {strides = array<i32>} : memref<128x64xf32, #tpu.memory_space<vmem>>, vector<128x64xf32>,
    return
  }
  func.func @transform_0(%arg0: i32) -> (i32, i32, i32) {
    %c0_i32 = arith.constant 0 : i32
    %c0_i32_0 = arith.constant 0 : i32
    %c0_i32_1 = arith.constant 0 : i32
    %c0_i32_2 = arith.constant 0 : i32
    return %c0_i32, %c0_i32_0, %c0_i32_1 : i32, i32, i32
  }
  func.func @transform_1(%arg0: i32) -> (i32, i32) {
    %c0_i32 = arith.constant 0 : i32
    %c0_i32_0 = arith.constant 0 : i32
    %c0_i32_1 = arith.constant 0 : i32
    return %c0_i32, %c0_i32_0 : i32, i32
  }
}

module attributes {stable_mosaic.version = 11 : i64} {
  func.func @_conv_bn_act_kernel(%arg0: i32, %arg1: memref<128x640xbf16, #tpu.memory_space<vmem>>, %arg2: memref<640x128xbf16, #tpu.memory_space<vmem>>, %arg3: memref<1x128xf32, #tpu.memory_space<vmem>>, %arg4: memref<1x128xf32, #tpu.memory_space<vmem>>, %arg5: memref<128x128xf32, #tpu.memory_space<vmem>>) attributes {dimension_semantics = [#tpu.dimension_semantics<parallel>], iteration_bounds = array<i64: 1>, scalar_prefetch = 0 : i64, scratch_operands = 0 : i64, tpu.core_type = #tpu.core_type<tc>, window_params = [{pipeline_mode = #tpu.pipeline_mode<synchronous>, transform_indices = @transform_0, window_bounds = array<i64: 128, 640>}, {transform_indices = @transform_1, window_bounds = array<i64: 640, 128>}, {transform_indices = @transform_2, window_bounds = array<i64: 1, 128>}, {transform_indices = @transform_3, window_bounds = array<i64: 1, 128>}, {transform_indices = @transform_4, window_bounds = array<i64: 128, 128>}]} {
    %c0 = arith.constant 0 : index
    %c0_0 = arith.constant 0 : index
    %0 = vector.load %arg1[%c0, %c0_0] : memref<128x640xbf16, #tpu.memory_space<vmem>>, vector<128x640xbf16>
    %c0_1 = arith.constant 0 : index
    %c0_2 = arith.constant 0 : index
    %1 = vector.load %arg2[%c0_1, %c0_2] : memref<640x128xbf16, #tpu.memory_space<vmem>>, vector<640x128xbf16>
    %cst = arith.constant dense<0.000000e+00> : vector<128x128xf32>
    %2 = tpu.matmul %0, %1, %cst {dimension_numbers = #tpu.dot_dimension_numbers<[1], [0], [0], [1], [0, 0, 1, 1], [], []>} : vector<128x640xbf16>, vector<640x128xbf16>, vector<128x128xf32> -> vector<128x128xf32>
    %cst_3 = arith.constant dense<0.000000e+00> : vector<128xf32>
    %3 = vector.multi_reduction <add>, %2, %cst_3 [0] : vector<128x128xf32> to vector<128xf32>
    %4 = vector.shape_cast %3 : vector<128xf32> to vector<1x128xf32>
    %5 = arith.mulf %2, %2 : vector<128x128xf32>
    %cst_4 = arith.constant dense<0.000000e+00> : vector<128xf32>
    %6 = vector.multi_reduction <add>, %5, %cst_4 [0] : vector<128x128xf32> to vector<128xf32>
    %7 = vector.shape_cast %6 : vector<128xf32> to vector<1x128xf32>
    %cst_5 = arith.constant 7.812500e-03 : f32
    %8 = vector.broadcast %cst_5 : f32 to vector<1x128xf32>
    %9 = arith.mulf %4, %8 : vector<1x128xf32>
    %cst_6 = arith.constant 7.812500e-03 : f32
    %10 = vector.broadcast %cst_6 : f32 to vector<1x128xf32>
    %11 = arith.mulf %7, %10 : vector<1x128xf32>
    %12 = arith.mulf %9, %9 : vector<1x128xf32>
    %13 = arith.subf %11, %12 : vector<1x128xf32>
    %cst_7 = arith.constant 0.000000e+00 : f32
    %14 = vector.broadcast %cst_7 : f32 to vector<1x128xf32>
    %15 = arith.maximumf %13, %14 : vector<1x128xf32>
    %cst_8 = arith.constant 9.99999974E-6 : f32
    %16 = vector.broadcast %cst_8 : f32 to vector<1x128xf32>
    %17 = arith.addf %15, %16 : vector<1x128xf32>
    %18 = math.rsqrt %17 : vector<1x128xf32>
    %c0_9 = arith.constant 0 : index
    %c0_10 = arith.constant 0 : index
    %19 = vector.load %arg3[%c0_9, %c0_10] : memref<1x128xf32, #tpu.memory_space<vmem>>, vector<1x128xf32>
    %20 = arith.mulf %18, %19 : vector<1x128xf32>
    %c0_11 = arith.constant 0 : index
    %c0_12 = arith.constant 0 : index
    %21 = vector.load %arg4[%c0_11, %c0_12] : memref<1x128xf32, #tpu.memory_space<vmem>>, vector<1x128xf32>
    %22 = arith.mulf %9, %20 : vector<1x128xf32>
    %23 = arith.subf %21, %22 : vector<1x128xf32>
    %24 = vector.broadcast %20 : vector<1x128xf32> to vector<128x128xf32>
    %25 = arith.mulf %2, %24 : vector<128x128xf32>
    %26 = vector.broadcast %23 : vector<1x128xf32> to vector<128x128xf32>
    %27 = arith.addf %25, %26 : vector<128x128xf32>
    %cst_13 = arith.constant 0.000000e+00 : f32
    %28 = vector.broadcast %cst_13 : f32 to vector<128x128xf32>
    %29 = arith.maximumf %27, %28 : vector<128x128xf32>
    %c0_14 = arith.constant 0 : index
    %c0_15 = arith.constant 0 : index
    %30 = vector.load %arg5[%c0_14, %c0_15] : memref<128x128xf32, #tpu.memory_space<vmem>>, vector<128x128xf32>
    tpu.vector_store %arg5[%c0_14, %c0_15], %29 {strides = array<i32>} : memref<128x128xf32, #tpu.memory_space<vmem>>, vector<128x128xf32>,
    return
  }
  func.func @transform_0(%arg0: i32) -> (i32, i32) {
    %c0_i32 = arith.constant 0 : i32
    %c0_i32_0 = arith.constant 0 : i32
    %c0_i32_1 = arith.constant 0 : i32
    return %c0_i32, %c0_i32_0 : i32, i32
  }
  func.func @transform_1(%arg0: i32) -> (i32, i32) {
    %c0_i32 = arith.constant 0 : i32
    %c0_i32_0 = arith.constant 0 : i32
    return %c0_i32, %arg0 : i32, i32
  }
  func.func @transform_2(%arg0: i32) -> (i32, i32) {
    %c0_i32 = arith.constant 0 : i32
    %c0_i32_0 = arith.constant 0 : i32
    return %c0_i32, %arg0 : i32, i32
  }
  func.func @transform_3(%arg0: i32) -> (i32, i32) {
    %c0_i32 = arith.constant 0 : i32
    %c0_i32_0 = arith.constant 0 : i32
    return %c0_i32, %arg0 : i32, i32
  }
  func.func @transform_4(%arg0: i32) -> (i32, i32) {
    %c0_i32 = arith.constant 0 : i32
    %c0_i32_0 = arith.constant 0 : i32
    return %c0_i32, %arg0 : i32, i32
  }
}

module attributes {stable_mosaic.version = 11 : i64} {
  func.func @_conv_bn_act_kernel(%arg0: i32, %arg1: memref<128x640xbf16, #tpu.memory_space<vmem>>, %arg2: memref<640x128xbf16, #tpu.memory_space<vmem>>, %arg3: memref<1x128xf32, #tpu.memory_space<vmem>>, %arg4: memref<1x128xf32, #tpu.memory_space<vmem>>, %arg5: memref<128x128xf32, #tpu.memory_space<vmem>>, %arg6: memref<128x128xf32, #tpu.memory_space<vmem>>) attributes {dimension_semantics = [#tpu.dimension_semantics<parallel>], iteration_bounds = array<i64: 1>, scalar_prefetch = 0 : i64, scratch_operands = 0 : i64, tpu.core_type = #tpu.core_type<tc>, window_params = [{pipeline_mode = #tpu.pipeline_mode<synchronous>, transform_indices = @transform_0, window_bounds = array<i64: 128, 640>}, {transform_indices = @transform_1, window_bounds = array<i64: 640, 128>}, {transform_indices = @transform_2, window_bounds = array<i64: 1, 128>}, {transform_indices = @transform_3, window_bounds = array<i64: 1, 128>}, {transform_indices = @transform_4, window_bounds = array<i64: 128, 128>}, {transform_indices = @transform_5, window_bounds = array<i64: 128, 128>}]} {
    %c0 = arith.constant 0 : index
    %c0_0 = arith.constant 0 : index
    %0 = vector.load %arg1[%c0, %c0_0] : memref<128x640xbf16, #tpu.memory_space<vmem>>, vector<128x640xbf16>
    %c0_1 = arith.constant 0 : index
    %c0_2 = arith.constant 0 : index
    %1 = vector.load %arg2[%c0_1, %c0_2] : memref<640x128xbf16, #tpu.memory_space<vmem>>, vector<640x128xbf16>
    %cst = arith.constant dense<0.000000e+00> : vector<128x128xf32>
    %2 = tpu.matmul %0, %1, %cst {dimension_numbers = #tpu.dot_dimension_numbers<[1], [0], [0], [1], [0, 0, 1, 1], [], []>} : vector<128x640xbf16>, vector<640x128xbf16>, vector<128x128xf32> -> vector<128x128xf32>
    %cst_3 = arith.constant dense<0.000000e+00> : vector<128xf32>
    %3 = vector.multi_reduction <add>, %2, %cst_3 [0] : vector<128x128xf32> to vector<128xf32>
    %4 = vector.shape_cast %3 : vector<128xf32> to vector<1x128xf32>
    %5 = arith.mulf %2, %2 : vector<128x128xf32>
    %cst_4 = arith.constant dense<0.000000e+00> : vector<128xf32>
    %6 = vector.multi_reduction <add>, %5, %cst_4 [0] : vector<128x128xf32> to vector<128xf32>
    %7 = vector.shape_cast %6 : vector<128xf32> to vector<1x128xf32>
    %cst_5 = arith.constant 7.812500e-03 : f32
    %8 = vector.broadcast %cst_5 : f32 to vector<1x128xf32>
    %9 = arith.mulf %4, %8 : vector<1x128xf32>
    %cst_6 = arith.constant 7.812500e-03 : f32
    %10 = vector.broadcast %cst_6 : f32 to vector<1x128xf32>
    %11 = arith.mulf %7, %10 : vector<1x128xf32>
    %12 = arith.mulf %9, %9 : vector<1x128xf32>
    %13 = arith.subf %11, %12 : vector<1x128xf32>
    %cst_7 = arith.constant 0.000000e+00 : f32
    %14 = vector.broadcast %cst_7 : f32 to vector<1x128xf32>
    %15 = arith.maximumf %13, %14 : vector<1x128xf32>
    %cst_8 = arith.constant 9.99999974E-6 : f32
    %16 = vector.broadcast %cst_8 : f32 to vector<1x128xf32>
    %17 = arith.addf %15, %16 : vector<1x128xf32>
    %18 = math.rsqrt %17 : vector<1x128xf32>
    %c0_9 = arith.constant 0 : index
    %c0_10 = arith.constant 0 : index
    %19 = vector.load %arg3[%c0_9, %c0_10] : memref<1x128xf32, #tpu.memory_space<vmem>>, vector<1x128xf32>
    %20 = arith.mulf %18, %19 : vector<1x128xf32>
    %c0_11 = arith.constant 0 : index
    %c0_12 = arith.constant 0 : index
    %21 = vector.load %arg4[%c0_11, %c0_12] : memref<1x128xf32, #tpu.memory_space<vmem>>, vector<1x128xf32>
    %22 = arith.mulf %9, %20 : vector<1x128xf32>
    %23 = arith.subf %21, %22 : vector<1x128xf32>
    %24 = vector.broadcast %20 : vector<1x128xf32> to vector<128x128xf32>
    %25 = arith.mulf %2, %24 : vector<128x128xf32>
    %26 = vector.broadcast %23 : vector<1x128xf32> to vector<128x128xf32>
    %27 = arith.addf %25, %26 : vector<128x128xf32>
    %c0_13 = arith.constant 0 : index
    %c0_14 = arith.constant 0 : index
    %28 = vector.load %arg5[%c0_13, %c0_14] : memref<128x128xf32, #tpu.memory_space<vmem>>, vector<128x128xf32>
    %29 = arith.addf %27, %28 : vector<128x128xf32>
    %cst_15 = arith.constant 0.000000e+00 : f32
    %30 = vector.broadcast %cst_15 : f32 to vector<128x128xf32>
    %31 = arith.maximumf %29, %30 : vector<128x128xf32>
    %c0_16 = arith.constant 0 : index
    %c0_17 = arith.constant 0 : index
    %32 = vector.load %arg6[%c0_16, %c0_17] : memref<128x128xf32, #tpu.memory_space<vmem>>, vector<128x128xf32>
    tpu.vector_store %arg6[%c0_16, %c0_17], %31 {strides = array<i32>} : memref<128x128xf32, #tpu.memory_space<vmem>>, vector<128x128xf32>,
    return
  }
  func.func @transform_0(%arg0: i32) -> (i32, i32) {
    %c0_i32 = arith.constant 0 : i32
    %c0_i32_0 = arith.constant 0 : i32
    %c0_i32_1 = arith.constant 0 : i32
    return %c0_i32, %c0_i32_0 : i32, i32
  }
  func.func @transform_1(%arg0: i32) -> (i32, i32) {
    %c0_i32 = arith.constant 0 : i32
    %c0_i32_0 = arith.constant 0 : i32
    return %c0_i32, %arg0 : i32, i32
  }
  func.func @transform_2(%arg0: i32) -> (i32, i32) {
    %c0_i32 = arith.constant 0 : i32
    %c0_i32_0 = arith.constant 0 : i32
    return %c0_i32, %arg0 : i32, i32
  }
  func.func @transform_3(%arg0: i32) -> (i32, i32) {
    %c0_i32 = arith.constant 0 : i32
    %c0_i32_0 = arith.constant 0 : i32
    return %c0_i32, %arg0 : i32, i32
  }
  func.func @transform_4(%arg0: i32) -> (i32, i32) {
    %c0_i32 = arith.constant 0 : i32
    %c0_i32_0 = arith.constant 0 : i32
    return %c0_i32, %arg0 : i32, i32
  }
  func.func @transform_5(%arg0: i32) -> (i32, i32) {
    %c0_i32 = arith.constant 0 : i32
    %c0_i32_0 = arith.constant 0 : i32
    return %c0_i32, %arg0 : i32, i32
  }
}

module attributes {stable_mosaic.version = 11 : i64} {
  func.func @_conv_bn_act_kernel(%arg0: i32, %arg1: memref<32x128xbf16, #tpu.memory_space<vmem>>, %arg2: memref<128x128xbf16, #tpu.memory_space<vmem>>, %arg3: memref<1x128xf32, #tpu.memory_space<vmem>>, %arg4: memref<1x128xf32, #tpu.memory_space<vmem>>, %arg5: memref<32x128xf32, #tpu.memory_space<vmem>>) attributes {dimension_semantics = [#tpu.dimension_semantics<parallel>], iteration_bounds = array<i64: 1>, scalar_prefetch = 0 : i64, scratch_operands = 0 : i64, tpu.core_type = #tpu.core_type<tc>, window_params = [{pipeline_mode = #tpu.pipeline_mode<synchronous>, transform_indices = @transform_0, window_bounds = array<i64: 32, 128>}, {transform_indices = @transform_1, window_bounds = array<i64: 128, 128>}, {transform_indices = @transform_2, window_bounds = array<i64: 1, 128>}, {transform_indices = @transform_3, window_bounds = array<i64: 1, 128>}, {transform_indices = @transform_4, window_bounds = array<i64: 32, 128>}]} {
    %c0 = arith.constant 0 : index
    %c0_0 = arith.constant 0 : index
    %0 = vector.load %arg1[%c0, %c0_0] : memref<32x128xbf16, #tpu.memory_space<vmem>>, vector<32x128xbf16>
    %c0_1 = arith.constant 0 : index
    %c0_2 = arith.constant 0 : index
    %1 = vector.load %arg2[%c0_1, %c0_2] : memref<128x128xbf16, #tpu.memory_space<vmem>>, vector<128x128xbf16>
    %cst = arith.constant dense<0.000000e+00> : vector<32x128xf32>
    %2 = tpu.matmul %0, %1, %cst {dimension_numbers = #tpu.dot_dimension_numbers<[1], [0], [0], [1], [0, 0, 1, 1], [], []>} : vector<32x128xbf16>, vector<128x128xbf16>, vector<32x128xf32> -> vector<32x128xf32>
    %cst_3 = arith.constant dense<0.000000e+00> : vector<128xf32>
    %3 = vector.multi_reduction <add>, %2, %cst_3 [0] : vector<32x128xf32> to vector<128xf32>
    %4 = vector.shape_cast %3 : vector<128xf32> to vector<1x128xf32>
    %5 = arith.mulf %2, %2 : vector<32x128xf32>
    %cst_4 = arith.constant dense<0.000000e+00> : vector<128xf32>
    %6 = vector.multi_reduction <add>, %5, %cst_4 [0] : vector<32x128xf32> to vector<128xf32>
    %7 = vector.shape_cast %6 : vector<128xf32> to vector<1x128xf32>
    %cst_5 = arith.constant 3.125000e-02 : f32
    %8 = vector.broadcast %cst_5 : f32 to vector<1x128xf32>
    %9 = arith.mulf %4, %8 : vector<1x128xf32>
    %cst_6 = arith.constant 3.125000e-02 : f32
    %10 = vector.broadcast %cst_6 : f32 to vector<1x128xf32>
    %11 = arith.mulf %7, %10 : vector<1x128xf32>
    %12 = arith.mulf %9, %9 : vector<1x128xf32>
    %13 = arith.subf %11, %12 : vector<1x128xf32>
    %cst_7 = arith.constant 0.000000e+00 : f32
    %14 = vector.broadcast %cst_7 : f32 to vector<1x128xf32>
    %15 = arith.maximumf %13, %14 : vector<1x128xf32>
    %cst_8 = arith.constant 9.99999974E-6 : f32
    %16 = vector.broadcast %cst_8 : f32 to vector<1x128xf32>
    %17 = arith.addf %15, %16 : vector<1x128xf32>
    %18 = math.rsqrt %17 : vector<1x128xf32>
    %c0_9 = arith.constant 0 : index
    %c0_10 = arith.constant 0 : index
    %19 = vector.load %arg3[%c0_9, %c0_10] : memref<1x128xf32, #tpu.memory_space<vmem>>, vector<1x128xf32>
    %20 = arith.mulf %18, %19 : vector<1x128xf32>
    %c0_11 = arith.constant 0 : index
    %c0_12 = arith.constant 0 : index
    %21 = vector.load %arg4[%c0_11, %c0_12] : memref<1x128xf32, #tpu.memory_space<vmem>>, vector<1x128xf32>
    %22 = arith.mulf %9, %20 : vector<1x128xf32>
    %23 = arith.subf %21, %22 : vector<1x128xf32>
    %24 = vector.broadcast %20 : vector<1x128xf32> to vector<32x128xf32>
    %25 = arith.mulf %2, %24 : vector<32x128xf32>
    %26 = vector.broadcast %23 : vector<1x128xf32> to vector<32x128xf32>
    %27 = arith.addf %25, %26 : vector<32x128xf32>
    %c0_13 = arith.constant 0 : index
    %c0_14 = arith.constant 0 : index
    %28 = vector.load %arg5[%c0_13, %c0_14] : memref<32x128xf32, #tpu.memory_space<vmem>>, vector<32x128xf32>
    tpu.vector_store %arg5[%c0_13, %c0_14], %27 {strides = array<i32>} : memref<32x128xf32, #tpu.memory_space<vmem>>, vector<32x128xf32>,
    return
  }
  func.func @transform_0(%arg0: i32) -> (i32, i32) {
    %c0_i32 = arith.constant 0 : i32
    %c0_i32_0 = arith.constant 0 : i32
    %c0_i32_1 = arith.constant 0 : i32
    return %c0_i32, %c0_i32_0 : i32, i32
  }
  func.func @transform_1(%arg0: i32) -> (i32, i32) {
    %c0_i32 = arith.constant 0 : i32
    %c0_i32_0 = arith.constant 0 : i32
    return %c0_i32, %arg0 : i32, i32
  }
  func.func @transform_2(%arg0: i32) -> (i32, i32) {
    %c0_i32 = arith.constant 0 : i32
    %c0_i32_0 = arith.constant 0 : i32
    return %c0_i32, %arg0 : i32, i32
  }
  func.func @transform_3(%arg0: i32) -> (i32, i32) {
    %c0_i32 = arith.constant 0 : i32
    %c0_i32_0 = arith.constant 0 : i32
    return %c0_i32, %arg0 : i32, i32
  }
  func.func @transform_4(%arg0: i32) -> (i32, i32) {
    %c0_i32 = arith.constant 0 : i32
    %c0_i32_0 = arith.constant 0 : i32
    return %c0_i32, %arg0 : i32, i32
  }
}

module attributes {stable_mosaic.version = 11 : i64} {
  func.func @_conv_bn_act_kernel(%arg0: i32, %arg1: memref<32x640xbf16, #tpu.memory_space<vmem>>, %arg2: memref<640x128xbf16, #tpu.memory_space<vmem>>, %arg3: memref<1x128xf32, #tpu.memory_space<vmem>>, %arg4: memref<1x128xf32, #tpu.memory_space<vmem>>, %arg5: memref<32x128xf32, #tpu.memory_space<vmem>>) attributes {dimension_semantics = [#tpu.dimension_semantics<parallel>], iteration_bounds = array<i64: 1>, scalar_prefetch = 0 : i64, scratch_operands = 0 : i64, tpu.core_type = #tpu.core_type<tc>, window_params = [{pipeline_mode = #tpu.pipeline_mode<synchronous>, transform_indices = @transform_0, window_bounds = array<i64: 32, 640>}, {transform_indices = @transform_1, window_bounds = array<i64: 640, 128>}, {transform_indices = @transform_2, window_bounds = array<i64: 1, 128>}, {transform_indices = @transform_3, window_bounds = array<i64: 1, 128>}, {transform_indices = @transform_4, window_bounds = array<i64: 32, 128>}]} {
    %c0 = arith.constant 0 : index
    %c0_0 = arith.constant 0 : index
    %0 = vector.load %arg1[%c0, %c0_0] : memref<32x640xbf16, #tpu.memory_space<vmem>>, vector<32x640xbf16>
    %c0_1 = arith.constant 0 : index
    %c0_2 = arith.constant 0 : index
    %1 = vector.load %arg2[%c0_1, %c0_2] : memref<640x128xbf16, #tpu.memory_space<vmem>>, vector<640x128xbf16>
    %cst = arith.constant dense<0.000000e+00> : vector<32x128xf32>
    %2 = tpu.matmul %0, %1, %cst {dimension_numbers = #tpu.dot_dimension_numbers<[1], [0], [0], [1], [0, 0, 1, 1], [], []>} : vector<32x640xbf16>, vector<640x128xbf16>, vector<32x128xf32> -> vector<32x128xf32>
    %cst_3 = arith.constant dense<0.000000e+00> : vector<128xf32>
    %3 = vector.multi_reduction <add>, %2, %cst_3 [0] : vector<32x128xf32> to vector<128xf32>
    %4 = vector.shape_cast %3 : vector<128xf32> to vector<1x128xf32>
    %5 = arith.mulf %2, %2 : vector<32x128xf32>
    %cst_4 = arith.constant dense<0.000000e+00> : vector<128xf32>
    %6 = vector.multi_reduction <add>, %5, %cst_4 [0] : vector<32x128xf32> to vector<128xf32>
    %7 = vector.shape_cast %6 : vector<128xf32> to vector<1x128xf32>
    %cst_5 = arith.constant 3.125000e-02 : f32
    %8 = vector.broadcast %cst_5 : f32 to vector<1x128xf32>
    %9 = arith.mulf %4, %8 : vector<1x128xf32>
    %cst_6 = arith.constant 3.125000e-02 : f32
    %10 = vector.broadcast %cst_6 : f32 to vector<1x128xf32>
    %11 = arith.mulf %7, %10 : vector<1x128xf32>
    %12 = arith.mulf %9, %9 : vector<1x128xf32>
    %13 = arith.subf %11, %12 : vector<1x128xf32>
    %cst_7 = arith.constant 0.000000e+00 : f32
    %14 = vector.broadcast %cst_7 : f32 to vector<1x128xf32>
    %15 = arith.maximumf %13, %14 : vector<1x128xf32>
    %cst_8 = arith.constant 9.99999974E-6 : f32
    %16 = vector.broadcast %cst_8 : f32 to vector<1x128xf32>
    %17 = arith.addf %15, %16 : vector<1x128xf32>
    %18 = math.rsqrt %17 : vector<1x128xf32>
    %c0_9 = arith.constant 0 : index
    %c0_10 = arith.constant 0 : index
    %19 = vector.load %arg3[%c0_9, %c0_10] : memref<1x128xf32, #tpu.memory_space<vmem>>, vector<1x128xf32>
    %20 = arith.mulf %18, %19 : vector<1x128xf32>
    %c0_11 = arith.constant 0 : index
    %c0_12 = arith.constant 0 : index
    %21 = vector.load %arg4[%c0_11, %c0_12] : memref<1x128xf32, #tpu.memory_space<vmem>>, vector<1x128xf32>
    %22 = arith.mulf %9, %20 : vector<1x128xf32>
    %23 = arith.subf %21, %22 : vector<1x128xf32>
    %24 = vector.broadcast %20 : vector<1x128xf32> to vector<32x128xf32>
    %25 = arith.mulf %2, %24 : vector<32x128xf32>
    %26 = vector.broadcast %23 : vector<1x128xf32> to vector<32x128xf32>
    %27 = arith.addf %25, %26 : vector<32x128xf32>
    %cst_13 = arith.constant 0.000000e+00 : f32
    %28 = vector.broadcast %cst_13 : f32 to vector<32x128xf32>
    %29 = arith.maximumf %27, %28 : vector<32x128xf32>
    %c0_14 = arith.constant 0 : index
    %c0_15 = arith.constant 0 : index
    %30 = vector.load %arg5[%c0_14, %c0_15] : memref<32x128xf32, #tpu.memory_space<vmem>>, vector<32x128xf32>
    tpu.vector_store %arg5[%c0_14, %c0_15], %29 {strides = array<i32>} : memref<32x128xf32, #tpu.memory_space<vmem>>, vector<32x128xf32>,
    return
  }
  func.func @transform_0(%arg0: i32) -> (i32, i32) {
    %c0_i32 = arith.constant 0 : i32
    %c0_i32_0 = arith.constant 0 : i32
    %c0_i32_1 = arith.constant 0 : i32
    return %c0_i32, %c0_i32_0 : i32, i32
  }
  func.func @transform_1(%arg0: i32) -> (i32, i32) {
    %c0_i32 = arith.constant 0 : i32
    %c0_i32_0 = arith.constant 0 : i32
    return %c0_i32, %arg0 : i32, i32
  }
  func.func @transform_2(%arg0: i32) -> (i32, i32) {
    %c0_i32 = arith.constant 0 : i32
    %c0_i32_0 = arith.constant 0 : i32
    return %c0_i32, %arg0 : i32, i32
  }
  func.func @transform_3(%arg0: i32) -> (i32, i32) {
    %c0_i32 = arith.constant 0 : i32
    %c0_i32_0 = arith.constant 0 : i32
    return %c0_i32, %arg0 : i32, i32
  }
  func.func @transform_4(%arg0: i32) -> (i32, i32) {
    %c0_i32 = arith.constant 0 : i32
    %c0_i32_0 = arith.constant 0 : i32
    return %c0_i32, %arg0 : i32, i32
  }
}

module attributes {stable_mosaic.version = 11 : i64} {
  func.func @_conv_bn_act_kernel(%arg0: i32, %arg1: memref<32x1152xbf16, #tpu.memory_space<vmem>>, %arg2: memref<1152x128xbf16, #tpu.memory_space<vmem>>, %arg3: memref<1x128xf32, #tpu.memory_space<vmem>>, %arg4: memref<1x128xf32, #tpu.memory_space<vmem>>, %arg5: memref<32x128xf32, #tpu.memory_space<vmem>>, %arg6: memref<32x128xf32, #tpu.memory_space<vmem>>) attributes {dimension_semantics = [#tpu.dimension_semantics<parallel>], iteration_bounds = array<i64: 1>, scalar_prefetch = 0 : i64, scratch_operands = 0 : i64, tpu.core_type = #tpu.core_type<tc>, window_params = [{pipeline_mode = #tpu.pipeline_mode<synchronous>, transform_indices = @transform_0, window_bounds = array<i64: 32, 1152>}, {transform_indices = @transform_1, window_bounds = array<i64: 1152, 128>}, {transform_indices = @transform_2, window_bounds = array<i64: 1, 128>}, {transform_indices = @transform_3, window_bounds = array<i64: 1, 128>}, {transform_indices = @transform_4, window_bounds = array<i64: 32, 128>}, {transform_indices = @transform_5, window_bounds = array<i64: 32, 128>}]} {
    %c0 = arith.constant 0 : index
    %c0_0 = arith.constant 0 : index
    %0 = vector.load %arg1[%c0, %c0_0] : memref<32x1152xbf16, #tpu.memory_space<vmem>>, vector<32x1152xbf16>
    %c0_1 = arith.constant 0 : index
    %c0_2 = arith.constant 0 : index
    %1 = vector.load %arg2[%c0_1, %c0_2] : memref<1152x128xbf16, #tpu.memory_space<vmem>>, vector<1152x128xbf16>
    %cst = arith.constant dense<0.000000e+00> : vector<32x128xf32>
    %2 = tpu.matmul %0, %1, %cst {dimension_numbers = #tpu.dot_dimension_numbers<[1], [0], [0], [1], [0, 0, 1, 1], [], []>} : vector<32x1152xbf16>, vector<1152x128xbf16>, vector<32x128xf32> -> vector<32x128xf32>
    %cst_3 = arith.constant dense<0.000000e+00> : vector<128xf32>
    %3 = vector.multi_reduction <add>, %2, %cst_3 [0] : vector<32x128xf32> to vector<128xf32>
    %4 = vector.shape_cast %3 : vector<128xf32> to vector<1x128xf32>
    %5 = arith.mulf %2, %2 : vector<32x128xf32>
    %cst_4 = arith.constant dense<0.000000e+00> : vector<128xf32>
    %6 = vector.multi_reduction <add>, %5, %cst_4 [0] : vector<32x128xf32> to vector<128xf32>
    %7 = vector.shape_cast %6 : vector<128xf32> to vector<1x128xf32>
    %cst_5 = arith.constant 3.125000e-02 : f32
    %8 = vector.broadcast %cst_5 : f32 to vector<1x128xf32>
    %9 = arith.mulf %4, %8 : vector<1x128xf32>
    %cst_6 = arith.constant 3.125000e-02 : f32
    %10 = vector.broadcast %cst_6 : f32 to vector<1x128xf32>
    %11 = arith.mulf %7, %10 : vector<1x128xf32>
    %12 = arith.mulf %9, %9 : vector<1x128xf32>
    %13 = arith.subf %11, %12 : vector<1x128xf32>
    %cst_7 = arith.constant 0.000000e+00 : f32
    %14 = vector.broadcast %cst_7 : f32 to vector<1x128xf32>
    %15 = arith.maximumf %13, %14 : vector<1x128xf32>
    %cst_8 = arith.constant 9.99999974E-6 : f32
    %16 = vector.broadcast %cst_8 : f32 to vector<1x128xf32>
    %17 = arith.addf %15, %16 : vector<1x128xf32>
    %18 = math.rsqrt %17 : vector<1x128xf32>
    %c0_9 = arith.constant 0 : index
    %c0_10 = arith.constant 0 : index
    %19 = vector.load %arg3[%c0_9, %c0_10] : memref<1x128xf32, #tpu.memory_space<vmem>>, vector<1x128xf32>
    %20 = arith.mulf %18, %19 : vector<1x128xf32>
    %c0_11 = arith.constant 0 : index
    %c0_12 = arith.constant 0 : index
    %21 = vector.load %arg4[%c0_11, %c0_12] : memref<1x128xf32, #tpu.memory_space<vmem>>, vector<1x128xf32>
    %22 = arith.mulf %9, %20 : vector<1x128xf32>
    %23 = arith.subf %21, %22 : vector<1x128xf32>
    %24 = vector.broadcast %20 : vector<1x128xf32> to vector<32x128xf32>
    %25 = arith.mulf %2, %24 : vector<32x128xf32>
    %26 = vector.broadcast %23 : vector<1x128xf32> to vector<32x128xf32>
    %27 = arith.addf %25, %26 : vector<32x128xf32>
    %c0_13 = arith.constant 0 : index
    %c0_14 = arith.constant 0 : index
    %28 = vector.load %arg5[%c0_13, %c0_14] : memref<32x128xf32, #tpu.memory_space<vmem>>, vector<32x128xf32>
    %29 = arith.addf %27, %28 : vector<32x128xf32>
    %cst_15 = arith.constant 0.000000e+00 : f32
    %30 = vector.broadcast %cst_15 : f32 to vector<32x128xf32>
    %31 = arith.maximumf %29, %30 : vector<32x128xf32>
    %c0_16 = arith.constant 0 : index
    %c0_17 = arith.constant 0 : index
    %32 = vector.load %arg6[%c0_16, %c0_17] : memref<32x128xf32, #tpu.memory_space<vmem>>, vector<32x128xf32>
    tpu.vector_store %arg6[%c0_16, %c0_17], %31 {strides = array<i32>} : memref<32x128xf32, #tpu.memory_space<vmem>>, vector<32x128xf32>,
    return
  }
  func.func @transform_0(%arg0: i32) -> (i32, i32) {
    %c0_i32 = arith.constant 0 : i32
    %c0_i32_0 = arith.constant 0 : i32
    %c0_i32_1 = arith.constant 0 : i32
    return %c0_i32, %c0_i32_0 : i32, i32
  }
  func.func @transform_1(%arg0: i32) -> (i32, i32) {
    %c0_i32 = arith.constant 0 : i32
    %c0_i32_0 = arith.constant 0 : i32
    return %c0_i32, %arg0 : i32, i32
  }
  func.func @transform_2(%arg0: i32) -> (i32, i32) {
    %c0_i32 = arith.constant 0 : i32
    %c0_i32_0 = arith.constant 0 : i32
    return %c0_i32, %arg0 : i32, i32
  }
  func.func @transform_3(%arg0: i32) -> (i32, i32) {
    %c0_i32 = arith.constant 0 : i32
    %c0_i32_0 = arith.constant 0 : i32
    return %c0_i32, %arg0 : i32, i32
  }
  func.func @transform_4(%arg0: i32) -> (i32, i32) {
    %c0_i32 = arith.constant 0 : i32
    %c0_i32_0 = arith.constant 0 : i32
    return %c0_i32, %arg0 : i32, i32
  }
  func.func @transform_5(%arg0: i32) -> (i32, i32) {
    %c0_i32 = arith.constant 0 : i32
    %c0_i32_0 = arith.constant 0 : i32
    return %c0_i32, %arg0 : i32, i32
  }
}

module attributes {stable_mosaic.version = 11 : i64} {
  func.func @_conv_bn_act_kernel(%arg0: i32, %arg1: memref<32x1152xbf16, #tpu.memory_space<vmem>>, %arg2: memref<1152x128xbf16, #tpu.memory_space<vmem>>, %arg3: memref<1x128xf32, #tpu.memory_space<vmem>>, %arg4: memref<1x128xf32, #tpu.memory_space<vmem>>, %arg5: memref<32x128xf32, #tpu.memory_space<vmem>>) attributes {dimension_semantics = [#tpu.dimension_semantics<parallel>], iteration_bounds = array<i64: 1>, scalar_prefetch = 0 : i64, scratch_operands = 0 : i64, tpu.core_type = #tpu.core_type<tc>, window_params = [{pipeline_mode = #tpu.pipeline_mode<synchronous>, transform_indices = @transform_0, window_bounds = array<i64: 32, 1152>}, {transform_indices = @transform_1, window_bounds = array<i64: 1152, 128>}, {transform_indices = @transform_2, window_bounds = array<i64: 1, 128>}, {transform_indices = @transform_3, window_bounds = array<i64: 1, 128>}, {transform_indices = @transform_4, window_bounds = array<i64: 32, 128>}]} {
    %c0 = arith.constant 0 : index
    %c0_0 = arith.constant 0 : index
    %0 = vector.load %arg1[%c0, %c0_0] : memref<32x1152xbf16, #tpu.memory_space<vmem>>, vector<32x1152xbf16>
    %c0_1 = arith.constant 0 : index
    %c0_2 = arith.constant 0 : index
    %1 = vector.load %arg2[%c0_1, %c0_2] : memref<1152x128xbf16, #tpu.memory_space<vmem>>, vector<1152x128xbf16>
    %cst = arith.constant dense<0.000000e+00> : vector<32x128xf32>
    %2 = tpu.matmul %0, %1, %cst {dimension_numbers = #tpu.dot_dimension_numbers<[1], [0], [0], [1], [0, 0, 1, 1], [], []>} : vector<32x1152xbf16>, vector<1152x128xbf16>, vector<32x128xf32> -> vector<32x128xf32>
    %cst_3 = arith.constant dense<0.000000e+00> : vector<128xf32>
    %3 = vector.multi_reduction <add>, %2, %cst_3 [0] : vector<32x128xf32> to vector<128xf32>
    %4 = vector.shape_cast %3 : vector<128xf32> to vector<1x128xf32>
    %5 = arith.mulf %2, %2 : vector<32x128xf32>
    %cst_4 = arith.constant dense<0.000000e+00> : vector<128xf32>
    %6 = vector.multi_reduction <add>, %5, %cst_4 [0] : vector<32x128xf32> to vector<128xf32>
    %7 = vector.shape_cast %6 : vector<128xf32> to vector<1x128xf32>
    %cst_5 = arith.constant 3.125000e-02 : f32
    %8 = vector.broadcast %cst_5 : f32 to vector<1x128xf32>
    %9 = arith.mulf %4, %8 : vector<1x128xf32>
    %cst_6 = arith.constant 3.125000e-02 : f32
    %10 = vector.broadcast %cst_6 : f32 to vector<1x128xf32>
    %11 = arith.mulf %7, %10 : vector<1x128xf32>
    %12 = arith.mulf %9, %9 : vector<1x128xf32>
    %13 = arith.subf %11, %12 : vector<1x128xf32>
    %cst_7 = arith.constant 0.000000e+00 : f32
    %14 = vector.broadcast %cst_7 : f32 to vector<1x128xf32>
    %15 = arith.maximumf %13, %14 : vector<1x128xf32>
    %cst_8 = arith.constant 9.99999974E-6 : f32
    %16 = vector.broadcast %cst_8 : f32 to vector<1x128xf32>
    %17 = arith.addf %15, %16 : vector<1x128xf32>
    %18 = math.rsqrt %17 : vector<1x128xf32>
    %c0_9 = arith.constant 0 : index
    %c0_10 = arith.constant 0 : index
    %19 = vector.load %arg3[%c0_9, %c0_10] : memref<1x128xf32, #tpu.memory_space<vmem>>, vector<1x128xf32>
    %20 = arith.mulf %18, %19 : vector<1x128xf32>
    %c0_11 = arith.constant 0 : index
    %c0_12 = arith.constant 0 : index
    %21 = vector.load %arg4[%c0_11, %c0_12] : memref<1x128xf32, #tpu.memory_space<vmem>>, vector<1x128xf32>
    %22 = arith.mulf %9, %20 : vector<1x128xf32>
    %23 = arith.subf %21, %22 : vector<1x128xf32>
    %24 = vector.broadcast %20 : vector<1x128xf32> to vector<32x128xf32>
    %25 = arith.mulf %2, %24 : vector<32x128xf32>
    %26 = vector.broadcast %23 : vector<1x128xf32> to vector<32x128xf32>
    %27 = arith.addf %25, %26 : vector<32x128xf32>
    %cst_13 = arith.constant 0.000000e+00 : f32
    %28 = vector.broadcast %cst_13 : f32 to vector<32x128xf32>
    %29 = arith.maximumf %27, %28 : vector<32x128xf32>
    %c0_14 = arith.constant 0 : index
    %c0_15 = arith.constant 0 : index
    %30 = vector.load %arg5[%c0_14, %c0_15] : memref<32x128xf32, #tpu.memory_space<vmem>>, vector<32x128xf32>
    tpu.vector_store %arg5[%c0_14, %c0_15], %29 {strides = array<i32>} : memref<32x128xf32, #tpu.memory_space<vmem>>, vector<32x128xf32>,
    return
  }
  func.func @transform_0(%arg0: i32) -> (i32, i32) {
    %c0_i32 = arith.constant 0 : i32
    %c0_i32_0 = arith.constant 0 : i32
    %c0_i32_1 = arith.constant 0 : i32
    return %c0_i32, %c0_i32_0 : i32, i32
  }
  func.func @transform_1(%arg0: i32) -> (i32, i32) {
    %c0_i32 = arith.constant 0 : i32
    %c0_i32_0 = arith.constant 0 : i32
    return %c0_i32, %arg0 : i32, i32
  }
  func.func @transform_2(%arg0: i32) -> (i32, i32) {
    %c0_i32 = arith.constant 0 : i32
    %c0_i32_0 = arith.constant 0 : i32
    return %c0_i32, %arg0 : i32, i32
  }
  func.func @transform_3(%arg0: i32) -> (i32, i32) {
    %c0_i32 = arith.constant 0 : i32
    %c0_i32_0 = arith.constant 0 : i32
    return %c0_i32, %arg0 : i32, i32
  }
  func.func @transform_4(%arg0: i32) -> (i32, i32) {
    %c0_i32 = arith.constant 0 : i32
    %c0_i32_0 = arith.constant 0 : i32
    return %c0_i32, %arg0 : i32, i32
  }
}

module attributes {stable_mosaic.version = 11 : i64} {
  func.func @_conv_bn_act_kernel(%arg0: i32, %arg1: memref<8x128xbf16, #tpu.memory_space<vmem>>, %arg2: memref<128x128xbf16, #tpu.memory_space<vmem>>, %arg3: memref<1x128xf32, #tpu.memory_space<vmem>>, %arg4: memref<1x128xf32, #tpu.memory_space<vmem>>, %arg5: memref<8x128xf32, #tpu.memory_space<vmem>>) attributes {dimension_semantics = [#tpu.dimension_semantics<parallel>], iteration_bounds = array<i64: 2>, scalar_prefetch = 0 : i64, scratch_operands = 0 : i64, tpu.core_type = #tpu.core_type<tc>, window_params = [{pipeline_mode = #tpu.pipeline_mode<synchronous>, transform_indices = @transform_0, window_bounds = array<i64: 8, 128>}, {transform_indices = @transform_1, window_bounds = array<i64: 128, 128>}, {transform_indices = @transform_2, window_bounds = array<i64: 1, 128>}, {transform_indices = @transform_3, window_bounds = array<i64: 1, 128>}, {transform_indices = @transform_4, window_bounds = array<i64: 8, 128>}]} {
    %c0 = arith.constant 0 : index
    %c0_0 = arith.constant 0 : index
    %0 = vector.load %arg1[%c0, %c0_0] : memref<8x128xbf16, #tpu.memory_space<vmem>>, vector<8x128xbf16>
    %c0_1 = arith.constant 0 : index
    %c0_2 = arith.constant 0 : index
    %1 = vector.load %arg2[%c0_1, %c0_2] : memref<128x128xbf16, #tpu.memory_space<vmem>>, vector<128x128xbf16>
    %cst = arith.constant dense<0.000000e+00> : vector<8x128xf32>
    %2 = tpu.matmul %0, %1, %cst {dimension_numbers = #tpu.dot_dimension_numbers<[1], [0], [0], [1], [0, 0, 1, 1], [], []>} : vector<8x128xbf16>, vector<128x128xbf16>, vector<8x128xf32> -> vector<8x128xf32>
    %cst_3 = arith.constant dense<0.000000e+00> : vector<128xf32>
    %3 = vector.multi_reduction <add>, %2, %cst_3 [0] : vector<8x128xf32> to vector<128xf32>
    %4 = vector.shape_cast %3 : vector<128xf32> to vector<1x128xf32>
    %5 = arith.mulf %2, %2 : vector<8x128xf32>
    %cst_4 = arith.constant dense<0.000000e+00> : vector<128xf32>
    %6 = vector.multi_reduction <add>, %5, %cst_4 [0] : vector<8x128xf32> to vector<128xf32>
    %7 = vector.shape_cast %6 : vector<128xf32> to vector<1x128xf32>
    %cst_5 = arith.constant 1.250000e-01 : f32
    %8 = vector.broadcast %cst_5 : f32 to vector<1x128xf32>
    %9 = arith.mulf %4, %8 : vector<1x128xf32>
    %cst_6 = arith.constant 1.250000e-01 : f32
    %10 = vector.broadcast %cst_6 : f32 to vector<1x128xf32>
    %11 = arith.mulf %7, %10 : vector<1x128xf32>
    %12 = arith.mulf %9, %9 : vector<1x128xf32>
    %13 = arith.subf %11, %12 : vector<1x128xf32>
    %cst_7 = arith.constant 0.000000e+00 : f32
    %14 = vector.broadcast %cst_7 : f32 to vector<1x128xf32>
    %15 = arith.maximumf %13, %14 : vector<1x128xf32>
    %cst_8 = arith.constant 9.99999974E-6 : f32
    %16 = vector.broadcast %cst_8 : f32 to vector<1x128xf32>
    %17 = arith.addf %15, %16 : vector<1x128xf32>
    %18 = math.rsqrt %17 : vector<1x128xf32>
    %c0_9 = arith.constant 0 : index
    %c0_10 = arith.constant 0 : index
    %19 = vector.load %arg3[%c0_9, %c0_10] : memref<1x128xf32, #tpu.memory_space<vmem>>, vector<1x128xf32>
    %20 = arith.mulf %18, %19 : vector<1x128xf32>
    %c0_11 = arith.constant 0 : index
    %c0_12 = arith.constant 0 : index
    %21 = vector.load %arg4[%c0_11, %c0_12] : memref<1x128xf32, #tpu.memory_space<vmem>>, vector<1x128xf32>
    %22 = arith.mulf %9, %20 : vector<1x128xf32>
    %23 = arith.subf %21, %22 : vector<1x128xf32>
    %24 = vector.broadcast %20 : vector<1x128xf32> to vector<8x128xf32>
    %25 = arith.mulf %2, %24 : vector<8x128xf32>
    %26 = vector.broadcast %23 : vector<1x128xf32> to vector<8x128xf32>
    %27 = arith.addf %25, %26 : vector<8x128xf32>
    %c0_13 = arith.constant 0 : index
    %c0_14 = arith.constant 0 : index
    %28 = vector.load %arg5[%c0_13, %c0_14] : memref<8x128xf32, #tpu.memory_space<vmem>>, vector<8x128xf32>
    tpu.vector_store %arg5[%c0_13, %c0_14], %27 {strides = array<i32>} : memref<8x128xf32, #tpu.memory_space<vmem>>, vector<8x128xf32>,
    return
  }
  func.func @transform_0(%arg0: i32) -> (i32, i32) {
    %c0_i32 = arith.constant 0 : i32
    %c0_i32_0 = arith.constant 0 : i32
    %c0_i32_1 = arith.constant 0 : i32
    return %c0_i32, %c0_i32_0 : i32, i32
  }
  func.func @transform_1(%arg0: i32) -> (i32, i32) {
    %c0_i32 = arith.constant 0 : i32
    %c0_i32_0 = arith.constant 0 : i32
    return %c0_i32, %arg0 : i32, i32
  }
  func.func @transform_2(%arg0: i32) -> (i32, i32) {
    %c0_i32 = arith.constant 0 : i32
    %c0_i32_0 = arith.constant 0 : i32
    return %c0_i32, %arg0 : i32, i32
  }
  func.func @transform_3(%arg0: i32) -> (i32, i32) {
    %c0_i32 = arith.constant 0 : i32
    %c0_i32_0 = arith.constant 0 : i32
    return %c0_i32, %arg0 : i32, i32
  }
  func.func @transform_4(%arg0: i32) -> (i32, i32) {
    %c0_i32 = arith.constant 0 : i32
    %c0_i32_0 = arith.constant 0 : i32
    return %c0_i32, %arg0 : i32, i32
  }
}

module attributes {stable_mosaic.version = 11 : i64} {
  func.func @_conv_bn_act_kernel(%arg0: i32, %arg1: memref<8x1152xbf16, #tpu.memory_space<vmem>>, %arg2: memref<1152x128xbf16, #tpu.memory_space<vmem>>, %arg3: memref<1x128xf32, #tpu.memory_space<vmem>>, %arg4: memref<1x128xf32, #tpu.memory_space<vmem>>, %arg5: memref<8x128xf32, #tpu.memory_space<vmem>>) attributes {dimension_semantics = [#tpu.dimension_semantics<parallel>], iteration_bounds = array<i64: 2>, scalar_prefetch = 0 : i64, scratch_operands = 0 : i64, tpu.core_type = #tpu.core_type<tc>, window_params = [{pipeline_mode = #tpu.pipeline_mode<synchronous>, transform_indices = @transform_0, window_bounds = array<i64: 8, 1152>}, {transform_indices = @transform_1, window_bounds = array<i64: 1152, 128>}, {transform_indices = @transform_2, window_bounds = array<i64: 1, 128>}, {transform_indices = @transform_3, window_bounds = array<i64: 1, 128>}, {transform_indices = @transform_4, window_bounds = array<i64: 8, 128>}]} {
    %c0 = arith.constant 0 : index
    %c0_0 = arith.constant 0 : index
    %0 = vector.load %arg1[%c0, %c0_0] : memref<8x1152xbf16, #tpu.memory_space<vmem>>, vector<8x1152xbf16>
    %c0_1 = arith.constant 0 : index
    %c0_2 = arith.constant 0 : index
    %1 = vector.load %arg2[%c0_1, %c0_2] : memref<1152x128xbf16, #tpu.memory_space<vmem>>, vector<1152x128xbf16>
    %cst = arith.constant dense<0.000000e+00> : vector<8x128xf32>
    %2 = tpu.matmul %0, %1, %cst {dimension_numbers = #tpu.dot_dimension_numbers<[1], [0], [0], [1], [0, 0, 1, 1], [], []>} : vector<8x1152xbf16>, vector<1152x128xbf16>, vector<8x128xf32> -> vector<8x128xf32>
    %cst_3 = arith.constant dense<0.000000e+00> : vector<128xf32>
    %3 = vector.multi_reduction <add>, %2, %cst_3 [0] : vector<8x128xf32> to vector<128xf32>
    %4 = vector.shape_cast %3 : vector<128xf32> to vector<1x128xf32>
    %5 = arith.mulf %2, %2 : vector<8x128xf32>
    %cst_4 = arith.constant dense<0.000000e+00> : vector<128xf32>
    %6 = vector.multi_reduction <add>, %5, %cst_4 [0] : vector<8x128xf32> to vector<128xf32>
    %7 = vector.shape_cast %6 : vector<128xf32> to vector<1x128xf32>
    %cst_5 = arith.constant 1.250000e-01 : f32
    %8 = vector.broadcast %cst_5 : f32 to vector<1x128xf32>
    %9 = arith.mulf %4, %8 : vector<1x128xf32>
    %cst_6 = arith.constant 1.250000e-01 : f32
    %10 = vector.broadcast %cst_6 : f32 to vector<1x128xf32>
    %11 = arith.mulf %7, %10 : vector<1x128xf32>
    %12 = arith.mulf %9, %9 : vector<1x128xf32>
    %13 = arith.subf %11, %12 : vector<1x128xf32>
    %cst_7 = arith.constant 0.000000e+00 : f32
    %14 = vector.broadcast %cst_7 : f32 to vector<1x128xf32>
    %15 = arith.maximumf %13, %14 : vector<1x128xf32>
    %cst_8 = arith.constant 9.99999974E-6 : f32
    %16 = vector.broadcast %cst_8 : f32 to vector<1x128xf32>
    %17 = arith.addf %15, %16 : vector<1x128xf32>
    %18 = math.rsqrt %17 : vector<1x128xf32>
    %c0_9 = arith.constant 0 : index
    %c0_10 = arith.constant 0 : index
    %19 = vector.load %arg3[%c0_9, %c0_10] : memref<1x128xf32, #tpu.memory_space<vmem>>, vector<1x128xf32>
    %20 = arith.mulf %18, %19 : vector<1x128xf32>
    %c0_11 = arith.constant 0 : index
    %c0_12 = arith.constant 0 : index
    %21 = vector.load %arg4[%c0_11, %c0_12] : memref<1x128xf32, #tpu.memory_space<vmem>>, vector<1x128xf32>
    %22 = arith.mulf %9, %20 : vector<1x128xf32>
    %23 = arith.subf %21, %22 : vector<1x128xf32>
    %24 = vector.broadcast %20 : vector<1x128xf32> to vector<8x128xf32>
    %25 = arith.mulf %2, %24 : vector<8x128xf32>
    %26 = vector.broadcast %23 : vector<1x128xf32> to vector<8x128xf32>
    %27 = arith.addf %25, %26 : vector<8x128xf32>
    %cst_13 = arith.constant 0.000000e+00 : f32
    %28 = vector.broadcast %cst_13 : f32 to vector<8x128xf32>
    %29 = arith.maximumf %27, %28 : vector<8x128xf32>
    %c0_14 = arith.constant 0 : index
    %c0_15 = arith.constant 0 : index
    %30 = vector.load %arg5[%c0_14, %c0_15] : memref<8x128xf32, #tpu.memory_space<vmem>>, vector<8x128xf32>
    tpu.vector_store %arg5[%c0_14, %c0_15], %29 {strides = array<i32>} : memref<8x128xf32, #tpu.memory_space<vmem>>, vector<8x128xf32>,
    return
  }
  func.func @transform_0(%arg0: i32) -> (i32, i32) {
    %c0_i32 = arith.constant 0 : i32
    %c0_i32_0 = arith.constant 0 : i32
    %c0_i32_1 = arith.constant 0 : i32
    return %c0_i32, %c0_i32_0 : i32, i32
  }
  func.func @transform_1(%arg0: i32) -> (i32, i32) {
    %c0_i32 = arith.constant 0 : i32
    %c0_i32_0 = arith.constant 0 : i32
    return %c0_i32, %arg0 : i32, i32
  }
  func.func @transform_2(%arg0: i32) -> (i32, i32) {
    %c0_i32 = arith.constant 0 : i32
    %c0_i32_0 = arith.constant 0 : i32
    return %c0_i32, %arg0 : i32, i32
  }
  func.func @transform_3(%arg0: i32) -> (i32, i32) {
    %c0_i32 = arith.constant 0 : i32
    %c0_i32_0 = arith.constant 0 : i32
    return %c0_i32, %arg0 : i32, i32
  }
  func.func @transform_4(%arg0: i32) -> (i32, i32) {
    %c0_i32 = arith.constant 0 : i32
    %c0_i32_0 = arith.constant 0 : i32
    return %c0_i32, %arg0 : i32, i32
  }
}

module attributes {stable_mosaic.version = 11 : i64} {
  func.func @_conv_bn_act_kernel(%arg0: i32, %arg1: memref<8x2304xbf16, #tpu.memory_space<vmem>>, %arg2: memref<2304x128xbf16, #tpu.memory_space<vmem>>, %arg3: memref<1x128xf32, #tpu.memory_space<vmem>>, %arg4: memref<1x128xf32, #tpu.memory_space<vmem>>, %arg5: memref<8x128xf32, #tpu.memory_space<vmem>>) attributes {dimension_semantics = [#tpu.dimension_semantics<parallel>], iteration_bounds = array<i64: 2>, scalar_prefetch = 0 : i64, scratch_operands = 0 : i64, tpu.core_type = #tpu.core_type<tc>, window_params = [{pipeline_mode = #tpu.pipeline_mode<synchronous>, transform_indices = @transform_0, window_bounds = array<i64: 8, 2304>}, {transform_indices = @transform_1, window_bounds = array<i64: 2304, 128>}, {transform_indices = @transform_2, window_bounds = array<i64: 1, 128>}, {transform_indices = @transform_3, window_bounds = array<i64: 1, 128>}, {transform_indices = @transform_4, window_bounds = array<i64: 8, 128>}]} {
    %c0 = arith.constant 0 : index
    %c0_0 = arith.constant 0 : index
    %0 = vector.load %arg1[%c0, %c0_0] : memref<8x2304xbf16, #tpu.memory_space<vmem>>, vector<8x2304xbf16>
    %c0_1 = arith.constant 0 : index
    %c0_2 = arith.constant 0 : index
    %1 = vector.load %arg2[%c0_1, %c0_2] : memref<2304x128xbf16, #tpu.memory_space<vmem>>, vector<2304x128xbf16>
    %cst = arith.constant dense<0.000000e+00> : vector<8x128xf32>
    %2 = tpu.matmul %0, %1, %cst {dimension_numbers = #tpu.dot_dimension_numbers<[1], [0], [0], [1], [0, 0, 1, 1], [], []>} : vector<8x2304xbf16>, vector<2304x128xbf16>, vector<8x128xf32> -> vector<8x128xf32>
    %cst_3 = arith.constant dense<0.000000e+00> : vector<128xf32>
    %3 = vector.multi_reduction <add>, %2, %cst_3 [0] : vector<8x128xf32> to vector<128xf32>
    %4 = vector.shape_cast %3 : vector<128xf32> to vector<1x128xf32>
    %5 = arith.mulf %2, %2 : vector<8x128xf32>
    %cst_4 = arith.constant dense<0.000000e+00> : vector<128xf32>
    %6 = vector.multi_reduction <add>, %5, %cst_4 [0] : vector<8x128xf32> to vector<128xf32>
    %7 = vector.shape_cast %6 : vector<128xf32> to vector<1x128xf32>
    %cst_5 = arith.constant 1.250000e-01 : f32
    %8 = vector.broadcast %cst_5 : f32 to vector<1x128xf32>
    %9 = arith.mulf %4, %8 : vector<1x128xf32>
    %cst_6 = arith.constant 1.250000e-01 : f32
    %10 = vector.broadcast %cst_6 : f32 to vector<1x128xf32>
    %11 = arith.mulf %7, %10 : vector<1x128xf32>
    %12 = arith.mulf %9, %9 : vector<1x128xf32>
    %13 = arith.subf %11, %12 : vector<1x128xf32>
    %cst_7 = arith.constant 0.000000e+00 : f32
    %14 = vector.broadcast %cst_7 : f32 to vector<1x128xf32>
    %15 = arith.maximumf %13, %14 : vector<1x128xf32>
    %cst_8 = arith.constant 9.99999974E-6 : f32
    %16 = vector.broadcast %cst_8 : f32 to vector<1x128xf32>
    %17 = arith.addf %15, %16 : vector<1x128xf32>
    %18 = math.rsqrt %17 : vector<1x128xf32>
    %c0_9 = arith.constant 0 : index
    %c0_10 = arith.constant 0 : index
    %19 = vector.load %arg3[%c0_9, %c0_10] : memref<1x128xf32, #tpu.memory_space<vmem>>, vector<1x128xf32>
    %20 = arith.mulf %18, %19 : vector<1x128xf32>
    %c0_11 = arith.constant 0 : index
    %c0_12 = arith.constant 0 : index
    %21 = vector.load %arg4[%c0_11, %c0_12] : memref<1x128xf32, #tpu.memory_space<vmem>>, vector<1x128xf32>
    %22 = arith.mulf %9, %20 : vector<1x128xf32>
    %23 = arith.subf %21, %22 : vector<1x128xf32>
    %24 = vector.broadcast %20 : vector<1x128xf32> to vector<8x128xf32>
    %25 = arith.mulf %2, %24 : vector<8x128xf32>
    %26 = vector.broadcast %23 : vector<1x128xf32> to vector<8x128xf32>
    %27 = arith.addf %25, %26 : vector<8x128xf32>
    %cst_13 = arith.constant 0.000000e+00 : f32
    %28 = vector.broadcast %cst_13 : f32 to vector<8x128xf32>
    %29 = arith.maximumf %27, %28 : vector<8x128xf32>
    %c0_14 = arith.constant 0 : index
    %c0_15 = arith.constant 0 : index
    %30 = vector.load %arg5[%c0_14, %c0_15] : memref<8x128xf32, #tpu.memory_space<vmem>>, vector<8x128xf32>
    tpu.vector_store %arg5[%c0_14, %c0_15], %29 {strides = array<i32>} : memref<8x128xf32, #tpu.memory_space<vmem>>, vector<8x128xf32>,
    return
  }
  func.func @transform_0(%arg0: i32) -> (i32, i32) {
    %c0_i32 = arith.constant 0 : i32
    %c0_i32_0 = arith.constant 0 : i32
    %c0_i32_1 = arith.constant 0 : i32
    return %c0_i32, %c0_i32_0 : i32, i32
  }
  func.func @transform_1(%arg0: i32) -> (i32, i32) {
    %c0_i32 = arith.constant 0 : i32
    %c0_i32_0 = arith.constant 0 : i32
    return %c0_i32, %arg0 : i32, i32
  }
  func.func @transform_2(%arg0: i32) -> (i32, i32) {
    %c0_i32 = arith.constant 0 : i32
    %c0_i32_0 = arith.constant 0 : i32
    return %c0_i32, %arg0 : i32, i32
  }
  func.func @transform_3(%arg0: i32) -> (i32, i32) {
    %c0_i32 = arith.constant 0 : i32
    %c0_i32_0 = arith.constant 0 : i32
    return %c0_i32, %arg0 : i32, i32
  }
  func.func @transform_4(%arg0: i32) -> (i32, i32) {
    %c0_i32 = arith.constant 0 : i32
    %c0_i32_0 = arith.constant 0 : i32
    return %c0_i32, %arg0 : i32, i32
  }
}

module attributes {stable_mosaic.version = 11 : i64} {
  func.func @_conv_bn_act_kernel(%arg0: i32, %arg1: memref<8x2304xbf16, #tpu.memory_space<vmem>>, %arg2: memref<2304x128xbf16, #tpu.memory_space<vmem>>, %arg3: memref<1x128xf32, #tpu.memory_space<vmem>>, %arg4: memref<1x128xf32, #tpu.memory_space<vmem>>, %arg5: memref<8x128xf32, #tpu.memory_space<vmem>>, %arg6: memref<8x128xf32, #tpu.memory_space<vmem>>) attributes {dimension_semantics = [#tpu.dimension_semantics<parallel>], iteration_bounds = array<i64: 2>, scalar_prefetch = 0 : i64, scratch_operands = 0 : i64, tpu.core_type = #tpu.core_type<tc>, window_params = [{pipeline_mode = #tpu.pipeline_mode<synchronous>, transform_indices = @transform_0, window_bounds = array<i64: 8, 2304>}, {transform_indices = @transform_1, window_bounds = array<i64: 2304, 128>}, {transform_indices = @transform_2, window_bounds = array<i64: 1, 128>}, {transform_indices = @transform_3, window_bounds = array<i64: 1, 128>}, {transform_indices = @transform_4, window_bounds = array<i64: 8, 128>}, {transform_indices = @transform_5, window_bounds = array<i64: 8, 128>}]} {
    %c0 = arith.constant 0 : index
    %c0_0 = arith.constant 0 : index
    %0 = vector.load %arg1[%c0, %c0_0] : memref<8x2304xbf16, #tpu.memory_space<vmem>>, vector<8x2304xbf16>
    %c0_1 = arith.constant 0 : index
    %c0_2 = arith.constant 0 : index
    %1 = vector.load %arg2[%c0_1, %c0_2] : memref<2304x128xbf16, #tpu.memory_space<vmem>>, vector<2304x128xbf16>
    %cst = arith.constant dense<0.000000e+00> : vector<8x128xf32>
    %2 = tpu.matmul %0, %1, %cst {dimension_numbers = #tpu.dot_dimension_numbers<[1], [0], [0], [1], [0, 0, 1, 1], [], []>} : vector<8x2304xbf16>, vector<2304x128xbf16>, vector<8x128xf32> -> vector<8x128xf32>
    %cst_3 = arith.constant dense<0.000000e+00> : vector<128xf32>
    %3 = vector.multi_reduction <add>, %2, %cst_3 [0] : vector<8x128xf32> to vector<128xf32>
    %4 = vector.shape_cast %3 : vector<128xf32> to vector<1x128xf32>
    %5 = arith.mulf %2, %2 : vector<8x128xf32>
    %cst_4 = arith.constant dense<0.000000e+00> : vector<128xf32>
    %6 = vector.multi_reduction <add>, %5, %cst_4 [0] : vector<8x128xf32> to vector<128xf32>
    %7 = vector.shape_cast %6 : vector<128xf32> to vector<1x128xf32>
    %cst_5 = arith.constant 1.250000e-01 : f32
    %8 = vector.broadcast %cst_5 : f32 to vector<1x128xf32>
    %9 = arith.mulf %4, %8 : vector<1x128xf32>
    %cst_6 = arith.constant 1.250000e-01 : f32
    %10 = vector.broadcast %cst_6 : f32 to vector<1x128xf32>
    %11 = arith.mulf %7, %10 : vector<1x128xf32>
    %12 = arith.mulf %9, %9 : vector<1x128xf32>
    %13 = arith.subf %11, %12 : vector<1x128xf32>
    %cst_7 = arith.constant 0.000000e+00 : f32
    %14 = vector.broadcast %cst_7 : f32 to vector<1x128xf32>
    %15 = arith.maximumf %13, %14 : vector<1x128xf32>
    %cst_8 = arith.constant 9.99999974E-6 : f32
    %16 = vector.broadcast %cst_8 : f32 to vector<1x128xf32>
    %17 = arith.addf %15, %16 : vector<1x128xf32>
    %18 = math.rsqrt %17 : vector<1x128xf32>
    %c0_9 = arith.constant 0 : index
    %c0_10 = arith.constant 0 : index
    %19 = vector.load %arg3[%c0_9, %c0_10] : memref<1x128xf32, #tpu.memory_space<vmem>>, vector<1x128xf32>
    %20 = arith.mulf %18, %19 : vector<1x128xf32>
    %c0_11 = arith.constant 0 : index
    %c0_12 = arith.constant 0 : index
    %21 = vector.load %arg4[%c0_11, %c0_12] : memref<1x128xf32, #tpu.memory_space<vmem>>, vector<1x128xf32>
    %22 = arith.mulf %9, %20 : vector<1x128xf32>
    %23 = arith.subf %21, %22 : vector<1x128xf32>
    %24 = vector.broadcast %20 : vector<1x128xf32> to vector<8x128xf32>
    %25 = arith.mulf %2, %24 : vector<8x128xf32>
    %26 = vector.broadcast %23 : vector<1x128xf32> to vector<8x128xf32>
    %27 = arith.addf %25, %26 : vector<8x128xf32>
    %c0_13 = arith.constant 0 : index
    %c0_14 = arith.constant 0 : index
    %28 = vector.load %arg5[%c0_13, %c0_14] : memref<8x128xf32, #tpu.memory_space<vmem>>, vector<8x128xf32>
    %29 = arith.addf %27, %28 : vector<8x128xf32>
    %cst_15 = arith.constant 0.000000e+00 : f32
    %30 = vector.broadcast %cst_15 : f32 to vector<8x128xf32>
    %31 = arith.maximumf %29, %30 : vector<8x128xf32>
    %c0_16 = arith.constant 0 : index
    %c0_17 = arith.constant 0 : index
    %32 = vector.load %arg6[%c0_16, %c0_17] : memref<8x128xf32, #tpu.memory_space<vmem>>, vector<8x128xf32>
    tpu.vector_store %arg6[%c0_16, %c0_17], %31 {strides = array<i32>} : memref<8x128xf32, #tpu.memory_space<vmem>>, vector<8x128xf32>,
    return
  }
  func.func @transform_0(%arg0: i32) -> (i32, i32) {
    %c0_i32 = arith.constant 0 : i32
    %c0_i32_0 = arith.constant 0 : i32
    %c0_i32_1 = arith.constant 0 : i32
    return %c0_i32, %c0_i32_0 : i32, i32
  }
  func.func @transform_1(%arg0: i32) -> (i32, i32) {
    %c0_i32 = arith.constant 0 : i32
    %c0_i32_0 = arith.constant 0 : i32
    return %c0_i32, %arg0 : i32, i32
  }
  func.func @transform_2(%arg0: i32) -> (i32, i32) {
    %c0_i32 = arith.constant 0 : i32
    %c0_i32_0 = arith.constant 0 : i32
    return %c0_i32, %arg0 : i32, i32
  }
  func.func @transform_3(%arg0: i32) -> (i32, i32) {
    %c0_i32 = arith.constant 0 : i32
    %c0_i32_0 = arith.constant 0 : i32
    return %c0_i32, %arg0 : i32, i32
  }
  func.func @transform_4(%arg0: i32) -> (i32, i32) {
    %c0_i32 = arith.constant 0 : i32
    %c0_i32_0 = arith.constant 0 : i32
    return %c0_i32, %arg0 : i32, i32
  }
  func.func @transform_5(%arg0: i32) -> (i32, i32) {
    %c0_i32 = arith.constant 0 : i32
    %c0_i32_0 = arith.constant 0 : i32
    return %c0_i32, %arg0 : i32, i32
  }
}

</mosaic_0001>

<bundles_post_ra>
// kernel: resnet_forward.16
= control target key start
LH: loop header
LB: loop body
LE: loop exit
PB: predicated region body
PF: predicated region fallthrough
CT: control target
= control target key end

     0   :  { %v1530_v0 = vmov 0   ;;  %s2939_s1 = inlined_call_operand.vmem [shape: bf16[256,128], index: 1, kind: input, shape index: {}]   ;;  %s2940_s0 = inlined_call_operand.vmem [shape: bf16[512,256], index: 0, kind: input, shape index: {}]   ;;  %s2941_s2 = inlined_call_operand.vmem [shape: f32[1,128], index: 2, kind: input, shape index: {}]   ;;  %s2942_s3 = inlined_call_operand.vmem [shape: f32[1,128], index: 3, kind: input, shape index: {}]   ;;  %s2943_s4 = inlined_call_operand.vmem [shape: f32[512,128], index: 4, kind: output, shape index: {}]  }
   0x1   :  { %530 = vmatprep.subr.bf16.mxu0 %v1530_v0  ;;  %v1416_v1 = vld [vmem:[%s2939_s1 + $0x38] sm:$0xff]   ;;  %1383 = vmatprep.subr.bf16.mxu1 %v1530_v0  ;;  %v1417_v2 = vld [vmem:[%s2939_s1 + $0x30] sm:$0xff]   ;;  %v1418_v3 = vld [vmem:[%s2939_s1 + $0x28] sm:$0xff]  }
   0x2   :  { %531 = vmatpush1.bf16.msra.mxu0 %v1416_v1  ;;  %1399 = vmatpush1.bf16.msra.mxu1 %v1416_v1  ;;  %v1419_v4 = vld [vmem:[%s2939_s1 + $0x20] sm:$0xff]   ;;  %v1420_v5 = vld [vmem:[%s2939_s1 + $0x18] sm:$0xff]   ;;  %v1421_v7 = vld [vmem:[%s2939_s1 + $0x10] sm:$0xff]  }
   0x3   :  { %532 = vmatprep.subr.bf16.mxu0 %v1530_v0  ;;  %1384 = vmatprep.subr.bf16.mxu1 %v1530_v0  ;;  %v1434_v6 = vld [vmem:[%s2940_s0 + $0x4] ss:$8 sps:$4 sm:$0xff]   ;;  %v1424_v11 = vld [vmem:[%s2939_s1 + $0x78] sm:$0xff]   ;;  %v1425_v12 = vld [vmem:[%s2939_s1 + $0x70] sm:$0xff]  }
   0x4   :  { %562 = vmatprep.mubr.bf16.mxu0 %v1434_v6  ;;  %v1422_v8 = vld [vmem:[%s2939_s1 + $0x8] sm:$0xff]   ;;  %v1423_v9 = vld [vmem:[%s2939_s1] sm:$0xff]   ;;  %v1428_v15 = vld [vmem:[%s2939_s1 + $0x58] sm:$0xff]  }
   0x5   :  { %v1458_v10 = vld [vmem:[%s2940_s0 + $0x104] ss:$8 sps:$4 sm:$0xff]   ;;  %v1429_v16 = vld [vmem:[%s2939_s1 + $0x50] sm:$0xff]   ;;  %v1432_v19 = vld [vmem:[%s2940_s0] ss:$8 sps:$4 sm:$0xff]  }
   0x6   :  { %533 = vmatpush1.bf16.msra.mxu0 %v1417_v2  ;;  %1400 = vmatpush1.bf16.msra.mxu1 %v1417_v2  ;;  %v1426_v13 = vld [vmem:[%s2939_s1 + $0x68] sm:$0xff]   ;;  %v1427_v14 = vld [vmem:[%s2939_s1 + $0x60] sm:$0xff]   ;;  %v1435_v21 = vld [vmem:[%s2940_s0 + $0x14] ss:$8 sps:$4 sm:$0xff]  }
   0x7   :  { %534 = vmatprep.subr.bf16.mxu0 %v1530_v0  ;;  %1385 = vmatprep.subr.bf16.mxu1 %v1530_v0  ;;  %v1430_v17 = vld [vmem:[%s2939_s1 + $0x48] sm:$0xff]   ;;  %v1431_v18 = vld [vmem:[%s2939_s1 + $0x40] sm:$0xff]   ;;  %v1462_v22 = vld [vmem:[%s2940_s0 + $0x114] ss:$8 sps:$4 sm:$0xff]  }
   0x8   :  { %690 = vmatprep.mubr.bf16.mxu1 %v1458_v10  ;;  %v1456_v20 = vld [vmem:[%s2940_s0 + $0x100] ss:$8 sps:$4 sm:$0xff]   ;;  %v1437_v23 = vld [vmem:[%s2940_s0 + $0x10] ss:$8 sps:$4 sm:$0xff]   ;;  %v1438_v25 = vld [vmem:[%s2940_s0 + $0x24] ss:$8 sps:$4 sm:$0xff]  }
   0x9   :  { %v1464_v24 = vld [vmem:[%s2940_s0 + $0x110] ss:$8 sps:$4 sm:$0xff]   ;;  %v1468_v26 = vld [vmem:[%s2940_s0 + $0x124] ss:$8 sps:$4 sm:$0xff]   ;;  %v1440_v27 = vld [vmem:[%s2940_s0 + $0x20] ss:$8 sps:$4 sm:$0xff]  }
   0xa   :  { %535 = vmatpush1.bf16.msra.mxu0 %v1418_v3  ;;  %1401 = vmatpush1.bf16.msra.mxu1 %v1418_v3  ;;  %v1470_v28 = vld [vmem:[%s2940_s0 + $0x120] ss:$8 sps:$4 sm:$0xff]   ;;  %v1441_v29 = vld [vmem:[%s2940_s0 + $0x34] ss:$8 sps:$4 sm:$0xff]   ;;  %v1443_v31 = vld [vmem:[%s2940_s0 + $0x30] ss:$8 sps:$4 sm:$0xff]  }
   0xb   :  { %536 = vmatprep.subr.bf16.mxu0 %v1530_v0  ;;  %1386 = vmatprep.subr.bf16.mxu1 %v1530_v0  ;;  %v1474_v30 = vld [vmem:[%s2940_s0 + $0x134] ss:$8 sps:$4 sm:$0xff]   ;;  %v1476_v32 = vld [vmem:[%s2940_s0 + $0x130] ss:$8 sps:$4 sm:$0xff]   ;;  %v1444_v33 = vld [vmem:[%s2940_s0 + $0x44] ss:$8 sps:$4 sm:$0xff]  }
   0xc   :  { %v1480_v34 = vld [vmem:[%s2940_s0 + $0x144] ss:$8 sps:$4 sm:$0xff]   ;;  %v1446_v35 = vld [vmem:[%s2940_s0 + $0x40] ss:$8 sps:$4 sm:$0xff]   ;;  %v1447_v37 = vld [vmem:[%s2940_s0 + $0x54] ss:$8 sps:$4 sm:$0xff]  }
   0xd   :  { %v1482_v36 = vld [vmem:[%s2940_s0 + $0x140] ss:$8 sps:$4 sm:$0xff]   ;;  %v1486_v38 = vld [vmem:[%s2940_s0 + $0x154] ss:$8 sps:$4 sm:$0xff]   ;;  %v1449_v39 = vld [vmem:[%s2940_s0 + $0x50] ss:$8 sps:$4 sm:$0xff]  }
   0xe   :  { %537 = vmatpush1.bf16.msra.mxu0 %v1419_v4  ;;  %1402 = vmatpush1.bf16.msra.mxu1 %v1419_v4  ;;  %v1488_v40 = vld [vmem:[%s2940_s0 + $0x150] ss:$8 sps:$4 sm:$0xff]   ;;  %v1450_v41 = vld [vmem:[%s2940_s0 + $0x64] ss:$8 sps:$4 sm:$0xff]   ;;  %v1452_v43 = vld [vmem:[%s2940_s0 + $0x60] ss:$8 sps:$4 sm:$0xff]  }
   0xf   :  { %538 = vmatprep.subr.bf16.mxu0 %v1530_v0  ;;  %1387 = vmatprep.subr.bf16.mxu1 %v1530_v0  ;;  %v1492_v42 = vld [vmem:[%s2940_s0 + $0x164] ss:$8 sps:$4 sm:$0xff]   ;;  %v1494_v44 = vld [vmem:[%s2940_s0 + $0x160] ss:$8 sps:$4 sm:$0xff]   ;;  %v1453_v45 = vld [vmem:[%s2940_s0 + $0x74] ss:$8 sps:$4 sm:$0xff]  }
  0x10   :  { %v1498_v46 = vld [vmem:[%s2940_s0 + $0x174] ss:$8 sps:$4 sm:$0xff]   ;;  %v1455_v47 = vld [vmem:[%s2940_s0 + $0x70] ss:$8 sps:$4 sm:$0xff]   ;;  %v1459_v49 = vld [vmem:[%s2940_s0 + $0x84] ss:$8 sps:$4 sm:$0xff]  }
  0x11   :  { %v1500_v48 = vld [vmem:[%s2940_s0 + $0x170] ss:$8 sps:$4 sm:$0xff]   ;;  %v1504_v50 = vld [vmem:[%s2940_s0 + $0x184] ss:$8 sps:$4 sm:$0xff]   ;;  %v1461_v51 = vld [vmem:[%s2940_s0 + $0x80] ss:$8 sps:$4 sm:$0xff]  }
  0x12   :  { %539 = vmatpush1.bf16.msra.mxu0 %v1420_v5  ;;  %1403 = vmatpush1.bf16.msra.mxu1 %v1420_v5  ;;  %v1506_v52 = vld [vmem:[%s2940_s0 + $0x180] ss:$8 sps:$4 sm:$0xff]   ;;  %v1465_v53 = vld [vmem:[%s2940_s0 + $0x94] ss:$8 sps:$4 sm:$0xff]   ;;  %v1467_v55 = vld [vmem:[%s2940_s0 + $0x90] ss:$8 sps:$4 sm:$0xff]  }
  0x13   :  { %540 = vmatprep.subr.bf16.mxu0 %v1530_v0  ;;  %1388 = vmatprep.subr.bf16.mxu1 %v1530_v0  ;;  %v1507_v54 = vld [vmem:[%s2940_s0 + $0x194] ss:$8 sps:$4 sm:$0xff]   ;;  %v1509_v56 = vld [vmem:[%s2940_s0 + $0x190] ss:$8 sps:$4 sm:$0xff]   ;;  %v1471_v57 = vld [vmem:[%s2940_s0 + $0xa4] ss:$8 sps:$4 sm:$0xff]  }
  0x14   :  { %v1510_v58 = vld [vmem:[%s2940_s0 + $0x1a4] ss:$8 sps:$4 sm:$0xff]   ;;  %v1473_v59 = vld [vmem:[%s2940_s0 + $0xa0] ss:$8 sps:$4 sm:$0xff]   ;;  %v1477_v61 = vld [vmem:[%s2940_s0 + $0xb4] ss:$8 sps:$4 sm:$0xff]  }
  0x15   :  { %v1512_v60 = vld [vmem:[%s2940_s0 + $0x1a0] ss:$8 sps:$4 sm:$0xff]   ;;  %v1513_v62 = vld [vmem:[%s2940_s0 + $0x1b4] ss:$8 sps:$4 sm:$0xff]   ;;  %v1479_v63 = vld [vmem:[%s2940_s0 + $0xb0] ss:$8 sps:$4 sm:$0xff]  }
  0x16   :  { %541 = vmatpush1.bf16.msra.mxu0 %v1421_v7  ;;  %1404 = vmatpush1.bf16.msra.mxu1 %v1421_v7  ;;  %v1483_v1 = vld [vmem:[%s2940_s0 + $0xc4] ss:$8 sps:$4 sm:$0xff]   ;;  %v1485_v3 = vld [vmem:[%s2940_s0 + $0xc0] ss:$8 sps:$4 sm:$0xff]   ;;  %v1489_v5 = vld [vmem:[%s2940_s0 + $0xd4] ss:$8 sps:$4 sm:$0xff]  }
  0x17   :  { %542 = vmatprep.subr.bf16.mxu0 %v1530_v0  ;;  %1389 = vmatprep.subr.bf16.mxu1 %v1530_v0  ;;  %v1516_v2 = vld [vmem:[%s2940_s0 + $0x1c4] ss:$8 sps:$4 sm:$0xff]   ;;  %v1518_v4 = vld [vmem:[%s2940_s0 + $0x1c0] ss:$8 sps:$4 sm:$0xff]   ;;  %v1519_v6 = vld [vmem:[%s2940_s0 + $0x1d4] ss:$8 sps:$4 sm:$0xff]  }
  0x18   :  { %v1491_v7 = vld [vmem:[%s2940_s0 + $0xd0] ss:$8 sps:$4 sm:$0xff]   ;;  %v1522_v10 = vld [vmem:[%s2940_s0 + $0x1e4] ss:$8 sps:$4 sm:$0xff]  }
  0x1a   :  { %543 = vmatpush1.bf16.msra.mxu0 %v1422_v8  ;;  %1405 = vmatpush1.bf16.msra.mxu1 %v1422_v8  ;;  %v1521_v8 = vld [vmem:[%s2940_s0 + $0x1d0] ss:$8 sps:$4 sm:$0xff]  }
  0x1b   :  { %544 = vmatprep.subr.bf16.mxu0 %v1530_v0  ;;  %1390 = vmatprep.subr.bf16.mxu1 %v1530_v0 }
  0x1e   :  { %545 = vmatpush1.bf16.msra.mxu0 %v1423_v9  ;;  %1406 = vmatpush1.bf16.msra.mxu1 %v1423_v9  ;;  %v1495_v9 = vld [vmem:[%s2940_s0 + $0xe4] ss:$8 sps:$4 sm:$0xff]  }
  0x1f   :  { %546 = vmatprep.subr.bf16.mxu0 %v1530_v0  ;;  %1391 = vmatprep.subr.bf16.mxu1 %v1530_v0 }
  0x22   :  { %547 = vmatpush2.bf16.msra.mxu0 %v1424_v11  ;;  %1407 = vmatpush2.bf16.msra.mxu1 %v1424_v11  ;;  %v1497_v11 = vld [vmem:[%s2940_s0 + $0xe0] ss:$8 sps:$4 sm:$0xff]  }
  0x23   :  { %548 = vmatprep.subr.bf16.mxu0 %v1530_v0  ;;  %1392 = vmatprep.subr.bf16.mxu1 %v1530_v0 }
  0x26   :  { %549 = vmatpush2.bf16.msra.mxu0 %v1425_v12  ;;  %1408 = vmatpush2.bf16.msra.mxu1 %v1425_v12  ;;  %v1524_v12 = vld [vmem:[%s2940_s0 + $0x1e0] ss:$8 sps:$4 sm:$0xff]  }
  0x27   :  { %550 = vmatprep.subr.bf16.mxu0 %v1530_v0  ;;  %1393 = vmatprep.subr.bf16.mxu1 %v1530_v0 }
  0x2a   :  { %551 = vmatpush2.bf16.msra.mxu0 %v1426_v13  ;;  %1409 = vmatpush2.bf16.msra.mxu1 %v1426_v13  ;;  %v1501_v13 = vld [vmem:[%s2940_s0 + $0xf4] ss:$8 sps:$4 sm:$0xff]  }
  0x2b   :  { %552 = vmatprep.subr.bf16.mxu0 %v1530_v0  ;;  %1394 = vmatprep.subr.bf16.mxu1 %v1530_v0 }
  0x2e   :  { %553 = vmatpush2.bf16.msra.mxu0 %v1427_v14  ;;  %1410 = vmatpush2.bf16.msra.mxu1 %v1427_v14  ;;  %v1525_v14 = vld [vmem:[%s2940_s0 + $0x1f4] ss:$8 sps:$4 sm:$0xff]  }
  0x2f   :  { %554 = vmatprep.subr.bf16.mxu0 %v1530_v0  ;;  %1395 = vmatprep.subr.bf16.mxu1 %v1530_v0 }
  0x32   :  { %555 = vmatpush2.bf16.msra.mxu0 %v1428_v15  ;;  %1411 = vmatpush2.bf16.msra.mxu1 %v1428_v15  ;;  %v1503_v15 = vld [vmem:[%s2940_s0 + $0xf0] ss:$8 sps:$4 sm:$0xff]  }
  0x33   :  { %556 = vmatprep.subr.bf16.mxu0 %v1530_v0  ;;  %1396 = vmatprep.subr.bf16.mxu1 %v1530_v0 }
  0x36   :  { %557 = vmatpush2.bf16.msra.mxu0 %v1429_v16  ;;  %1412 = vmatpush2.bf16.msra.mxu1 %v1429_v16  ;;  %v1527_v16 = vld [vmem:[%s2940_s0 + $0x1f0] ss:$8 sps:$4 sm:$0xff]  }
  0x37   :  { %558 = vmatprep.subr.bf16.mxu0 %v1530_v0  ;;  %1397 = vmatprep.subr.bf16.mxu1 %v1530_v0 }
  0x3a   :  { %559 = vmatpush2.bf16.msra.mxu0 %v1430_v17  ;;  %1413 = vmatpush2.bf16.msra.mxu1 %v1430_v17 }
  0x3b   :  { %560 = vmatprep.subr.bf16.mxu0 %v1530_v0  ;;  %1398 = vmatprep.subr.bf16.mxu1 %v1530_v0  ;;  %v1515_v0 = vld [vmem:[%s2940_s0 + $0x1b0] ss:$8 sps:$4 sm:$0xff]  }
  0x3e   :  { %561 = vmatpush2.bf16.msra.mxu0 %v1431_v18  ;;  %1414 = vmatpush2.bf16.msra.mxu1 %v1431_v18 }
  0x41   :  { %563 = vmatmul.mubr.bf16.vlgmr.msra.gmra.mxu0 %v1432_v19  ;;  %691 = vmatmul.mubr.bf16.vlgmr.msra.gmra.mxu1 %v1456_v20 }
  0x42   :  { %570 = vmatprep.mubr.bf16.mxu0 %v1435_v21  ;;  %698 = vmatprep.mubr.bf16.mxu1 %v1462_v22 }
  0x49   :  { %571 = vmatmul.mubr.bf16.gmra.mxu0 %v1437_v23  ;;  %699 = vmatmul.mubr.bf16.gmra.mxu1 %v1464_v24 }
  0x4a   :  { %578 = vmatprep.mubr.bf16.mxu0 %v1438_v25  ;;  %706 = vmatprep.mubr.bf16.mxu1 %v1468_v26 }
  0x51   :  { %579 = vmatmul.mubr.bf16.gmra.mxu0 %v1440_v27  ;;  %707 = vmatmul.mubr.bf16.gmra.mxu1 %v1470_v28 }
  0x52   :  { %586 = vmatprep.mubr.bf16.mxu0 %v1441_v29  ;;  %714 = vmatprep.mubr.bf16.mxu1 %v1474_v30 }
  0x59   :  { %587 = vmatmul.mubr.bf16.gmra.mxu0 %v1443_v31  ;;  %715 = vmatmul.mubr.bf16.gmra.mxu1 %v1476_v32 }
  0x5a   :  { %594 = vmatprep.mubr.bf16.mxu0 %v1444_v33  ;;  %722 = vmatprep.mubr.bf16.mxu1 %v1480_v34 }
  0x61   :  { %595 = vmatmul.mubr.bf16.gmra.mxu0 %v1446_v35  ;;  %723 = vmatmul.mubr.bf16.gmra.mxu1 %v1482_v36 }
  0x62   :  { %602 = vmatprep.mubr.bf16.mxu0 %v1447_v37  ;;  %730 = vmatprep.mubr.bf16.mxu1 %v1486_v38 }
  0x69   :  { %603 = vmatmul.mubr.bf16.gmra.mxu0 %v1449_v39  ;;  %731 = vmatmul.mubr.bf16.gmra.mxu1 %v1488_v40 }
  0x6a   :  { %610 = vmatprep.mubr.bf16.mxu0 %v1450_v41  ;;  %738 = vmatprep.mubr.bf16.mxu1 %v1492_v42 }
  0x71   :  { %611 = vmatmul.mubr.bf16.gmra.mxu0 %v1452_v43  ;;  %739 = vmatmul.mubr.bf16.gmra.mxu1 %v1494_v44 }
  0x72   :  { %618 = vmatprep.mubr.bf16.mxu0 %v1453_v45  ;;  %746 = vmatprep.mubr.bf16.mxu1 %v1498_v46 }
  0x79   :  { %619 = vmatmul.mubr.bf16.gmra.mxu0 %v1455_v47  ;;  %747 = vmatmul.mubr.bf16.gmra.mxu1 %v1500_v48 }
  0x7a   :  { %626 = vmatprep.mubr.bf16.mxu0 %v1459_v49  ;;  %754 = vmatprep.mubr.bf16.mxu1 %v1504_v50 }
  0x81   :  { %627 = vmatmul.mubr.bf16.gmra.mxu0 %v1461_v51  ;;  %755 = vmatmul.mubr.bf16.gmra.mxu1 %v1506_v52 }
  0x82   :  { %634 = vmatprep.mubr.bf16.mxu0 %v1465_v53  ;;  %762 = vmatprep.mubr.bf16.mxu1 %v1507_v54 }
  0x89   :  { %635 = vmatmul.mubr.bf16.gmra.mxu0 %v1467_v55  ;;  %763 = vmatmul.mubr.bf16.gmra.mxu1 %v1509_v56 }
  0x8a   :  { %642 = vmatprep.mubr.bf16.mxu0 %v1471_v57  ;;  %770 = vmatprep.mubr.bf16.mxu1 %v1510_v58 }
  0x91   :  { %643 = vmatmul.mubr.bf16.gmra.mxu0 %v1473_v59  ;;  %771 = vmatmul.mubr.bf16.gmra.mxu1 %v1512_v60 }
  0x92   :  { %650 = vmatprep.mubr.bf16.mxu0 %v1477_v61  ;;  %778 = vmatprep.mubr.bf16.mxu1 %v1513_v62 }
  0x99   :  { %651 = vmatmul.mubr.bf16.gmra.mxu0 %v1479_v63  ;;  %779 = vmatmul.mubr.bf16.gmra.mxu1 %v1515_v0 }
  0x9a   :  { %658 = vmatprep.mubr.bf16.mxu0 %v1483_v1  ;;  %786 = vmatprep.mubr.bf16.mxu1 %v1516_v2 }
  0xa1   :  { %659 = vmatmul.mubr.bf16.gmra.mxu0 %v1485_v3  ;;  %787 = vmatmul.mubr.bf16.gmra.mxu1 %v1518_v4 }
  0xa2   :  { %666 = vmatprep.mubr.bf16.mxu0 %v1489_v5  ;;  %794 = vmatprep.mubr.bf16.mxu1 %v1519_v6 }
  0xa9   :  { %667 = vmatmul.mubr.bf16.gmra.mxu0 %v1491_v7  ;;  %795 = vmatmul.mubr.bf16.gmra.mxu1 %v1521_v8 }
  0xaa   :  { %674 = vmatprep.mubr.bf16.mxu0 %v1495_v9  ;;  %802 = vmatprep.mubr.bf16.mxu1 %v1522_v10 }
  0xb1   :  { %675 = vmatmul.mubr.bf16.gmra.mxu0 %v1497_v11  ;;  %803 = vmatmul.mubr.bf16.gmra.mxu1 %v1524_v12 }
  0xb2   :  { %682 = vmatprep.mubr.bf16.mxu0 %v1501_v13  ;;  %810 = vmatprep.mubr.bf16.mxu1 %v1525_v14 }
  0xb9   :  { %683 = vmatmul.mubr.bf16.gmra.mxu0 %v1503_v15  ;;  %811 = vmatmul.mubr.bf16.gmra.mxu1 %v1527_v16 }
 0x101   :  { %v1828_v17 = vpop.f32.mrf.mxu0  ;;  %v1830_v18 = vpop.f32.mrf.mxu1 }
 0x103   :  { %v566_v19 = vpop.f32.mrf.mxu0  ;;  %v694_v20 = vpop.f32.mrf.mxu1 }
 0x105   :  { %v1832_v21 = vpop.f32.mrf.mxu0  ;;  %v1834_v22 = vpop.f32.mrf.mxu1 }
 0x106   :  { %v889_v19 = vmul.f32 %v1832_v21, %v1832_v21 }
 0x107   :  { %v569_v23 = vpop.f32.mrf.mxu0  ;;  %v697_v24 = vpop.f32.mrf.mxu1 }
 0x108   :  { %v888_v24 = vmul.f32 %v1828_v17, %v1828_v17 }
 0x109   :  { %v1836_v25 = vpop.f32.mrf.mxu0  ;;  %v1838_v26 = vpop.f32.mrf.mxu1 }
 0x10b   :  { %v574_v27 = vpop.f32.mrf.mxu0  ;;  %v702_v28 = vpop.f32.mrf.mxu1 }
 0x10c   :  { %v819_v27 = vadd.f32 %v1832_v21, %v1828_v17  ;;  %v890_v28 = vmul.f32 %v1836_v25, %v1836_v25 }
 0x10d   :  { %v1840_v29 = vpop.f32.mrf.mxu0  ;;  %v1842_v30 = vpop.f32.mrf.mxu1 }
 0x10f   :  { %v577_v31 = vpop.f32.mrf.mxu0  ;;  %v705_v32 = vpop.f32.mrf.mxu1 }
 0x111   :  { %v1844_v33 = vpop.f32.mrf.mxu0  ;;  %v1846_v34 = vpop.f32.mrf.mxu1 }
 0x113   :  { %v582_v35 = vpop.f32.mrf.mxu0  ;;  %v710_v36 = vpop.f32.mrf.mxu1 }
 0x114   :  { %v952_v35 = vadd.f32 %v889_v19, %v888_v24  ;;  %v820_v36 = vadd.f32 %v819_v27, %v1836_v25 }
 0x115   :  { %v1848_v37 = vpop.f32.mrf.mxu0  ;;  %v1850_v38 = vpop.f32.mrf.mxu1 }
 0x117   :  { %v585_v39 = vpop.f32.mrf.mxu0  ;;  %v713_v40 = vpop.f32.mrf.mxu1 }
 0x118   :  { %v891_v39 = vmul.f32 %v1840_v29, %v1840_v29 }
 0x119   :  { %v1852_v41 = vpop.f32.mrf.mxu0  ;;  %v1854_v42 = vpop.f32.mrf.mxu1 }
 0x11b   :  { %v590_v43 = vpop.f32.mrf.mxu0  ;;  %v718_v44 = vpop.f32.mrf.mxu1 }
 0x11c   :  { %v953_v44 = vadd.f32 %v952_v35, %v890_v28 }
 0x11d   :  { %v1856_v45 = vpop.f32.mrf.mxu0  ;;  %v1858_v46 = vpop.f32.mrf.mxu1 }
 0x11f   :  { %v593_v47 = vpop.f32.mrf.mxu0  ;;  %v721_v48 = vpop.f32.mrf.mxu1 }
 0x120   :  { %v821_v47 = vadd.f32 %v820_v36, %v1840_v29  ;;  %v892_v48 = vmul.f32 %v1844_v33, %v1844_v33 }
 0x121   :  { %v1860_v49 = vpop.f32.mrf.mxu0  ;;  %v1862_v50 = vpop.f32.mrf.mxu1 }
 0x122   :  { %v896_v28 = vmul.f32 %v1860_v49, %v1860_v49 }
 0x123   :  { %v598_v51 = vpop.f32.mrf.mxu0  ;;  %v726_v52 = vpop.f32.mrf.mxu1 }
 0x125   :  { %v1864_v53 = vpop.f32.mrf.mxu0  ;;  %v1866_v54 = vpop.f32.mrf.mxu1 }
 0x127   :  { %v601_v55 = vpop.f32.mrf.mxu0  ;;  %v729_v56 = vpop.f32.mrf.mxu1 }
 0x128   :  { %v954_v55 = vadd.f32 %v953_v44, %v891_v39  ;;  %v822_v56 = vadd.f32 %v821_v47, %v1844_v33  ;;  %v897_v39 = vmul.f32 %v1864_v53, %v1864_v53 }
 0x129   :  { %v1868_v57 = vpop.f32.mrf.mxu0  ;;  %v1870_v58 = vpop.f32.mrf.mxu1 }
 0x12b   :  { %v606_v59 = vpop.f32.mrf.mxu0  ;;  %v734_v60 = vpop.f32.mrf.mxu1 }
 0x12c   :  { %v893_v59 = vmul.f32 %v1848_v37, %v1848_v37 }
 0x12d   :  { %v1872_v61 = vpop.f32.mrf.mxu0  ;;  %v1874_v62 = vpop.f32.mrf.mxu1 }
 0x12f   :  { %v609_v63 = vpop.f32.mrf.mxu0  ;;  %v737_v0 = vpop.f32.mrf.mxu1 }
 0x130   :  { %v955_v0 = vadd.f32 %v954_v55, %v892_v48 }
 0x131   :  { %v1876_v1 = vpop.f32.mrf.mxu0  ;;  %v1878_v2 = vpop.f32.mrf.mxu1 }
 0x133   :  { %v614_v3 = vpop.f32.mrf.mxu0  ;;  %v742_v4 = vpop.f32.mrf.mxu1 }
 0x134   :  { %v823_v3 = vadd.f32 %v822_v56, %v1848_v37  ;;  %v894_v4 = vmul.f32 %v1852_v41, %v1852_v41 }
 0x135   :  { %v1880_v5 = vpop.f32.mrf.mxu0  ;;  %v1882_v6 = vpop.f32.mrf.mxu1 }
 0x137   :  { %v617_v7 = vpop.f32.mrf.mxu0  ;;  %v745_v8 = vpop.f32.mrf.mxu1 }
 0x139   :  { %v1884_v9 = vpop.f32.mrf.mxu0  ;;  %v1886_v10 = vpop.f32.mrf.mxu1 }
 0x13b   :  { %v622_v11 = vpop.f32.mrf.mxu0  ;;  %v750_v12 = vpop.f32.mrf.mxu1 }
 0x13c   :  { %v956_v11 = vadd.f32 %v955_v0, %v893_v59  ;;  %v824_v12 = vadd.f32 %v823_v3, %v1852_v41  ;;  %v899_v3 = vmul.f32 %v1872_v61, %v1872_v61 }
 0x13d   :  { %v1888_v13 = vpop.f32.mrf.mxu0  ;;  %v1890_v14 = vpop.f32.mrf.mxu1 }
 0x13e   :  { %v957_v24 = vadd.f32 %v956_v11, %v894_v4  ;;  %v825_v27 = vadd.f32 %v824_v12, %v1856_v45  ;;  %v900_v12 = vmul.f32 %v1876_v1, %v1876_v1 }
 0x13f   :  { %v625_v15 = vpop.f32.mrf.mxu0  ;;  %v753_v16 = vpop.f32.mrf.mxu1 }
 0x140   :  { %v895_v15 = vmul.f32 %v1856_v45, %v1856_v45  ;;  %v826_v36 = vadd.f32 %v825_v27, %v1860_v49 }
 0x141   :  { %v1894_v20 = vpop.f32.mrf.mxu0  ;;  %v1896_v23 = vpop.f32.mrf.mxu1 }
 0x142   :  { %2968 = vst [vmem:[#allocation2_spill] sm:$0xff] %v1894_v20  ;;  %v958_v35 = vadd.f32 %v957_v24, %v895_v15 }
 0x143   :  { %v630_v31 = vpop.f32.mrf.mxu0  ;;  %v758_v32 = vpop.f32.mrf.mxu1 }
 0x144   :  { %v959_v48 = vadd.f32 %v958_v35, %v896_v28 }
 0x145   :  { %v1907_v40 = vpop.f32.mrf.mxu0  ;;  %v1909_v43 = vpop.f32.mrf.mxu1 }
 0x146   :  { %2969 = vst [vmem:[#allocation3_spill] sm:$0xff] %v1907_v40  ;;  %v960_v59 = vadd.f32 %v959_v48, %v897_v39  ;;  %v902_v48 = vmul.f32 %v1884_v9, %v1884_v9 }
 0x147   :  { %v633_v51 = vpop.f32.mrf.mxu0  ;;  %v761_v52 = vpop.f32.mrf.mxu1 }
 0x148   :  { %v827_v51 = vadd.f32 %v826_v36, %v1864_v53  ;;  %v898_v52 = vmul.f32 %v1868_v57, %v1868_v57 }
 0x149   :  { %v1917_v60 = vpop.f32.mrf.mxu0  ;;  %v1919_v63 = vpop.f32.mrf.mxu1 }
 0x14a   :  { %2970 = vst [vmem:[#allocation4_spill] sm:$0xff] %v1917_v60  ;;  %v828_v0 = vadd.f32 %v827_v51, %v1868_v57 }
 0x14b   :  { %v638_v7 = vpop.f32.mrf.mxu0  ;;  %v766_v8 = vpop.f32.mrf.mxu1 }
 0x14c   :  { %v961_v8 = vadd.f32 %v960_v59, %v898_v52  ;;  %v829_v11 = vadd.f32 %v828_v0, %v1872_v61  ;;  %v903_v59 = vmul.f32 %v1888_v13, %v1888_v13 }
 0x14d   :  { %v1927_v16 = vpop.f32.mrf.mxu0  ;;  %v1929_v19 = vpop.f32.mrf.mxu1 }
 0x14e   :  { %2971 = vst [vmem:[#allocation5_spill] sm:$0xff] %v1927_v16  ;;  %v962_v27 = vadd.f32 %v961_v8, %v899_v3  ;;  %v830_v28 = vadd.f32 %v829_v11, %v1876_v1 }
 0x14f   :  { %v641_v31 = vpop.f32.mrf.mxu0  ;;  %v769_v32 = vpop.f32.mrf.mxu1 }
 0x150   :  { %v901_v31 = vmul.f32 %v1880_v5, %v1880_v5  ;;  %v963_v36 = vadd.f32 %v962_v27, %v900_v12  ;;  %v831_v39 = vadd.f32 %v830_v28, %v1880_v5  ;;  %v904_v12 = vmul.f32 %v1894_v20, %v1894_v20 }
 0x151   :  { %v1937_v44 = vpop.f32.mrf.mxu0  ;;  %v1939_v47 = vpop.f32.mrf.mxu1 }
 0x152   :  { %2972 = vst [vmem:[#allocation6_spill] sm:$0xff] %v1937_v44 }
 0x153   :  { %v646_v55 = vpop.f32.mrf.mxu0  ;;  %v774_v56 = vpop.f32.mrf.mxu1 }
 0x154   :  { %v964_v55 = vadd.f32 %v963_v36, %v901_v31  ;;  %v832_v56 = vadd.f32 %v831_v39, %v1884_v9  ;;  %v905_v31 = vmul.f32 %v1907_v40, %v1907_v40 }
 0x155   :  { %v1947_v4 = vpop.f32.mrf.mxu0  ;;  %v1949_v7 = vpop.f32.mrf.mxu1 }
 0x156   :  { %2973 = vst [vmem:[#allocation7_spill] sm:$0xff] %v1947_v4  ;;  %v965_v8 = vadd.f32 %v964_v55, %v902_v48  ;;  %v833_v11 = vadd.f32 %v832_v56, %v1888_v13 }
 0x157   :  { %v649_v15 = vpop.f32.mrf.mxu0  ;;  %v777_v24 = vpop.f32.mrf.mxu1 }
 0x158   :  { %v966_v27 = vadd.f32 %v965_v8, %v903_v59  ;;  %v834_v28 = vadd.f32 %v833_v11, %v1894_v20  ;;  %v907_v8 = vmul.f32 %v1927_v16, %v1927_v16 }
 0x159   :  { %v1957_v32 = vpop.f32.mrf.mxu0  ;;  %v1959_v35 = vpop.f32.mrf.mxu1 }
 0x15a   :  { %2974 = vst [vmem:[#allocation8_spill] sm:$0xff] %v1957_v32  ;;  %v835_v48 = vadd.f32 %v834_v28, %v1907_v40 }
 0x15b   :  { %v654_v51 = vpop.f32.mrf.mxu0  ;;  %v782_v52 = vpop.f32.mrf.mxu1 }
 0x15c   :  { %v967_v51 = vadd.f32 %v966_v27, %v904_v12  ;;  %v906_v52 = vmul.f32 %v1917_v60, %v1917_v60  ;;  %v836_v59 = vadd.f32 %v835_v48, %v1917_v60  ;;  %v908_v27 = vmul.f32 %v1937_v44, %v1937_v44 }
 0x15d   :  { %v1967_v0 = vpop.f32.mrf.mxu0  ;;  %v1969_v3 = vpop.f32.mrf.mxu1 }
 0x15e   :  { %2975 = vst [vmem:[#allocation9_spill] sm:$0xff] %v1967_v0  ;;  %v837_v12 = vadd.f32 %v836_v59, %v1927_v16 }
 0x15f   :  { %v657_v15 = vpop.f32.mrf.mxu0  ;;  %v785_v24 = vpop.f32.mrf.mxu1 }
 0x160   :  { %v968_v15 = vadd.f32 %v967_v51, %v905_v31  ;;  %v838_v31 = vadd.f32 %v837_v12, %v1937_v44  ;;  %v909_v51 = vmul.f32 %v1947_v4, %v1947_v4 }
 0x161   :  { %v1977_v36 = vpop.f32.mrf.mxu0  ;;  %v1979_v39 = vpop.f32.mrf.mxu1 }
 0x162   :  { %2976 = vst [vmem:[#allocation10_spill] sm:$0xff] %v1977_v36  ;;  %2977 = vst [vmem:[#allocation11_spill] sm:$0xff] %v1979_v39  ;;  %v969_v20 = vadd.f32 %v968_v15, %v906_v52  ;;  %v839_v52 = vadd.f32 %v838_v31, %v1947_v4  ;;  %v910_v15 = vmul.f32 %v1957_v32, %v1957_v32 }
 0x163   :  { %v662_v55 = vpop.f32.mrf.mxu0  ;;  %v790_v56 = vpop.f32.mrf.mxu1 }
 0x164   :  { %v970_v55 = vadd.f32 %v969_v20, %v907_v8  ;;  %v840_v20 = vadd.f32 %v839_v52, %v1957_v32 }
 0x165   :  { %v1987_v11 = vpop.f32.mrf.mxu0  ;;  %v1989_v24 = vpop.f32.mrf.mxu1 }
 0x166   :  { %2978 = vst [vmem:[#allocation12_spill] sm:$0xff] %v1987_v11  ;;  %2979 = vst [vmem:[#allocation13_spill] sm:$0xff] %v1989_v24  ;;  %v971_v60 = vadd.f32 %v970_v55, %v908_v27  ;;  %v841_v27 = vadd.f32 %v840_v20, %v1967_v0  ;;  %v912_v55 = vmul.f32 %v1977_v36, %v1977_v36 }
 0x167   :  { %v665_v28 = vpop.f32.mrf.mxu0  ;;  %v793_v40 = vpop.f32.mrf.mxu1 }
 0x168   :  { %v972_v28 = vadd.f32 %v971_v60, %v909_v51  ;;  %v911_v40 = vmul.f32 %v1967_v0, %v1967_v0  ;;  %v842_v60 = vadd.f32 %v841_v27, %v1977_v36 }
 0x169   :  { %v1997_v48 = vpop.f32.mrf.mxu0  ;;  %v1999_v56 = vpop.f32.mrf.mxu1 }
 0x16a   :  { %2980 = vst [vmem:[#allocation14_spill] sm:$0xff] %v1997_v48  ;;  %2981 = vst [vmem:[#allocation15_spill] sm:$0xff] %v1999_v56  ;;  %v973_v44 = vadd.f32 %v972_v28, %v910_v15  ;;  %v843_v15 = vadd.f32 %v842_v60, %v1987_v11  ;;  %v914_v28 = vmul.f32 %v1997_v48, %v1997_v48 }
 0x16b   :  { %v670_v59 = vpop.f32.mrf.mxu0  ;;  %v798_v16 = vpop.f32.mrf.mxu1 }
 0x16c   :  { %v974_v59 = vadd.f32 %v973_v44, %v911_v40  ;;  %v913_v16 = vmul.f32 %v1987_v11, %v1987_v11  ;;  %v844_v44 = vadd.f32 %v843_v15, %v1997_v48 }
 0x16d   :  { %v2007_v8 = vpop.f32.mrf.mxu0  ;;  %v2009_v12 = vpop.f32.mrf.mxu1 }
 0x16e   :  { %2982 = vst [vmem:[#allocation16_spill] sm:$0xff] %v2007_v8  ;;  %2983 = vst [vmem:[#allocation17_spill] sm:$0xff] %v2009_v12  ;;  %v975_v32 = vadd.f32 %v974_v59, %v912_v55  ;;  %v845_v55 = vadd.f32 %v844_v44, %v2007_v8 }
 0x16f   :  { %v673_v31 = vpop.f32.mrf.mxu0  ;;  %v801_v4 = vpop.f32.mrf.mxu1 }
 0x170   :  { %v976_v31 = vadd.f32 %v975_v32, %v913_v16  ;;  %v915_v4 = vmul.f32 %v2007_v8, %v2007_v8 }
 0x171   :  { %v2017_v51 = vpop.f32.mrf.mxu0  ;;  %v2019_v52 = vpop.f32.mrf.mxu1 }
 0x172   :  { %2984 = vst [vmem:[#allocation18_spill] sm:$0xff] %v2017_v51  ;;  %2985 = vst [vmem:[#allocation19_spill] sm:$0xff] %v2019_v52  ;;  %v977_v36 = vadd.f32 %v976_v31, %v914_v28  ;;  %v916_v59 = vmul.f32 %v2017_v51, %v2017_v51  ;;  %v846_v32 = vadd.f32 %v845_v55, %v2017_v51 }
 0x173   :  { %v678_v20 = vpop.f32.mrf.mxu0  ;;  %v806_v0 = vpop.f32.mrf.mxu1 }
 0x174   :  { %v978_v20 = vadd.f32 %v977_v36, %v915_v4 }
 0x175   :  { %v2027_v40 = vpop.f32.mrf.mxu0  ;;  %v2029_v27 = vpop.f32.mrf.mxu1 }
 0x176   :  { %2986 = vst [vmem:[#allocation20_spill] sm:$0xff] %v2027_v40  ;;  %2987 = vst [vmem:[#allocation21_spill] sm:$0xff] %v2029_v27  ;;  %v917_v0 = vmul.f32 %v2027_v40, %v2027_v40  ;;  %v979_v48 = vadd.f32 %v978_v20, %v916_v59  ;;  %v847_v28 = vadd.f32 %v846_v32, %v2027_v40 }
 0x177   :  { %v681_v60 = vpop.f32.mrf.mxu0  ;;  %v809_v11 = vpop.f32.mrf.mxu1  ;;  %v920_v40 = vmul.f32 %v1830_v18, %v1830_v18 }
 0x178   :  { %v980_v60 = vadd.f32 %v979_v48, %v917_v0  ;;  %v921_v0 = vmul.f32 %v1834_v22, %v1834_v22 }
 0x179   :  { %v2037_v16 = vpop.f32.mrf.mxu0  ;;  %v2039_v15 = vpop.f32.mrf.mxu1 }
 0x17a   :  { %2988 = vst [vmem:[#allocation22_spill] sm:$0xff] %v2039_v15  ;;  %v918_v31 = vmul.f32 %v2037_v16, %v2037_v16  ;;  %v848_v36 = vadd.f32 %v847_v28, %v2037_v16 }
 0x17b   :  { %v686_v44 = vpop.f32.mrf.mxu0  ;;  %v814_v8 = vpop.f32.mrf.mxu1 }
 0x17c   :  { %v981_v55 = vadd.f32 %v980_v60, %v918_v31  ;;  %v922_v31 = vmul.f32 %v1838_v26, %v1838_v26 }
 0x17d   :  { %v2045_v11 = vpop.f32.mrf.mxu0  ;;  %v2047_v4 = vpop.f32.mrf.mxu1 }
 0x17e   :  { %2989 = vst [vmem:[#allocation23_spill] sm:$0xff] %v2045_v11  ;;  %2990 = vst [vmem:[#allocation24_spill] sm:$0xff] %v2047_v4  ;;  %v849_v51 = vadd.f32 %v848_v36, %v2045_v11  ;;  %v919_v59 = vmul.f32 %v2045_v11, %v2045_v11 }
 0x17f   :  { %v689_v20 = vpop.f32.mrf.mxu0  ;;  %v817_v32 = vpop.f32.mrf.mxu1 }
 0x180   :  { %v850_v8 = vadd.f32 %v849_v51, %v1830_v18  ;;  %v982_v48 = vadd.f32 %v981_v55, %v919_v59  ;;  %v923_v20 = vmul.f32 %v1842_v30, %v1842_v30  ;;  %v924_v51 = vmul.f32 %v1846_v34, %v1846_v34 }
 0x182   :  { %v851_v28 = vadd.f32 %v850_v8, %v1834_v22  ;;  %v983_v44 = vadd.f32 %v982_v48, %v920_v40  ;;  %v925_v40 = vmul.f32 %v1850_v38, %v1850_v38 }
 0x184   :  { %v852_v60 = vadd.f32 %v851_v28, %v1838_v26  ;;  %v984_v36 = vadd.f32 %v983_v44, %v921_v0  ;;  %v926_v0 = vmul.f32 %v1854_v42, %v1854_v42 }
 0x186   :  { %v853_v32 = vadd.f32 %v852_v60, %v1842_v30  ;;  %v985_v11 = vadd.f32 %v984_v36, %v922_v31  ;;  %v927_v31 = vmul.f32 %v1858_v46, %v1858_v46 }
 0x188   :  { %v854_v55 = vadd.f32 %v853_v32, %v1846_v34  ;;  %v986_v59 = vadd.f32 %v985_v11, %v923_v20  ;;  %v928_v11 = vmul.f32 %v1862_v50, %v1862_v50 }
 0x18a   :  { %v855_v8 = vadd.f32 %v854_v55, %v1850_v38  ;;  %v987_v48 = vadd.f32 %v986_v59, %v924_v51  ;;  %v929_v51 = vmul.f32 %v1866_v54, %v1866_v54 }
 0x18c   :  { %v856_v28 = vadd.f32 %v855_v8, %v1854_v42  ;;  %v988_v44 = vadd.f32 %v987_v48, %v925_v40  ;;  %v930_v40 = vmul.f32 %v1870_v58, %v1870_v58 }
 0x18e   :  { %v857_v60 = vadd.f32 %v856_v28, %v1858_v46  ;;  %v989_v36 = vadd.f32 %v988_v44, %v926_v0  ;;  %v931_v0 = vmul.f32 %v1874_v62, %v1874_v62 }
 0x190   :  { %v990_v20 = vadd.f32 %v989_v36, %v927_v31  ;;  %v858_v32 = vadd.f32 %v857_v60, %v1862_v50  ;;  %v932_v31 = vmul.f32 %v1878_v2, %v1878_v2 }
 0x192   :  { %v859_v55 = vadd.f32 %v858_v32, %v1866_v54  ;;  %v991_v59 = vadd.f32 %v990_v20, %v928_v11  ;;  %v933_v11 = vmul.f32 %v1882_v6, %v1882_v6 }
 0x194   :  { %v860_v8 = vadd.f32 %v859_v55, %v1870_v58  ;;  %v992_v48 = vadd.f32 %v991_v59, %v929_v51  ;;  %v934_v51 = vmul.f32 %v1886_v10, %v1886_v10 }
 0x196   :  { %v861_v28 = vadd.f32 %v860_v8, %v1874_v62  ;;  %v993_v44 = vadd.f32 %v992_v48, %v930_v40  ;;  %v935_v40 = vmul.f32 %v1890_v14, %v1890_v14 }
 0x198   :  { %v862_v60 = vadd.f32 %v861_v28, %v1878_v2  ;;  %v994_v36 = vadd.f32 %v993_v44, %v931_v0  ;;  %v936_v0 = vmul.f32 %v1896_v23, %v1896_v23 }
 0x19a   :  { %v863_v20 = vadd.f32 %v862_v60, %v1882_v6  ;;  %v995_v32 = vadd.f32 %v994_v36, %v932_v31  ;;  %v937_v60 = vmul.f32 %v1909_v43, %v1909_v43 }
 0x19c   :  { %v864_v55 = vadd.f32 %v863_v20, %v1886_v10  ;;  %v996_v59 = vadd.f32 %v995_v32, %v933_v11  ;;  %v938_v32 = vmul.f32 %v1919_v63, %v1919_v63 }
 0x19e   :  { %v865_v8 = vadd.f32 %v864_v55, %v1890_v14  ;;  %v997_v48 = vadd.f32 %v996_v59, %v934_v51  ;;  %v939_v59 = vmul.f32 %v1929_v19, %v1929_v19 }
 0x1a0   :  { %v866_v28 = vadd.f32 %v865_v8, %v1896_v23  ;;  %v998_v44 = vadd.f32 %v997_v48, %v935_v40  ;;  %v940_v48 = vmul.f32 %v1939_v47, %v1939_v47 }
 0x1a2   :  { %v867_v31 = vadd.f32 %v866_v28, %v1909_v43  ;;  %v999_v36 = vadd.f32 %v998_v44, %v936_v0  ;;  %v941_v44 = vmul.f32 %v1949_v7, %v1949_v7 }
 0x1a4   :  { %v1000_v20 = vadd.f32 %v999_v36, %v937_v60  ;;  %v868_v11 = vadd.f32 %v867_v31, %v1919_v63  ;;  %v942_v36 = vmul.f32 %v1959_v35, %v1959_v35 }
 0x1a6   :  { %v1001_v55 = vadd.f32 %v1000_v20, %v938_v32  ;;  %v869_v51 = vadd.f32 %v868_v11, %v1929_v19  ;;  %v943_v32 = vmul.f32 %v1969_v3, %v1969_v3 }
 0x1a8   :  { %v1002_v8 = vadd.f32 %v1001_v55, %v939_v59  ;;  %v870_v40 = vadd.f32 %v869_v51, %v1939_v47  ;;  %v944_v59 = vmul.f32 %v1979_v39, %v1979_v39 }
 0x1aa   :  { %v1003_v28 = vadd.f32 %v1002_v8, %v940_v48  ;;  %v871_v0 = vadd.f32 %v870_v40, %v1949_v7  ;;  %v945_v48 = vmul.f32 %v1989_v24, %v1989_v24 }
 0x1ac   :  { %v1004_v31 = vadd.f32 %v1003_v28, %v941_v44  ;;  %v872_v60 = vadd.f32 %v871_v0, %v1959_v35  ;;  %v946_v44 = vmul.f32 %v1999_v56, %v1999_v56 }
 0x1ae   :  { %v1005_v20 = vadd.f32 %v1004_v31, %v942_v36  ;;  %v873_v11 = vadd.f32 %v872_v60, %v1969_v3  ;;  %v947_v36 = vmul.f32 %v2009_v12, %v2009_v12 }
 0x1b0   :  { %v1006_v55 = vadd.f32 %v1005_v20, %v943_v32  ;;  %v874_v51 = vadd.f32 %v873_v11, %v1979_v39  ;;  %v948_v32 = vmul.f32 %v2019_v52, %v2019_v52 }
 0x1b2   :  { %v1007_v8 = vadd.f32 %v1006_v55, %v944_v59  ;;  %v875_v40 = vadd.f32 %v874_v51, %v1989_v24  ;;  %v949_v59 = vmul.f32 %v2029_v27, %v2029_v27 }
 0x1b4   :  { %v1008_v28 = vadd.f32 %v1007_v8, %v945_v48  ;;  %v876_v0 = vadd.f32 %v875_v40, %v1999_v56  ;;  %v950_v48 = vmul.f32 %v2039_v15, %v2039_v15 }
 0x1b6   :  { %v1009_v31 = vadd.f32 %v1008_v28, %v946_v44  ;;  %v877_v60 = vadd.f32 %v876_v0, %v2009_v12  ;;  %v951_v44 = vmul.f32 %v2047_v4, %v2047_v4 }
 0x1b8   :  { %v1010_v20 = vadd.f32 %v1009_v31, %v947_v36  ;;  %v878_v11 = vadd.f32 %v877_v60, %v2019_v52 }
 0x1ba   :  { %v1011_v55 = vadd.f32 %v1010_v20, %v948_v32  ;;  %v879_v51 = vadd.f32 %v878_v11, %v2029_v27 }
 0x1bc   :  { %v1012_v8 = vadd.f32 %v1011_v55, %v949_v59  ;;  %v880_v40 = vadd.f32 %v879_v51, %v2039_v15 }
 0x1be   :  { %v1013_v28 = vadd.f32 %v1012_v8, %v950_v48  ;;  %v881_v0 = vadd.f32 %v880_v40, %v2047_v4  ;;  %v1033_v4 = vlaneseq }
 0x1c0   :  { %v882_v31 = vrot.slane %v881_v0, 4  ;;  %v1014_v60 = vadd.f32 %v1013_v28, %v951_v44  ;;  %v2148_v28 = vshrl.u32 %v1033_v4, 7 }
 0x1c2   :  { %v883_v36 = vadd.f32 %v882_v31, %v881_v0  ;;  %v1015_v20 = vrot.slane %v1014_v60, 4  ;;  %v1028_v0 = vld [vmem:[%s2941_s2] sm:$0x1]  ;;  %v2967_v44 = vsub.s32 0, %v2148_v28 }
 0x1c4   :  { %v884_v11 = vrot.slane %v883_v36, 2  ;;  %v1016_v32 = vadd.f32 %v1015_v20, %v1014_v60  ;;  %v2991_v20 = vld [vmem:[#allocation2_spill] sm:$0xff] }
 0x1c6   :  { %v885_v52 = vadd.f32 %v884_v11, %v883_v36  ;;  %v1017_v27 = vrot.slane %v1016_v32, 2  ;;  %v2992_v11 = vld [vmem:[#allocation3_spill] sm:$0xff] }
 0x1c8   :  { %v886_v55 = vrot.slane %v885_v52, 1  ;;  %v1018_v59 = vadd.f32 %v1017_v27, %v1016_v32  ;;  %v2993_v32 = vld [vmem:[#allocation4_spill] sm:$0xff] }
 0x1ca   :  { %v887_v51 = vadd.f32 %v886_v55, %v885_v52  ;;  %v1019_v12 = vrot.slane %v1018_v59, 1  ;;  %v2994_v55 = vld [vmem:[#allocation5_spill] sm:$0xff] }
 0x1cc   :  { %v1020_v56 = vadd.f32 %v1019_v12, %v1018_v59  ;;  %v1021_v15 = vmul.f32 0.001953125, %v887_v51  ;;  %v2995_v59 = vld [vmem:[#allocation6_spill] sm:$0xff]  ;;  %v2996_v51 = vld [vmem:[#allocation7_spill] sm:$0xff] }
 0x1ce   :  { %v1022_v8 = vmul.f32 0.001953125, %v1020_v56  ;;  %v1023_v48 = vmul.f32 %v1021_v15, %v1021_v15  ;;  %v2157_v56 = vld [vmem:[%s2942_s3] sm:$0x1] }
 0x1d0   :  { %v1024_v40 = vsub.f32 %v1022_v8, %v1023_v48  ;;  %v2997_v48 = vld [vmem:[#allocation8_spill] sm:$0xff] }
 0x1d2   :  { %v1025_v24 = vmax.f32 %v1024_v40, 0.0 }
 0x1d4   :  { %v1026_v39 = vadd.f32 1e-05, %v1025_v24 }
 0x1d6   :  { %1528 = vrsqrt.f32 %v1026_v39 }
 0x1e3   :  { %v1529_v27 = vpop.eup %1528 }
 0x1e4   :  { %v1029_v52 = vmul.f32 %v1529_v27, %v1028_v0  ;;  %v2998_v0 = vld [vmem:[#allocation9_spill] sm:$0xff] }
 0x1e6   :  { %v2159_v12 = vmul.f32 %v1029_v52, %v1021_v15  ;;  %v2163_v39 = vrot.slane %v1029_v52, %v2967_v44  ;;  %v2999_v52 = vld [vmem:[#allocation10_spill] sm:$0xff]  ;;  %v3005_v44 = vld [vmem:[#allocation23_spill] sm:$0xff] }
 0x1e8   :  { %v1032_v24 = vsub.f32 %v2157_v56, %v2159_v12  ;;  %v2169_v4 = vmul.f32 %v2163_v39, %v1828_v17  ;;  %v2173_v31 = vmul.f32 %v2163_v39, %v1832_v21  ;;  %v2177_v60 = vmul.f32 %v2163_v39, %v1836_v25  ;;  %v3000_v12 = vld [vmem:[#allocation12_spill] sm:$0xff] }
 0x1e9   :  { %v2181_v15 = vmul.f32 %v2163_v39, %v1840_v29  ;;  %v2185_v36 = vmul.f32 %v2163_v39, %v1844_v33  ;;  %v2189_v17 = vmul.f32 %v2163_v39, %v1848_v37  ;;  %v2193_v21 = vmul.f32 %v2163_v39, %v1852_v41 }
 0x1ea   :  { %v2197_v25 = vmul.f32 %v2163_v39, %v1856_v45  ;;  %v2201_v29 = vmul.f32 %v2163_v39, %v1860_v49  ;;  %v2205_v33 = vmul.f32 %v2163_v39, %v1864_v53  ;;  %v2209_v37 = vmul.f32 %v2163_v39, %v1868_v57 }
 0x1eb   :  { %v2213_v41 = vmul.f32 %v2163_v39, %v1872_v61  ;;  %v2217_v45 = vmul.f32 %v2163_v39, %v1876_v1  ;;  %v2221_v49 = vmul.f32 %v2163_v39, %v1880_v5  ;;  %v2225_v53 = vmul.f32 %v2163_v39, %v1884_v9 }
 0x1ec   :  { %v2229_v57 = vmul.f32 %v2163_v39, %v1888_v13  ;;  %v2233_v61 = vmul.f32 %v2163_v39, %v2991_v20  ;;  %v2237_v1 = vmul.f32 %v2163_v39, %v2992_v11  ;;  %v2241_v5 = vmul.f32 %v2163_v39, %v2993_v32  ;;  %v3001_v11 = vld [vmem:[#allocation14_spill] sm:$0xff] }
 0x1ed   :  { %v2245_v9 = vmul.f32 %v2163_v39, %v2994_v55  ;;  %v2249_v13 = vmul.f32 %v2163_v39, %v2995_v59  ;;  %v2253_v8 = vmul.f32 %v2163_v39, %v2996_v51  ;;  %v2257_v40 = vmul.f32 %v2163_v39, %v2997_v48  ;;  %v3002_v55 = vld [vmem:[#allocation16_spill] sm:$0xff]  ;;  %v3003_v51 = vld [vmem:[#allocation18_spill] sm:$0xff] }
 0x1ee   :  { %v2261_v27 = vmul.f32 %v2163_v39, %v2998_v0  ;;  %v2265_v56 = vmul.f32 %v2163_v39, %v2999_v52  ;;  %v2269_v20 = vmul.f32 %v2163_v39, %v3000_v12  ;;  %v2273_v32 = vmul.f32 %v2163_v39, %v3001_v11  ;;  %v3004_v0 = vld [vmem:[#allocation20_spill] sm:$0xff] }
 0x1ef   :  { %v2277_v59 = vmul.f32 %v2163_v39, %v3002_v55  ;;  %v2281_v48 = vmul.f32 %v2163_v39, %v3003_v51  ;;  %v2285_v52 = vmul.f32 %v2163_v39, %v3004_v0  ;;  %v2289_v12 = vmul.f32 %v2163_v39, %v2037_v16 }
 0x1f0   :  { %v2293_v11 = vmul.f32 %v2163_v39, %v3005_v44  ;;  %v2297_v55 = vmul.f32 %v2163_v39, %v1830_v18  ;;  %v2301_v51 = vmul.f32 %v2163_v39, %v1834_v22  ;;  %v2305_v0 = vmul.f32 %v2163_v39, %v1838_v26 }
 0x1f1   :  { %v2309_v16 = vmul.f32 %v2163_v39, %v1842_v30  ;;  %v2313_v44 = vmul.f32 %v2163_v39, %v1846_v34  ;;  %v2317_v18 = vmul.f32 %v2163_v39, %v1850_v38  ;;  %v2321_v22 = vmul.f32 %v2163_v39, %v1854_v42 }
 0x1f2   :  { %v2325_v26 = vmul.f32 %v2163_v39, %v1858_v46  ;;  %v2329_v30 = vmul.f32 %v2163_v39, %v1862_v50  ;;  %v2333_v34 = vmul.f32 %v2163_v39, %v1866_v54  ;;  %v2337_v38 = vmul.f32 %v2163_v39, %v1870_v58 }
 0x1f3   :  { %v2341_v42 = vmul.f32 %v2163_v39, %v1874_v62  ;;  %v2345_v46 = vmul.f32 %v2163_v39, %v1878_v2  ;;  %v2349_v50 = vmul.f32 %v2163_v39, %v1882_v6  ;;  %v2353_v54 = vmul.f32 %v2163_v39, %v1886_v10 }
 0x1f4   :  { %v2357_v58 = vmul.f32 %v2163_v39, %v1890_v14  ;;  %v2361_v62 = vmul.f32 %v2163_v39, %v1896_v23  ;;  %v2365_v2 = vmul.f32 %v2163_v39, %v1909_v43  ;;  %v2369_v6 = vmul.f32 %v2163_v39, %v1919_v63 }
 0x1f5   :  { %v2373_v10 = vmul.f32 %v2163_v39, %v1929_v19  ;;  %v2377_v14 = vmul.f32 %v2163_v39, %v1939_v47  ;;  %v2381_v23 = vmul.f32 %v2163_v39, %v1949_v7  ;;  %v2385_v43 = vmul.f32 %v2163_v39, %v1959_v35 }
 0x1f6   :  { %3006 = vst [vmem:[#allocation2_spill] sm:$0xff] %v2369_v6  ;;  %v2389_v63 = vmul.f32 %v2163_v39, %v1969_v3  ;;  %v3012_v6 = vld [vmem:[#allocation11_spill] sm:$0xff] }
 0x1f7   :  { %3007 = vst [vmem:[#allocation3_spill] sm:$0xff] %v2373_v10  ;;  %3008 = vst [vmem:[#allocation4_spill] sm:$0xff] %v2377_v14  ;;  %v2393_v19 = vmul.f32 %v2163_v39, %v3012_v6  ;;  %v3014_v10 = vld [vmem:[#allocation13_spill] sm:$0xff]  ;;  %v3016_v14 = vld [vmem:[#allocation15_spill] sm:$0xff] }
 0x1f8   :  { %3009 = vst [vmem:[#allocation5_spill] sm:$0xff] %v2381_v23  ;;  %3010 = vst [vmem:[#allocation6_spill] sm:$0xff] %v2385_v43  ;;  %v2397_v47 = vmul.f32 %v2163_v39, %v3014_v10  ;;  %v2401_v7 = vmul.f32 %v2163_v39, %v3016_v14  ;;  %v3018_v23 = vld [vmem:[#allocation17_spill] sm:$0xff]  ;;  %v3019_v43 = vsub.s32 0, %v2148_v28 }
 0x1f9   :  { %3011 = vst [vmem:[#allocation7_spill] sm:$0xff] %v2389_v63  ;;  %3013 = vst [vmem:[#allocation8_spill] sm:$0xff] %v2393_v19  ;;  %v2405_v35 = vmul.f32 %v2163_v39, %v3018_v23  ;;  %v3020_v63 = vld [vmem:[#allocation19_spill] sm:$0xff]  ;;  %v3021_v19 = vld [vmem:[#allocation21_spill] sm:$0xff] }
 0x1fa   :  { %3015 = vst [vmem:[#allocation9_spill] sm:$0xff] %v2397_v47  ;;  %3017 = vst [vmem:[#allocation10_spill] sm:$0xff] %v2401_v7  ;;  %v2409_v3 = vrot.slane %v1032_v24, %v3019_v43  ;;  %v2413_v6 = vmul.f32 %v2163_v39, %v3020_v63  ;;  %v2417_v10 = vmul.f32 %v2163_v39, %v3021_v19  ;;  %v3022_v47 = vld [vmem:[#allocation22_spill] sm:$0xff]  ;;  %v3023_v7 = vld [vmem:[#allocation24_spill] sm:$0xff] }
 0x1fb   :  { %v2421_v14 = vmul.f32 %v2163_v39, %v3022_v47  ;;  %v2425_v23 = vmul.f32 %v2163_v39, %v3023_v7 }
 0x1fc   :  { %v2429_v28 = vadd.f32 %v2409_v3, %v2169_v4  ;;  %v2433_v24 = vadd.f32 %v2409_v3, %v2173_v31  ;;  %v2437_v43 = vadd.f32 %v2409_v3, %v2177_v60  ;;  %v2441_v63 = vadd.f32 %v2409_v3, %v2181_v15 }
 0x1fd   :  { %v2445_v39 = vadd.f32 %v2409_v3, %v2185_v36  ;;  %v2449_v4 = vadd.f32 %v2409_v3, %v2189_v17  ;;  %v2453_v31 = vadd.f32 %v2409_v3, %v2193_v21  ;;  %v2457_v60 = vadd.f32 %v2409_v3, %v2197_v25  ;;  %v3027_v19 = vld [vmem:[#allocation2_spill] sm:$0xff] }
 0x1fe   :  { %v2461_v15 = vadd.f32 %v2409_v3, %v2201_v29  ;;  %v2465_v36 = vadd.f32 %v2409_v3, %v2205_v33  ;;  %v2469_v17 = vadd.f32 %v2409_v3, %v2209_v37  ;;  %v2473_v21 = vadd.f32 %v2409_v3, %v2213_v41  ;;  %v3029_v47 = vld [vmem:[#allocation3_spill] sm:$0xff]  ;;  %v3031_v7 = vld [vmem:[#allocation4_spill] sm:$0xff] }
 0x1ff   :  { %v2477_v25 = vadd.f32 %v2409_v3, %v2217_v45  ;;  %v2481_v29 = vadd.f32 %v2409_v3, %v2221_v49  ;;  %v2485_v33 = vadd.f32 %v2409_v3, %v2225_v53  ;;  %v2489_v37 = vadd.f32 %v2409_v3, %v2229_v57 }
 0x200   :  { %v2493_v41 = vadd.f32 %v2409_v3, %v2233_v61  ;;  %v2497_v45 = vadd.f32 %v2409_v3, %v2237_v1  ;;  %v2501_v49 = vadd.f32 %v2409_v3, %v2241_v5  ;;  %v2505_v53 = vadd.f32 %v2409_v3, %v2245_v9 }
 0x201   :  { %v2509_v57 = vadd.f32 %v2409_v3, %v2249_v13  ;;  %v2513_v61 = vadd.f32 %v2409_v3, %v2253_v8  ;;  %v2517_v1 = vadd.f32 %v2409_v3, %v2257_v40  ;;  %v2521_v5 = vadd.f32 %v2409_v3, %v2261_v27 }
 0x202   :  { %v2525_v9 = vadd.f32 %v2409_v3, %v2265_v56  ;;  %v2529_v13 = vadd.f32 %v2409_v3, %v2269_v20  ;;  %v2533_v8 = vadd.f32 %v2409_v3, %v2273_v32  ;;  %v2537_v40 = vadd.f32 %v2409_v3, %v2277_v59 }
 0x203   :  { %v2541_v27 = vadd.f32 %v2409_v3, %v2281_v48  ;;  %v2545_v56 = vadd.f32 %v2409_v3, %v2285_v52  ;;  %v2549_v20 = vadd.f32 %v2409_v3, %v2289_v12  ;;  %v2553_v32 = vadd.f32 %v2409_v3, %v2293_v11 }
 0x204   :  { %v2557_v59 = vadd.f32 %v2409_v3, %v2297_v55  ;;  %v2561_v48 = vadd.f32 %v2409_v3, %v2301_v51  ;;  %v2565_v52 = vadd.f32 %v2409_v3, %v2305_v0  ;;  %v2569_v12 = vadd.f32 %v2409_v3, %v2309_v16 }
 0x205   :  { %v2573_v11 = vadd.f32 %v2409_v3, %v2313_v44  ;;  %v2577_v55 = vadd.f32 %v2409_v3, %v2317_v18  ;;  %v2581_v51 = vadd.f32 %v2409_v3, %v2321_v22  ;;  %v2585_v0 = vadd.f32 %v2409_v3, %v2325_v26 }
 0x206   :  { %v2589_v16 = vadd.f32 %v2409_v3, %v2329_v30  ;;  %v2593_v44 = vadd.f32 %v2409_v3, %v2333_v34  ;;  %v2597_v18 = vadd.f32 %v2409_v3, %v2337_v38  ;;  %v2601_v22 = vadd.f32 %v2409_v3, %v2341_v42 }
 0x207   :  { %v2605_v26 = vadd.f32 %v2409_v3, %v2345_v46  ;;  %v2609_v30 = vadd.f32 %v2409_v3, %v2349_v50  ;;  %v2613_v34 = vadd.f32 %v2409_v3, %v2353_v54  ;;  %v2617_v38 = vadd.f32 %v2409_v3, %v2357_v58 }
 0x208   :  { %v2621_v42 = vadd.f32 %v2409_v3, %v2361_v62  ;;  %v2625_v46 = vadd.f32 %v2409_v3, %v2365_v2  ;;  %v2629_v50 = vadd.f32 %v2409_v3, %v3027_v19  ;;  %v2633_v54 = vadd.f32 %v2409_v3, %v3029_v47 }
 0x209   :  { %3024 = vst [vmem:[#allocation12_spill] sm:$0xff] %v2617_v38  ;;  %v2637_v58 = vadd.f32 %v2409_v3, %v3031_v7  ;;  %v3033_v38 = vld [vmem:[#allocation5_spill] sm:$0xff] }
 0x20a   :  { %3025 = vst [vmem:[#allocation14_spill] sm:$0xff] %v2621_v42  ;;  %3026 = vst [vmem:[#allocation16_spill] sm:$0xff] %v2625_v46  ;;  %v2641_v62 = vadd.f32 %v2409_v3, %v3033_v38  ;;  %v3034_v42 = vld [vmem:[#allocation6_spill] sm:$0xff]  ;;  %v3035_v46 = vld [vmem:[#allocation7_spill] sm:$0xff] }
 0x20b   :  { %3028 = vst [vmem:[#allocation18_spill] sm:$0xff] %v2629_v50  ;;  %3030 = vst [vmem:[#allocation20_spill] sm:$0xff] %v2633_v54  ;;  %v2645_v2 = vadd.f32 %v2409_v3, %v3034_v42  ;;  %v2649_v19 = vadd.f32 %v2409_v3, %v3035_v46  ;;  %v3036_v50 = vld [vmem:[#allocation8_spill] sm:$0xff]  ;;  %v3037_v54 = vld [vmem:[#allocation9_spill] sm:$0xff]  ;;  %v2665_v42 = vadd.f32 %v2409_v3, %v2405_v35  ;;  %v1172_v35 = vmax.f32 %v2433_v24, 0.0 }
 0x20c   :  { %3032 = vst [vmem:[#allocation23_spill] sm:$0xff] %v2637_v58  ;;  %v2653_v47 = vadd.f32 %v2409_v3, %v3036_v50  ;;  %v2657_v7 = vadd.f32 %v2409_v3, %v3037_v54  ;;  %v3038_v58 = vld [vmem:[#allocation10_spill] sm:$0xff]  ;;  %v2669_v46 = vadd.f32 %v2409_v3, %v2413_v6  ;;  %v2673_v50 = vadd.f32 %v2409_v3, %v2417_v10 }
 0x20d   :  { %v2661_v38 = vadd.f32 %v2409_v3, %v3038_v58  ;;  %3040 = vst [vmem:[#allocation13_spill] sm:$0xff] %v2665_v42  ;;  %v2677_v54 = vadd.f32 %v2409_v3, %v2421_v14  ;;  %v2681_v58 = vadd.f32 %v2409_v3, %v2425_v23  ;;  %v1173_v42 = vmax.f32 %v2437_v43, 0.0  ;;  %1236 = vst [vmem:[%s2943_s4 + $0x8] sm:$0xff] %v1172_v35 }
 0x20e   :  { %3041 = vst [vmem:[#allocation15_spill] sm:$0xff] %v2669_v46  ;;  %3042 = vst [vmem:[#allocation17_spill] sm:$0xff] %v2673_v50  ;;  %v1174_v6 = vmax.f32 %v2441_v63, 0.0  ;;  %v1175_v46 = vmax.f32 %v2445_v39, 0.0  ;;  %v1176_v10 = vmax.f32 %v2449_v4, 0.0  ;;  %v1177_v50 = vmax.f32 %v2453_v31, 0.0 }
 0x20f   :  { %3039 = vst [vmem:[#allocation11_spill] sm:$0xff] %v2661_v38  ;;  %3043 = vst [vmem:[#allocation19_spill] sm:$0xff] %v2677_v54  ;;  %v1171_v38 = vmax.f32 %v2429_v28, 0.0  ;;  %v1178_v14 = vmax.f32 %v2457_v60, 0.0  ;;  %v1179_v54 = vmax.f32 %v2461_v15, 0.0  ;;  %v1180_v3 = vmax.f32 %v2465_v36, 0.0 }
 0x210   :  { %v1181_v23 = vmax.f32 %v2469_v17, 0.0  ;;  %v1182_v28 = vmax.f32 %v2473_v21, 0.0  ;;  %1237 = vst [vmem:[%s2943_s4 + $0x10] sm:$0xff] %v1173_v42  ;;  %1238 = vst [vmem:[%s2943_s4 + $0x18] sm:$0xff] %v1174_v6  ;;  %v1183_v24 = vmax.f32 %v2477_v25, 0.0  ;;  %v1184_v43 = vmax.f32 %v2481_v29, 0.0 }
 0x211   :  { %1235 = vst [vmem:[%s2943_s4] sm:$0xff] %v1171_v38  ;;  %v1185_v63 = vmax.f32 %v2485_v33, 0.0  ;;  %v1186_v39 = vmax.f32 %v2489_v37, 0.0  ;;  %1239 = vst [vmem:[%s2943_s4 + $0x20] sm:$0xff] %v1175_v46  ;;  %v1187_v4 = vmax.f32 %v2493_v41, 0.0  ;;  %v1188_v31 = vmax.f32 %v2497_v45, 0.0 }
 0x212   :  { %1240 = vst [vmem:[%s2943_s4 + $0x28] sm:$0xff] %v1176_v10  ;;  %1241 = vst [vmem:[%s2943_s4 + $0x30] sm:$0xff] %v1177_v50  ;;  %v1189_v60 = vmax.f32 %v2501_v49, 0.0  ;;  %v1190_v15 = vmax.f32 %v2505_v53, 0.0  ;;  %v1191_v36 = vmax.f32 %v2509_v57, 0.0  ;;  %v1192_v17 = vmax.f32 %v2513_v61, 0.0 }
 0x213   :  { %1242 = vst [vmem:[%s2943_s4 + $0x38] sm:$0xff] %v1178_v14  ;;  %1243 = vst [vmem:[%s2943_s4 + $0x40] sm:$0xff] %v1179_v54  ;;  %v1193_v21 = vmax.f32 %v2517_v1, 0.0  ;;  %v1194_v25 = vmax.f32 %v2521_v5, 0.0  ;;  %v1195_v29 = vmax.f32 %v2525_v9, 0.0  ;;  %v1196_v33 = vmax.f32 %v2529_v13, 0.0 }
 0x214   :  { %1244 = vst [vmem:[%s2943_s4 + $0x48] sm:$0xff] %v1180_v3  ;;  %1245 = vst [vmem:[%s2943_s4 + $0x50] sm:$0xff] %v1181_v23  ;;  %v1197_v37 = vmax.f32 %v2533_v8, 0.0  ;;  %v1198_v41 = vmax.f32 %v2537_v40, 0.0  ;;  %v1199_v45 = vmax.f32 %v2541_v27, 0.0  ;;  %v1200_v49 = vmax.f32 %v2545_v56, 0.0 }
 0x215   :  { %1246 = vst [vmem:[%s2943_s4 + $0x58] sm:$0xff] %v1182_v28  ;;  %1247 = vst [vmem:[%s2943_s4 + $0x60] sm:$0xff] %v1183_v24  ;;  %v1201_v53 = vmax.f32 %v2549_v20, 0.0  ;;  %v1202_v57 = vmax.f32 %v2553_v32, 0.0  ;;  %v1203_v61 = vmax.f32 %v2557_v59, 0.0  ;;  %v1204_v1 = vmax.f32 %v2561_v48, 0.0 }
 0x216   :  { %1248 = vst [vmem:[%s2943_s4 + $0x68] sm:$0xff] %v1184_v43  ;;  %1249 = vst [vmem:[%s2943_s4 + $0x70] sm:$0xff] %v1185_v63  ;;  %v1205_v5 = vmax.f32 %v2565_v52, 0.0  ;;  %v1206_v9 = vmax.f32 %v2569_v12, 0.0  ;;  %v1207_v13 = vmax.f32 %v2573_v11, 0.0  ;;  %v1208_v8 = vmax.f32 %v2577_v55, 0.0 }
 0x217   :  { %1250 = vst [vmem:[%s2943_s4 + $0x78] sm:$0xff] %v1186_v39  ;;  %1251 = vst [vmem:[%s2943_s4 + $0x80] sm:$0xff] %v1187_v4  ;;  %v1209_v40 = vmax.f32 %v2581_v51, 0.0  ;;  %v1210_v27 = vmax.f32 %v2585_v0, 0.0  ;;  %v1211_v56 = vmax.f32 %v2589_v16, 0.0  ;;  %v1212_v20 = vmax.f32 %v2593_v44, 0.0 }
 0x218   :  { %1252 = vst [vmem:[%s2943_s4 + $0x88] sm:$0xff] %v1188_v31  ;;  %1253 = vst [vmem:[%s2943_s4 + $0x90] sm:$0xff] %v1189_v60  ;;  %v1213_v32 = vmax.f32 %v2597_v18, 0.0  ;;  %v1214_v59 = vmax.f32 %v2601_v22, 0.0  ;;  %v1215_v48 = vmax.f32 %v2605_v26, 0.0  ;;  %v1216_v52 = vmax.f32 %v2609_v30, 0.0 }
 0x219   :  { %1254 = vst [vmem:[%s2943_s4 + $0x98] sm:$0xff] %v1190_v15  ;;  %1255 = vst [vmem:[%s2943_s4 + $0xa0] sm:$0xff] %v1191_v36  ;;  %v1217_v12 = vmax.f32 %v2613_v34, 0.0  ;;  %v3044_v11 = vld [vmem:[#allocation12_spill] sm:$0xff]  ;;  %v3045_v51 = vld [vmem:[#allocation14_spill] sm:$0xff]  ;;  %v1224_v42 = vmax.f32 %v2641_v62, 0.0 }
 0x21a   :  { %1256 = vst [vmem:[%s2943_s4 + $0xa8] sm:$0xff] %v1192_v17  ;;  %1257 = vst [vmem:[%s2943_s4 + $0xb0] sm:$0xff] %v1193_v21  ;;  %v1218_v55 = vmax.f32 %v3044_v11, 0.0  ;;  %v1219_v0 = vmax.f32 %v3045_v51, 0.0  ;;  %v3046_v16 = vld [vmem:[#allocation16_spill] sm:$0xff]  ;;  %v3047_v18 = vld [vmem:[#allocation18_spill] sm:$0xff] }
 0x21b   :  { %1258 = vst [vmem:[%s2943_s4 + $0xb8] sm:$0xff] %v1194_v25  ;;  %1259 = vst [vmem:[%s2943_s4 + $0xc0] sm:$0xff] %v1195_v29  ;;  %v1220_v44 = vmax.f32 %v3046_v16, 0.0  ;;  %v1221_v22 = vmax.f32 %v3047_v18, 0.0  ;;  %v3048_v26 = vld [vmem:[#allocation20_spill] sm:$0xff]  ;;  %v3049_v34 = vld [vmem:[#allocation23_spill] sm:$0xff] }
 0x21c   :  { %1260 = vst [vmem:[%s2943_s4 + $0xc8] sm:$0xff] %v1196_v33  ;;  %1261 = vst [vmem:[%s2943_s4 + $0xd0] sm:$0xff] %v1197_v37  ;;  %v1222_v30 = vmax.f32 %v3048_v26, 0.0  ;;  %v1223_v38 = vmax.f32 %v3049_v34, 0.0  ;;  %v1225_v46 = vmax.f32 %v2645_v2, 0.0  ;;  %v1226_v50 = vmax.f32 %v2649_v19, 0.0 }
 0x21d   :  { %1262 = vst [vmem:[%s2943_s4 + $0xd8] sm:$0xff] %v1198_v41  ;;  %1263 = vst [vmem:[%s2943_s4 + $0xe0] sm:$0xff] %v1199_v45  ;;  %v1227_v62 = vmax.f32 %v2653_v47, 0.0  ;;  %v1228_v2 = vmax.f32 %v2657_v7, 0.0  ;;  %v3050_v19 = vld [vmem:[#allocation11_spill] sm:$0xff]  ;;  %v3051_v35 = vld [vmem:[#allocation13_spill] sm:$0xff] }
 0x21e   :  { %1264 = vst [vmem:[%s2943_s4 + $0xe8] sm:$0xff] %v1200_v49  ;;  %1265 = vst [vmem:[%s2943_s4 + $0xf0] sm:$0xff] %v1201_v53  ;;  %v1229_v54 = vmax.f32 %v3050_v19, 0.0  ;;  %v1230_v6 = vmax.f32 %v3051_v35, 0.0  ;;  %v3052_v47 = vld [vmem:[#allocation15_spill] sm:$0xff]  ;;  %v3053_v10 = vld [vmem:[#allocation17_spill] sm:$0xff] }
 0x21f   :  { %1266 = vst [vmem:[%s2943_s4 + $0xf8] sm:$0xff] %v1202_v57  ;;  %1267 = vst [vmem:[%s2943_s4 + $0x100] sm:$0xff] %v1203_v61  ;;  %v1231_v7 = vmax.f32 %v3052_v47, 0.0  ;;  %v1232_v14 = vmax.f32 %v3053_v10, 0.0  ;;  %v3054_v3 = vld [vmem:[#allocation19_spill] sm:$0xff]  ;;  %v1234_v28 = vmax.f32 %v2681_v58, 0.0 }
 0x220   :  { %1268 = vst [vmem:[%s2943_s4 + $0x108] sm:$0xff] %v1204_v1  ;;  %1269 = vst [vmem:[%s2943_s4 + $0x110] sm:$0xff] %v1205_v5  ;;  %v1233_v23 = vmax.f32 %v3054_v3, 0.0 }
 0x221   :  { %1270 = vst [vmem:[%s2943_s4 + $0x118] sm:$0xff] %v1206_v9  ;;  %1271 = vst [vmem:[%s2943_s4 + $0x120] sm:$0xff] %v1207_v13 }
 0x222   :  { %1272 = vst [vmem:[%s2943_s4 + $0x128] sm:$0xff] %v1208_v8  ;;  %1273 = vst [vmem:[%s2943_s4 + $0x130] sm:$0xff] %v1209_v40 }
 0x223   :  { %1274 = vst [vmem:[%s2943_s4 + $0x138] sm:$0xff] %v1210_v27  ;;  %1275 = vst [vmem:[%s2943_s4 + $0x140] sm:$0xff] %v1211_v56 }
 0x224   :  { %1276 = vst [vmem:[%s2943_s4 + $0x148] sm:$0xff] %v1212_v20  ;;  %1277 = vst [vmem:[%s2943_s4 + $0x150] sm:$0xff] %v1213_v32 }
 0x225   :  { %1278 = vst [vmem:[%s2943_s4 + $0x158] sm:$0xff] %v1214_v59  ;;  %1279 = vst [vmem:[%s2943_s4 + $0x160] sm:$0xff] %v1215_v48 }
 0x226   :  { %1280 = vst [vmem:[%s2943_s4 + $0x168] sm:$0xff] %v1216_v52  ;;  %1281 = vst [vmem:[%s2943_s4 + $0x170] sm:$0xff] %v1217_v12 }
 0x227   :  { %1282 = vst [vmem:[%s2943_s4 + $0x178] sm:$0xff] %v1218_v55  ;;  %1283 = vst [vmem:[%s2943_s4 + $0x180] sm:$0xff] %v1219_v0 }
 0x228   :  { %1284 = vst [vmem:[%s2943_s4 + $0x188] sm:$0xff] %v1220_v44  ;;  %1285 = vst [vmem:[%s2943_s4 + $0x190] sm:$0xff] %v1221_v22 }
 0x229   :  { %1286 = vst [vmem:[%s2943_s4 + $0x198] sm:$0xff] %v1222_v30  ;;  %1287 = vst [vmem:[%s2943_s4 + $0x1a0] sm:$0xff] %v1223_v38 }
 0x22a   :  { %1288 = vst [vmem:[%s2943_s4 + $0x1a8] sm:$0xff] %v1224_v42  ;;  %1289 = vst [vmem:[%s2943_s4 + $0x1b0] sm:$0xff] %v1225_v46 }
 0x22b   :  { %1290 = vst [vmem:[%s2943_s4 + $0x1b8] sm:$0xff] %v1226_v50  ;;  %1291 = vst [vmem:[%s2943_s4 + $0x1c0] sm:$0xff] %v1227_v62 }
 0x22c   :  { %1292 = vst [vmem:[%s2943_s4 + $0x1c8] sm:$0xff] %v1228_v2  ;;  %1293 = vst [vmem:[%s2943_s4 + $0x1d0] sm:$0xff] %v1229_v54 }
 0x22d   :  { %1294 = vst [vmem:[%s2943_s4 + $0x1d8] sm:$0xff] %v1230_v6  ;;  %1295 = vst [vmem:[%s2943_s4 + $0x1e0] sm:$0xff] %v1231_v7 }
 0x22e   :  { %1296 = vst [vmem:[%s2943_s4 + $0x1e8] sm:$0xff] %v1232_v14  ;;  %1297 = vst [vmem:[%s2943_s4 + $0x1f0] sm:$0xff] %v1233_v23 }
 0x22f   :  { %1298 = vst [vmem:[%s2943_s4 + $0x1f8] sm:$0xff] %v1234_v28 }

// kernel: resnet_forward.17
= control target key start
LH: loop header
LB: loop body
LE: loop exit
PB: predicated region body
PF: predicated region fallthrough
CT: control target
= control target key end

     0   :  { %vm288_vm0 = vcmask 523264   ;;  %s943_s0 = inlined_call_operand.vmem [shape: f32[9,128,64], index: 0, kind: input, shape index: {}]   ;;  %s944_s1 = inlined_call_operand.vmem [shape: f32[128,64], index: 1, kind: output, shape index: {}]  }
   0x1   :  { %v8_v0 = vld [vmem:[%s943_s0] sm:$0xff]  ;;  %v9_v6 = vld [vmem:[%s943_s0 + $0x8] sm:$0xff]  ;;  %v10_v15 = vld [vmem:[%s943_s0 + $0x10] sm:$0xff] }
   0x2   :  { %v309_v1 = vld [vmem:[%s943_s0 + $0x80] sm:$0xff]  ;;  %v310_v7 = vld [vmem:[%s943_s0 + $0x88] sm:$0xff]  ;;  %v311_v16 = vld [vmem:[%s943_s0 + $0x90] sm:$0xff] }
   0x3   :  { %v325_v2 = vld [vmem:[%s943_s0 + $0x100] sm:$0xff]  ;;  %v41_v3 = vmax.f32 %v8_v0, %v309_v1  ;;  %v326_v8 = vld [vmem:[%s943_s0 + $0x108] sm:$0xff]  ;;  %v42_v10 = vmax.f32 %v9_v6, %v310_v7  ;;  %v327_v17 = vld [vmem:[%s943_s0 + $0x110] sm:$0xff]  ;;  %v43_v20 = vmax.f32 %v10_v15, %v311_v16 }
   0x4   :  { %v341_v4 = vld [vmem:[%s943_s0 + $0x180] sm:$0xff]  ;;  %v342_v13 = vld [vmem:[%s943_s0 + $0x188] sm:$0xff]  ;;  %v343_v24 = vld [vmem:[%s943_s0 + $0x190] sm:$0xff] }
   0x5   :  { %v74_v5 = vmax.f32 %v41_v3, %v325_v2  ;;  %v357_v9 = vld [vmem:[%s943_s0 + $0x200] sm:$0xff]  ;;  %v75_v14 = vmax.f32 %v42_v10, %v326_v8  ;;  %v358_v19 = vld [vmem:[%s943_s0 + $0x208] sm:$0xff]  ;;  %v76_v26 = vmax.f32 %v43_v20, %v327_v17  ;;  %v11_v27 = vld [vmem:[%s943_s0 + $0x18] sm:$0xff] }
   0x6   :  { %v373_v12 = vld [vmem:[%s943_s0 + $0x280] sm:$0xff]  ;;  %v374_v23 = vld [vmem:[%s943_s0 + $0x288] sm:$0xff]  ;;  %v312_v28 = vld [vmem:[%s943_s0 + $0x98] sm:$0xff] }
   0x7   :  { %v107_v11 = vmax.f32 %v74_v5, %v341_v4  ;;  %v389_v21 = vld [vmem:[%s943_s0 + $0x300] sm:$0xff]  ;;  %v108_v22 = vmax.f32 %v75_v14, %v342_v13  ;;  %v328_v29 = vld [vmem:[%s943_s0 + $0x118] sm:$0xff]  ;;  %v359_v33 = vld [vmem:[%s943_s0 + $0x210] sm:$0xff]  ;;  %v44_v34 = vmax.f32 %v11_v27, %v312_v28  ;;  %v109_v37 = vmax.f32 %v76_v26, %v343_v24 }
   0x8   :  { %v405_v30 = vld [vmem:[%s943_s0 + $0x380] sm:$0xff]  ;;  %v390_v36 = vld [vmem:[%s943_s0 + $0x308] sm:$0xff]  ;;  %v375_v38 = vld [vmem:[%s943_s0 + $0x290] sm:$0xff] }
   0x9   :  { %v140_v18 = vmax.f32 %v107_v11, %v357_v9  ;;  %v421_v31 = vld [vmem:[%s943_s0 + $0x400] sm:$0xff]  ;;  %v141_v32 = vmax.f32 %v108_v22, %v358_v19  ;;  %v344_v39 = vld [vmem:[%s943_s0 + $0x198] sm:$0xff]  ;;  %v77_v41 = vmax.f32 %v44_v34, %v328_v29  ;;  %v406_v46 = vld [vmem:[%s943_s0 + $0x388] sm:$0xff]  ;;  %v142_v48 = vmax.f32 %v109_v37, %v359_v33 }
   0xa   :  { %v12_v42 = vld [vmem:[%s943_s0 + $0x20] sm:$0xff]  ;;  %v422_v47 = vld [vmem:[%s943_s0 + $0x408] sm:$0xff]  ;;  %v360_v49 = vld [vmem:[%s943_s0 + $0x218] sm:$0xff] }
   0xb   :  { %v173_v25 = vmax.f32 %v140_v18, %v373_v12  ;;  %v174_v40 = vmax.f32 %v141_v32, %v374_v23  ;;  %v313_v43 = vld [vmem:[%s943_s0 + $0xa0] sm:$0xff]  ;;  %v391_v52 = vld [vmem:[%s943_s0 + $0x310] sm:$0xff]  ;;  %v110_v53 = vmax.f32 %v77_v41, %v344_v39  ;;  %v376_v54 = vld [vmem:[%s943_s0 + $0x298] sm:$0xff]  ;;  %v175_v57 = vmax.f32 %v142_v48, %v375_v38 }
   0xc   :  { %v329_v44 = vld [vmem:[%s943_s0 + $0x120] sm:$0xff]  ;;  %v45_v50 = vmax.f32 %v12_v42, %v313_v43  ;;  %v13_v59 = vld [vmem:[%s943_s0 + $0x28] sm:$0xff]  ;;  %v407_v63 = vld [vmem:[%s943_s0 + $0x390] sm:$0xff] }
   0xd   :  { %v206_v35 = vmax.f32 %v173_v25, %v389_v21  ;;  %v207_v51 = vmax.f32 %v174_v40, %v390_v36  ;;  %v345_v55 = vld [vmem:[%s943_s0 + $0x1a0] sm:$0xff]  ;;  %v314_v60 = vld [vmem:[%s943_s0 + $0xa8] sm:$0xff]  ;;  %v423_v0 = vld [vmem:[%s943_s0 + $0x410] sm:$0xff]  ;;  %v143_v1 = vmax.f32 %v110_v53, %v360_v49  ;;  %v208_v4 = vmax.f32 %v175_v57, %v391_v52 }
   0xe   :  { %v78_v58 = vmax.f32 %v45_v50, %v329_v44  ;;  %v330_v61 = vld [vmem:[%s943_s0 + $0x128] sm:$0xff]  ;;  %v361_v2 = vld [vmem:[%s943_s0 + $0x220] sm:$0xff]  ;;  %v46_v3 = vmax.f32 %v13_v59, %v314_v60  ;;  %v392_v5 = vld [vmem:[%s943_s0 + $0x318] sm:$0xff] }
   0xf   :  { %v239_v45 = vmax.f32 %v206_v35, %v405_v30  ;;  %v240_v62 = vmax.f32 %v207_v51, %v406_v46  ;;  %v377_v7 = vld [vmem:[%s943_s0 + $0x2a0] sm:$0xff]  ;;  %v346_v8 = vld [vmem:[%s943_s0 + $0x1a8] sm:$0xff]  ;;  %v176_v10 = vmax.f32 %v143_v1, %v376_v54  ;;  %v14_v12 = vld [vmem:[%s943_s0 + $0x30] sm:$0xff]  ;;  %v241_v15 = vmax.f32 %v208_v4, %v407_v63 }
  0x10   :  { %v111_v6 = vmax.f32 %v78_v58, %v345_v55  ;;  %v79_v11 = vmax.f32 %v46_v3, %v330_v61  ;;  %v315_v13 = vld [vmem:[%s943_s0 + $0xb0] sm:$0xff]  ;;  %v408_v16 = vld [vmem:[%s943_s0 + $0x398] sm:$0xff]  ;;  %v362_v19 = vld [vmem:[%s943_s0 + $0x228] sm:$0xff] }
  0x11   :  { %v272_v56 = vmax.f32 %v239_v45, %v421_v31  ;;  %v273_v9 = vmax.f32 %v240_v62, %v422_v47  ;;  %v331_v14 = vld [vmem:[%s943_s0 + $0x130] sm:$0xff]  ;;  %v424_v17 = vld [vmem:[%s943_s0 + $0x418] sm:$0xff]  ;;  %v47_v20 = vmax.f32 %v14_v12, %v315_v13  ;;  %v209_v21 = vmax.f32 %v176_v10, %v392_v5  ;;  %v393_v22 = vld [vmem:[%s943_s0 + $0x320] sm:$0xff] }
  0x12   :  { %v144_v18 = vmax.f32 %v111_v6, %v361_v2  ;;  %v112_v23 = vmax.f32 %v79_v11, %v346_v8  ;;  %v378_v24 = vld [vmem:[%s943_s0 + $0x2a8] sm:$0xff]  ;;  %v347_v25 = vld [vmem:[%s943_s0 + $0x1b0] sm:$0xff]  ;;  %v274_v26 = vmax.f32 %v241_v15, %v423_v0  ;;  %v15_v29 = vld [vmem:[%s943_s0 + $0x38] sm:$0xff] }
  0x13   :  { %289 = vst.msk [vmem:[%s944_s1] sm:$0xff] %vm288_vm0, %v272_v56  ;;  %290 = vst.msk [vmem:[%s944_s1 + $0x8] sm:$0xff] %vm288_vm0, %v273_v9  ;;  %v80_v28 = vmax.f32 %v47_v20, %v331_v14  ;;  %v316_v30 = vld [vmem:[%s943_s0 + $0xb8] sm:$0xff]  ;;  %v242_v32 = vmax.f32 %v209_v21, %v408_v16  ;;  %v409_v33 = vld [vmem:[%s943_s0 + $0x3a0] sm:$0xff] }
  0x14   :  { %v177_v27 = vmax.f32 %v144_v18, %v377_v7  ;;  %v332_v31 = vld [vmem:[%s943_s0 + $0x138] sm:$0xff]  ;;  %v425_v34 = vld [vmem:[%s943_s0 + $0x420] sm:$0xff]  ;;  %v145_v35 = vmax.f32 %v112_v23, %v362_v19  ;;  %v363_v36 = vld [vmem:[%s943_s0 + $0x230] sm:$0xff]  ;;  %v48_v37 = vmax.f32 %v15_v29, %v316_v30  ;;  %291 = vst.msk [vmem:[%s944_s1 + $0x10] sm:$0xff] %vm288_vm0, %v274_v26 }
  0x15   :  { %v394_v39 = vld [vmem:[%s943_s0 + $0x328] sm:$0xff]  ;;  %v113_v40 = vmax.f32 %v80_v28, %v347_v25  ;;  %v379_v41 = vld [vmem:[%s943_s0 + $0x2b0] sm:$0xff]  ;;  %v348_v42 = vld [vmem:[%s943_s0 + $0x1b8] sm:$0xff]  ;;  %v275_v43 = vmax.f32 %v242_v32, %v424_v17 }
  0x16   :  { %v210_v38 = vmax.f32 %v177_v27, %v393_v22  ;;  %v178_v44 = vmax.f32 %v145_v35, %v378_v24  ;;  %v81_v45 = vmax.f32 %v48_v37, %v332_v31  ;;  %v16_v46 = vld [vmem:[%s943_s0 + $0x40] sm:$0xff]  ;;  %v410_v50 = vld [vmem:[%s943_s0 + $0x3a8] sm:$0xff]  ;;  %v364_v53 = vld [vmem:[%s943_s0 + $0x238] sm:$0xff] }
  0x17   :  { %v317_v47 = vld [vmem:[%s943_s0 + $0xc0] sm:$0xff]  ;;  %v426_v51 = vld [vmem:[%s943_s0 + $0x428] sm:$0xff]  ;;  %v146_v52 = vmax.f32 %v113_v40, %v363_v36  ;;  %292 = vst.msk [vmem:[%s944_s1 + $0x18] sm:$0xff] %vm288_vm0, %v275_v43  ;;  %v395_v56 = vld [vmem:[%s943_s0 + $0x330] sm:$0xff] }
  0x18   :  { %v333_v48 = vld [vmem:[%s943_s0 + $0x140] sm:$0xff]  ;;  %v243_v49 = vmax.f32 %v210_v38, %v409_v33  ;;  %v49_v54 = vmax.f32 %v16_v46, %v317_v47  ;;  %v211_v55 = vmax.f32 %v178_v44, %v394_v39  ;;  %v114_v57 = vmax.f32 %v81_v45, %v348_v42  ;;  %v380_v58 = vld [vmem:[%s943_s0 + $0x2b8] sm:$0xff]  ;;  %v17_v63 = vld [vmem:[%s943_s0 + $0x48] sm:$0xff] }
  0x19   :  { %v349_v59 = vld [vmem:[%s943_s0 + $0x1c0] sm:$0xff]  ;;  %v179_v61 = vmax.f32 %v146_v52, %v379_v41  ;;  %v318_v0 = vld [vmem:[%s943_s0 + $0xc8] sm:$0xff]  ;;  %v411_v3 = vld [vmem:[%s943_s0 + $0x3b0] sm:$0xff] }
  0x1a   :  { %v276_v60 = vmax.f32 %v243_v49, %v425_v34  ;;  %v82_v62 = vmax.f32 %v49_v54, %v333_v48  ;;  %v334_v1 = vld [vmem:[%s943_s0 + $0x148] sm:$0xff]  ;;  %v244_v2 = vmax.f32 %v211_v55, %v410_v50  ;;  %v427_v4 = vld [vmem:[%s943_s0 + $0x430] sm:$0xff]  ;;  %v147_v5 = vmax.f32 %v114_v57, %v364_v53  ;;  %v365_v6 = vld [vmem:[%s943_s0 + $0x240] sm:$0xff] }
  0x1b   :  { %v50_v7 = vmax.f32 %v17_v63, %v318_v0  ;;  %v212_v8 = vmax.f32 %v179_v61, %v395_v56  ;;  %v396_v9 = vld [vmem:[%s943_s0 + $0x338] sm:$0xff]  ;;  %v381_v11 = vld [vmem:[%s943_s0 + $0x2c0] sm:$0xff]  ;;  %v350_v12 = vld [vmem:[%s943_s0 + $0x1c8] sm:$0xff] }
  0x1c   :  { %293 = vst.msk [vmem:[%s944_s1 + $0x20] sm:$0xff] %vm288_vm0, %v276_v60  ;;  %v115_v10 = vmax.f32 %v82_v62, %v349_v59  ;;  %v277_v13 = vmax.f32 %v244_v2, %v426_v51  ;;  %v180_v14 = vmax.f32 %v147_v5, %v380_v58  ;;  %v18_v16 = vld [vmem:[%s943_s0 + $0x50] sm:$0xff]  ;;  %v412_v20 = vld [vmem:[%s943_s0 + $0x3b8] sm:$0xff]  ;;  %v366_v23 = vld [vmem:[%s943_s0 + $0x248] sm:$0xff] }
  0x1d   :  { %v83_v15 = vmax.f32 %v50_v7, %v334_v1  ;;  %v319_v17 = vld [vmem:[%s943_s0 + $0xd0] sm:$0xff]  ;;  %v245_v19 = vmax.f32 %v212_v8, %v411_v3  ;;  %v428_v21 = vld [vmem:[%s943_s0 + $0x438] sm:$0xff]  ;;  %v397_v26 = vld [vmem:[%s943_s0 + $0x340] sm:$0xff] }
  0x1e   :  { %v335_v18 = vld [vmem:[%s943_s0 + $0x150] sm:$0xff]  ;;  %v148_v22 = vmax.f32 %v115_v10, %v365_v6  ;;  %v51_v24 = vmax.f32 %v18_v16, %v319_v17  ;;  %294 = vst.msk [vmem:[%s944_s1 + $0x28] sm:$0xff] %vm288_vm0, %v277_v13  ;;  %v213_v25 = vmax.f32 %v180_v14, %v396_v9  ;;  %v382_v28 = vld [vmem:[%s943_s0 + $0x2c8] sm:$0xff]  ;;  %v19_v33 = vld [vmem:[%s943_s0 + $0x58] sm:$0xff] }
  0x1f   :  { %v116_v27 = vmax.f32 %v83_v15, %v350_v12  ;;  %v351_v29 = vld [vmem:[%s943_s0 + $0x1d0] sm:$0xff]  ;;  %v278_v30 = vmax.f32 %v245_v19, %v427_v4  ;;  %v320_v34 = vld [vmem:[%s943_s0 + $0xd8] sm:$0xff]  ;;  %v413_v37 = vld [vmem:[%s943_s0 + $0x3c0] sm:$0xff] }
  0x20   :  { %v181_v31 = vmax.f32 %v148_v22, %v381_v11  ;;  %v84_v32 = vmax.f32 %v51_v24, %v335_v18  ;;  %v336_v35 = vld [vmem:[%s943_s0 + $0x158] sm:$0xff]  ;;  %v246_v36 = vmax.f32 %v213_v25, %v412_v20  ;;  %v429_v38 = vld [vmem:[%s943_s0 + $0x440] sm:$0xff]  ;;  %v367_v40 = vld [vmem:[%s943_s0 + $0x250] sm:$0xff]  ;;  %v52_v41 = vmax.f32 %v19_v33, %v320_v34 }
  0x21   :  { %v149_v39 = vmax.f32 %v116_v27, %v366_v23  ;;  %295 = vst.msk [vmem:[%s944_s1 + $0x30] sm:$0xff] %vm288_vm0, %v278_v30  ;;  %v398_v43 = vld [vmem:[%s943_s0 + $0x348] sm:$0xff]  ;;  %v383_v45 = vld [vmem:[%s943_s0 + $0x2d0] sm:$0xff]  ;;  %v352_v46 = vld [vmem:[%s943_s0 + $0x1d8] sm:$0xff] }
  0x22   :  { %v214_v42 = vmax.f32 %v181_v31, %v397_v26  ;;  %v117_v44 = vmax.f32 %v84_v32, %v351_v29  ;;  %v279_v47 = vmax.f32 %v246_v36, %v428_v21  ;;  %v85_v49 = vmax.f32 %v52_v41, %v336_v35  ;;  %v20_v50 = vld [vmem:[%s943_s0 + $0x60] sm:$0xff]  ;;  %v414_v54 = vld [vmem:[%s943_s0 + $0x3c8] sm:$0xff]  ;;  %v368_v57 = vld [vmem:[%s943_s0 + $0x258] sm:$0xff] }
  0x23   :  { %v182_v48 = vmax.f32 %v149_v39, %v382_v28  ;;  %v321_v51 = vld [vmem:[%s943_s0 + $0xe0] sm:$0xff]  ;;  %v430_v55 = vld [vmem:[%s943_s0 + $0x448] sm:$0xff]  ;;  %v399_v60 = vld [vmem:[%s943_s0 + $0x350] sm:$0xff] }
  0x24   :  { %v337_v52 = vld [vmem:[%s943_s0 + $0x160] sm:$0xff]  ;;  %v247_v53 = vmax.f32 %v214_v42, %v413_v37  ;;  %v150_v56 = vmax.f32 %v117_v44, %v367_v40  ;;  %v53_v58 = vmax.f32 %v20_v50, %v321_v51  ;;  %296 = vst.msk [vmem:[%s944_s1 + $0x38] sm:$0xff] %vm288_vm0, %v279_v47  ;;  %v118_v61 = vmax.f32 %v85_v49, %v352_v46  ;;  %v384_v62 = vld [vmem:[%s943_s0 + $0x2d8] sm:$0xff]  ;;  %v21_v3 = vld [vmem:[%s943_s0 + $0x68] sm:$0xff] }
  0x25   :  { %v215_v59 = vmax.f32 %v182_v48, %v398_v43  ;;  %v353_v63 = vld [vmem:[%s943_s0 + $0x1e0] sm:$0xff]  ;;  %v322_v4 = vld [vmem:[%s943_s0 + $0xe8] sm:$0xff]  ;;  %v415_v7 = vld [vmem:[%s943_s0 + $0x3d0] sm:$0xff] }
  0x26   :  { %v280_v0 = vmax.f32 %v247_v53, %v429_v38  ;;  %v183_v1 = vmax.f32 %v150_v56, %v383_v45  ;;  %v86_v2 = vmax.f32 %v53_v58, %v337_v52  ;;  %v338_v5 = vld [vmem:[%s943_s0 + $0x168] sm:$0xff]  ;;  %v431_v8 = vld [vmem:[%s943_s0 + $0x450] sm:$0xff]  ;;  %v151_v9 = vmax.f32 %v118_v61, %v368_v57  ;;  %v369_v10 = vld [vmem:[%s943_s0 + $0x260] sm:$0xff] }
  0x27   :  { %v248_v6 = vmax.f32 %v215_v59, %v414_v54  ;;  %v54_v11 = vmax.f32 %v21_v3, %v322_v4  ;;  %v400_v13 = vld [vmem:[%s943_s0 + $0x358] sm:$0xff]  ;;  %v385_v15 = vld [vmem:[%s943_s0 + $0x2e0] sm:$0xff]  ;;  %v354_v16 = vld [vmem:[%s943_s0 + $0x1e8] sm:$0xff] }
  0x28   :  { %297 = vst.msk [vmem:[%s944_s1 + $0x40] sm:$0xff] %vm288_vm0, %v280_v0  ;;  %v216_v12 = vmax.f32 %v183_v1, %v399_v60  ;;  %v119_v14 = vmax.f32 %v86_v2, %v353_v63  ;;  %v184_v18 = vmax.f32 %v151_v9, %v384_v62  ;;  %v22_v20 = vld [vmem:[%s943_s0 + $0x70] sm:$0xff]  ;;  %v416_v24 = vld [vmem:[%s943_s0 + $0x3d8] sm:$0xff]  ;;  %v370_v27 = vld [vmem:[%s943_s0 + $0x268] sm:$0xff] }
  0x29   :  { %v281_v17 = vmax.f32 %v248_v6, %v430_v55  ;;  %v87_v19 = vmax.f32 %v54_v11, %v338_v5  ;;  %v323_v21 = vld [vmem:[%s943_s0 + $0xf0] sm:$0xff]  ;;  %v432_v25 = vld [vmem:[%s943_s0 + $0x458] sm:$0xff]  ;;  %v401_v30 = vld [vmem:[%s943_s0 + $0x360] sm:$0xff] }
  0x2a   :  { %v339_v22 = vld [vmem:[%s943_s0 + $0x170] sm:$0xff]  ;;  %v249_v23 = vmax.f32 %v216_v12, %v415_v7  ;;  %v152_v26 = vmax.f32 %v119_v14, %v369_v10  ;;  %v55_v28 = vmax.f32 %v22_v20, %v323_v21  ;;  %v217_v29 = vmax.f32 %v184_v18, %v400_v13  ;;  %v386_v32 = vld [vmem:[%s943_s0 + $0x2e8] sm:$0xff]  ;;  %v23_v37 = vld [vmem:[%s943_s0 + $0x78] sm:$0xff] }
  0x2b   :  { %298 = vst.msk [vmem:[%s944_s1 + $0x48] sm:$0xff] %vm288_vm0, %v281_v17  ;;  %v120_v31 = vmax.f32 %v87_v19, %v354_v16  ;;  %v355_v33 = vld [vmem:[%s943_s0 + $0x1f0] sm:$0xff]  ;;  %v324_v38 = vld [vmem:[%s943_s0 + $0xf8] sm:$0xff]  ;;  %v417_v41 = vld [vmem:[%s943_s0 + $0x3e0] sm:$0xff] }
  0x2c   :  { %v282_v34 = vmax.f32 %v249_v23, %v431_v8  ;;  %v185_v35 = vmax.f32 %v152_v26, %v385_v15  ;;  %v88_v36 = vmax.f32 %v55_v28, %v339_v22  ;;  %v340_v39 = vld [vmem:[%s943_s0 + $0x178] sm:$0xff]  ;;  %v250_v40 = vmax.f32 %v217_v29, %v416_v24  ;;  %v371_v43 = vld [vmem:[%s943_s0 + $0x270] sm:$0xff]  ;;  %v402_v46 = vld [vmem:[%s943_s0 + $0x368] sm:$0xff] }
  0x2d   :  { %v153_v42 = vmax.f32 %v120_v31, %v370_v27  ;;  %v56_v44 = vmax.f32 %v23_v37, %v324_v38  ;;  %v356_v48 = vld [vmem:[%s943_s0 + $0x1f8] sm:$0xff]  ;;  %v433_v50 = vld [vmem:[%s943_s0 + $0x460] sm:$0xff]  ;;  %v387_v52 = vld [vmem:[%s943_s0 + $0x2f0] sm:$0xff] }
  0x2e   :  { %299 = vst.msk [vmem:[%s944_s1 + $0x50] sm:$0xff] %vm288_vm0, %v282_v34  ;;  %v218_v45 = vmax.f32 %v185_v35, %v401_v30  ;;  %v121_v47 = vmax.f32 %v88_v36, %v355_v33  ;;  %v283_v49 = vmax.f32 %v250_v40, %v432_v25  ;;  %v418_v55 = vld [vmem:[%s943_s0 + $0x3e8] sm:$0xff]  ;;  %v372_v57 = vld [vmem:[%s943_s0 + $0x278] sm:$0xff]  ;;  %v403_v59 = vld [vmem:[%s943_s0 + $0x370] sm:$0xff] }
  0x2f   :  { %v186_v51 = vmax.f32 %v153_v42, %v386_v32  ;;  %v89_v53 = vmax.f32 %v56_v44, %v340_v39  ;;  %v434_v62 = vld [vmem:[%s943_s0 + $0x468] sm:$0xff]  ;;  %v388_v0 = vld [vmem:[%s943_s0 + $0x2f8] sm:$0xff]  ;;  %v419_v2 = vld [vmem:[%s943_s0 + $0x3f0] sm:$0xff] }
  0x30   :  { %v251_v54 = vmax.f32 %v218_v45, %v417_v41  ;;  %v154_v56 = vmax.f32 %v121_v47, %v371_v43  ;;  %300 = vst.msk [vmem:[%s944_s1 + $0x58] sm:$0xff] %vm288_vm0, %v283_v49  ;;  %v404_v5 = vld [vmem:[%s943_s0 + $0x378] sm:$0xff]  ;;  %v435_v7 = vld [vmem:[%s943_s0 + $0x470] sm:$0xff] }
  0x31   :  { %v219_v58 = vmax.f32 %v186_v51, %v402_v46  ;;  %v122_v60 = vmax.f32 %v89_v53, %v356_v48  ;;  %v420_v10 = vld [vmem:[%s943_s0 + $0x3f8] sm:$0xff] }
  0x32   :  { %v284_v61 = vmax.f32 %v251_v54, %v433_v50  ;;  %v187_v63 = vmax.f32 %v154_v56, %v387_v52  ;;  %v436_v13 = vld [vmem:[%s943_s0 + $0x478] sm:$0xff] }
  0x33   :  { %v252_v1 = vmax.f32 %v219_v58, %v418_v55  ;;  %v155_v3 = vmax.f32 %v122_v60, %v372_v57 }
  0x34   :  { %301 = vst.msk [vmem:[%s944_s1 + $0x60] sm:$0xff] %vm288_vm0, %v284_v61  ;;  %v220_v4 = vmax.f32 %v187_v63, %v403_v59 }
  0x35   :  { %v285_v6 = vmax.f32 %v252_v1, %v434_v62  ;;  %v188_v8 = vmax.f32 %v155_v3, %v388_v0 }
  0x36   :  { %v253_v9 = vmax.f32 %v220_v4, %v419_v2 }
  0x37   :  { %302 = vst.msk [vmem:[%s944_s1 + $0x68] sm:$0xff] %vm288_vm0, %v285_v6  ;;  %v221_v11 = vmax.f32 %v188_v8, %v404_v5 }
  0x38   :  { %v286_v12 = vmax.f32 %v253_v9, %v435_v7 }
  0x39   :  { %v254_v14 = vmax.f32 %v221_v11, %v420_v10 }
  0x3a   :  { %303 = vst.msk [vmem:[%s944_s1 + $0x70] sm:$0xff] %vm288_vm0, %v286_v12 }
  0x3b   :  { %v287_v15 = vmax.f32 %v254_v14, %v436_v13 }
  0x3d   :  { %304 = vst.msk [vmem:[%s944_s1 + $0x78] sm:$0xff] %vm288_vm0, %v287_v15 }

// kernel: resnet_forward.23
= control target key start
LH: loop header
LB: loop body
LE: loop exit
PB: predicated region body
PF: predicated region fallthrough
CT: control target
= control target key end

     0   :  { %v181_v42 = vlaneseq  ;;  %s332_s1 = inlined_call_operand.vmem [shape: bf16[128,128], index: 1, kind: input, shape index: {}]   ;;  %s333_s0 = inlined_call_operand.vmem [shape: bf16[32,128], index: 0, kind: input, shape index: {}]   ;;  %s334_s2 = inlined_call_operand.vmem [shape: f32[1,128], index: 2, kind: input, shape index: {}]   ;;  %s335_s3 = inlined_call_operand.vmem [shape: f32[1,128], index: 3, kind: input, shape index: {}]   ;;  %s336_s4 = inlined_call_operand.vmem [shape: f32[32,128], index: 4, kind: output, shape index: {}]  }
   0x1   :  { %v247_v0 = vld [vmem:[%s332_s1 + $0x38] sm:$0xff]   ;;  %v248_v1 = vld [vmem:[%s332_s1 + $0x30] sm:$0xff]   ;;  %v249_v2 = vld [vmem:[%s332_s1 + $0x28] sm:$0xff]  }
   0x2   :  { %227 = vmatprep.subr.bf16.mxu0 %v247_v0  ;;  %v250_v3 = vld [vmem:[%s332_s1 + $0x20] sm:$0xff]   ;;  %v251_v5 = vld [vmem:[%s332_s1 + $0x18] sm:$0xff]   ;;  %v252_v6 = vld [vmem:[%s332_s1 + $0x10] sm:$0xff]   ;;  %v182_v43 = vshrl.u32 %v181_v42, 7 }
   0x3   :  { %228 = vmatpush3.bf16.msra.mxu0 %v247_v0  ;;  %v255_v4 = vld [vmem:[%s333_s0] sm:$0xff]   ;;  %v253_v7 = vld [vmem:[%s332_s1 + $0x8] sm:$0xff]  }
   0x4   :  { %229 = vmatprep.subr.bf16.mxu0 %v248_v1  ;;  %243 = vmatprep.mubr.bf16.mxu0 %v255_v4  ;;  %v254_v8 = vld [vmem:[%s332_s1] sm:$0xff]   ;;  %v256_v9 = vld [vmem:[%s333_s0 + $0x8] sm:$0xff]   ;;  %v183_v45 = vsub.s32 0, %v182_v43 }
   0x5   :  { %v176_v44 = vld [vmem:[%s334_s2] sm:$0x1] }
   0x6   :  { %v178_v48 = vld [vmem:[%s335_s3] sm:$0x1] }
   0x7   :  { %230 = vmatpush3.bf16.msra.mxu0 %v248_v1 }
   0x8   :  { %231 = vmatprep.subr.bf16.mxu0 %v249_v2 }
   0xb   :  { %232 = vmatpush3.bf16.msra.mxu0 %v249_v2 }
   0xc   :  { %233 = vmatprep.subr.bf16.mxu0 %v250_v3 }
   0xf   :  { %234 = vmatpush3.bf16.msra.mxu0 %v250_v3 }
  0x10   :  { %235 = vmatprep.subr.bf16.mxu0 %v251_v5 }
  0x13   :  { %236 = vmatpush3.bf16.msra.mxu0 %v251_v5 }
  0x14   :  { %237 = vmatprep.subr.bf16.mxu0 %v252_v6 }
  0x17   :  { %238 = vmatpush3.bf16.msra.mxu0 %v252_v6 }
  0x18   :  { %239 = vmatprep.subr.bf16.mxu0 %v253_v7 }
  0x1b   :  { %240 = vmatpush3.bf16.msra.mxu0 %v253_v7 }
  0x1c   :  { %241 = vmatprep.subr.bf16.mxu0 %v254_v8 }
  0x1f   :  { %242 = vmatpush3.bf16.msra.mxu0 %v254_v8 }
  0x22   :  { %244 = vmatmul.mubr.bf16.vlgmr.msra.gmra.mxu0 %v256_v9 }
  0xe2   :  { %v245_v10 = vpop.f32.mrf.mxu0 }
  0xe3   :  { %v158_v17 = vmul.f32 %v245_v10, %v245_v10 }
  0xe4   :  { %v132_v11 = vpop.f32.mrf.mxu0 }
  0xe5   :  { %v156_v14 = vmul.f32 %v132_v11, %v132_v11 }
  0xe6   :  { %v246_v12 = vpop.f32.mrf.mxu0 }
  0xe7   :  { %v159_v20 = vmul.f32 %v246_v12, %v246_v12 }
  0xe8   :  { %v135_v13 = vpop.f32.mrf.mxu0 }
  0xe9   :  { %v147_v15 = vadd.f32 %v135_v13, %v132_v11  ;;  %v157_v16 = vmul.f32 %v135_v13, %v135_v13 }
  0xeb   :  { %v148_v18 = vadd.f32 %v245_v10, %v147_v15  ;;  %v160_v19 = vadd.f32 %v157_v16, %v156_v14 }
  0xed   :  { %v149_v21 = vadd.f32 %v246_v12, %v148_v18  ;;  %v161_v22 = vadd.f32 %v160_v19, %v158_v17 }
  0xef   :  { %v150_v23 = vrot.slane %v149_v21, 4  ;;  %v162_v24 = vadd.f32 %v161_v22, %v159_v20 }
  0xf1   :  { %v151_v25 = vadd.f32 %v150_v23, %v149_v21  ;;  %v163_v26 = vrot.slane %v162_v24, 4 }
  0xf3   :  { %v152_v27 = vrot.slane %v151_v25, 2  ;;  %v164_v28 = vadd.f32 %v163_v26, %v162_v24 }
  0xf5   :  { %v153_v29 = vadd.f32 %v152_v27, %v151_v25  ;;  %v165_v30 = vrot.slane %v164_v28, 2 }
  0xf7   :  { %v154_v31 = vrot.slane %v153_v29, 1  ;;  %v166_v32 = vadd.f32 %v165_v30, %v164_v28 }
  0xf9   :  { %v155_v33 = vadd.f32 %v154_v31, %v153_v29  ;;  %v167_v34 = vrot.slane %v166_v32, 1 }
  0xfb   :  { %v168_v35 = vadd.f32 %v167_v34, %v166_v32  ;;  %v169_v36 = vmul.f32 0.03125, %v155_v33 }
  0xfd   :  { %v170_v37 = vmul.f32 0.03125, %v168_v35  ;;  %v171_v38 = vmul.f32 %v169_v36, %v169_v36 }
  0xff   :  { %v172_v39 = vsub.f32 %v170_v37, %v171_v38 }
 0x101   :  { %v173_v40 = vmax.f32 %v172_v39, 0.0 }
 0x103   :  { %v174_v41 = vadd.f32 1e-05, %v173_v40 }
 0x105   :  { %257 = vrsqrt.f32 %v174_v41 }
 0x112   :  { %v258_v46 = vpop.eup %257 }
 0x113   :  { %v177_v47 = vmul.f32 %v258_v46, %v176_v44 }
 0x115   :  { %v179_v49 = vmul.f32 %v177_v47, %v169_v36  ;;  %v184_v50 = vrot.slane %v177_v47, %v183_v45 }
 0x117   :  { %v180_v51 = vsub.f32 %v178_v48, %v179_v49  ;;  %v185_v52 = vmul.f32 %v184_v50, %v132_v11  ;;  %v186_v53 = vmul.f32 %v184_v50, %v135_v13  ;;  %v187_v54 = vmul.f32 %v245_v10, %v184_v50 }
 0x118   :  { %v188_v55 = vmul.f32 %v246_v12, %v184_v50 }
 0x119   :  { %v193_v56 = vrot.slane %v180_v51, %v183_v45 }
 0x11b   :  { %v195_v57 = vadd.f32 %v193_v56, %v185_v52  ;;  %v196_v58 = vadd.f32 %v193_v56, %v186_v53  ;;  %v197_v59 = vadd.f32 %v193_v56, %v187_v54  ;;  %v198_v60 = vadd.f32 %v193_v56, %v188_v55 }
 0x11d   :  { %199 = vst [vmem:[%s336_s4] sm:$0xff] %v195_v57  ;;  %200 = vst [vmem:[%s336_s4 + $0x8] sm:$0xff] %v196_v58 }
 0x11e   :  { %201 = vst [vmem:[%s336_s4 + $0x10] sm:$0xff] %v197_v59  ;;  %202 = vst [vmem:[%s336_s4 + $0x18] sm:$0xff] %v198_v60 }

// kernel: resnet_forward.18
= control target key start
LH: loop header
LB: loop body
LE: loop exit
PB: predicated region body
PF: predicated region fallthrough
CT: control target
= control target key end

     0   :  { %s1947_s1 = inlined_call_operand.vmem [shape: bf16[640,128], index: 1, kind: input, shape index: {}]   ;;  %s1948_s0 = inlined_call_operand.vmem [shape: bf16[128,640], index: 0, kind: input, shape index: {}]   ;;  %s1949_s2 = inlined_call_operand.vmem [shape: f32[1,128], index: 2, kind: input, shape index: {}]   ;;  %s1950_s3 = inlined_call_operand.vmem [shape: f32[1,128], index: 3, kind: input, shape index: {}]   ;;  %s1951_s4 = inlined_call_operand.vmem [shape: f32[128,128], index: 4, kind: output, shape index: {}]  }
   0x1   :  { %v1305_v0 = vld [vmem:[%s1947_s1 + $0x78] sm:$0xff]   ;;  %v1309_v4 = vld [vmem:[%s1947_s1 + $0x70] sm:$0xff]   ;;  %v1313_v8 = vld [vmem:[%s1947_s1 + $0x68] sm:$0xff]  }
   0x2   :  { %v1306_v1 = vld [vmem:[%s1947_s1 + $0xf8] sm:$0xff]   ;;  %1113 = vmatprep.subr.bf16.mxu0 %v1305_v0  ;;  %v1310_v5 = vld [vmem:[%s1947_s1 + $0xf0] sm:$0xff]   ;;  %v1314_v9 = vld [vmem:[%s1947_s1 + $0xe8] sm:$0xff]  }
   0x3   :  { %v1307_v2 = vld [vmem:[%s1947_s1 + $0x38] sm:$0xff]   ;;  %1177 = vmatprep.subr.bf16.mxu1 %v1306_v1  ;;  %v1311_v6 = vld [vmem:[%s1947_s1 + $0x30] sm:$0xff]   ;;  %v1315_v10 = vld [vmem:[%s1947_s1 + $0x28] sm:$0xff]  }
   0x4   :  { %v1308_v3 = vld [vmem:[%s1947_s1 + $0xb8] sm:$0xff]   ;;  %1114 = vmatpush3.bf16.msra.mxu0 %v1307_v2  ;;  %v1312_v7 = vld [vmem:[%s1947_s1 + $0xb0] sm:$0xff]   ;;  %v1316_v11 = vld [vmem:[%s1947_s1 + $0xa8] sm:$0xff]  }
   0x5   :  { %1178 = vmatpush3.bf16.msra.mxu1 %v1308_v3  ;;  %1115 = vmatprep.subr.bf16.mxu0 %v1309_v4  ;;  %v1317_v12 = vld [vmem:[%s1947_s1 + $0x60] sm:$0xff]   ;;  %v1321_v16 = vld [vmem:[%s1947_s1 + $0x58] sm:$0xff]   ;;  %v1325_v20 = vld [vmem:[%s1947_s1 + $0x50] sm:$0xff]  }
   0x6   :  { %1179 = vmatprep.subr.bf16.mxu1 %v1310_v5  ;;  %v1318_v13 = vld [vmem:[%s1947_s1 + $0xe0] sm:$0xff]   ;;  %v1322_v17 = vld [vmem:[%s1947_s1 + $0xd8] sm:$0xff]   ;;  %v1326_v21 = vld [vmem:[%s1947_s1 + $0xd0] sm:$0xff]  }
   0x7   :  { %v1319_v14 = vld [vmem:[%s1947_s1 + $0x20] sm:$0xff]   ;;  %v1323_v18 = vld [vmem:[%s1947_s1 + $0x18] sm:$0xff]   ;;  %v1327_v22 = vld [vmem:[%s1947_s1 + $0x10] sm:$0xff]  }
   0x8   :  { %1116 = vmatpush3.bf16.msra.mxu0 %v1311_v6  ;;  %v1320_v15 = vld [vmem:[%s1947_s1 + $0xa0] sm:$0xff]   ;;  %v1324_v19 = vld [vmem:[%s1947_s1 + $0x98] sm:$0xff]   ;;  %v1328_v23 = vld [vmem:[%s1947_s1 + $0x90] sm:$0xff]  }
   0x9   :  { %1180 = vmatpush3.bf16.msra.mxu1 %v1312_v7  ;;  %1117 = vmatprep.subr.bf16.mxu0 %v1313_v8  ;;  %v1329_v24 = vld [vmem:[%s1947_s1 + $0x48] sm:$0xff]   ;;  %v1333_v28 = vld [vmem:[%s1947_s1 + $0x40] sm:$0xff]   ;;  %v1343_v36 = vld [vmem:[%s1947_s1 + $0x138] sm:$0xff]  }
   0xa   :  { %1181 = vmatprep.subr.bf16.mxu1 %v1314_v9  ;;  %v1330_v25 = vld [vmem:[%s1947_s1 + $0xc8] sm:$0xff]   ;;  %v1334_v29 = vld [vmem:[%s1947_s1 + $0xc0] sm:$0xff]   ;;  %v1350_v39 = vld [vmem:[%s1947_s1 + $0x130] sm:$0xff]  }
   0xb   :  { %v1331_v26 = vld [vmem:[%s1947_s1 + $0x8] sm:$0xff]   ;;  %v1335_v30 = vld [vmem:[%s1947_s1] sm:$0xff]   ;;  %v1353_v43 = vld [vmem:[%s1948_s0 + $0x5c] ss:$20 sps:$4 sm:$0xff]  }
   0xc   :  { %1118 = vmatpush3.bf16.msra.mxu0 %v1315_v10  ;;  %v1332_v27 = vld [vmem:[%s1947_s1 + $0x88] sm:$0xff]   ;;  %v1336_v31 = vld [vmem:[%s1947_s1 + $0x80] sm:$0xff]   ;;  %v1358_v48 = vld [vmem:[%s1948_s0 + $0x7c] ss:$20 sps:$4 sm:$0xff]  }
   0xd   :  { %1182 = vmatpush3.bf16.msra.mxu1 %v1316_v11  ;;  %1119 = vmatprep.subr.bf16.mxu0 %v1317_v12  ;;  %v1337_v32 = vld [vmem:[%s1948_s0] ss:$20 sps:$4 sm:$0xff]   ;;  %v1339_v33 = vld [vmem:[%s1948_s0 + $0x4] ss:$20 sps:$4 sm:$0xff]   ;;  %v1340_v34 = vld [vmem:[%s1948_s0 + $0x8] ss:$20 sps:$4 sm:$0xff]  }
   0xe   :  { %1183 = vmatprep.subr.bf16.mxu1 %v1318_v13  ;;  %v1342_v35 = vld [vmem:[%s1948_s0 + $0xc] ss:$20 sps:$4 sm:$0xff]   ;;  %626 = vmatprep.mubr.bf16.mxu0 %v1339_v33  ;;  %v1346_v38 = vld [vmem:[%s1948_s0 + $0x34] ss:$20 sps:$4 sm:$0xff]   ;;  %v1349_v41 = vld [vmem:[%s1948_s0 + $0x30] ss:$20 sps:$4 sm:$0xff]  }
   0xf   :  { %723 = vmatprep.mubr.bf16.mxu1 %v1342_v35  ;;  %v1344_v37 = vld [vmem:[%s1948_s0 + $0x2c] ss:$20 sps:$4 sm:$0xff]   ;;  %v1348_v40 = vld [vmem:[%s1948_s0 + $0x28] ss:$20 sps:$4 sm:$0xff]   ;;  %v1355_v46 = vld [vmem:[%s1948_s0 + $0x50] ss:$20 sps:$4 sm:$0xff]  }
  0x10   :  { %1120 = vmatpush3.bf16.msra.mxu0 %v1319_v14  ;;  %v1351_v42 = vld [vmem:[%s1948_s0 + $0x54] ss:$20 sps:$4 sm:$0xff]   ;;  %v1364_v45 = vld [vmem:[%s1947_s1 + $0x120] sm:$0xff]   ;;  %v1356_v47 = vld [vmem:[%s1948_s0 + $0x58] ss:$20 sps:$4 sm:$0xff]  }
  0x11   :  { %1184 = vmatpush3.bf16.msra.mxu1 %v1320_v15  ;;  %1121 = vmatprep.subr.bf16.mxu0 %v1321_v16  ;;  %v1357_v44 = vld [vmem:[%s1947_s1 + $0x128] sm:$0xff]   ;;  %v1360_v49 = vld [vmem:[%s1948_s0 + $0x84] ss:$20 sps:$4 sm:$0xff]   ;;  %v1378_v51 = vld [vmem:[%s1947_s1 + $0x110] sm:$0xff]  }
  0x12   :  { %1185 = vmatprep.subr.bf16.mxu1 %v1322_v17  ;;  %v1371_v50 = vld [vmem:[%s1947_s1 + $0x118] sm:$0xff]   ;;  %v1363_v53 = vld [vmem:[%s1948_s0 + $0x80] ss:$20 sps:$4 sm:$0xff]   ;;  %v1385_v55 = vld [vmem:[%s1947_s1 + $0x108] sm:$0xff]  }
  0x13   :  { %v1362_v52 = vld [vmem:[%s1948_s0 + $0x78] ss:$20 sps:$4 sm:$0xff]   ;;  %v1392_v57 = vld [vmem:[%s1947_s1 + $0x100] sm:$0xff]   ;;  %v1370_v59 = vld [vmem:[%s1948_s0 + $0xa8] ss:$20 sps:$4 sm:$0xff]  }
  0x14   :  { %1122 = vmatpush3.bf16.msra.mxu0 %v1323_v18  ;;  %v1365_v54 = vld [vmem:[%s1948_s0 + $0xa4] ss:$20 sps:$4 sm:$0xff]   ;;  %v1367_v56 = vld [vmem:[%s1948_s0 + $0xac] ss:$20 sps:$4 sm:$0xff]   ;;  %v1374_v61 = vld [vmem:[%s1948_s0 + $0xd4] ss:$20 sps:$4 sm:$0xff]  }
  0x15   :  { %1186 = vmatpush3.bf16.msra.mxu1 %v1324_v19  ;;  %1123 = vmatprep.subr.bf16.mxu0 %v1325_v20  ;;  %v1369_v58 = vld [vmem:[%s1948_s0 + $0xa0] ss:$20 sps:$4 sm:$0xff]   ;;  %v1376_v62 = vld [vmem:[%s1948_s0 + $0xc8] ss:$20 sps:$4 sm:$0xff]   ;;  %v1377_v63 = vld [vmem:[%s1948_s0 + $0xd0] ss:$20 sps:$4 sm:$0xff]  }
  0x16   :  { %1187 = vmatprep.subr.bf16.mxu1 %v1326_v21  ;;  %v1372_v60 = vld [vmem:[%s1948_s0 + $0xcc] ss:$20 sps:$4 sm:$0xff]   ;;  %v1379_v0 = vld [vmem:[%s1948_s0 + $0xf4] ss:$20 sps:$4 sm:$0xff]   ;;  %v1381_v1 = vld [vmem:[%s1948_s0 + $0xfc] ss:$20 sps:$4 sm:$0xff]  }
  0x17   :  { %v1383_v2 = vld [vmem:[%s1948_s0 + $0xf0] ss:$20 sps:$4 sm:$0xff]   ;;  %v1384_v3 = vld [vmem:[%s1948_s0 + $0xf8] ss:$20 sps:$4 sm:$0xff]   ;;  %v1391_v7 = vld [vmem:[%s1948_s0 + $0x120] ss:$20 sps:$4 sm:$0xff]  }
  0x18   :  { %1124 = vmatpush3.bf16.msra.mxu0 %v1327_v22  ;;  %v1386_v4 = vld [vmem:[%s1948_s0 + $0x11c] ss:$20 sps:$4 sm:$0xff]   ;;  %v1388_v5 = vld [vmem:[%s1948_s0 + $0x124] ss:$20 sps:$4 sm:$0xff]   ;;  %v1397_v12 = vld [vmem:[%s1948_s0 + $0x60] ss:$20 sps:$4 sm:$0xff]  }
  0x19   :  { %1188 = vmatpush3.bf16.msra.mxu1 %v1328_v23  ;;  %1125 = vmatprep.subr.bf16.mxu0 %v1329_v24  ;;  %v1390_v6 = vld [vmem:[%s1948_s0 + $0x118] ss:$20 sps:$4 sm:$0xff]   ;;  %v1393_v8 = vld [vmem:[%s1948_s0 + $0x10] ss:$20 sps:$4 sm:$0xff]   ;;  %v1398_v13 = vld [vmem:[%s1948_s0 + $0x100] ss:$20 sps:$4 sm:$0xff]  }
  0x1a   :  { %1189 = vmatprep.subr.bf16.mxu1 %v1330_v25  ;;  %v1394_v9 = vld [vmem:[%s1948_s0 + $0xb0] ss:$20 sps:$4 sm:$0xff]   ;;  %v1395_v10 = vld [vmem:[%s1948_s0 + $0x38] ss:$20 sps:$4 sm:$0xff]   ;;  %v1399_v14 = vld [vmem:[%s1948_s0 + $0x88] ss:$20 sps:$4 sm:$0xff]  }
  0x1b   :  { %v1396_v11 = vld [vmem:[%s1948_s0 + $0xd8] ss:$20 sps:$4 sm:$0xff]   ;;  %v1400_v15 = vld [vmem:[%s1948_s0 + $0x128] ss:$20 sps:$4 sm:$0xff]  }
  0x1c   :  { %1126 = vmatpush3.bf16.msra.mxu0 %v1331_v26 }
  0x1d   :  { %1190 = vmatpush3.bf16.msra.mxu1 %v1332_v27  ;;  %1127 = vmatprep.subr.bf16.mxu0 %v1333_v28 }
  0x1e   :  { %1191 = vmatprep.subr.bf16.mxu1 %v1334_v29 }
  0x20   :  { %1128 = vmatpush3.bf16.msra.mxu0 %v1335_v30 }
  0x21   :  { %1192 = vmatpush3.bf16.msra.mxu1 %v1336_v31  ;;  %1257 = vmatprep.subr.bf16.mxu0 %v1343_v36 }
  0x22   :  { %1289 = vmatprep.subr.bf16.mxu1 %v1343_v36 }
  0x23   :  { %627 = vmatmul.mubr.bf16.vlgmr.msra.gmra.mxu0 %v1337_v32 }
  0x24   :  { %724 = vmatmul.mubr.bf16.vlgmr.msra.gmra.mxu1 %v1340_v34  ;;  %1258 = vmatpush3.bf16.msra.mxu0 %v1343_v36 }
  0x25   :  { %634 = vmatprep.mubr.bf16.mxu0 %v1344_v37  ;;  %731 = vmatprep.mubr.bf16.mxu1 %v1346_v38 }
  0x26   :  { %1297 = vmatpush3.bf16.msra.mxu1 %v1343_v36  ;;  %1259 = vmatprep.subr.bf16.mxu0 %v1350_v39 }
  0x27   :  { %1290 = vmatprep.subr.bf16.mxu1 %v1350_v39 }
  0x28   :  { %1260 = vmatpush3.bf16.msra.mxu0 %v1350_v39 }
  0x29   :  { %1261 = vmatprep.subr.bf16.mxu0 %v1357_v44 }
  0x2a   :  { %1298 = vmatpush3.bf16.msra.mxu1 %v1350_v39 }
  0x2b   :  { %635 = vmatmul.mubr.bf16.gmra.mxu0 %v1348_v40  ;;  %1291 = vmatprep.subr.bf16.mxu1 %v1357_v44 }
  0x2c   :  { %732 = vmatmul.mubr.bf16.gmra.mxu1 %v1349_v41  ;;  %642 = vmatprep.mubr.bf16.mxu0 %v1351_v42 }
  0x2d   :  { %739 = vmatprep.mubr.bf16.mxu1 %v1353_v43  ;;  %1262 = vmatpush3.bf16.msra.mxu0 %v1357_v44 }
  0x2e   :  { %1263 = vmatprep.subr.bf16.mxu0 %v1364_v45  ;;  %1299 = vmatpush3.bf16.msra.mxu1 %v1357_v44 }
  0x2f   :  { %1292 = vmatprep.subr.bf16.mxu1 %v1364_v45 }
  0x31   :  { %1264 = vmatpush3.bf16.msra.mxu0 %v1364_v45 }
  0x32   :  { %1265 = vmatprep.subr.bf16.mxu0 %v1371_v50  ;;  %1300 = vmatpush3.bf16.msra.mxu1 %v1364_v45 }
  0x33   :  { %643 = vmatmul.mubr.bf16.gmra.mxu0 %v1355_v46  ;;  %1293 = vmatprep.subr.bf16.mxu1 %v1371_v50 }
  0x34   :  { %740 = vmatmul.mubr.bf16.gmra.mxu1 %v1356_v47  ;;  %650 = vmatprep.mubr.bf16.mxu0 %v1358_v48 }
  0x35   :  { %747 = vmatprep.mubr.bf16.mxu1 %v1360_v49  ;;  %1266 = vmatpush3.bf16.msra.mxu0 %v1371_v50 }
  0x36   :  { %1267 = vmatprep.subr.bf16.mxu0 %v1378_v51  ;;  %1301 = vmatpush3.bf16.msra.mxu1 %v1371_v50 }
  0x37   :  { %1294 = vmatprep.subr.bf16.mxu1 %v1378_v51 }
  0x39   :  { %1268 = vmatpush3.bf16.msra.mxu0 %v1378_v51 }
  0x3a   :  { %1269 = vmatprep.subr.bf16.mxu0 %v1385_v55  ;;  %1302 = vmatpush3.bf16.msra.mxu1 %v1378_v51 }
  0x3b   :  { %651 = vmatmul.mubr.bf16.gmra.mxu0 %v1362_v52  ;;  %1295 = vmatprep.subr.bf16.mxu1 %v1385_v55 }
  0x3c   :  { %748 = vmatmul.mubr.bf16.gmra.mxu1 %v1363_v53  ;;  %658 = vmatprep.mubr.bf16.mxu0 %v1365_v54 }
  0x3d   :  { %755 = vmatprep.mubr.bf16.mxu1 %v1367_v56  ;;  %1270 = vmatpush3.bf16.msra.mxu0 %v1385_v55 }
  0x3e   :  { %1271 = vmatprep.subr.bf16.mxu0 %v1392_v57  ;;  %1303 = vmatpush3.bf16.msra.mxu1 %v1385_v55 }
  0x3f   :  { %1296 = vmatprep.subr.bf16.mxu1 %v1392_v57 }
  0x41   :  { %1272 = vmatpush3.bf16.msra.mxu0 %v1392_v57 }
  0x42   :  { %1304 = vmatpush3.bf16.msra.mxu1 %v1392_v57 }
  0x43   :  { %659 = vmatmul.mubr.bf16.gmra.mxu0 %v1369_v58 }
  0x44   :  { %756 = vmatmul.mubr.bf16.gmra.mxu1 %v1370_v59  ;;  %666 = vmatprep.mubr.bf16.mxu0 %v1372_v60 }
  0x45   :  { %763 = vmatprep.mubr.bf16.mxu1 %v1374_v61 }
  0x4b   :  { %667 = vmatmul.mubr.bf16.gmra.mxu0 %v1376_v62 }
  0x4c   :  { %764 = vmatmul.mubr.bf16.gmra.mxu1 %v1377_v63  ;;  %674 = vmatprep.mubr.bf16.mxu0 %v1379_v0 }
  0x4d   :  { %771 = vmatprep.mubr.bf16.mxu1 %v1381_v1 }
  0x53   :  { %675 = vmatmul.mubr.bf16.gmra.mxu0 %v1383_v2 }
  0x54   :  { %772 = vmatmul.mubr.bf16.gmra.mxu1 %v1384_v3  ;;  %682 = vmatprep.mubr.bf16.mxu0 %v1386_v4 }
  0x55   :  { %779 = vmatprep.mubr.bf16.mxu1 %v1388_v5 }
  0x5b   :  { %683 = vmatmul.mubr.bf16.gmra.mxu0 %v1390_v6 }
  0x5c   :  { %780 = vmatmul.mubr.bf16.gmra.mxu1 %v1391_v7  ;;  %1273 = vmatprep.mubr.bf16.mxu0 %v1393_v8 }
  0x5d   :  { %1281 = vmatprep.mubr.bf16.mxu1 %v1394_v9 }
  0x63   :  { %1274 = vmatmul.mubr.bf16.vlgmr.msra.gmra.mxu0 %v1395_v10 }
  0x64   :  { %1282 = vmatmul.mubr.bf16.vlgmr.msra.gmra.mxu1 %v1396_v11  ;;  %1277 = vmatprep.mubr.bf16.mxu0 %v1397_v12 }
  0x65   :  { %1285 = vmatprep.mubr.bf16.mxu1 %v1398_v13 }
  0x6b   :  { %1278 = vmatmul.mubr.bf16.gmra.mxu0 %v1399_v14 }
  0x6c   :  { %1286 = vmatmul.mubr.bf16.gmra.mxu1 %v1400_v15 }
  0xe3   :  { %v1129_v16 = vpop.f32.mrf.mxu0 }
  0xe4   :  { %v1193_v17 = vpop.f32.mrf.mxu1 }
  0xe5   :  { %v1130_v18 = vpop.f32.mrf.mxu0 }
  0xe6   :  { %v1668_v19 = vadd.f32 %v1130_v18, %v1129_v16  ;;  %v1194_v20 = vpop.f32.mrf.mxu1 }
  0xe7   :  { %v1132_v21 = vpop.f32.mrf.mxu0  ;;  %v1195_v15 = vadd.f32 %v1194_v20, %v1193_v17 }
  0xe8   :  { %v1196_v22 = vpop.f32.mrf.mxu1 }
  0xe9   :  { %v1133_v23 = vpop.f32.mrf.mxu0 }
  0xea   :  { %v1197_v24 = vpop.f32.mrf.mxu1 }
  0xeb   :  { %v1135_v25 = vpop.f32.mrf.mxu0 }
  0xec   :  { %v1199_v26 = vpop.f32.mrf.mxu1 }
  0xed   :  { %v1136_v27 = vpop.f32.mrf.mxu0 }
  0xee   :  { %v1200_v28 = vpop.f32.mrf.mxu1 }
  0xef   :  { %v1138_v29 = vpop.f32.mrf.mxu0 }
  0xf0   :  { %v1202_v30 = vpop.f32.mrf.mxu1 }
  0xf1   :  { %v1139_v31 = vpop.f32.mrf.mxu0 }
  0xf2   :  { %v1203_v32 = vpop.f32.mrf.mxu1 }
  0xf3   :  { %v1141_v33 = vpop.f32.mrf.mxu0 }
  0xf4   :  { %v1205_v34 = vpop.f32.mrf.mxu1 }
  0xf5   :  { %v1142_v35 = vpop.f32.mrf.mxu0 }
  0xf6   :  { %v1206_v36 = vpop.f32.mrf.mxu1 }
  0xf7   :  { %v1670_v37 = vpop.f32.mrf.mxu0 }
  0xf8   :  { %v1672_v38 = vpop.f32.mrf.mxu1 }
  0xf9   :  { %v1674_v39 = vpop.f32.mrf.mxu0 }
  0xfa   :  { %v1676_v40 = vpop.f32.mrf.mxu1 }
  0xfb   :  { %v1678_v41 = vpop.f32.mrf.mxu0 }
  0xfc   :  { %v1680_v42 = vpop.f32.mrf.mxu1 }
  0xfd   :  { %v1682_v43 = vpop.f32.mrf.mxu0 }
  0xfe   :  { %v1684_v44 = vpop.f32.mrf.mxu1 }
  0xff   :  { %v1686_v45 = vpop.f32.mrf.mxu0 }
 0x100   :  { %v1688_v46 = vpop.f32.mrf.mxu1 }
 0x101   :  { %v1690_v47 = vpop.f32.mrf.mxu0 }
 0x102   :  { %v1692_v48 = vpop.f32.mrf.mxu1 }
 0x103   :  { %v1694_v49 = vpop.f32.mrf.mxu0 }
 0x104   :  { %v1696_v50 = vpop.f32.mrf.mxu1 }
 0x105   :  { %v1698_v51 = vpop.f32.mrf.mxu0 }
 0x106   :  { %v1700_v52 = vpop.f32.mrf.mxu1 }
 0x107   :  { %v1702_v53 = vpop.f32.mrf.mxu0 }
 0x108   :  { %v1704_v54 = vpop.f32.mrf.mxu1 }
 0x109   :  { %v1706_v55 = vpop.f32.mrf.mxu0 }
 0x10a   :  { %v1708_v56 = vpop.f32.mrf.mxu1 }
 0x10b   :  { %v1710_v57 = vpop.f32.mrf.mxu0 }
 0x10c   :  { %v1712_v58 = vpop.f32.mrf.mxu1 }
 0x10d   :  { %v1714_v59 = vpop.f32.mrf.mxu0 }
 0x10e   :  { %v1716_v60 = vpop.f32.mrf.mxu1 }
 0x10f   :  { %v1718_v61 = vpop.f32.mrf.mxu0 }
 0x110   :  { %v1720_v62 = vpop.f32.mrf.mxu1 }
 0x111   :  { %v1722_v63 = vpop.f32.mrf.mxu0 }
 0x112   :  { %v1724_v0 = vpop.f32.mrf.mxu1 }
 0x113   :  { %v1726_v1 = vpop.f32.mrf.mxu0 }
 0x114   :  { %1952 = vst [vmem:[#allocation2_spill] sm:$0xff] %v1726_v1  ;;  %v1728_v2 = vpop.f32.mrf.mxu1 }
 0x115   :  { %1953 = vst [vmem:[#allocation3_spill] sm:$0xff] %v1728_v2  ;;  %v1730_v3 = vpop.f32.mrf.mxu0  ;;  %v1204_v2 = vadd.f32 %v1203_v32, %v1202_v30 }
 0x116   :  { %1954 = vst [vmem:[#allocation4_spill] sm:$0xff] %v1730_v3  ;;  %v1732_v4 = vpop.f32.mrf.mxu1  ;;  %v1207_v3 = vadd.f32 %v1206_v36, %v1205_v34  ;;  %v1152_v34 = vadd.f32 %v1690_v47, %v1686_v45 }
 0x117   :  { %1955 = vst [vmem:[#allocation5_spill] sm:$0xff] %v1732_v4  ;;  %v1734_v5 = vpop.f32.mrf.mxu0 }
 0x118   :  { %1956 = vst [vmem:[#allocation6_spill] sm:$0xff] %v1734_v5  ;;  %v1736_v6 = vpop.f32.mrf.mxu1  ;;  %v1137_v5 = vadd.f32 %v1136_v27, %v1135_v25  ;;  %v1146_v25 = vadd.f32 %v1674_v39, %v1670_v37  ;;  %v1149_v27 = vadd.f32 %v1682_v43, %v1678_v41  ;;  %v1219_v43 = vadd.f32 %v1700_v52, %v1696_v50 }
 0x119   :  { %1957 = vst [vmem:[#allocation7_spill] sm:$0xff] %v1736_v6  ;;  %v1738_v7 = vpop.f32.mrf.mxu0 }
 0x11a   :  { %1958 = vst [vmem:[#allocation8_spill] sm:$0xff] %v1738_v7  ;;  %v1740_v8 = vpop.f32.mrf.mxu1  ;;  %v1134_v7 = vadd.f32 %v1133_v23, %v1132_v21 }
 0x11b   :  { %1959 = vst [vmem:[#allocation9_spill] sm:$0xff] %v1740_v8  ;;  %v1742_v9 = vpop.f32.mrf.mxu0  ;;  %v1198_v8 = vadd.f32 %v1197_v24, %v1196_v22 }
 0x11c   :  { %1960 = vst [vmem:[#allocation10_spill] sm:$0xff] %v1742_v9  ;;  %v1744_v10 = vpop.f32.mrf.mxu1  ;;  %v1201_v9 = vadd.f32 %v1200_v28, %v1199_v26  ;;  %v1210_v26 = vadd.f32 %v1676_v40, %v1672_v38  ;;  %v1213_v28 = vadd.f32 %v1684_v44, %v1680_v42  ;;  %v1155_v42 = vadd.f32 %v1698_v51, %v1694_v49 }
 0x11d   :  { %1961 = vst [vmem:[#allocation11_spill] sm:$0xff] %v1744_v10  ;;  %v1746_v11 = vpop.f32.mrf.mxu0  ;;  %v726_v10 = vadd.f32 %v1195_v15, %v1668_v19  ;;  %v1228_v15 = vadd.f32 %v1724_v0, %v1720_v62 }
 0x11e   :  { %1962 = vst [vmem:[#allocation12_spill] sm:$0xff] %v1746_v11  ;;  %v1748_v12 = vpop.f32.mrf.mxu1  ;;  %v734_v20 = vadd.f32 %v1201_v9, %v1137_v5  ;;  %v750_v44 = vadd.f32 %v1213_v28, %v1149_v27  ;;  %v1222_v5 = vadd.f32 %v1708_v56, %v1704_v54  ;;  %v758_v54 = vadd.f32 %v1219_v43, %v1155_v42 }
 0x11f   :  { %1963 = vst [vmem:[#allocation13_spill] sm:$0xff] %v1748_v12  ;;  %v1750_v13 = vpop.f32.mrf.mxu0  ;;  %v1140_v12 = vadd.f32 %v1139_v31, %v1138_v29  ;;  %v1972_v27 = vld [vmem:[#allocation6_spill] sm:$0xff] }
 0x120   :  { %1964 = vst [vmem:[#allocation14_spill] sm:$0xff] %v1750_v13  ;;  %v1752_v14 = vpop.f32.mrf.mxu1  ;;  %v1143_v13 = vadd.f32 %v1142_v35, %v1141_v33  ;;  %v1216_v35 = vadd.f32 %v1692_v48, %v1688_v46 }
 0x121   :  { %1965 = vst [vmem:[#allocation15_spill] sm:$0xff] %v1752_v14  ;;  %v1754_v16 = vpop.f32.mrf.mxu0  ;;  %v737_v23 = vadd.f32 %v1204_v2, %v1140_v12  ;;  %v745_v2 = vadd.f32 %v1210_v26, %v1146_v25  ;;  %v1971_v25 = vld [vmem:[#allocation5_spill] sm:$0xff]  ;;  %v1973_v28 = vld [vmem:[#allocation8_spill] sm:$0xff] }
 0x122   :  { %1966 = vst [vmem:[#allocation16_spill] sm:$0xff] %v1754_v16  ;;  %v1756_v18 = vpop.f32.mrf.mxu1  ;;  %v742_v19 = vadd.f32 %v1207_v3, %v1143_v13  ;;  %v1158_v3 = vadd.f32 %v1706_v55, %v1702_v53  ;;  %v753_v51 = vadd.f32 %v1216_v35, %v1152_v34  ;;  %v1225_v53 = vadd.f32 %v1716_v60, %v1712_v58 }
 0x123   :  { %1967 = vst [vmem:[#allocation17_spill] sm:$0xff] %v1756_v18  ;;  %v1275_v6 = vpop.f32.mrf.mxu0  ;;  %v729_v18 = vadd.f32 %v1198_v8, %v1134_v7  ;;  %v1164_v13 = vadd.f32 %v1722_v63, %v1718_v61 }
 0x124   :  { %v1758_v4 = vpop.f32.mrf.mxu1  ;;  %v1765_v22 = vadd.f32 %v1275_v6, %v734_v20  ;;  %v1968_v20 = vld [vmem:[#allocation2_spill] sm:$0xff] }
 0x125   :  { %v822_v11 = vpop.f32.mrf.mxu0  ;;  %v769_v34 = vadd.f32 %v1228_v15, %v1164_v13  ;;  %v1977_v42 = vld [vmem:[#allocation12_spill] sm:$0xff] }
 0x126   :  { %v854_v14 = vpop.f32.mrf.mxu1  ;;  %v1761_v16 = vadd.f32 %v822_v11, %v726_v10  ;;  %v908_v38 = vmul.f32 %v1765_v22, %v1765_v22  ;;  %v1161_v10 = vadd.f32 %v1714_v59, %v1710_v57 }
 0x127   :  { %v1276_v17 = vpop.f32.mrf.mxu0  ;;  %v1825_v59 = vadd.f32 %v854_v14, %v758_v54 }
 0x128   :  { %v1763_v1 = vpop.f32.mrf.mxu1  ;;  %v906_v30 = vmul.f32 %v1761_v16, %v1761_v16  ;;  %v1779_v31 = vadd.f32 %v1276_v17, %v737_v23  ;;  %v766_v61 = vadd.f32 %v1225_v53, %v1161_v10 }
 0x129   :  { %v825_v21 = vpop.f32.mrf.mxu0 }
 0x12a   :  { %v1767_v24 = vadd.f32 %v825_v21, %v729_v18  ;;  %v857_v36 = vpop.f32.mrf.mxu1  ;;  %v909_v46 = vmul.f32 %v1779_v31, %v1779_v31  ;;  %v761_v18 = vadd.f32 %v1222_v5, %v1158_v3  ;;  %v1969_v21 = vld [vmem:[#allocation4_spill] sm:$0xff]  ;;  %v1980_v5 = vld [vmem:[#allocation14_spill] sm:$0xff] }
 0x12b   :  { %v1279_v29 = vpop.f32.mrf.mxu0  ;;  %v1167_v23 = vadd.f32 %v1969_v21, %v1968_v20 }
 0x12c   :  { %v885_v32 = vadd.f32 %v1767_v24, %v1761_v16  ;;  %v907_v33 = vmul.f32 %v1767_v24, %v1767_v24  ;;  %v1805_v6 = vadd.f32 %v1279_v29, %v750_v44  ;;  %v1287_v49 = vpop.f32.mrf.mxu1  ;;  %v1834_v63 = vadd.f32 %v857_v36, %v761_v18  ;;  %v1978_v44 = vld [vmem:[#allocation11_spill] sm:$0xff] }
 0x12d   :  { %v838_v37 = vpop.f32.mrf.mxu0  ;;  %v1170_v29 = vadd.f32 %v1973_v28, %v1972_v27  ;;  %v914_v36 = vmul.f32 %v1825_v59, %v1825_v59 }
 0x12e   :  { %v886_v39 = vadd.f32 %v885_v32, %v1765_v22  ;;  %v922_v40 = vadd.f32 %v907_v33, %v906_v30  ;;  %v1792_v41 = vadd.f32 %v838_v37, %v742_v19  ;;  %v870_v57 = vpop.f32.mrf.mxu1  ;;  %v912_v58 = vmul.f32 %v1805_v6, %v1805_v6  ;;  %v1970_v19 = vld [vmem:[#allocation3_spill] sm:$0xff]  ;;  %v1975_v32 = vld [vmem:[#allocation9_spill] sm:$0xff] }
 0x12f   :  { %v1280_v45 = vpop.f32.mrf.mxu0  ;;  %v1231_v26 = vadd.f32 %v1971_v25, %v1970_v19  ;;  %v1974_v30 = vld [vmem:[#allocation7_spill] sm:$0xff]  ;;  %v1844_v37 = vadd.f32 %v1758_v4, %v766_v61  ;;  %v915_v4 = vmul.f32 %v1834_v63, %v1834_v63 }
 0x130   :  { %v923_v47 = vadd.f32 %v922_v40, %v908_v38  ;;  %v887_v48 = vadd.f32 %v886_v39, %v1779_v31  ;;  %v910_v7 = vmul.f32 %v1792_v41, %v1792_v41  ;;  %v1816_v56 = vadd.f32 %v1280_v45, %v753_v51  ;;  %v1288_v35 = vpop.f32.mrf.mxu1  ;;  %v1976_v40 = vld [vmem:[#allocation10_spill] sm:$0xff]  ;;  %v1979_v45 = vld [vmem:[#allocation13_spill] sm:$0xff]  ;;  %v1981_v51 = vld [vmem:[#allocation16_spill] sm:$0xff] }
 0x131   :  { %v841_v50 = vpop.f32.mrf.mxu0  ;;  %v1234_v33 = vadd.f32 %v1975_v32, %v1974_v30  ;;  %v1173_v43 = vadd.f32 %v1977_v42, %v1976_v40  ;;  %v916_v54 = vmul.f32 %v1844_v37, %v1844_v37 }
 0x132   :  { %v888_v52 = vadd.f32 %v887_v48, %v1792_v41  ;;  %v924_v8 = vadd.f32 %v923_v47, %v909_v46  ;;  %v1810_v9 = vadd.f32 %v841_v50, %v745_v2  ;;  %v913_v62 = vmul.f32 %v1816_v56, %v1816_v56  ;;  %v873_v53 = vpop.f32.mrf.mxu1 }
 0x133   :  { %v1237_v46 = vadd.f32 %v1979_v45, %v1978_v44  ;;  %v774_v47 = vadd.f32 %v1231_v26, %v1167_v23  ;;  %v1854_v48 = vadd.f32 %v1763_v1, %v769_v34  ;;  %v1176_v50 = vadd.f32 %v1981_v51, %v1980_v5  ;;  %v950_v51 = vld [vmem:[%s1949_s2] sm:$0x1] }
 0x134   :  { %v925_v55 = vadd.f32 %v924_v8, %v910_v7  ;;  %v889_v11 = vadd.f32 %v888_v52, %v1810_v9  ;;  %v911_v12 = vmul.f32 %v1810_v9, %v1810_v9  ;;  %v1982_v52 = vld [vmem:[#allocation15_spill] sm:$0xff]  ;;  %v1983_v7 = vld [vmem:[#allocation17_spill] sm:$0xff]  ;;  %v777_v10 = vadd.f32 %v1234_v33, %v1170_v29 }
 0x135   :  { %v1240_v8 = vadd.f32 %v1983_v7, %v1982_v52  ;;  %v917_v13 = vmul.f32 %v1854_v48, %v1854_v48 }
 0x136   :  { %v890_v60 = vadd.f32 %v889_v11, %v1805_v6  ;;  %v926_v17 = vadd.f32 %v925_v55, %v911_v12  ;;  %v1865_v55 = vadd.f32 %v870_v57, %v774_v47  ;;  %v782_v12 = vadd.f32 %v1237_v46, %v1173_v43 }
 0x137   :  { %v1870_v15 = vadd.f32 %v873_v53, %v777_v10 }
 0x138   :  { %v891_v0 = vadd.f32 %v890_v60, %v1816_v56  ;;  %v927_v14 = vadd.f32 %v926_v17, %v912_v58  ;;  %v785_v60 = vadd.f32 %v1240_v8, %v1176_v50  ;;  %v879_v17 = vadd.f32 %v1287_v49, %v782_v12  ;;  %v952_v8 = vld [vmem:[%s1950_s3] sm:$0x1] }
 0x139   :  { %v918_v20 = vmul.f32 %v1865_v55, %v1865_v55  ;;  %v919_v25 = vmul.f32 %v1870_v15, %v1870_v15 }
 0x13a   :  { %v892_v38 = vadd.f32 %v891_v0, %v1825_v59  ;;  %v928_v39 = vadd.f32 %v927_v14, %v913_v62  ;;  %v882_v23 = vadd.f32 %v1288_v35, %v785_v60  ;;  %v920_v61 = vmul.f32 %v879_v17, %v879_v17 }
 0x13c   :  { %v929_v2 = vadd.f32 %v928_v39, %v914_v36  ;;  %v893_v3 = vadd.f32 %v892_v38, %v1834_v63  ;;  %v921_v14 = vmul.f32 %v882_v23, %v882_v23 }
 0x13e   :  { %v894_v1 = vadd.f32 %v893_v3, %v1844_v37  ;;  %v930_v11 = vadd.f32 %v929_v2, %v915_v4  ;;  %v955_v3 = vlaneseq }
 0x140   :  { %v895_v18 = vadd.f32 %v894_v1, %v1854_v48  ;;  %v931_v58 = vadd.f32 %v930_v11, %v916_v54  ;;  %v956_v5 = vshrl.u32 %v955_v3, 7 }
 0x142   :  { %v896_v57 = vadd.f32 %v895_v18, %v1865_v55  ;;  %v932_v21 = vadd.f32 %v931_v58, %v917_v13  ;;  %v957_v50 = vsub.s32 0, %v956_v5 }
 0x144   :  { %v897_v19 = vadd.f32 %v896_v57, %v1870_v15  ;;  %v933_v26 = vadd.f32 %v932_v21, %v918_v20 }
 0x146   :  { %v898_v62 = vadd.f32 %v897_v19, %v879_v17  ;;  %v934_v0 = vadd.f32 %v933_v26, %v919_v25 }
 0x148   :  { %v899_v27 = vadd.f32 %v898_v62, %v882_v23  ;;  %v935_v28 = vadd.f32 %v934_v0, %v920_v61 }
 0x14a   :  { %v900_v49 = vrot.slane %v899_v27, 4  ;;  %v936_v29 = vadd.f32 %v935_v28, %v921_v14 }
 0x14c   :  { %v901_v30 = vadd.f32 %v900_v49, %v899_v27  ;;  %v937_v32 = vrot.slane %v936_v29, 4 }
 0x14e   :  { %v902_v33 = vrot.slane %v901_v30, 2  ;;  %v938_v34 = vadd.f32 %v937_v32, %v936_v29 }
 0x150   :  { %v903_v36 = vadd.f32 %v902_v33, %v901_v30  ;;  %v939_v35 = vrot.slane %v938_v34, 2 }
 0x152   :  { %v904_v38 = vrot.slane %v903_v36, 1  ;;  %v940_v39 = vadd.f32 %v939_v35, %v938_v34 }
 0x154   :  { %v905_v40 = vadd.f32 %v904_v38, %v903_v36  ;;  %v941_v42 = vrot.slane %v940_v39, 1 }
 0x156   :  { %v942_v43 = vadd.f32 %v941_v42, %v940_v39  ;;  %v943_v44 = vmul.f32 0.0078125, %v905_v40 }
 0x158   :  { %v944_v45 = vmul.f32 0.0078125, %v942_v43  ;;  %v945_v46 = vmul.f32 %v943_v44, %v943_v44 }
 0x15a   :  { %v946_v47 = vsub.f32 %v944_v45, %v945_v46 }
 0x15c   :  { %v947_v4 = vmax.f32 %v946_v47, 0.0 }
 0x15e   :  { %v948_v2 = vadd.f32 1e-05, %v947_v4 }
 0x160   :  { %1401 = vrsqrt.f32 %v948_v2 }
 0x16d   :  { %v1402_v52 = vpop.eup %1401 }
 0x16e   :  { %v951_v7 = vmul.f32 %v1402_v52, %v950_v51 }
 0x170   :  { %v953_v10 = vmul.f32 %v951_v7, %v943_v44  ;;  %v958_v53 = vrot.slane %v951_v7, %v957_v50 }
 0x172   :  { %v954_v54 = vsub.f32 %v952_v8, %v953_v10  ;;  %v959_v1 = vmul.f32 %v958_v53, %v1761_v16  ;;  %v960_v11 = vmul.f32 %v958_v53, %v1767_v24  ;;  %v961_v12 = vmul.f32 %v958_v53, %v1765_v22 }
 0x173   :  { %v962_v13 = vmul.f32 %v958_v53, %v1779_v31  ;;  %v963_v18 = vmul.f32 %v958_v53, %v1792_v41  ;;  %v964_v58 = vmul.f32 %v958_v53, %v1810_v9  ;;  %v965_v60 = vmul.f32 %v958_v53, %v1805_v6 }
 0x174   :  { %v966_v20 = vmul.f32 %v958_v53, %v1816_v56  ;;  %v967_v57 = vmul.f32 %v958_v53, %v1825_v59  ;;  %v968_v21 = vmul.f32 %v958_v53, %v1834_v63  ;;  %v969_v16 = vmul.f32 %v958_v53, %v1844_v37 }
 0x175   :  { %v970_v24 = vmul.f32 %v958_v53, %v1854_v48  ;;  %v979_v19 = vrot.slane %v954_v54, %v957_v50  ;;  %v971_v22 = vmul.f32 %v958_v53, %v1865_v55  ;;  %v972_v31 = vmul.f32 %v958_v53, %v1870_v15 }
 0x176   :  { %v973_v41 = vmul.f32 %v958_v53, %v879_v17  ;;  %v974_v25 = vmul.f32 %v958_v53, %v882_v23 }
 0x177   :  { %v981_v9 = vadd.f32 %v979_v19, %v959_v1  ;;  %v982_v26 = vadd.f32 %v979_v19, %v960_v11  ;;  %v983_v6 = vadd.f32 %v979_v19, %v961_v12  ;;  %v984_v61 = vadd.f32 %v979_v19, %v962_v13 }
 0x178   :  { %v985_v56 = vadd.f32 %v979_v19, %v963_v18  ;;  %v986_v62 = vadd.f32 %v979_v19, %v964_v58  ;;  %v987_v59 = vadd.f32 %v979_v19, %v965_v60  ;;  %v988_v0 = vadd.f32 %v979_v19, %v966_v20 }
 0x179   :  { %v989_v63 = vadd.f32 %v979_v19, %v967_v57  ;;  %v990_v14 = vadd.f32 %v979_v19, %v968_v21  ;;  %v991_v37 = vadd.f32 %v979_v19, %v969_v16  ;;  %v992_v27 = vadd.f32 %v979_v19, %v970_v24 }
 0x17a   :  { %v993_v48 = vadd.f32 %v979_v19, %v971_v22  ;;  %v994_v28 = vadd.f32 %v979_v19, %v972_v31  ;;  %v995_v49 = vadd.f32 %v979_v19, %v973_v41  ;;  %v996_v55 = vadd.f32 %v979_v19, %v974_v25 }
 0x17b   :  { %v997_v29 = vmax.f32 %v981_v9, 0.0  ;;  %v998_v15 = vmax.f32 %v982_v26, 0.0  ;;  %v999_v17 = vmax.f32 %v983_v6, 0.0  ;;  %v1000_v23 = vmax.f32 %v984_v61, 0.0 }
 0x17c   :  { %v1001_v30 = vmax.f32 %v985_v56, 0.0  ;;  %v1002_v32 = vmax.f32 %v986_v62, 0.0  ;;  %v1003_v33 = vmax.f32 %v987_v59, 0.0  ;;  %v1004_v34 = vmax.f32 %v988_v0, 0.0 }
 0x17d   :  { %v1005_v36 = vmax.f32 %v989_v63, 0.0  ;;  %v1006_v35 = vmax.f32 %v990_v14, 0.0  ;;  %v1007_v38 = vmax.f32 %v991_v37, 0.0  ;;  %v1008_v39 = vmax.f32 %v992_v27, 0.0  ;;  %1013 = vst [vmem:[%s1951_s4] sm:$0xff] %v997_v29  ;;  %1014 = vst [vmem:[%s1951_s4 + $0x8] sm:$0xff] %v998_v15 }
 0x17e   :  { %1015 = vst [vmem:[%s1951_s4 + $0x10] sm:$0xff] %v999_v17  ;;  %1016 = vst [vmem:[%s1951_s4 + $0x18] sm:$0xff] %v1000_v23  ;;  %v1009_v40 = vmax.f32 %v993_v48, 0.0  ;;  %v1010_v42 = vmax.f32 %v994_v28, 0.0  ;;  %v1011_v43 = vmax.f32 %v995_v49, 0.0  ;;  %v1012_v44 = vmax.f32 %v996_v55, 0.0 }
 0x17f   :  { %1017 = vst [vmem:[%s1951_s4 + $0x20] sm:$0xff] %v1001_v30  ;;  %1018 = vst [vmem:[%s1951_s4 + $0x28] sm:$0xff] %v1002_v32 }
 0x180   :  { %1019 = vst [vmem:[%s1951_s4 + $0x30] sm:$0xff] %v1003_v33  ;;  %1020 = vst [vmem:[%s1951_s4 + $0x38] sm:$0xff] %v1004_v34 }
 0x181   :  { %1021 = vst [vmem:[%s1951_s4 + $0x40] sm:$0xff] %v1005_v36  ;;  %1022 = vst [vmem:[%s1951_s4 + $0x48] sm:$0xff] %v1006_v35 }
 0x182   :  { %1023 = vst [vmem:[%s1951_s4 + $0x50] sm:$0xff] %v1007_v38  ;;  %1024 = vst [vmem:[%s1951_s4 + $0x58] sm:$0xff] %v1008_v39 }
 0x183   :  { %1025 = vst [vmem:[%s1951_s4 + $0x60] sm:$0xff] %v1009_v40  ;;  %1026 = vst [vmem:[%s1951_s4 + $0x68] sm:$0xff] %v1010_v42 }
 0x184   :  { %1027 = vst [vmem:[%s1951_s4 + $0x70] sm:$0xff] %v1011_v43  ;;  %1028 = vst [vmem:[%s1951_s4 + $0x78] sm:$0xff] %v1012_v44 }

// kernel: resnet_forward.19
= control target key start
LH: loop header
LB: loop body
LE: loop exit
PB: predicated region body
PF: predicated region fallthrough
CT: control target
= control target key end

     0   :  { %s2035_s1 = inlined_call_operand.vmem [shape: bf16[640,128], index: 1, kind: input, shape index: {}]   ;;  %s2036_s0 = inlined_call_operand.vmem [shape: bf16[128,640], index: 0, kind: input, shape index: {}]   ;;  %s2037_s2 = inlined_call_operand.vmem [shape: f32[1,128], index: 2, kind: input, shape index: {}]   ;;  %s2038_s3 = inlined_call_operand.vmem [shape: f32[1,128], index: 3, kind: input, shape index: {}]   ;;  %s2039_s4 = inlined_call_operand.vmem [shape: f32[128,128], index: 4, kind: input, shape index: {}]   ;;  %s2040_s5 = inlined_call_operand.vmem [shape: f32[128,128], index: 5, kind: output, shape index: {}]  }
   0x1   :  { %v1340_v0 = vld [vmem:[%s2035_s1 + $0x78] sm:$0xff]   ;;  %v1344_v4 = vld [vmem:[%s2035_s1 + $0x70] sm:$0xff]   ;;  %v1348_v8 = vld [vmem:[%s2035_s1 + $0x68] sm:$0xff]  }
   0x2   :  { %v1341_v1 = vld [vmem:[%s2035_s1 + $0xf8] sm:$0xff]   ;;  %1148 = vmatprep.subr.bf16.mxu0 %v1340_v0  ;;  %v1345_v5 = vld [vmem:[%s2035_s1 + $0xf0] sm:$0xff]   ;;  %v1349_v9 = vld [vmem:[%s2035_s1 + $0xe8] sm:$0xff]  }
   0x3   :  { %v1342_v2 = vld [vmem:[%s2035_s1 + $0x38] sm:$0xff]   ;;  %1212 = vmatprep.subr.bf16.mxu1 %v1341_v1  ;;  %v1346_v6 = vld [vmem:[%s2035_s1 + $0x30] sm:$0xff]   ;;  %v1350_v10 = vld [vmem:[%s2035_s1 + $0x28] sm:$0xff]  }
   0x4   :  { %v1343_v3 = vld [vmem:[%s2035_s1 + $0xb8] sm:$0xff]   ;;  %1149 = vmatpush3.bf16.msra.mxu0 %v1342_v2  ;;  %v1347_v7 = vld [vmem:[%s2035_s1 + $0xb0] sm:$0xff]   ;;  %v1351_v11 = vld [vmem:[%s2035_s1 + $0xa8] sm:$0xff]  }
   0x5   :  { %1213 = vmatpush3.bf16.msra.mxu1 %v1343_v3  ;;  %1150 = vmatprep.subr.bf16.mxu0 %v1344_v4  ;;  %v1352_v12 = vld [vmem:[%s2035_s1 + $0x60] sm:$0xff]   ;;  %v1356_v16 = vld [vmem:[%s2035_s1 + $0x58] sm:$0xff]   ;;  %v1360_v20 = vld [vmem:[%s2035_s1 + $0x50] sm:$0xff]  }
   0x6   :  { %1214 = vmatprep.subr.bf16.mxu1 %v1345_v5  ;;  %v1353_v13 = vld [vmem:[%s2035_s1 + $0xe0] sm:$0xff]   ;;  %v1357_v17 = vld [vmem:[%s2035_s1 + $0xd8] sm:$0xff]   ;;  %v1361_v21 = vld [vmem:[%s2035_s1 + $0xd0] sm:$0xff]  }
   0x7   :  { %v1354_v14 = vld [vmem:[%s2035_s1 + $0x20] sm:$0xff]   ;;  %v1358_v18 = vld [vmem:[%s2035_s1 + $0x18] sm:$0xff]   ;;  %v1362_v22 = vld [vmem:[%s2035_s1 + $0x10] sm:$0xff]  }
   0x8   :  { %1151 = vmatpush3.bf16.msra.mxu0 %v1346_v6  ;;  %v1355_v15 = vld [vmem:[%s2035_s1 + $0xa0] sm:$0xff]   ;;  %v1359_v19 = vld [vmem:[%s2035_s1 + $0x98] sm:$0xff]   ;;  %v1363_v23 = vld [vmem:[%s2035_s1 + $0x90] sm:$0xff]  }
   0x9   :  { %1215 = vmatpush3.bf16.msra.mxu1 %v1347_v7  ;;  %1152 = vmatprep.subr.bf16.mxu0 %v1348_v8  ;;  %v1364_v24 = vld [vmem:[%s2035_s1 + $0x48] sm:$0xff]   ;;  %v1368_v28 = vld [vmem:[%s2035_s1 + $0x40] sm:$0xff]   ;;  %v1378_v36 = vld [vmem:[%s2035_s1 + $0x138] sm:$0xff]  }
   0xa   :  { %1216 = vmatprep.subr.bf16.mxu1 %v1349_v9  ;;  %v1365_v25 = vld [vmem:[%s2035_s1 + $0xc8] sm:$0xff]   ;;  %v1369_v29 = vld [vmem:[%s2035_s1 + $0xc0] sm:$0xff]   ;;  %v1385_v39 = vld [vmem:[%s2035_s1 + $0x130] sm:$0xff]  }
   0xb   :  { %v1366_v26 = vld [vmem:[%s2035_s1 + $0x8] sm:$0xff]   ;;  %v1370_v30 = vld [vmem:[%s2035_s1] sm:$0xff]   ;;  %v1388_v43 = vld [vmem:[%s2036_s0 + $0x5c] ss:$20 sps:$4 sm:$0xff]  }
   0xc   :  { %1153 = vmatpush3.bf16.msra.mxu0 %v1350_v10  ;;  %v1367_v27 = vld [vmem:[%s2035_s1 + $0x88] sm:$0xff]   ;;  %v1371_v31 = vld [vmem:[%s2035_s1 + $0x80] sm:$0xff]   ;;  %v1393_v48 = vld [vmem:[%s2036_s0 + $0x7c] ss:$20 sps:$4 sm:$0xff]  }
   0xd   :  { %1217 = vmatpush3.bf16.msra.mxu1 %v1351_v11  ;;  %1154 = vmatprep.subr.bf16.mxu0 %v1352_v12  ;;  %v1372_v32 = vld [vmem:[%s2036_s0] ss:$20 sps:$4 sm:$0xff]   ;;  %v1374_v33 = vld [vmem:[%s2036_s0 + $0x4] ss:$20 sps:$4 sm:$0xff]   ;;  %v1375_v34 = vld [vmem:[%s2036_s0 + $0x8] ss:$20 sps:$4 sm:$0xff]  }
   0xe   :  { %1218 = vmatprep.subr.bf16.mxu1 %v1353_v13  ;;  %v1377_v35 = vld [vmem:[%s2036_s0 + $0xc] ss:$20 sps:$4 sm:$0xff]   ;;  %629 = vmatprep.mubr.bf16.mxu0 %v1374_v33  ;;  %v1381_v38 = vld [vmem:[%s2036_s0 + $0x34] ss:$20 sps:$4 sm:$0xff]   ;;  %v1384_v41 = vld [vmem:[%s2036_s0 + $0x30] ss:$20 sps:$4 sm:$0xff]  }
   0xf   :  { %726 = vmatprep.mubr.bf16.mxu1 %v1377_v35  ;;  %v1379_v37 = vld [vmem:[%s2036_s0 + $0x2c] ss:$20 sps:$4 sm:$0xff]   ;;  %v1383_v40 = vld [vmem:[%s2036_s0 + $0x28] ss:$20 sps:$4 sm:$0xff]   ;;  %v1390_v46 = vld [vmem:[%s2036_s0 + $0x50] ss:$20 sps:$4 sm:$0xff]  }
  0x10   :  { %1155 = vmatpush3.bf16.msra.mxu0 %v1354_v14  ;;  %v1386_v42 = vld [vmem:[%s2036_s0 + $0x54] ss:$20 sps:$4 sm:$0xff]   ;;  %v1399_v45 = vld [vmem:[%s2035_s1 + $0x120] sm:$0xff]   ;;  %v1391_v47 = vld [vmem:[%s2036_s0 + $0x58] ss:$20 sps:$4 sm:$0xff]  }
  0x11   :  { %1219 = vmatpush3.bf16.msra.mxu1 %v1355_v15  ;;  %1156 = vmatprep.subr.bf16.mxu0 %v1356_v16  ;;  %v1392_v44 = vld [vmem:[%s2035_s1 + $0x128] sm:$0xff]   ;;  %v1395_v49 = vld [vmem:[%s2036_s0 + $0x84] ss:$20 sps:$4 sm:$0xff]   ;;  %v1413_v51 = vld [vmem:[%s2035_s1 + $0x110] sm:$0xff]  }
  0x12   :  { %1220 = vmatprep.subr.bf16.mxu1 %v1357_v17  ;;  %v1406_v50 = vld [vmem:[%s2035_s1 + $0x118] sm:$0xff]   ;;  %v1398_v53 = vld [vmem:[%s2036_s0 + $0x80] ss:$20 sps:$4 sm:$0xff]   ;;  %v1420_v55 = vld [vmem:[%s2035_s1 + $0x108] sm:$0xff]  }
  0x13   :  { %v1397_v52 = vld [vmem:[%s2036_s0 + $0x78] ss:$20 sps:$4 sm:$0xff]   ;;  %v1427_v57 = vld [vmem:[%s2035_s1 + $0x100] sm:$0xff]   ;;  %v1405_v59 = vld [vmem:[%s2036_s0 + $0xa8] ss:$20 sps:$4 sm:$0xff]  }
  0x14   :  { %1157 = vmatpush3.bf16.msra.mxu0 %v1358_v18  ;;  %v1400_v54 = vld [vmem:[%s2036_s0 + $0xa4] ss:$20 sps:$4 sm:$0xff]   ;;  %v1402_v56 = vld [vmem:[%s2036_s0 + $0xac] ss:$20 sps:$4 sm:$0xff]   ;;  %v1409_v61 = vld [vmem:[%s2036_s0 + $0xd4] ss:$20 sps:$4 sm:$0xff]  }
  0x15   :  { %1221 = vmatpush3.bf16.msra.mxu1 %v1359_v19  ;;  %1158 = vmatprep.subr.bf16.mxu0 %v1360_v20  ;;  %v1404_v58 = vld [vmem:[%s2036_s0 + $0xa0] ss:$20 sps:$4 sm:$0xff]   ;;  %v1411_v62 = vld [vmem:[%s2036_s0 + $0xc8] ss:$20 sps:$4 sm:$0xff]   ;;  %v1412_v63 = vld [vmem:[%s2036_s0 + $0xd0] ss:$20 sps:$4 sm:$0xff]  }
  0x16   :  { %1222 = vmatprep.subr.bf16.mxu1 %v1361_v21  ;;  %v1407_v60 = vld [vmem:[%s2036_s0 + $0xcc] ss:$20 sps:$4 sm:$0xff]   ;;  %v1414_v0 = vld [vmem:[%s2036_s0 + $0xf4] ss:$20 sps:$4 sm:$0xff]   ;;  %v1416_v1 = vld [vmem:[%s2036_s0 + $0xfc] ss:$20 sps:$4 sm:$0xff]  }
  0x17   :  { %v1418_v2 = vld [vmem:[%s2036_s0 + $0xf0] ss:$20 sps:$4 sm:$0xff]   ;;  %v1419_v3 = vld [vmem:[%s2036_s0 + $0xf8] ss:$20 sps:$4 sm:$0xff]   ;;  %v1426_v7 = vld [vmem:[%s2036_s0 + $0x120] ss:$20 sps:$4 sm:$0xff]  }
  0x18   :  { %1159 = vmatpush3.bf16.msra.mxu0 %v1362_v22  ;;  %v1421_v4 = vld [vmem:[%s2036_s0 + $0x11c] ss:$20 sps:$4 sm:$0xff]   ;;  %v1423_v5 = vld [vmem:[%s2036_s0 + $0x124] ss:$20 sps:$4 sm:$0xff]   ;;  %v1432_v12 = vld [vmem:[%s2036_s0 + $0x60] ss:$20 sps:$4 sm:$0xff]  }
  0x19   :  { %1223 = vmatpush3.bf16.msra.mxu1 %v1363_v23  ;;  %1160 = vmatprep.subr.bf16.mxu0 %v1364_v24  ;;  %v1425_v6 = vld [vmem:[%s2036_s0 + $0x118] ss:$20 sps:$4 sm:$0xff]   ;;  %v1428_v8 = vld [vmem:[%s2036_s0 + $0x10] ss:$20 sps:$4 sm:$0xff]   ;;  %v1433_v13 = vld [vmem:[%s2036_s0 + $0x100] ss:$20 sps:$4 sm:$0xff]  }
  0x1a   :  { %1224 = vmatprep.subr.bf16.mxu1 %v1365_v25  ;;  %v1429_v9 = vld [vmem:[%s2036_s0 + $0xb0] ss:$20 sps:$4 sm:$0xff]   ;;  %v1430_v10 = vld [vmem:[%s2036_s0 + $0x38] ss:$20 sps:$4 sm:$0xff]   ;;  %v1434_v14 = vld [vmem:[%s2036_s0 + $0x88] ss:$20 sps:$4 sm:$0xff]  }
  0x1b   :  { %v1431_v11 = vld [vmem:[%s2036_s0 + $0xd8] ss:$20 sps:$4 sm:$0xff]   ;;  %v1435_v15 = vld [vmem:[%s2036_s0 + $0x128] ss:$20 sps:$4 sm:$0xff]  }
  0x1c   :  { %1161 = vmatpush3.bf16.msra.mxu0 %v1366_v26 }
  0x1d   :  { %1225 = vmatpush3.bf16.msra.mxu1 %v1367_v27  ;;  %1162 = vmatprep.subr.bf16.mxu0 %v1368_v28 }
  0x1e   :  { %1226 = vmatprep.subr.bf16.mxu1 %v1369_v29 }
  0x20   :  { %1163 = vmatpush3.bf16.msra.mxu0 %v1370_v30 }
  0x21   :  { %1227 = vmatpush3.bf16.msra.mxu1 %v1371_v31  ;;  %1292 = vmatprep.subr.bf16.mxu0 %v1378_v36 }
  0x22   :  { %1324 = vmatprep.subr.bf16.mxu1 %v1378_v36 }
  0x23   :  { %630 = vmatmul.mubr.bf16.vlgmr.msra.gmra.mxu0 %v1372_v32 }
  0x24   :  { %727 = vmatmul.mubr.bf16.vlgmr.msra.gmra.mxu1 %v1375_v34  ;;  %1293 = vmatpush3.bf16.msra.mxu0 %v1378_v36 }
  0x25   :  { %637 = vmatprep.mubr.bf16.mxu0 %v1379_v37  ;;  %734 = vmatprep.mubr.bf16.mxu1 %v1381_v38 }
  0x26   :  { %1332 = vmatpush3.bf16.msra.mxu1 %v1378_v36  ;;  %1294 = vmatprep.subr.bf16.mxu0 %v1385_v39 }
  0x27   :  { %1325 = vmatprep.subr.bf16.mxu1 %v1385_v39 }
  0x28   :  { %1295 = vmatpush3.bf16.msra.mxu0 %v1385_v39 }
  0x29   :  { %1296 = vmatprep.subr.bf16.mxu0 %v1392_v44 }
  0x2a   :  { %1333 = vmatpush3.bf16.msra.mxu1 %v1385_v39 }
  0x2b   :  { %638 = vmatmul.mubr.bf16.gmra.mxu0 %v1383_v40  ;;  %1326 = vmatprep.subr.bf16.mxu1 %v1392_v44 }
  0x2c   :  { %735 = vmatmul.mubr.bf16.gmra.mxu1 %v1384_v41  ;;  %645 = vmatprep.mubr.bf16.mxu0 %v1386_v42 }
  0x2d   :  { %742 = vmatprep.mubr.bf16.mxu1 %v1388_v43  ;;  %1297 = vmatpush3.bf16.msra.mxu0 %v1392_v44 }
  0x2e   :  { %1298 = vmatprep.subr.bf16.mxu0 %v1399_v45  ;;  %1334 = vmatpush3.bf16.msra.mxu1 %v1392_v44 }
  0x2f   :  { %1327 = vmatprep.subr.bf16.mxu1 %v1399_v45 }
  0x31   :  { %1299 = vmatpush3.bf16.msra.mxu0 %v1399_v45 }
  0x32   :  { %1300 = vmatprep.subr.bf16.mxu0 %v1406_v50  ;;  %1335 = vmatpush3.bf16.msra.mxu1 %v1399_v45 }
  0x33   :  { %646 = vmatmul.mubr.bf16.gmra.mxu0 %v1390_v46  ;;  %1328 = vmatprep.subr.bf16.mxu1 %v1406_v50 }
  0x34   :  { %743 = vmatmul.mubr.bf16.gmra.mxu1 %v1391_v47  ;;  %653 = vmatprep.mubr.bf16.mxu0 %v1393_v48 }
  0x35   :  { %750 = vmatprep.mubr.bf16.mxu1 %v1395_v49  ;;  %1301 = vmatpush3.bf16.msra.mxu0 %v1406_v50 }
  0x36   :  { %1302 = vmatprep.subr.bf16.mxu0 %v1413_v51  ;;  %1336 = vmatpush3.bf16.msra.mxu1 %v1406_v50 }
  0x37   :  { %1329 = vmatprep.subr.bf16.mxu1 %v1413_v51 }
  0x39   :  { %1303 = vmatpush3.bf16.msra.mxu0 %v1413_v51 }
  0x3a   :  { %1304 = vmatprep.subr.bf16.mxu0 %v1420_v55  ;;  %1337 = vmatpush3.bf16.msra.mxu1 %v1413_v51 }
  0x3b   :  { %654 = vmatmul.mubr.bf16.gmra.mxu0 %v1397_v52  ;;  %1330 = vmatprep.subr.bf16.mxu1 %v1420_v55 }
  0x3c   :  { %751 = vmatmul.mubr.bf16.gmra.mxu1 %v1398_v53  ;;  %661 = vmatprep.mubr.bf16.mxu0 %v1400_v54 }
  0x3d   :  { %758 = vmatprep.mubr.bf16.mxu1 %v1402_v56  ;;  %1305 = vmatpush3.bf16.msra.mxu0 %v1420_v55 }
  0x3e   :  { %1306 = vmatprep.subr.bf16.mxu0 %v1427_v57  ;;  %1338 = vmatpush3.bf16.msra.mxu1 %v1420_v55 }
  0x3f   :  { %1331 = vmatprep.subr.bf16.mxu1 %v1427_v57 }
  0x41   :  { %1307 = vmatpush3.bf16.msra.mxu0 %v1427_v57 }
  0x42   :  { %1339 = vmatpush3.bf16.msra.mxu1 %v1427_v57 }
  0x43   :  { %662 = vmatmul.mubr.bf16.gmra.mxu0 %v1404_v58 }
  0x44   :  { %759 = vmatmul.mubr.bf16.gmra.mxu1 %v1405_v59  ;;  %669 = vmatprep.mubr.bf16.mxu0 %v1407_v60 }
  0x45   :  { %766 = vmatprep.mubr.bf16.mxu1 %v1409_v61 }
  0x4b   :  { %670 = vmatmul.mubr.bf16.gmra.mxu0 %v1411_v62 }
  0x4c   :  { %767 = vmatmul.mubr.bf16.gmra.mxu1 %v1412_v63  ;;  %677 = vmatprep.mubr.bf16.mxu0 %v1414_v0 }
  0x4d   :  { %774 = vmatprep.mubr.bf16.mxu1 %v1416_v1 }
  0x53   :  { %678 = vmatmul.mubr.bf16.gmra.mxu0 %v1418_v2 }
  0x54   :  { %775 = vmatmul.mubr.bf16.gmra.mxu1 %v1419_v3  ;;  %685 = vmatprep.mubr.bf16.mxu0 %v1421_v4 }
  0x55   :  { %782 = vmatprep.mubr.bf16.mxu1 %v1423_v5 }
  0x5b   :  { %686 = vmatmul.mubr.bf16.gmra.mxu0 %v1425_v6 }
  0x5c   :  { %783 = vmatmul.mubr.bf16.gmra.mxu1 %v1426_v7  ;;  %1308 = vmatprep.mubr.bf16.mxu0 %v1428_v8 }
  0x5d   :  { %1316 = vmatprep.mubr.bf16.mxu1 %v1429_v9 }
  0x63   :  { %1309 = vmatmul.mubr.bf16.vlgmr.msra.gmra.mxu0 %v1430_v10 }
  0x64   :  { %1317 = vmatmul.mubr.bf16.vlgmr.msra.gmra.mxu1 %v1431_v11  ;;  %1312 = vmatprep.mubr.bf16.mxu0 %v1432_v12 }
  0x65   :  { %1320 = vmatprep.mubr.bf16.mxu1 %v1433_v13 }
  0x6b   :  { %1313 = vmatmul.mubr.bf16.gmra.mxu0 %v1434_v14 }
  0x6c   :  { %1321 = vmatmul.mubr.bf16.gmra.mxu1 %v1435_v15 }
  0xe3   :  { %v1164_v16 = vpop.f32.mrf.mxu0 }
  0xe4   :  { %v1228_v17 = vpop.f32.mrf.mxu1 }
  0xe5   :  { %v1165_v18 = vpop.f32.mrf.mxu0 }
  0xe6   :  { %v1708_v19 = vadd.f32 %v1165_v18, %v1164_v16  ;;  %v1229_v20 = vpop.f32.mrf.mxu1 }
  0xe7   :  { %v1167_v21 = vpop.f32.mrf.mxu0  ;;  %v1230_v15 = vadd.f32 %v1229_v20, %v1228_v17 }
  0xe8   :  { %v1231_v22 = vpop.f32.mrf.mxu1 }
  0xe9   :  { %v1168_v23 = vpop.f32.mrf.mxu0 }
  0xea   :  { %v1232_v24 = vpop.f32.mrf.mxu1 }
  0xeb   :  { %v1170_v25 = vpop.f32.mrf.mxu0 }
  0xec   :  { %v1234_v26 = vpop.f32.mrf.mxu1 }
  0xed   :  { %v1171_v27 = vpop.f32.mrf.mxu0 }
  0xee   :  { %v1235_v28 = vpop.f32.mrf.mxu1 }
  0xef   :  { %v1173_v29 = vpop.f32.mrf.mxu0 }
  0xf0   :  { %v1237_v30 = vpop.f32.mrf.mxu1 }
  0xf1   :  { %v1174_v31 = vpop.f32.mrf.mxu0 }
  0xf2   :  { %v1238_v32 = vpop.f32.mrf.mxu1 }
  0xf3   :  { %v1176_v33 = vpop.f32.mrf.mxu0 }
  0xf4   :  { %v1240_v34 = vpop.f32.mrf.mxu1 }
  0xf5   :  { %v1177_v35 = vpop.f32.mrf.mxu0 }
  0xf6   :  { %v1241_v36 = vpop.f32.mrf.mxu1 }
  0xf7   :  { %v1710_v37 = vpop.f32.mrf.mxu0 }
  0xf8   :  { %v1712_v38 = vpop.f32.mrf.mxu1 }
  0xf9   :  { %v1714_v39 = vpop.f32.mrf.mxu0 }
  0xfa   :  { %v1716_v40 = vpop.f32.mrf.mxu1 }
  0xfb   :  { %v1718_v41 = vpop.f32.mrf.mxu0 }
  0xfc   :  { %v1720_v42 = vpop.f32.mrf.mxu1 }
  0xfd   :  { %v1722_v43 = vpop.f32.mrf.mxu0 }
  0xfe   :  { %v1724_v44 = vpop.f32.mrf.mxu1 }
  0xff   :  { %v1726_v45 = vpop.f32.mrf.mxu0 }
 0x100   :  { %v1728_v46 = vpop.f32.mrf.mxu1 }
 0x101   :  { %v1730_v47 = vpop.f32.mrf.mxu0 }
 0x102   :  { %v1732_v48 = vpop.f32.mrf.mxu1 }
 0x103   :  { %v1734_v49 = vpop.f32.mrf.mxu0 }
 0x104   :  { %v1736_v50 = vpop.f32.mrf.mxu1 }
 0x105   :  { %v1738_v51 = vpop.f32.mrf.mxu0 }
 0x106   :  { %v1740_v52 = vpop.f32.mrf.mxu1 }
 0x107   :  { %v1742_v53 = vpop.f32.mrf.mxu0 }
 0x108   :  { %v1744_v54 = vpop.f32.mrf.mxu1 }
 0x109   :  { %v1746_v55 = vpop.f32.mrf.mxu0 }
 0x10a   :  { %v1748_v56 = vpop.f32.mrf.mxu1 }
 0x10b   :  { %v1750_v57 = vpop.f32.mrf.mxu0 }
 0x10c   :  { %v1752_v58 = vpop.f32.mrf.mxu1 }
 0x10d   :  { %v1754_v59 = vpop.f32.mrf.mxu0 }
 0x10e   :  { %v1756_v60 = vpop.f32.mrf.mxu1 }
 0x10f   :  { %v1758_v61 = vpop.f32.mrf.mxu0 }
 0x110   :  { %v1760_v62 = vpop.f32.mrf.mxu1 }
 0x111   :  { %v1762_v63 = vpop.f32.mrf.mxu0 }
 0x112   :  { %v1764_v0 = vpop.f32.mrf.mxu1 }
 0x113   :  { %v1766_v1 = vpop.f32.mrf.mxu0 }
 0x114   :  { %2041 = vst [vmem:[#allocation2_spill] sm:$0xff] %v1766_v1  ;;  %v1768_v2 = vpop.f32.mrf.mxu1 }
 0x115   :  { %2042 = vst [vmem:[#allocation3_spill] sm:$0xff] %v1768_v2  ;;  %v1770_v3 = vpop.f32.mrf.mxu0  ;;  %v1239_v2 = vadd.f32 %v1238_v32, %v1237_v30 }
 0x116   :  { %2043 = vst [vmem:[#allocation4_spill] sm:$0xff] %v1770_v3  ;;  %v1772_v4 = vpop.f32.mrf.mxu1  ;;  %v1242_v3 = vadd.f32 %v1241_v36, %v1240_v34  ;;  %v1187_v34 = vadd.f32 %v1730_v47, %v1726_v45 }
 0x117   :  { %2044 = vst [vmem:[#allocation5_spill] sm:$0xff] %v1772_v4  ;;  %v1774_v5 = vpop.f32.mrf.mxu0 }
 0x118   :  { %2045 = vst [vmem:[#allocation6_spill] sm:$0xff] %v1774_v5  ;;  %v1776_v6 = vpop.f32.mrf.mxu1  ;;  %v1172_v5 = vadd.f32 %v1171_v27, %v1170_v25  ;;  %v1181_v25 = vadd.f32 %v1714_v39, %v1710_v37  ;;  %v1184_v27 = vadd.f32 %v1722_v43, %v1718_v41  ;;  %v1254_v43 = vadd.f32 %v1740_v52, %v1736_v50 }
 0x119   :  { %2046 = vst [vmem:[#allocation7_spill] sm:$0xff] %v1776_v6  ;;  %v1778_v7 = vpop.f32.mrf.mxu0 }
 0x11a   :  { %2047 = vst [vmem:[#allocation8_spill] sm:$0xff] %v1778_v7  ;;  %v1780_v8 = vpop.f32.mrf.mxu1  ;;  %v1169_v7 = vadd.f32 %v1168_v23, %v1167_v21 }
 0x11b   :  { %2048 = vst [vmem:[#allocation9_spill] sm:$0xff] %v1780_v8  ;;  %v1782_v9 = vpop.f32.mrf.mxu0  ;;  %v1233_v8 = vadd.f32 %v1232_v24, %v1231_v22 }
 0x11c   :  { %2049 = vst [vmem:[#allocation10_spill] sm:$0xff] %v1782_v9  ;;  %v1784_v10 = vpop.f32.mrf.mxu1  ;;  %v1236_v9 = vadd.f32 %v1235_v28, %v1234_v26  ;;  %v1245_v26 = vadd.f32 %v1716_v40, %v1712_v38  ;;  %v1248_v28 = vadd.f32 %v1724_v44, %v1720_v42  ;;  %v1190_v42 = vadd.f32 %v1738_v51, %v1734_v49 }
 0x11d   :  { %2050 = vst [vmem:[#allocation11_spill] sm:$0xff] %v1784_v10  ;;  %v1786_v11 = vpop.f32.mrf.mxu0  ;;  %v729_v10 = vadd.f32 %v1230_v15, %v1708_v19  ;;  %v1263_v15 = vadd.f32 %v1764_v0, %v1760_v62 }
 0x11e   :  { %2051 = vst [vmem:[#allocation12_spill] sm:$0xff] %v1786_v11  ;;  %v1788_v12 = vpop.f32.mrf.mxu1  ;;  %v737_v20 = vadd.f32 %v1236_v9, %v1172_v5  ;;  %v753_v44 = vadd.f32 %v1248_v28, %v1184_v27  ;;  %v1257_v5 = vadd.f32 %v1748_v56, %v1744_v54  ;;  %v761_v54 = vadd.f32 %v1254_v43, %v1190_v42 }
 0x11f   :  { %2052 = vst [vmem:[#allocation13_spill] sm:$0xff] %v1788_v12  ;;  %v1790_v13 = vpop.f32.mrf.mxu0  ;;  %v1175_v12 = vadd.f32 %v1174_v31, %v1173_v29  ;;  %v2061_v27 = vld [vmem:[#allocation6_spill] sm:$0xff] }
 0x120   :  { %2053 = vst [vmem:[#allocation14_spill] sm:$0xff] %v1790_v13  ;;  %v1792_v14 = vpop.f32.mrf.mxu1  ;;  %v1178_v13 = vadd.f32 %v1177_v35, %v1176_v33  ;;  %v1251_v35 = vadd.f32 %v1732_v48, %v1728_v46 }
 0x121   :  { %2054 = vst [vmem:[#allocation15_spill] sm:$0xff] %v1792_v14  ;;  %v1794_v16 = vpop.f32.mrf.mxu0  ;;  %v740_v23 = vadd.f32 %v1239_v2, %v1175_v12  ;;  %v748_v2 = vadd.f32 %v1245_v26, %v1181_v25  ;;  %v2060_v25 = vld [vmem:[#allocation5_spill] sm:$0xff]  ;;  %v2062_v28 = vld [vmem:[#allocation8_spill] sm:$0xff] }
 0x122   :  { %2055 = vst [vmem:[#allocation16_spill] sm:$0xff] %v1794_v16  ;;  %v1796_v18 = vpop.f32.mrf.mxu1  ;;  %v745_v19 = vadd.f32 %v1242_v3, %v1178_v13  ;;  %v1193_v3 = vadd.f32 %v1746_v55, %v1742_v53  ;;  %v756_v51 = vadd.f32 %v1251_v35, %v1187_v34  ;;  %v1260_v53 = vadd.f32 %v1756_v60, %v1752_v58 }
 0x123   :  { %2056 = vst [vmem:[#allocation17_spill] sm:$0xff] %v1796_v18  ;;  %v1310_v6 = vpop.f32.mrf.mxu0  ;;  %v732_v18 = vadd.f32 %v1233_v8, %v1169_v7  ;;  %v1199_v13 = vadd.f32 %v1762_v63, %v1758_v61 }
 0x124   :  { %v1798_v4 = vpop.f32.mrf.mxu1  ;;  %v1805_v22 = vadd.f32 %v1310_v6, %v737_v20  ;;  %v2057_v20 = vld [vmem:[#allocation2_spill] sm:$0xff] }
 0x125   :  { %v825_v11 = vpop.f32.mrf.mxu0  ;;  %v772_v34 = vadd.f32 %v1263_v15, %v1199_v13  ;;  %v2066_v42 = vld [vmem:[#allocation12_spill] sm:$0xff] }
 0x126   :  { %v857_v14 = vpop.f32.mrf.mxu1  ;;  %v1801_v16 = vadd.f32 %v825_v11, %v729_v10  ;;  %v911_v38 = vmul.f32 %v1805_v22, %v1805_v22  ;;  %v1196_v10 = vadd.f32 %v1754_v59, %v1750_v57 }
 0x127   :  { %v1311_v17 = vpop.f32.mrf.mxu0  ;;  %v1865_v59 = vadd.f32 %v857_v14, %v761_v54 }
 0x128   :  { %v1803_v1 = vpop.f32.mrf.mxu1  ;;  %v909_v30 = vmul.f32 %v1801_v16, %v1801_v16  ;;  %v1819_v31 = vadd.f32 %v1311_v17, %v740_v23  ;;  %v769_v61 = vadd.f32 %v1260_v53, %v1196_v10 }
 0x129   :  { %v828_v21 = vpop.f32.mrf.mxu0 }
 0x12a   :  { %v1807_v24 = vadd.f32 %v828_v21, %v732_v18  ;;  %v860_v36 = vpop.f32.mrf.mxu1  ;;  %v912_v46 = vmul.f32 %v1819_v31, %v1819_v31  ;;  %v764_v18 = vadd.f32 %v1257_v5, %v1193_v3  ;;  %v2058_v21 = vld [vmem:[#allocation4_spill] sm:$0xff]  ;;  %v2069_v5 = vld [vmem:[#allocation14_spill] sm:$0xff] }
 0x12b   :  { %v1314_v29 = vpop.f32.mrf.mxu0  ;;  %v1202_v23 = vadd.f32 %v2058_v21, %v2057_v20 }
 0x12c   :  { %v888_v32 = vadd.f32 %v1807_v24, %v1801_v16  ;;  %v910_v33 = vmul.f32 %v1807_v24, %v1807_v24  ;;  %v1845_v6 = vadd.f32 %v1314_v29, %v753_v44  ;;  %v1322_v49 = vpop.f32.mrf.mxu1  ;;  %v1874_v63 = vadd.f32 %v860_v36, %v764_v18  ;;  %v2067_v44 = vld [vmem:[#allocation11_spill] sm:$0xff] }
 0x12d   :  { %v841_v37 = vpop.f32.mrf.mxu0  ;;  %v1205_v29 = vadd.f32 %v2062_v28, %v2061_v27  ;;  %v917_v36 = vmul.f32 %v1865_v59, %v1865_v59 }
 0x12e   :  { %v889_v39 = vadd.f32 %v888_v32, %v1805_v22  ;;  %v925_v40 = vadd.f32 %v910_v33, %v909_v30  ;;  %v1832_v41 = vadd.f32 %v841_v37, %v745_v19  ;;  %v873_v57 = vpop.f32.mrf.mxu1  ;;  %v915_v58 = vmul.f32 %v1845_v6, %v1845_v6  ;;  %v2059_v19 = vld [vmem:[#allocation3_spill] sm:$0xff]  ;;  %v2064_v32 = vld [vmem:[#allocation9_spill] sm:$0xff] }
 0x12f   :  { %v1315_v45 = vpop.f32.mrf.mxu0  ;;  %v1266_v26 = vadd.f32 %v2060_v25, %v2059_v19  ;;  %v2063_v30 = vld [vmem:[#allocation7_spill] sm:$0xff]  ;;  %v1884_v37 = vadd.f32 %v1798_v4, %v769_v61  ;;  %v918_v4 = vmul.f32 %v1874_v63, %v1874_v63 }
 0x130   :  { %v926_v47 = vadd.f32 %v925_v40, %v911_v38  ;;  %v890_v48 = vadd.f32 %v889_v39, %v1819_v31  ;;  %v913_v7 = vmul.f32 %v1832_v41, %v1832_v41  ;;  %v1856_v56 = vadd.f32 %v1315_v45, %v756_v51  ;;  %v1323_v35 = vpop.f32.mrf.mxu1  ;;  %v2065_v40 = vld [vmem:[#allocation10_spill] sm:$0xff]  ;;  %v2068_v45 = vld [vmem:[#allocation13_spill] sm:$0xff]  ;;  %v2070_v51 = vld [vmem:[#allocation16_spill] sm:$0xff] }
 0x131   :  { %v844_v50 = vpop.f32.mrf.mxu0  ;;  %v1269_v33 = vadd.f32 %v2064_v32, %v2063_v30  ;;  %v1208_v43 = vadd.f32 %v2066_v42, %v2065_v40  ;;  %v919_v54 = vmul.f32 %v1884_v37, %v1884_v37 }
 0x132   :  { %v891_v52 = vadd.f32 %v890_v48, %v1832_v41  ;;  %v927_v8 = vadd.f32 %v926_v47, %v912_v46  ;;  %v1850_v9 = vadd.f32 %v844_v50, %v748_v2  ;;  %v916_v62 = vmul.f32 %v1856_v56, %v1856_v56  ;;  %v876_v53 = vpop.f32.mrf.mxu1 }
 0x133   :  { %v1272_v46 = vadd.f32 %v2068_v45, %v2067_v44  ;;  %v777_v47 = vadd.f32 %v1266_v26, %v1202_v23  ;;  %v1894_v48 = vadd.f32 %v1803_v1, %v772_v34  ;;  %v1211_v50 = vadd.f32 %v2070_v51, %v2069_v5  ;;  %v953_v51 = vld [vmem:[%s2037_s2] sm:$0x1] }
 0x134   :  { %v928_v55 = vadd.f32 %v927_v8, %v913_v7  ;;  %v892_v11 = vadd.f32 %v891_v52, %v1850_v9  ;;  %v914_v12 = vmul.f32 %v1850_v9, %v1850_v9  ;;  %v2071_v52 = vld [vmem:[#allocation15_spill] sm:$0xff]  ;;  %v2072_v7 = vld [vmem:[#allocation17_spill] sm:$0xff]  ;;  %v780_v10 = vadd.f32 %v1269_v33, %v1205_v29 }
 0x135   :  { %v1275_v8 = vadd.f32 %v2072_v7, %v2071_v52  ;;  %v920_v13 = vmul.f32 %v1894_v48, %v1894_v48 }
 0x136   :  { %v893_v60 = vadd.f32 %v892_v11, %v1845_v6  ;;  %v929_v17 = vadd.f32 %v928_v55, %v914_v12  ;;  %v1905_v55 = vadd.f32 %v873_v57, %v777_v47  ;;  %v785_v12 = vadd.f32 %v1272_v46, %v1208_v43 }
 0x137   :  { %v1910_v15 = vadd.f32 %v876_v53, %v780_v10 }
 0x138   :  { %v894_v0 = vadd.f32 %v893_v60, %v1856_v56  ;;  %v930_v14 = vadd.f32 %v929_v17, %v915_v58  ;;  %v788_v60 = vadd.f32 %v1275_v8, %v1211_v50  ;;  %v882_v17 = vadd.f32 %v1322_v49, %v785_v12  ;;  %v955_v8 = vld [vmem:[%s2038_s3] sm:$0x1] }
 0x139   :  { %v921_v20 = vmul.f32 %v1905_v55, %v1905_v55  ;;  %v922_v25 = vmul.f32 %v1910_v15, %v1910_v15 }
 0x13a   :  { %v895_v38 = vadd.f32 %v894_v0, %v1865_v59  ;;  %v931_v39 = vadd.f32 %v930_v14, %v916_v62  ;;  %v885_v23 = vadd.f32 %v1323_v35, %v788_v60  ;;  %v923_v61 = vmul.f32 %v882_v17, %v882_v17 }
 0x13c   :  { %v932_v2 = vadd.f32 %v931_v39, %v917_v36  ;;  %v896_v3 = vadd.f32 %v895_v38, %v1874_v63  ;;  %v924_v14 = vmul.f32 %v885_v23, %v885_v23 }
 0x13e   :  { %v897_v1 = vadd.f32 %v896_v3, %v1884_v37  ;;  %v933_v11 = vadd.f32 %v932_v2, %v918_v4  ;;  %v958_v3 = vlaneseq }
 0x140   :  { %v898_v18 = vadd.f32 %v897_v1, %v1894_v48  ;;  %v934_v58 = vadd.f32 %v933_v11, %v919_v54  ;;  %v959_v5 = vshrl.u32 %v958_v3, 7 }
 0x142   :  { %v899_v57 = vadd.f32 %v898_v18, %v1905_v55  ;;  %v935_v21 = vadd.f32 %v934_v58, %v920_v13  ;;  %v960_v50 = vsub.s32 0, %v959_v5 }
 0x144   :  { %v900_v19 = vadd.f32 %v899_v57, %v1910_v15  ;;  %v936_v26 = vadd.f32 %v935_v21, %v921_v20 }
 0x146   :  { %v901_v62 = vadd.f32 %v900_v19, %v882_v17  ;;  %v937_v0 = vadd.f32 %v936_v26, %v922_v25 }
 0x148   :  { %v902_v27 = vadd.f32 %v901_v62, %v885_v23  ;;  %v938_v28 = vadd.f32 %v937_v0, %v923_v61  ;;  %v1004_v61 = vld [vmem:[%s2039_s4 + $0x20] sm:$0xff]  ;;  %v1005_v62 = vld [vmem:[%s2039_s4 + $0x28] sm:$0xff]  ;;  %v1006_v0 = vld [vmem:[%s2039_s4 + $0x30] sm:$0xff] }
 0x14a   :  { %v903_v49 = vrot.slane %v902_v27, 4  ;;  %v939_v29 = vadd.f32 %v938_v28, %v924_v14 }
 0x14c   :  { %v904_v30 = vadd.f32 %v903_v49, %v902_v27  ;;  %v940_v32 = vrot.slane %v939_v29, 4 }
 0x14e   :  { %v905_v33 = vrot.slane %v904_v30, 2  ;;  %v941_v34 = vadd.f32 %v940_v32, %v939_v29  ;;  %v1007_v29 = vld [vmem:[%s2039_s4 + $0x38] sm:$0xff]  ;;  %v1009_v32 = vld [vmem:[%s2039_s4 + $0x48] sm:$0xff] }
 0x150   :  { %v906_v36 = vadd.f32 %v905_v33, %v904_v30  ;;  %v942_v35 = vrot.slane %v941_v34, 2  ;;  %v1008_v30 = vld [vmem:[%s2039_s4 + $0x40] sm:$0xff] }
 0x152   :  { %v907_v38 = vrot.slane %v906_v36, 1  ;;  %v943_v39 = vadd.f32 %v942_v35, %v941_v34 }
 0x154   :  { %v908_v40 = vadd.f32 %v907_v38, %v906_v36  ;;  %v944_v42 = vrot.slane %v943_v39, 1  ;;  %v1010_v38 = vld [vmem:[%s2039_s4 + $0x50] sm:$0xff] }
 0x156   :  { %v945_v43 = vadd.f32 %v944_v42, %v943_v39  ;;  %v946_v44 = vmul.f32 0.0078125, %v908_v40  ;;  %v1011_v39 = vld [vmem:[%s2039_s4 + $0x58] sm:$0xff]  ;;  %v1012_v40 = vld [vmem:[%s2039_s4 + $0x60] sm:$0xff]  ;;  %v1013_v42 = vld [vmem:[%s2039_s4 + $0x68] sm:$0xff] }
 0x158   :  { %v947_v45 = vmul.f32 0.0078125, %v945_v43  ;;  %v948_v46 = vmul.f32 %v946_v44, %v946_v44  ;;  %v1014_v43 = vld [vmem:[%s2039_s4 + $0x70] sm:$0xff] }
 0x15a   :  { %v949_v47 = vsub.f32 %v947_v45, %v948_v46 }
 0x15c   :  { %v950_v4 = vmax.f32 %v949_v47, 0.0 }
 0x15e   :  { %v951_v2 = vadd.f32 1e-05, %v950_v4 }
 0x160   :  { %1436 = vrsqrt.f32 %v951_v2 }
 0x16d   :  { %v1437_v52 = vpop.eup %1436 }
 0x16e   :  { %v954_v7 = vmul.f32 %v1437_v52, %v953_v51 }
 0x170   :  { %v956_v10 = vmul.f32 %v954_v7, %v946_v44  ;;  %v961_v53 = vrot.slane %v954_v7, %v960_v50  ;;  %v1015_v44 = vld [vmem:[%s2039_s4 + $0x78] sm:$0xff] }
 0x172   :  { %v957_v54 = vsub.f32 %v955_v8, %v956_v10  ;;  %v962_v1 = vmul.f32 %v961_v53, %v1801_v16  ;;  %v963_v11 = vmul.f32 %v961_v53, %v1807_v24  ;;  %v964_v12 = vmul.f32 %v961_v53, %v1805_v22 }
 0x173   :  { %v965_v13 = vmul.f32 %v961_v53, %v1819_v31  ;;  %v966_v18 = vmul.f32 %v961_v53, %v1832_v41  ;;  %v967_v58 = vmul.f32 %v961_v53, %v1850_v9  ;;  %v968_v60 = vmul.f32 %v961_v53, %v1845_v6  ;;  %v1000_v6 = vld [vmem:[%s2039_s4] sm:$0xff] }
 0x174   :  { %v969_v20 = vmul.f32 %v961_v53, %v1856_v56  ;;  %v970_v57 = vmul.f32 %v961_v53, %v1865_v59  ;;  %v971_v21 = vmul.f32 %v961_v53, %v1874_v63  ;;  %v972_v16 = vmul.f32 %v961_v53, %v1884_v37  ;;  %v1001_v63 = vld [vmem:[%s2039_s4 + $0x8] sm:$0xff]  ;;  %v1002_v37 = vld [vmem:[%s2039_s4 + $0x10] sm:$0xff] }
 0x175   :  { %v973_v24 = vmul.f32 %v961_v53, %v1894_v48  ;;  %v982_v19 = vrot.slane %v957_v54, %v960_v50  ;;  %v974_v22 = vmul.f32 %v961_v53, %v1905_v55  ;;  %v975_v31 = vmul.f32 %v961_v53, %v1910_v15  ;;  %v1003_v48 = vld [vmem:[%s2039_s4 + $0x18] sm:$0xff] }
 0x176   :  { %v976_v41 = vmul.f32 %v961_v53, %v882_v17  ;;  %v977_v25 = vmul.f32 %v961_v53, %v885_v23 }
 0x177   :  { %v984_v9 = vadd.f32 %v982_v19, %v962_v1  ;;  %v985_v56 = vadd.f32 %v982_v19, %v963_v11  ;;  %v986_v59 = vadd.f32 %v982_v19, %v964_v12  ;;  %v987_v26 = vadd.f32 %v982_v19, %v965_v13 }
 0x178   :  { %v988_v55 = vadd.f32 %v982_v19, %v966_v18  ;;  %v989_v15 = vadd.f32 %v982_v19, %v967_v58  ;;  %v990_v17 = vadd.f32 %v982_v19, %v968_v60  ;;  %v991_v23 = vadd.f32 %v982_v19, %v969_v20 }
 0x179   :  { %v992_v14 = vadd.f32 %v982_v19, %v970_v57  ;;  %v993_v27 = vadd.f32 %v982_v19, %v971_v21  ;;  %v994_v28 = vadd.f32 %v982_v19, %v972_v16  ;;  %v995_v49 = vadd.f32 %v982_v19, %v973_v24 }
 0x17a   :  { %v996_v33 = vadd.f32 %v982_v19, %v974_v22  ;;  %v997_v34 = vadd.f32 %v982_v19, %v975_v31  ;;  %v998_v36 = vadd.f32 %v982_v19, %v976_v41  ;;  %v999_v35 = vadd.f32 %v982_v19, %v977_v25 }
 0x17b   :  { %v1016_v45 = vadd.f32 %v1000_v6, %v984_v9  ;;  %v1017_v46 = vadd.f32 %v1001_v63, %v985_v56  ;;  %v1018_v47 = vadd.f32 %v1002_v37, %v986_v59  ;;  %v1019_v4 = vadd.f32 %v1003_v48, %v987_v26 }
 0x17c   :  { %v1020_v2 = vadd.f32 %v1004_v61, %v988_v55  ;;  %v1021_v3 = vadd.f32 %v1005_v62, %v989_v15  ;;  %v1022_v5 = vadd.f32 %v1006_v0, %v990_v17  ;;  %v1023_v51 = vadd.f32 %v1007_v29, %v991_v23 }
 0x17d   :  { %v1024_v50 = vadd.f32 %v1008_v30, %v992_v14  ;;  %v1025_v52 = vadd.f32 %v1009_v32, %v993_v27  ;;  %v1026_v7 = vadd.f32 %v1010_v38, %v994_v28  ;;  %v1027_v8 = vadd.f32 %v1011_v39, %v995_v49 }
 0x17e   :  { %v1028_v10 = vadd.f32 %v1012_v40, %v996_v33  ;;  %v1029_v53 = vadd.f32 %v1013_v42, %v997_v34  ;;  %v1030_v54 = vadd.f32 %v1014_v43, %v998_v36  ;;  %v1031_v1 = vadd.f32 %v1015_v44, %v999_v35 }
 0x17f   :  { %v1032_v11 = vmax.f32 %v1016_v45, 0.0  ;;  %v1033_v12 = vmax.f32 %v1017_v46, 0.0  ;;  %v1034_v13 = vmax.f32 %v1018_v47, 0.0  ;;  %v1035_v18 = vmax.f32 %v1019_v4, 0.0 }
 0x180   :  { %v1036_v58 = vmax.f32 %v1020_v2, 0.0  ;;  %v1037_v60 = vmax.f32 %v1021_v3, 0.0  ;;  %v1038_v20 = vmax.f32 %v1022_v5, 0.0  ;;  %v1039_v57 = vmax.f32 %v1023_v51, 0.0 }
 0x181   :  { %v1040_v21 = vmax.f32 %v1024_v50, 0.0  ;;  %v1041_v16 = vmax.f32 %v1025_v52, 0.0  ;;  %v1042_v24 = vmax.f32 %v1026_v7, 0.0  ;;  %v1043_v19 = vmax.f32 %v1027_v8, 0.0  ;;  %1048 = vst [vmem:[%s2040_s5] sm:$0xff] %v1032_v11  ;;  %1049 = vst [vmem:[%s2040_s5 + $0x8] sm:$0xff] %v1033_v12 }
 0x182   :  { %1050 = vst [vmem:[%s2040_s5 + $0x10] sm:$0xff] %v1034_v13  ;;  %1051 = vst [vmem:[%s2040_s5 + $0x18] sm:$0xff] %v1035_v18  ;;  %v1044_v22 = vmax.f32 %v1028_v10, 0.0  ;;  %v1045_v31 = vmax.f32 %v1029_v53, 0.0  ;;  %v1046_v41 = vmax.f32 %v1030_v54, 0.0  ;;  %v1047_v25 = vmax.f32 %v1031_v1, 0.0 }
 0x183   :  { %1052 = vst [vmem:[%s2040_s5 + $0x20] sm:$0xff] %v1036_v58  ;;  %1053 = vst [vmem:[%s2040_s5 + $0x28] sm:$0xff] %v1037_v60 }
 0x184   :  { %1054 = vst [vmem:[%s2040_s5 + $0x30] sm:$0xff] %v1038_v20  ;;  %1055 = vst [vmem:[%s2040_s5 + $0x38] sm:$0xff] %v1039_v57 }
 0x185   :  { %1056 = vst [vmem:[%s2040_s5 + $0x40] sm:$0xff] %v1040_v21  ;;  %1057 = vst [vmem:[%s2040_s5 + $0x48] sm:$0xff] %v1041_v16 }
 0x186   :  { %1058 = vst [vmem:[%s2040_s5 + $0x50] sm:$0xff] %v1042_v24  ;;  %1059 = vst [vmem:[%s2040_s5 + $0x58] sm:$0xff] %v1043_v19 }
 0x187   :  { %1060 = vst [vmem:[%s2040_s5 + $0x60] sm:$0xff] %v1044_v22  ;;  %1061 = vst [vmem:[%s2040_s5 + $0x68] sm:$0xff] %v1045_v31 }
 0x188   :  { %1062 = vst [vmem:[%s2040_s5 + $0x70] sm:$0xff] %v1046_v41  ;;  %1063 = vst [vmem:[%s2040_s5 + $0x78] sm:$0xff] %v1047_v25 }

// kernel: resnet_forward.22
= control target key start
LH: loop header
LB: loop body
LE: loop exit
PB: predicated region body
PF: predicated region fallthrough
CT: control target
= control target key end

     0   :  { %s998_s1 = inlined_call_operand.vmem [shape: bf16[640,128], index: 1, kind: input, shape index: {}]   ;;  %s999_s0 = inlined_call_operand.vmem [shape: bf16[32,640], index: 0, kind: input, shape index: {}]   ;;  %s1000_s2 = inlined_call_operand.vmem [shape: f32[1,128], index: 2, kind: input, shape index: {}]   ;;  %s1001_s3 = inlined_call_operand.vmem [shape: f32[1,128], index: 3, kind: input, shape index: {}]   ;;  %s1002_s4 = inlined_call_operand.vmem [shape: f32[32,128], index: 4, kind: output, shape index: {}]  }
   0x1   :  { %v749_v0 = vld [vmem:[%s998_s1 + $0x78] sm:$0xff]   ;;  %v753_v4 = vld [vmem:[%s998_s1 + $0x70] sm:$0xff]   ;;  %v757_v8 = vld [vmem:[%s998_s1 + $0x68] sm:$0xff]  }
   0x2   :  { %v750_v1 = vld [vmem:[%s998_s1 + $0xf8] sm:$0xff]   ;;  %663 = vmatprep.subr.bf16.mxu0 %v749_v0  ;;  %v754_v5 = vld [vmem:[%s998_s1 + $0xf0] sm:$0xff]   ;;  %v758_v9 = vld [vmem:[%s998_s1 + $0xe8] sm:$0xff]  }
   0x3   :  { %v751_v2 = vld [vmem:[%s998_s1 + $0x38] sm:$0xff]   ;;  %691 = vmatprep.subr.bf16.mxu1 %v750_v1  ;;  %v755_v6 = vld [vmem:[%s998_s1 + $0x30] sm:$0xff]   ;;  %v759_v10 = vld [vmem:[%s998_s1 + $0x28] sm:$0xff]  }
   0x4   :  { %v752_v3 = vld [vmem:[%s998_s1 + $0xb8] sm:$0xff]   ;;  %664 = vmatpush3.bf16.msra.mxu0 %v751_v2  ;;  %v756_v7 = vld [vmem:[%s998_s1 + $0xb0] sm:$0xff]   ;;  %v760_v11 = vld [vmem:[%s998_s1 + $0xa8] sm:$0xff]  }
   0x5   :  { %692 = vmatpush3.bf16.msra.mxu1 %v752_v3  ;;  %665 = vmatprep.subr.bf16.mxu0 %v753_v4  ;;  %v761_v12 = vld [vmem:[%s998_s1 + $0x60] sm:$0xff]   ;;  %v765_v16 = vld [vmem:[%s998_s1 + $0x58] sm:$0xff]   ;;  %v769_v20 = vld [vmem:[%s998_s1 + $0x50] sm:$0xff]  }
   0x6   :  { %693 = vmatprep.subr.bf16.mxu1 %v754_v5  ;;  %v762_v13 = vld [vmem:[%s998_s1 + $0xe0] sm:$0xff]   ;;  %v766_v17 = vld [vmem:[%s998_s1 + $0xd8] sm:$0xff]   ;;  %v770_v21 = vld [vmem:[%s998_s1 + $0xd0] sm:$0xff]  }
   0x7   :  { %v763_v14 = vld [vmem:[%s998_s1 + $0x20] sm:$0xff]   ;;  %v767_v18 = vld [vmem:[%s998_s1 + $0x18] sm:$0xff]   ;;  %v771_v22 = vld [vmem:[%s998_s1 + $0x10] sm:$0xff]  }
   0x8   :  { %666 = vmatpush3.bf16.msra.mxu0 %v755_v6  ;;  %v764_v15 = vld [vmem:[%s998_s1 + $0xa0] sm:$0xff]   ;;  %v768_v19 = vld [vmem:[%s998_s1 + $0x98] sm:$0xff]   ;;  %v772_v23 = vld [vmem:[%s998_s1 + $0x90] sm:$0xff]  }
   0x9   :  { %694 = vmatpush3.bf16.msra.mxu1 %v756_v7  ;;  %667 = vmatprep.subr.bf16.mxu0 %v757_v8  ;;  %v773_v24 = vld [vmem:[%s998_s1 + $0x48] sm:$0xff]   ;;  %v777_v28 = vld [vmem:[%s998_s1 + $0x40] sm:$0xff]   ;;  %v787_v36 = vld [vmem:[%s998_s1 + $0x138] sm:$0xff]  }
   0xa   :  { %695 = vmatprep.subr.bf16.mxu1 %v758_v9  ;;  %v774_v25 = vld [vmem:[%s998_s1 + $0xc8] sm:$0xff]   ;;  %v778_v29 = vld [vmem:[%s998_s1 + $0xc0] sm:$0xff]   ;;  %v788_v37 = vld [vmem:[%s998_s1 + $0x130] sm:$0xff]  }
   0xb   :  { %v775_v26 = vld [vmem:[%s998_s1 + $0x8] sm:$0xff]   ;;  %v779_v30 = vld [vmem:[%s998_s1] sm:$0xff]   ;;  %v791_v45 = vld [vmem:[%s998_s1 + $0x118] sm:$0xff]  }
   0xc   :  { %668 = vmatpush3.bf16.msra.mxu0 %v759_v10  ;;  %v776_v27 = vld [vmem:[%s998_s1 + $0x88] sm:$0xff]   ;;  %v780_v31 = vld [vmem:[%s998_s1 + $0x80] sm:$0xff]   ;;  %v798_v46 = vld [vmem:[%s998_s1 + $0x110] sm:$0xff]  }
   0xd   :  { %696 = vmatpush3.bf16.msra.mxu1 %v760_v11  ;;  %669 = vmatprep.subr.bf16.mxu0 %v761_v12  ;;  %v781_v32 = vld [vmem:[%s999_s0] ss:$20 sps:$4 sm:$0xff]   ;;  %v783_v33 = vld [vmem:[%s999_s0 + $0x4] ss:$20 sps:$4 sm:$0xff]   ;;  %v784_v34 = vld [vmem:[%s999_s0 + $0x8] ss:$20 sps:$4 sm:$0xff]  }
   0xe   :  { %697 = vmatprep.subr.bf16.mxu1 %v762_v13  ;;  %v786_v35 = vld [vmem:[%s999_s0 + $0xc] ss:$20 sps:$4 sm:$0xff]   ;;  %434 = vmatprep.mubr.bf16.mxu0 %v783_v33  ;;  %v794_v40 = vld [vmem:[%s999_s0 + $0x34] ss:$20 sps:$4 sm:$0xff]   ;;  %v797_v42 = vld [vmem:[%s999_s0 + $0x30] ss:$20 sps:$4 sm:$0xff]  }
   0xf   :  { %483 = vmatprep.mubr.bf16.mxu1 %v786_v35  ;;  %v789_v38 = vld [vmem:[%s998_s1 + $0x128] sm:$0xff]   ;;  %v790_v43 = vld [vmem:[%s998_s1 + $0x120] sm:$0xff]  }
  0x10   :  { %670 = vmatpush3.bf16.msra.mxu0 %v763_v14  ;;  %v792_v39 = vld [vmem:[%s999_s0 + $0x2c] ss:$20 sps:$4 sm:$0xff]   ;;  %v796_v41 = vld [vmem:[%s999_s0 + $0x28] ss:$20 sps:$4 sm:$0xff]   ;;  %v801_v44 = vld [vmem:[%s999_s0 + $0x10] ss:$20 sps:$4 sm:$0xff]  }
  0x11   :  { %698 = vmatpush3.bf16.msra.mxu1 %v764_v15  ;;  %671 = vmatprep.subr.bf16.mxu0 %v765_v16  ;;  %v799_v47 = vld [vmem:[%s998_s1 + $0x108] sm:$0xff]   ;;  %v800_v48 = vld [vmem:[%s998_s1 + $0x100] sm:$0xff]  }
  0x12   :  { %699 = vmatprep.subr.bf16.mxu1 %v766_v17  ;;  %v802_v49 = vld [vmem:[%s999_s0 + $0x38] ss:$20 sps:$4 sm:$0xff]  }
  0x14   :  { %672 = vmatpush3.bf16.msra.mxu0 %v767_v18 }
  0x15   :  { %700 = vmatpush3.bf16.msra.mxu1 %v768_v19  ;;  %673 = vmatprep.subr.bf16.mxu0 %v769_v20 }
  0x16   :  { %701 = vmatprep.subr.bf16.mxu1 %v770_v21 }
  0x18   :  { %674 = vmatpush3.bf16.msra.mxu0 %v771_v22 }
  0x19   :  { %702 = vmatpush3.bf16.msra.mxu1 %v772_v23  ;;  %675 = vmatprep.subr.bf16.mxu0 %v773_v24 }
  0x1a   :  { %703 = vmatprep.subr.bf16.mxu1 %v774_v25 }
  0x1c   :  { %676 = vmatpush3.bf16.msra.mxu0 %v775_v26 }
  0x1d   :  { %704 = vmatpush3.bf16.msra.mxu1 %v776_v27  ;;  %677 = vmatprep.subr.bf16.mxu0 %v777_v28 }
  0x1e   :  { %705 = vmatprep.subr.bf16.mxu1 %v778_v29 }
  0x20   :  { %678 = vmatpush3.bf16.msra.mxu0 %v779_v30 }
  0x21   :  { %706 = vmatpush3.bf16.msra.mxu1 %v780_v31  ;;  %729 = vmatprep.subr.bf16.mxu0 %v787_v36 }
  0x23   :  { %435 = vmatmul.mubr.bf16.vlgmr.msra.gmra.mxu0 %v781_v32 }
  0x24   :  { %484 = vmatmul.mubr.bf16.vlgmr.msra.gmra.mxu1 %v784_v34  ;;  %730 = vmatpush3.bf16.msra.mxu0 %v787_v36 }
  0x25   :  { %731 = vmatprep.subr.bf16.mxu0 %v788_v37  ;;  %442 = vmatprep.mubr.bf16.mxu0 %v792_v39 }
  0x26   :  { %491 = vmatprep.mubr.bf16.mxu1 %v794_v40 }
  0x28   :  { %732 = vmatpush3.bf16.msra.mxu0 %v788_v37 }
  0x29   :  { %733 = vmatprep.subr.bf16.mxu0 %v789_v38 }
  0x2b   :  { %443 = vmatmul.mubr.bf16.gmra.mxu0 %v796_v41 }
  0x2c   :  { %492 = vmatmul.mubr.bf16.gmra.mxu1 %v797_v42  ;;  %734 = vmatpush3.bf16.msra.mxu0 %v789_v38 }
  0x2d   :  { %735 = vmatprep.subr.bf16.mxu0 %v790_v43  ;;  %745 = vmatprep.mubr.bf16.mxu0 %v801_v44 }
  0x30   :  { %736 = vmatpush3.bf16.msra.mxu0 %v790_v43 }
  0x31   :  { %737 = vmatprep.subr.bf16.mxu0 %v791_v45 }
  0x34   :  { %738 = vmatpush3.bf16.msra.mxu0 %v791_v45 }
  0x35   :  { %739 = vmatprep.subr.bf16.mxu0 %v798_v46 }
  0x38   :  { %740 = vmatpush3.bf16.msra.mxu0 %v798_v46 }
  0x39   :  { %741 = vmatprep.subr.bf16.mxu0 %v799_v47 }
  0x3c   :  { %742 = vmatpush3.bf16.msra.mxu0 %v799_v47 }
  0x3d   :  { %743 = vmatprep.subr.bf16.mxu0 %v800_v48 }
  0x40   :  { %744 = vmatpush3.bf16.msra.mxu0 %v800_v48 }
  0x43   :  { %746 = vmatmul.mubr.bf16.vlgmr.msra.gmra.mxu0 %v802_v49 }
  0xe3   :  { %v679_v50 = vpop.f32.mrf.mxu0 }
  0xe4   :  { %v707_v51 = vpop.f32.mrf.mxu1 }
  0xe5   :  { %v680_v52 = vpop.f32.mrf.mxu0 }
  0xe6   :  { %v708_v53 = vpop.f32.mrf.mxu1  ;;  %v681_v1 = vadd.f32 %v680_v52, %v679_v50  ;;  %v583_v50 = vlaneseq  ;;  %v578_v52 = vld [vmem:[%s1000_s2] sm:$0x1] }
  0xe7   :  { %v682_v54 = vpop.f32.mrf.mxu0  ;;  %v709_v2 = vadd.f32 %v708_v53, %v707_v51 }
  0xe8   :  { %v710_v55 = vpop.f32.mrf.mxu1  ;;  %v584_v51 = vshrl.u32 %v583_v50, 7 }
  0xe9   :  { %v683_v56 = vpop.f32.mrf.mxu0  ;;  %v486_v12 = vadd.f32 %v709_v2, %v681_v1 }
  0xea   :  { %v711_v57 = vpop.f32.mrf.mxu1  ;;  %v684_v5 = vadd.f32 %v683_v56, %v682_v54  ;;  %v585_v53 = vsub.s32 0, %v584_v51  ;;  %v580_v56 = vld [vmem:[%s1001_s3] sm:$0x1] }
  0xeb   :  { %v685_v58 = vpop.f32.mrf.mxu0  ;;  %v712_v6 = vadd.f32 %v711_v57, %v710_v55 }
  0xec   :  { %v713_v59 = vpop.f32.mrf.mxu1 }
  0xed   :  { %v686_v60 = vpop.f32.mrf.mxu0  ;;  %v489_v16 = vadd.f32 %v712_v6, %v684_v5 }
  0xee   :  { %v714_v61 = vpop.f32.mrf.mxu1  ;;  %v687_v7 = vadd.f32 %v686_v60, %v685_v58 }
  0xef   :  { %v688_v62 = vpop.f32.mrf.mxu0  ;;  %v715_v8 = vadd.f32 %v714_v61, %v713_v59 }
  0xf0   :  { %v716_v63 = vpop.f32.mrf.mxu1 }
  0xf1   :  { %v689_v0 = vpop.f32.mrf.mxu0  ;;  %v494_v14 = vadd.f32 %v715_v8, %v687_v7 }
  0xf2   :  { %v717_v3 = vpop.f32.mrf.mxu1  ;;  %v690_v10 = vadd.f32 %v689_v0, %v688_v62 }
  0xf3   :  { %v718_v11 = vadd.f32 %v717_v3, %v716_v63 }
  0xf5   :  { %v497_v19 = vadd.f32 %v718_v11, %v690_v10 }
 0x103   :  { %v747_v4 = vpop.f32.mrf.mxu0 }
 0x104   :  { %v543_v18 = vadd.f32 %v747_v4, %v494_v14 }
 0x105   :  { %v534_v9 = vpop.f32.mrf.mxu0 }
 0x106   :  { %v535_v15 = vadd.f32 %v534_v9, %v486_v12  ;;  %v560_v25 = vmul.f32 %v543_v18, %v543_v18 }
 0x107   :  { %v748_v13 = vpop.f32.mrf.mxu0 }
 0x108   :  { %v558_v21 = vmul.f32 %v535_v15, %v535_v15  ;;  %v546_v22 = vadd.f32 %v748_v13, %v497_v19 }
 0x109   :  { %v537_v17 = vpop.f32.mrf.mxu0 }
 0x10a   :  { %v538_v20 = vadd.f32 %v537_v17, %v489_v16  ;;  %v561_v28 = vmul.f32 %v546_v22, %v546_v22 }
 0x10c   :  { %v549_v23 = vadd.f32 %v538_v20, %v535_v15  ;;  %v559_v24 = vmul.f32 %v538_v20, %v538_v20 }
 0x10e   :  { %v550_v26 = vadd.f32 %v549_v23, %v543_v18  ;;  %v562_v27 = vadd.f32 %v559_v24, %v558_v21 }
 0x110   :  { %v551_v29 = vadd.f32 %v550_v26, %v546_v22  ;;  %v563_v30 = vadd.f32 %v562_v27, %v560_v25 }
 0x112   :  { %v552_v31 = vrot.slane %v551_v29, 4  ;;  %v564_v32 = vadd.f32 %v563_v30, %v561_v28 }
 0x114   :  { %v553_v33 = vadd.f32 %v552_v31, %v551_v29  ;;  %v565_v34 = vrot.slane %v564_v32, 4 }
 0x116   :  { %v554_v35 = vrot.slane %v553_v33, 2  ;;  %v566_v36 = vadd.f32 %v565_v34, %v564_v32 }
 0x118   :  { %v555_v37 = vadd.f32 %v554_v35, %v553_v33  ;;  %v567_v38 = vrot.slane %v566_v36, 2 }
 0x11a   :  { %v556_v39 = vrot.slane %v555_v37, 1  ;;  %v568_v40 = vadd.f32 %v567_v38, %v566_v36 }
 0x11c   :  { %v557_v41 = vadd.f32 %v556_v39, %v555_v37  ;;  %v569_v42 = vrot.slane %v568_v40, 1 }
 0x11e   :  { %v570_v43 = vadd.f32 %v569_v42, %v568_v40  ;;  %v571_v44 = vmul.f32 0.03125, %v557_v41 }
 0x120   :  { %v572_v45 = vmul.f32 0.03125, %v570_v43  ;;  %v573_v46 = vmul.f32 %v571_v44, %v571_v44 }
 0x122   :  { %v574_v47 = vsub.f32 %v572_v45, %v573_v46 }
 0x124   :  { %v575_v48 = vmax.f32 %v574_v47, 0.0 }
 0x126   :  { %v576_v49 = vadd.f32 1e-05, %v575_v48 }
 0x128   :  { %803 = vrsqrt.f32 %v576_v49 }
 0x135   :  { %v804_v54 = vpop.eup %803 }
 0x136   :  { %v579_v55 = vmul.f32 %v804_v54, %v578_v52 }
 0x138   :  { %v581_v57 = vmul.f32 %v579_v55, %v571_v44  ;;  %v586_v58 = vrot.slane %v579_v55, %v585_v53 }
 0x13a   :  { %v582_v59 = vsub.f32 %v580_v56, %v581_v57  ;;  %v587_v60 = vmul.f32 %v586_v58, %v535_v15  ;;  %v588_v61 = vmul.f32 %v586_v58, %v538_v20  ;;  %v589_v62 = vmul.f32 %v586_v58, %v543_v18 }
 0x13b   :  { %v590_v63 = vmul.f32 %v586_v58, %v546_v22 }
 0x13c   :  { %v595_v0 = vrot.slane %v582_v59, %v585_v53 }
 0x13e   :  { %v597_v1 = vadd.f32 %v595_v0, %v587_v60  ;;  %v598_v2 = vadd.f32 %v595_v0, %v588_v61  ;;  %v599_v3 = vadd.f32 %v595_v0, %v589_v62  ;;  %v600_v4 = vadd.f32 %v595_v0, %v590_v63 }
 0x140   :  { %v601_v5 = vmax.f32 %v597_v1, 0.0  ;;  %v602_v6 = vmax.f32 %v598_v2, 0.0  ;;  %v603_v7 = vmax.f32 %v599_v3, 0.0  ;;  %v604_v8 = vmax.f32 %v600_v4, 0.0 }
 0x142   :  { %605 = vst [vmem:[%s1002_s4] sm:$0xff] %v601_v5  ;;  %606 = vst [vmem:[%s1002_s4 + $0x8] sm:$0xff] %v602_v6 }
 0x143   :  { %607 = vst [vmem:[%s1002_s4 + $0x10] sm:$0xff] %v603_v7  ;;  %608 = vst [vmem:[%s1002_s4 + $0x18] sm:$0xff] %v604_v8 }

// kernel: resnet_forward.28
= control target key start
LH: loop header
LB: loop body
LE: loop exit
PB: predicated region body
PF: predicated region fallthrough
CT: control target
= control target key end

     0   :  { %s683_s15 = smov 0   ;;  %s685_s16 = smov 0   ;;  %s764_s0 = inlined_call_operand.vmem [shape: bf16[8,128], index: 0, kind: input, shape index: {}]   ;;  %s765_s1 = inlined_call_operand.vmem [shape: bf16[128,256], index: 1, kind: input, shape index: {}]   ;;  %s766_s2 = inlined_call_operand.vmem [shape: f32[1,256], index: 2, kind: input, shape index: {}]   ;;  %s767_s3 = inlined_call_operand.vmem [shape: f32[1,256], index: 3, kind: input, shape index: {}]   ;;  %s768_s4 = inlined_call_operand.vmem [shape: f32[8,256], index: 4, kind: output, shape index: {}]  }
   0x1   :  { %s687_s17 = smov 0  }
   0x2 LB: > { %s548_s18 = sadd.s32 4294967295, %s654_s17   ;;  %s700_s19 = sadd.s32 1, %s654_s17   ;;  %s654_s17 = sphi %s687_s17, %s771_s17   ;;  %s650_s16 = sphi %s685_s16, %s770_s16   ;;  %s646_s15 = sphi %s683_s15, %s769_s15  }
   0x3   : > { %s39_s20 = ssub.s32 %s654_s17, %s700_s19  ;;  %s42_s21 = sadd.s32 1, %s650_s16 }
   0x4   : > { %p40_p0 = scmp.eq.s32.totalorder %s39_s20, 0  ;;  %p49_p1 = scmp.ne.s32.totalorder %s650_s16, %s646_s15 }
   0x5   : > { %p50_p2 = scmp.eq.s32.totalorder %s654_s17, 0  ;;  %p551_p4 = scmp.ge.s32.totalorder %s654_s17, 2 }
   0x6   : > { %s709_s22 = scalar_select %p40_p0, %s650_s16, %s42_s21  }
   0x7   : > { %p51_p3 = por %p50_p2, %p49_p1  ;;  %156 = sbr.rel (%p551_p4) target bundleno = 26 (0x1a), region = 20 }
   0xc   : > { %159 = sbr.rel (!%p51_p3) target bundleno = 26 (0x1a), region = 24  ;;  %s161_s23 = sand.u32 (%p51_p3), 1, %s650_s16  }
   0xd   : > { %s553_s24 = sshll.u32 (%p51_p3), %s654_s17, 2  ;;  %s552_s25 = sshll.u32 (%p51_p3), %s161_s23, 6 }
   0xe   : > { %s717_s28 = scalar_lea.vmem (%p51_p3), %s765_s1, %s553_s24  ;;  %s163_s29 = scalar_lea.vmem (%p51_p3), [#allocation2], %s552_s25 }
   0xf   : > { %v182_v0 = vld [vmem:[%s717_s28] sm:$0xf] (%p51_p3)  ;;  %v184_v1 = vld [vmem:[%s717_s28 + $0x8] sm:$0xf] (%p51_p3)  ;;  %v186_v2 = vld [vmem:[%s717_s28 + $0x10] sm:$0xf] (%p51_p3) }
  0x10   : > { %183 = vst [vmem:[%s163_s29] sm:$0xf] (%p51_p3), %v182_v0  ;;  %185 = vst [vmem:[%s163_s29 + $0x4] sm:$0xf] (%p51_p3), %v184_v1  ;;  %v188_v3 = vld [vmem:[%s717_s28 + $0x18] sm:$0xf] (%p51_p3) }
  0x11   : > { %v190_v4 = vld [vmem:[%s717_s28 + $0x20] sm:$0xf]  ;;  %187 = vst [vmem:[%s163_s29 + $0x8] sm:$0xf] %v186_v2  ;;  %189 = vst [vmem:[%s163_s29 + $0xc] sm:$0xf] %v188_v3 }
  0x12   : > { %191 = vst [vmem:[%s163_s29 + $0x10] sm:$0xf] %v190_v4  ;;  %v192_v5 = vld [vmem:[%s717_s28 + $0x28] sm:$0xf]  ;;  %v194_v6 = vld [vmem:[%s717_s28 + $0x30] sm:$0xf] }
  0x13   : > { %v196_v7 = vld [vmem:[%s717_s28 + $0x38] sm:$0xf]  ;;  %193 = vst [vmem:[%s163_s29 + $0x14] sm:$0xf] %v192_v5  ;;  %195 = vst [vmem:[%s163_s29 + $0x18] sm:$0xf] %v194_v6 }
  0x14   : > { %197 = vst [vmem:[%s163_s29 + $0x1c] sm:$0xf] %v196_v7  ;;  %v198_v8 = vld [vmem:[%s717_s28 + $0x40] sm:$0xf]  ;;  %v200_v9 = vld [vmem:[%s717_s28 + $0x48] sm:$0xf] }
  0x15   : > { %v202_v10 = vld [vmem:[%s717_s28 + $0x50] sm:$0xf]  ;;  %199 = vst [vmem:[%s163_s29 + $0x20] sm:$0xf] %v198_v8  ;;  %201 = vst [vmem:[%s163_s29 + $0x24] sm:$0xf] %v200_v9 }
  0x16   : > { %203 = vst [vmem:[%s163_s29 + $0x28] sm:$0xf] %v202_v10  ;;  %v204_v11 = vld [vmem:[%s717_s28 + $0x58] sm:$0xf]  ;;  %v206_v12 = vld [vmem:[%s717_s28 + $0x60] sm:$0xf] }
  0x17   : > { %v208_v13 = vld [vmem:[%s717_s28 + $0x68] sm:$0xf]  ;;  %205 = vst [vmem:[%s163_s29 + $0x2c] sm:$0xf] %v204_v11  ;;  %207 = vst [vmem:[%s163_s29 + $0x30] sm:$0xf] %v206_v12 }
  0x18   : > { %209 = vst [vmem:[%s163_s29 + $0x34] sm:$0xf] %v208_v13  ;;  %v210_v14 = vld [vmem:[%s717_s28 + $0x70] sm:$0xf]  ;;  %v212_v15 = vld [vmem:[%s717_s28 + $0x78] sm:$0xf] }
  0x19   : > { %211 = vst [vmem:[%s163_s29 + $0x38] sm:$0xf] %v210_v14  ;;  %213 = vst [vmem:[%s163_s29 + $0x3c] sm:$0xf] %v212_v15 }
  0x1a PF: > { %p554_p5 = scmp.ge.s32.totalorder %s654_s17, 1  ;;  %p280_p6 = scmp.lt.s32.totalorder %s654_s17, 3 }
  0x1c   : > { %p281_p7 = pnand %p554_p5, %p280_p6 }
  0x1d   : > { %s287_s30 = sand.u32 (!%p281_p7), 1, %s646_s15   ;;  %p317_p8 = scmp.lt.s32.totalorder (!%p281_p7), %s548_s18, 1 }
  0x1e   : > { %284 = sbr.rel (%p281_p7) target bundleno = 308 (0x134), region = 73  ;;  %s555_s5 = sshll.u32 (!%p281_p7), %s287_s30, 6 }
  0x1f   : > { %s289_s6 = scalar_lea.vmem (!%p281_p7), [#allocation2], %s555_s5 }
  0x23   : > { %v656_v16 = vmov 0.0   ;;  %vm657_vm0 = vmmov 0   ;;  %v622_v17 = vld [vmem:[%s289_s6 + $0x38] sm:$0xff]   ;;  %v623_v18 = vld [vmem:[%s289_s6 + $0x30] sm:$0xff]   ;;  %v624_v19 = vld [vmem:[%s289_s6 + $0x28] sm:$0xff]   ;;  %s773_s18 = smov (!%p317_p8, %s548_s18), 1  ;;  %v458_v49 = vlaneseq }
  0x24   : > { %576 = vmatprep.subr.bf16.mxu0 %v656_v16  ;;  %592 = vmatprep.mubr.msk.bf16.mxu0 %vm657_vm0, %v656_v16  ;;  %v625_v20 = vld [vmem:[%s289_s6 + $0x20] sm:$0xff]   ;;  %v626_v21 = vld [vmem:[%s289_s6 + $0x18] sm:$0xff]   ;;  %v627_v22 = vld [vmem:[%s289_s6 + $0x10] sm:$0xff]   ;;  %s319_s11 = scalar_lea.vmem %s766_s2, %s773_s18  ;;  %s322_s14 = scalar_lea.vmem %s767_s3, %s773_s18 }
  0x25   : > { %577 = vmatpush3.bf16.msra.mxu0 %v622_v17  ;;  %v628_v23 = vld [vmem:[%s289_s6 + $0x8] sm:$0xff]   ;;  %v629_v24 = vld [vmem:[%s289_s6] sm:$0xff]   ;;  %v459_v50 = vshrl.u32 %v458_v49, 7  ;;  %s556_s15 = sshll.u32 %s773_s18, 3 }
  0x26   : > { %578 = vmatprep.subr.bf16.mxu0 %v656_v16  ;;  %v328_v25 = vld [vmem:[%s764_s0] sm:$0xf]  ;;  %s326_s21 = scalar_lea.vmem %s768_s4, %s556_s15 }
  0x27   : > { %v453_v51 = vld [vmem:[%s319_s11] sm:$0x1]  ;;  %v460_v52 = vsub.s32 0, %v459_v50 }
  0x28   : > { %v455_v55 = vld [vmem:[%s322_s14] sm:$0x1] }
  0x29   : > { %579 = vmatpush3.bf16.msra.mxu0 %v623_v18 }
  0x2a   : > { %580 = vmatprep.subr.bf16.mxu0 %v656_v16 }
  0x2d   : > { %581 = vmatpush3.bf16.msra.mxu0 %v624_v19 }
  0x2e   : > { %582 = vmatprep.subr.bf16.mxu0 %v656_v16 }
  0x31   : > { %583 = vmatpush3.bf16.msra.mxu0 %v625_v20 }
  0x32   : > { %584 = vmatprep.subr.bf16.mxu0 %v656_v16 }
  0x35   : > { %585 = vmatpush3.bf16.msra.mxu0 %v626_v21 }
  0x36   : > { %586 = vmatprep.subr.bf16.mxu0 %v656_v16 }
  0x39   : > { %587 = vmatpush3.bf16.msra.mxu0 %v627_v22 }
  0x3a   : > { %588 = vmatprep.subr.bf16.mxu0 %v656_v16 }
  0x3d   : > { %589 = vmatpush3.bf16.msra.mxu0 %v628_v23 }
  0x3e   : > { %590 = vmatprep.subr.bf16.mxu0 %v656_v16 }
  0x41   : > { %591 = vmatpush3.bf16.msra.mxu0 %v629_v24 }
  0x44   : > { %593 = vmatmul.mubr.bf16.vlgmr.msra.gmra.mxu0 %v328_v25 }
 0x104   : > { %v427_v26 = vpop.f32.mrf.mxu0 }
 0x105   : > { %v433_v27 = vrot.slane %v427_v26, 4  ;;  %v439_v28 = vmul.f32 %v427_v26, %v427_v26 }
 0x106   : > { %v594_v29 = vpop.f32.mrf.mxu0 }
 0x107   : > { %v434_v30 = vadd.f32 %v433_v27, %v427_v26  ;;  %v440_v31 = vrot.slane %v439_v28, 4 }
 0x108   : > { %v430_v32 = vpop.f32.mrf.mxu0 }
 0x109   : > { %v435_v33 = vrot.slane %v434_v30, 2  ;;  %v441_v34 = vadd.f32 %v440_v31, %v439_v28 }
 0x10a   : > { %v595_v35 = vpop.f32.mrf.mxu0 }
 0x10b   : > { %v436_v36 = vadd.f32 %v435_v33, %v434_v30  ;;  %v442_v37 = vrot.slane %v441_v34, 2 }
 0x10d   : > { %v437_v38 = vrot.slane %v436_v36, 1  ;;  %v443_v39 = vadd.f32 %v442_v37, %v441_v34 }
 0x10f   : > { %v438_v40 = vadd.f32 %v437_v38, %v436_v36  ;;  %v444_v41 = vrot.slane %v443_v39, 1 }
 0x111   : > { %v445_v42 = vadd.f32 %v444_v41, %v443_v39  ;;  %v446_v43 = vmul.f32 0.125, %v438_v40 }
 0x113   : > { %v447_v44 = vmul.f32 0.125, %v445_v42  ;;  %v448_v45 = vmul.f32 %v446_v43, %v446_v43 }
 0x115   : > { %v449_v46 = vsub.f32 %v447_v44, %v448_v45 }
 0x117   : > { %v450_v47 = vmax.f32 %v449_v46, 0.0 }
 0x119   : > { %v451_v48 = vadd.f32 1e-05, %v450_v47 }
 0x11b   : > { %630 = vrsqrt.f32 %v451_v48 }
 0x128   : > { %v631_v53 = vpop.eup %630 }
 0x129   : > { %v454_v54 = vmul.f32 %v631_v53, %v453_v51 }
 0x12b   : > { %v456_v56 = vmul.f32 %v454_v54, %v446_v43  ;;  %v461_v57 = vrot.slane %v454_v54, %v460_v52 }
 0x12d   : > { %v457_v58 = vsub.f32 %v455_v55, %v456_v56  ;;  %v462_v59 = vmul.f32 %v461_v57, %v427_v26 }
 0x12f   : > { %v467_v60 = vrot.slane %v457_v58, %v460_v52 }
 0x131   : > { %v469_v61 = vadd.f32 %v467_v60, %v462_v59 }
 0x133   : > { %470 = vst [vmem:[%s326_s21] sm:$0xff] %v469_v61 }
 0x134 PF: > { %p11_p9 = scmp.ge.s32.totalorder %s700_s19, 4   ;;  %s769_s15 = smov %s650_s16 }
 0x135   : > { %s770_s16 = smov %s709_s22  ;;  %s771_s17 = smov %s700_s19 }
 0x136   :  { %13 = sbr.rel (!%p11_p9) target bundleno = 2 (0x2), region = 118 }

// kernel: resnet_forward.24
= control target key start
LH: loop header
LB: loop body
LE: loop exit
PB: predicated region body
PF: predicated region fallthrough
CT: control target
= control target key end

     0   :  { %s1688_s1 = inlined_call_operand.vmem [shape: bf16[1152,128], index: 1, kind: input, shape index: {}]   ;;  %s1689_s0 = inlined_call_operand.vmem [shape: bf16[32,1152], index: 0, kind: input, shape index: {}]   ;;  %s1690_s2 = inlined_call_operand.vmem [shape: f32[1,128], index: 2, kind: input, shape index: {}]   ;;  %s1691_s3 = inlined_call_operand.vmem [shape: f32[1,128], index: 3, kind: input, shape index: {}]   ;;  %s1692_s4 = inlined_call_operand.vmem [shape: f32[32,128], index: 4, kind: input, shape index: {}]   ;;  %s1693_s5 = inlined_call_operand.vmem [shape: f32[32,128], index: 5, kind: output, shape index: {}]  }
   0x1   :  { %v1258_v0 = vld [vmem:[%s1688_s1 + $0x78] sm:$0xff]   ;;  %v1262_v4 = vld [vmem:[%s1688_s1 + $0x70] sm:$0xff]   ;;  %v1266_v8 = vld [vmem:[%s1688_s1 + $0x68] sm:$0xff]  }
   0x2   :  { %v1259_v1 = vld [vmem:[%s1688_s1 + $0xf8] sm:$0xff]   ;;  %1116 = vmatprep.subr.bf16.mxu0 %v1258_v0  ;;  %v1263_v5 = vld [vmem:[%s1688_s1 + $0xf0] sm:$0xff]   ;;  %v1267_v9 = vld [vmem:[%s1688_s1 + $0xe8] sm:$0xff]  }
   0x3   :  { %v1260_v2 = vld [vmem:[%s1688_s1 + $0x38] sm:$0xff]   ;;  %1144 = vmatprep.subr.bf16.mxu1 %v1259_v1  ;;  %v1264_v6 = vld [vmem:[%s1688_s1 + $0x30] sm:$0xff]   ;;  %v1268_v10 = vld [vmem:[%s1688_s1 + $0x28] sm:$0xff]  }
   0x4   :  { %v1261_v3 = vld [vmem:[%s1688_s1 + $0xb8] sm:$0xff]   ;;  %1117 = vmatpush3.bf16.msra.mxu0 %v1260_v2  ;;  %v1265_v7 = vld [vmem:[%s1688_s1 + $0xb0] sm:$0xff]   ;;  %v1269_v11 = vld [vmem:[%s1688_s1 + $0xa8] sm:$0xff]  }
   0x5   :  { %1145 = vmatpush3.bf16.msra.mxu1 %v1261_v3  ;;  %1118 = vmatprep.subr.bf16.mxu0 %v1262_v4  ;;  %v1270_v12 = vld [vmem:[%s1688_s1 + $0x60] sm:$0xff]   ;;  %v1274_v16 = vld [vmem:[%s1688_s1 + $0x58] sm:$0xff]   ;;  %v1278_v20 = vld [vmem:[%s1688_s1 + $0x50] sm:$0xff]  }
   0x6   :  { %1146 = vmatprep.subr.bf16.mxu1 %v1263_v5  ;;  %v1271_v13 = vld [vmem:[%s1688_s1 + $0xe0] sm:$0xff]   ;;  %v1275_v17 = vld [vmem:[%s1688_s1 + $0xd8] sm:$0xff]   ;;  %v1279_v21 = vld [vmem:[%s1688_s1 + $0xd0] sm:$0xff]  }
   0x7   :  { %v1272_v14 = vld [vmem:[%s1688_s1 + $0x20] sm:$0xff]   ;;  %v1276_v18 = vld [vmem:[%s1688_s1 + $0x18] sm:$0xff]   ;;  %v1280_v22 = vld [vmem:[%s1688_s1 + $0x10] sm:$0xff]  }
   0x8   :  { %1119 = vmatpush3.bf16.msra.mxu0 %v1264_v6  ;;  %v1273_v15 = vld [vmem:[%s1688_s1 + $0xa0] sm:$0xff]   ;;  %v1277_v19 = vld [vmem:[%s1688_s1 + $0x98] sm:$0xff]   ;;  %v1281_v23 = vld [vmem:[%s1688_s1 + $0x90] sm:$0xff]  }
   0x9   :  { %1147 = vmatpush3.bf16.msra.mxu1 %v1265_v7  ;;  %1120 = vmatprep.subr.bf16.mxu0 %v1266_v8  ;;  %v1282_v24 = vld [vmem:[%s1688_s1 + $0x48] sm:$0xff]   ;;  %v1286_v28 = vld [vmem:[%s1688_s1 + $0x40] sm:$0xff]   ;;  %v1296_v36 = vld [vmem:[%s1688_s1 + $0x178] sm:$0xff]  }
   0xa   :  { %1148 = vmatprep.subr.bf16.mxu1 %v1267_v9  ;;  %v1283_v25 = vld [vmem:[%s1688_s1 + $0xc8] sm:$0xff]   ;;  %v1287_v29 = vld [vmem:[%s1688_s1 + $0xc0] sm:$0xff]   ;;  %v1297_v37 = vld [vmem:[%s1688_s1 + $0x138] sm:$0xff]  }
   0xb   :  { %v1284_v26 = vld [vmem:[%s1688_s1 + $0x8] sm:$0xff]   ;;  %v1288_v30 = vld [vmem:[%s1688_s1] sm:$0xff]   ;;  %v1298_v38 = vld [vmem:[%s1688_s1 + $0x1f8] sm:$0xff]  }
   0xc   :  { %1121 = vmatpush3.bf16.msra.mxu0 %v1268_v10  ;;  %v1285_v27 = vld [vmem:[%s1688_s1 + $0x88] sm:$0xff]   ;;  %v1289_v31 = vld [vmem:[%s1688_s1 + $0x80] sm:$0xff]   ;;  %v1299_v39 = vld [vmem:[%s1688_s1 + $0x1b8] sm:$0xff]  }
   0xd   :  { %1149 = vmatpush3.bf16.msra.mxu1 %v1269_v11  ;;  %1122 = vmatprep.subr.bf16.mxu0 %v1270_v12  ;;  %v1290_v32 = vld [vmem:[%s1689_s0] ss:$36 sps:$4 sm:$0xff]   ;;  %v1293_v34 = vld [vmem:[%s1689_s0 + $0x8] ss:$36 sps:$4 sm:$0xff]   ;;  %v1300_v40 = vld [vmem:[%s1688_s1 + $0x170] sm:$0xff]  }
   0xe   :  { %1150 = vmatprep.subr.bf16.mxu1 %v1271_v13  ;;  %v1292_v33 = vld [vmem:[%s1689_s0 + $0x4] ss:$36 sps:$4 sm:$0xff]   ;;  %v1295_v35 = vld [vmem:[%s1689_s0 + $0xc] ss:$36 sps:$4 sm:$0xff]   ;;  %v1312_v52 = vld [vmem:[%s1688_s1 + $0x158] sm:$0xff]  }
   0xf   :  { %741 = vmatprep.mubr.bf16.mxu0 %v1292_v33  ;;  %790 = vmatprep.mubr.bf16.mxu1 %v1295_v35  ;;  %v1301_v41 = vld [vmem:[%s1688_s1 + $0x130] sm:$0xff]   ;;  %v1304_v44 = vld [vmem:[%s1688_s1 + $0x168] sm:$0xff]   ;;  %v1308_v48 = vld [vmem:[%s1688_s1 + $0x160] sm:$0xff]  }
  0x10   :  { %1123 = vmatpush3.bf16.msra.mxu0 %v1272_v14  ;;  %v1302_v42 = vld [vmem:[%s1688_s1 + $0x1f0] sm:$0xff]   ;;  %v1305_v45 = vld [vmem:[%s1688_s1 + $0x128] sm:$0xff]   ;;  %v1309_v49 = vld [vmem:[%s1688_s1 + $0x120] sm:$0xff]  }
  0x11   :  { %1151 = vmatpush3.bf16.msra.mxu1 %v1273_v15  ;;  %1124 = vmatprep.subr.bf16.mxu0 %v1274_v16  ;;  %v1303_v43 = vld [vmem:[%s1688_s1 + $0x1b0] sm:$0xff]   ;;  %v1306_v46 = vld [vmem:[%s1688_s1 + $0x1e8] sm:$0xff]   ;;  %v1310_v50 = vld [vmem:[%s1688_s1 + $0x1e0] sm:$0xff]  }
  0x12   :  { %1152 = vmatprep.subr.bf16.mxu1 %v1275_v17  ;;  %v1307_v47 = vld [vmem:[%s1688_s1 + $0x1a8] sm:$0xff]   ;;  %v1311_v51 = vld [vmem:[%s1688_s1 + $0x1a0] sm:$0xff]   ;;  %v1313_v53 = vld [vmem:[%s1688_s1 + $0x118] sm:$0xff]  }
  0x13   :  { %v1314_v54 = vld [vmem:[%s1689_s0 + $0x4c] ss:$36 sps:$4 sm:$0xff]   ;;  %v1316_v55 = vld [vmem:[%s1689_s0 + $0x54] ss:$36 sps:$4 sm:$0xff]   ;;  %v1330_v4 = vld [vmem:[%s1688_s1 + $0x140] sm:$0xff]  }
  0x14   :  { %1125 = vmatpush3.bf16.msra.mxu0 %v1276_v18  ;;  %v1318_v56 = vld [vmem:[%s1688_s1 + $0x1d8] sm:$0xff]   ;;  %v1319_v57 = vld [vmem:[%s1689_s0 + $0x48] ss:$36 sps:$4 sm:$0xff]   ;;  %v1320_v58 = vld [vmem:[%s1689_s0 + $0x50] ss:$36 sps:$4 sm:$0xff]  }
  0x15   :  { %1153 = vmatpush3.bf16.msra.mxu1 %v1277_v19  ;;  %1126 = vmatprep.subr.bf16.mxu0 %v1278_v20  ;;  %v1321_v59 = vld [vmem:[%s1688_s1 + $0x198] sm:$0xff]   ;;  %v1322_v60 = vld [vmem:[%s1688_s1 + $0x150] sm:$0xff]   ;;  %v1326_v0 = vld [vmem:[%s1688_s1 + $0x148] sm:$0xff]  }
  0x16   :  { %1154 = vmatprep.subr.bf16.mxu1 %v1279_v21  ;;  %v1323_v61 = vld [vmem:[%s1688_s1 + $0x110] sm:$0xff]   ;;  %v1327_v1 = vld [vmem:[%s1688_s1 + $0x108] sm:$0xff]   ;;  %v1331_v5 = vld [vmem:[%s1688_s1 + $0x100] sm:$0xff]  }
  0x17   :  { %v1324_v62 = vld [vmem:[%s1688_s1 + $0x1d0] sm:$0xff]   ;;  %v1328_v2 = vld [vmem:[%s1688_s1 + $0x1c8] sm:$0xff]   ;;  %v1332_v6 = vld [vmem:[%s1688_s1 + $0x1c0] sm:$0xff]  }
  0x18   :  { %1127 = vmatpush3.bf16.msra.mxu0 %v1280_v22  ;;  %v1325_v63 = vld [vmem:[%s1688_s1 + $0x190] sm:$0xff]   ;;  %v1329_v3 = vld [vmem:[%s1688_s1 + $0x188] sm:$0xff]   ;;  %v1336_v9 = vld [vmem:[%s1688_s1 + $0x180] sm:$0xff]  }
  0x19   :  { %1155 = vmatpush3.bf16.msra.mxu1 %v1281_v23  ;;  %1128 = vmatprep.subr.bf16.mxu0 %v1282_v24  ;;  %v1333_v7 = vld [vmem:[%s1689_s0 + $0x10] ss:$36 sps:$4 sm:$0xff]   ;;  %v1337_v10 = vld [vmem:[%s1688_s1 + $0x238] sm:$0xff]   ;;  %v1345_v16 = vld [vmem:[%s1688_s1 + $0x228] sm:$0xff]  }
  0x1a   :  { %1156 = vmatprep.subr.bf16.mxu1 %v1283_v25  ;;  %v1335_v8 = vld [vmem:[%s1689_s0 + $0x14] ss:$36 sps:$4 sm:$0xff]   ;;  %v1340_v12 = vld [vmem:[%s1689_s0 + $0x1c] ss:$36 sps:$4 sm:$0xff]   ;;  %v1346_v17 = vld [vmem:[%s1689_s0 + $0x64] ss:$36 sps:$4 sm:$0xff]  }
  0x1b   :  { %v1338_v11 = vld [vmem:[%s1689_s0 + $0x18] ss:$36 sps:$4 sm:$0xff]   ;;  %v1341_v13 = vld [vmem:[%s1688_s1 + $0x230] sm:$0xff]   ;;  %v1348_v18 = vld [vmem:[%s1689_s0 + $0x60] ss:$36 sps:$4 sm:$0xff]  }
  0x1c   :  { %1129 = vmatpush3.bf16.msra.mxu0 %v1284_v26  ;;  %v1342_v14 = vld [vmem:[%s1689_s0 + $0x5c] ss:$36 sps:$4 sm:$0xff]   ;;  %v1351_v22 = vld [vmem:[%s1688_s1 + $0x210] sm:$0xff]   ;;  %v1352_v23 = vld [vmem:[%s1688_s1 + $0x208] sm:$0xff]  }
  0x1d   :  { %1157 = vmatpush3.bf16.msra.mxu1 %v1285_v27  ;;  %1130 = vmatprep.subr.bf16.mxu0 %v1286_v28  ;;  %v1344_v15 = vld [vmem:[%s1689_s0 + $0x58] ss:$36 sps:$4 sm:$0xff]   ;;  %v1349_v19 = vld [vmem:[%s1688_s1 + $0x220] sm:$0xff]   ;;  %v1355_v25 = vld [vmem:[%s1689_s0 + $0x68] ss:$36 sps:$4 sm:$0xff]  }
  0x1e   :  { %1158 = vmatprep.subr.bf16.mxu1 %v1287_v29  ;;  %v1350_v20 = vld [vmem:[%s1688_s1 + $0x218] sm:$0xff]   ;;  %v1354_v21 = vld [vmem:[%s1689_s0 + $0x20] ss:$36 sps:$4 sm:$0xff]  }
  0x1f   :  { %v1353_v24 = vld [vmem:[%s1688_s1 + $0x200] sm:$0xff]  }
  0x20   :  { %1131 = vmatpush3.bf16.msra.mxu0 %v1288_v30 }
  0x21   :  { %1159 = vmatpush3.bf16.msra.mxu1 %v1289_v31  ;;  %1172 = vmatprep.subr.bf16.mxu0 %v1296_v36 }
  0x22   :  { %1200 = vmatprep.subr.bf16.mxu1 %v1298_v38 }
  0x23   :  { %742 = vmatmul.mubr.bf16.vlgmr.msra.gmra.mxu0 %v1290_v32 }
  0x24   :  { %791 = vmatmul.mubr.bf16.vlgmr.msra.gmra.mxu1 %v1293_v34  ;;  %1173 = vmatpush3.bf16.msra.mxu0 %v1297_v37 }
  0x25   :  { %1201 = vmatpush3.bf16.msra.mxu1 %v1299_v39  ;;  %1174 = vmatprep.subr.bf16.mxu0 %v1300_v40 }
  0x26   :  { %1202 = vmatprep.subr.bf16.mxu1 %v1302_v42  ;;  %749 = vmatprep.mubr.bf16.mxu0 %v1314_v54 }
  0x27   :  { %798 = vmatprep.mubr.bf16.mxu1 %v1316_v55 }
  0x28   :  { %1175 = vmatpush3.bf16.msra.mxu0 %v1301_v41 }
  0x29   :  { %1203 = vmatpush3.bf16.msra.mxu1 %v1303_v43  ;;  %1176 = vmatprep.subr.bf16.mxu0 %v1304_v44 }
  0x2a   :  { %1204 = vmatprep.subr.bf16.mxu1 %v1306_v46 }
  0x2b   :  { %750 = vmatmul.mubr.bf16.gmra.mxu0 %v1319_v57 }
  0x2c   :  { %1177 = vmatpush3.bf16.msra.mxu0 %v1305_v45  ;;  %799 = vmatmul.mubr.bf16.gmra.mxu1 %v1320_v58 }
  0x2d   :  { %1205 = vmatpush3.bf16.msra.mxu1 %v1307_v47  ;;  %1178 = vmatprep.subr.bf16.mxu0 %v1308_v48 }
  0x2e   :  { %1206 = vmatprep.subr.bf16.mxu1 %v1310_v50  ;;  %839 = vmatprep.mubr.bf16.mxu0 %v1335_v8 }
  0x2f   :  { %888 = vmatprep.mubr.bf16.mxu1 %v1340_v12 }
  0x30   :  { %1179 = vmatpush3.bf16.msra.mxu0 %v1309_v49 }
  0x31   :  { %1207 = vmatpush3.bf16.msra.mxu1 %v1311_v51  ;;  %1180 = vmatprep.subr.bf16.mxu0 %v1312_v52 }
  0x32   :  { %1208 = vmatprep.subr.bf16.mxu1 %v1318_v56 }
  0x34   :  { %1181 = vmatpush3.bf16.msra.mxu0 %v1313_v53 }
  0x35   :  { %1209 = vmatpush3.bf16.msra.mxu1 %v1321_v59  ;;  %1182 = vmatprep.subr.bf16.mxu0 %v1322_v60 }
  0x36   :  { %1210 = vmatprep.subr.bf16.mxu1 %v1324_v62 }
  0x38   :  { %1183 = vmatpush3.bf16.msra.mxu0 %v1323_v61 }
  0x39   :  { %1211 = vmatpush3.bf16.msra.mxu1 %v1325_v63  ;;  %1184 = vmatprep.subr.bf16.mxu0 %v1326_v0 }
  0x3a   :  { %1212 = vmatprep.subr.bf16.mxu1 %v1328_v2 }
  0x3c   :  { %1185 = vmatpush3.bf16.msra.mxu0 %v1327_v1 }
  0x3d   :  { %1213 = vmatpush3.bf16.msra.mxu1 %v1329_v3  ;;  %1186 = vmatprep.subr.bf16.mxu0 %v1330_v4 }
  0x3e   :  { %1214 = vmatprep.subr.bf16.mxu1 %v1332_v6 }
  0x40   :  { %1187 = vmatpush3.bf16.msra.mxu0 %v1331_v5 }
  0x41   :  { %1215 = vmatpush3.bf16.msra.mxu1 %v1336_v9  ;;  %1238 = vmatprep.subr.bf16.mxu0 %v1337_v10 }
  0x43   :  { %840 = vmatmul.mubr.bf16.vlgmr.msra.gmra.mxu0 %v1333_v7 }
  0x44   :  { %1239 = vmatpush3.bf16.msra.mxu0 %v1337_v10  ;;  %889 = vmatmul.mubr.bf16.vlgmr.msra.gmra.mxu1 %v1338_v11 }
  0x45   :  { %1240 = vmatprep.subr.bf16.mxu0 %v1341_v13  ;;  %847 = vmatprep.mubr.bf16.mxu0 %v1342_v14 }
  0x46   :  { %896 = vmatprep.mubr.bf16.mxu1 %v1346_v17 }
  0x48   :  { %1241 = vmatpush3.bf16.msra.mxu0 %v1341_v13 }
  0x49   :  { %1242 = vmatprep.subr.bf16.mxu0 %v1345_v16 }
  0x4b   :  { %848 = vmatmul.mubr.bf16.gmra.mxu0 %v1344_v15 }
  0x4c   :  { %1243 = vmatpush3.bf16.msra.mxu0 %v1345_v16  ;;  %897 = vmatmul.mubr.bf16.gmra.mxu1 %v1348_v18 }
  0x4d   :  { %1244 = vmatprep.subr.bf16.mxu0 %v1349_v19  ;;  %1254 = vmatprep.mubr.bf16.mxu0 %v1354_v21 }
  0x50   :  { %1245 = vmatpush3.bf16.msra.mxu0 %v1349_v19 }
  0x51   :  { %1246 = vmatprep.subr.bf16.mxu0 %v1350_v20 }
  0x54   :  { %1247 = vmatpush3.bf16.msra.mxu0 %v1350_v20 }
  0x55   :  { %1248 = vmatprep.subr.bf16.mxu0 %v1351_v22 }
  0x58   :  { %1249 = vmatpush3.bf16.msra.mxu0 %v1351_v22 }
  0x59   :  { %1250 = vmatprep.subr.bf16.mxu0 %v1352_v23 }
  0x5c   :  { %1251 = vmatpush3.bf16.msra.mxu0 %v1352_v23 }
  0x5d   :  { %1252 = vmatprep.subr.bf16.mxu0 %v1353_v24 }
  0x60   :  { %1253 = vmatpush3.bf16.msra.mxu0 %v1353_v24 }
  0x63   :  { %1255 = vmatmul.mubr.bf16.vlgmr.msra.gmra.mxu0 %v1355_v25 }
  0xe3   :  { %v1132_v26 = vpop.f32.mrf.mxu0 }
  0xe4   :  { %v1160_v27 = vpop.f32.mrf.mxu1 }
  0xe5   :  { %v1133_v28 = vpop.f32.mrf.mxu0 }
  0xe6   :  { %v1161_v29 = vpop.f32.mrf.mxu1  ;;  %v1134_v55 = vadd.f32 %v1133_v28, %v1132_v26 }
  0xe7   :  { %v1135_v30 = vpop.f32.mrf.mxu0  ;;  %v1162_v56 = vadd.f32 %v1161_v29, %v1160_v27 }
  0xe8   :  { %v1163_v31 = vpop.f32.mrf.mxu1 }
  0xe9   :  { %v1136_v32 = vpop.f32.mrf.mxu0  ;;  %v793_v2 = vadd.f32 %v1162_v56, %v1134_v55 }
  0xea   :  { %v1164_v34 = vpop.f32.mrf.mxu1  ;;  %v1137_v57 = vadd.f32 %v1136_v32, %v1135_v30 }
  0xeb   :  { %v1138_v33 = vpop.f32.mrf.mxu0  ;;  %v1165_v58 = vadd.f32 %v1164_v34, %v1163_v31 }
  0xec   :  { %v1166_v35 = vpop.f32.mrf.mxu1 }
  0xed   :  { %v1139_v36 = vpop.f32.mrf.mxu0  ;;  %v796_v5 = vadd.f32 %v1165_v58, %v1137_v57  ;;  %v988_v58 = vlaneseq }
  0xee   :  { %v1167_v37 = vpop.f32.mrf.mxu1  ;;  %v1140_v59 = vadd.f32 %v1139_v36, %v1138_v33 }
  0xef   :  { %v1141_v38 = vpop.f32.mrf.mxu0  ;;  %v1168_v60 = vadd.f32 %v1167_v37, %v1166_v35 }
  0xf0   :  { %v1169_v39 = vpop.f32.mrf.mxu1 }
  0xf1   :  { %v1142_v40 = vpop.f32.mrf.mxu0  ;;  %v801_v6 = vadd.f32 %v1168_v60, %v1140_v59  ;;  %v989_v59 = vshrl.u32 %v988_v58, 7  ;;  %v983_v60 = vld [vmem:[%s1690_s2] sm:$0x1] }
  0xf2   :  { %v1170_v42 = vpop.f32.mrf.mxu1  ;;  %v1143_v62 = vadd.f32 %v1142_v40, %v1141_v38 }
  0xf3   :  { %v1171_v63 = vadd.f32 %v1170_v42, %v1169_v39 }
  0xf5   :  { %v804_v10 = vadd.f32 %v1171_v63, %v1143_v62 }
 0x103   :  { %v1188_v41 = vpop.f32.mrf.mxu0 }
 0x104   :  { %v1216_v44 = vpop.f32.mrf.mxu1 }
 0x105   :  { %v1189_v43 = vpop.f32.mrf.mxu0 }
 0x106   :  { %v1217_v46 = vpop.f32.mrf.mxu1  ;;  %v1190_v61 = vadd.f32 %v1189_v43, %v1188_v41 }
 0x107   :  { %v1191_v45 = vpop.f32.mrf.mxu0  ;;  %v1218_v8 = vadd.f32 %v1217_v46, %v1216_v44 }
 0x108   :  { %v1219_v48 = vpop.f32.mrf.mxu1  ;;  %v842_v7 = vadd.f32 %v1190_v61, %v793_v2  ;;  %v990_v61 = vsub.s32 0, %v989_v59 }
 0x109   :  { %v1192_v47 = vpop.f32.mrf.mxu0 }
 0x10a   :  { %v1220_v50 = vpop.f32.mrf.mxu1  ;;  %v1193_v3 = vadd.f32 %v1192_v47, %v1191_v45  ;;  %v891_v20 = vadd.f32 %v1218_v8, %v842_v7 }
 0x10b   :  { %v1194_v49 = vpop.f32.mrf.mxu0  ;;  %v1221_v14 = vadd.f32 %v1220_v50, %v1219_v48 }
 0x10c   :  { %v1222_v52 = vpop.f32.mrf.mxu1  ;;  %v845_v13 = vadd.f32 %v1193_v3, %v796_v5 }
 0x10d   :  { %v1195_v51 = vpop.f32.mrf.mxu0 }
 0x10e   :  { %v1223_v54 = vpop.f32.mrf.mxu1  ;;  %v1196_v4 = vadd.f32 %v1195_v51, %v1194_v49  ;;  %v894_v24 = vadd.f32 %v1221_v14, %v845_v13 }
 0x10f   :  { %v1197_v53 = vpop.f32.mrf.mxu0  ;;  %v1224_v16 = vadd.f32 %v1223_v54, %v1222_v52 }
 0x110   :  { %v1225_v1 = vpop.f32.mrf.mxu1  ;;  %v850_v15 = vadd.f32 %v1196_v4, %v801_v6 }
 0x111   :  { %v1198_v0 = vpop.f32.mrf.mxu0 }
 0x112   :  { %v1199_v9 = vadd.f32 %v1198_v0, %v1197_v53  ;;  %v1226_v11 = vpop.f32.mrf.mxu1  ;;  %v899_v22 = vadd.f32 %v1224_v16, %v850_v15  ;;  %v985_v0 = vld [vmem:[%s1691_s3] sm:$0x1] }
 0x113   :  { %v1227_v19 = vadd.f32 %v1226_v11, %v1225_v1  ;;  %v1008_v11 = vld [vmem:[%s1692_s4 + $0x10] sm:$0xff] }
 0x114   :  { %v853_v18 = vadd.f32 %v1199_v9, %v804_v10  ;;  %v1006_v9 = vld [vmem:[%s1692_s4] sm:$0xff]  ;;  %v1007_v10 = vld [vmem:[%s1692_s4 + $0x8] sm:$0xff] }
 0x116   :  { %v902_v27 = vadd.f32 %v1227_v19, %v853_v18 }
 0x123   :  { %v1256_v12 = vpop.f32.mrf.mxu0 }
 0x124   :  { %v948_v26 = vadd.f32 %v1256_v12, %v899_v22  ;;  %v1009_v12 = vld [vmem:[%s1692_s4 + $0x18] sm:$0xff] }
 0x125   :  { %v939_v17 = vpop.f32.mrf.mxu0 }
 0x126   :  { %v940_v23 = vadd.f32 %v939_v17, %v891_v20  ;;  %v965_v33 = vmul.f32 %v948_v26, %v948_v26 }
 0x127   :  { %v1257_v21 = vpop.f32.mrf.mxu0 }
 0x128   :  { %v963_v29 = vmul.f32 %v940_v23, %v940_v23  ;;  %v951_v30 = vadd.f32 %v1257_v21, %v902_v27 }
 0x129   :  { %v942_v25 = vpop.f32.mrf.mxu0 }
 0x12a   :  { %v943_v28 = vadd.f32 %v942_v25, %v894_v24  ;;  %v966_v36 = vmul.f32 %v951_v30, %v951_v30 }
 0x12c   :  { %v954_v31 = vadd.f32 %v943_v28, %v940_v23  ;;  %v964_v32 = vmul.f32 %v943_v28, %v943_v28 }
 0x12e   :  { %v955_v34 = vadd.f32 %v954_v31, %v948_v26  ;;  %v967_v35 = vadd.f32 %v964_v32, %v963_v29 }
 0x130   :  { %v956_v37 = vadd.f32 %v955_v34, %v951_v30  ;;  %v968_v38 = vadd.f32 %v967_v35, %v965_v33 }
 0x132   :  { %v957_v39 = vrot.slane %v956_v37, 4  ;;  %v969_v40 = vadd.f32 %v968_v38, %v966_v36 }
 0x134   :  { %v958_v41 = vadd.f32 %v957_v39, %v956_v37  ;;  %v970_v42 = vrot.slane %v969_v40, 4 }
 0x136   :  { %v959_v43 = vrot.slane %v958_v41, 2  ;;  %v971_v44 = vadd.f32 %v970_v42, %v969_v40 }
 0x138   :  { %v960_v45 = vadd.f32 %v959_v43, %v958_v41  ;;  %v972_v46 = vrot.slane %v971_v44, 2 }
 0x13a   :  { %v961_v47 = vrot.slane %v960_v45, 1  ;;  %v973_v48 = vadd.f32 %v972_v46, %v971_v44 }
 0x13c   :  { %v962_v49 = vadd.f32 %v961_v47, %v960_v45  ;;  %v974_v50 = vrot.slane %v973_v48, 1 }
 0x13e   :  { %v975_v51 = vadd.f32 %v974_v50, %v973_v48  ;;  %v976_v52 = vmul.f32 0.03125, %v962_v49 }
 0x140   :  { %v977_v53 = vmul.f32 0.03125, %v975_v51  ;;  %v978_v54 = vmul.f32 %v976_v52, %v976_v52 }
 0x142   :  { %v979_v55 = vsub.f32 %v977_v53, %v978_v54 }
 0x144   :  { %v980_v56 = vmax.f32 %v979_v55, 0.0 }
 0x146   :  { %v981_v57 = vadd.f32 1e-05, %v980_v56 }
 0x148   :  { %1356 = vrsqrt.f32 %v981_v57 }
 0x155   :  { %v1357_v62 = vpop.eup %1356 }
 0x156   :  { %v984_v63 = vmul.f32 %v1357_v62, %v983_v60 }
 0x158   :  { %v986_v1 = vmul.f32 %v984_v63, %v976_v52  ;;  %v991_v2 = vrot.slane %v984_v63, %v990_v61 }
 0x15a   :  { %v987_v3 = vsub.f32 %v985_v0, %v986_v1  ;;  %v992_v4 = vmul.f32 %v991_v2, %v940_v23  ;;  %v993_v5 = vmul.f32 %v991_v2, %v943_v28  ;;  %v994_v6 = vmul.f32 %v991_v2, %v948_v26 }
 0x15b   :  { %v995_v7 = vmul.f32 %v991_v2, %v951_v30 }
 0x15c   :  { %v1000_v8 = vrot.slane %v987_v3, %v990_v61 }
 0x15e   :  { %v1002_v13 = vadd.f32 %v1000_v8, %v992_v4  ;;  %v1003_v14 = vadd.f32 %v1000_v8, %v993_v5  ;;  %v1004_v15 = vadd.f32 %v1000_v8, %v994_v6  ;;  %v1005_v16 = vadd.f32 %v1000_v8, %v995_v7 }
 0x160   :  { %v1010_v17 = vadd.f32 %v1006_v9, %v1002_v13  ;;  %v1011_v18 = vadd.f32 %v1007_v10, %v1003_v14  ;;  %v1012_v19 = vadd.f32 %v1008_v11, %v1004_v15  ;;  %v1013_v20 = vadd.f32 %v1009_v12, %v1005_v16 }
 0x162   :  { %v1014_v21 = vmax.f32 %v1010_v17, 0.0  ;;  %v1015_v22 = vmax.f32 %v1011_v18, 0.0  ;;  %v1016_v23 = vmax.f32 %v1012_v19, 0.0  ;;  %v1017_v24 = vmax.f32 %v1013_v20, 0.0 }
 0x164   :  { %1018 = vst [vmem:[%s1693_s5] sm:$0xff] %v1014_v21  ;;  %1019 = vst [vmem:[%s1693_s5 + $0x8] sm:$0xff] %v1015_v22 }
 0x165   :  { %1020 = vst [vmem:[%s1693_s5 + $0x10] sm:$0xff] %v1016_v23  ;;  %1021 = vst [vmem:[%s1693_s5 + $0x18] sm:$0xff] %v1017_v24 }

// kernel: resnet_forward.25
= control target key start
LH: loop header
LB: loop body
LE: loop exit
PB: predicated region body
PF: predicated region fallthrough
CT: control target
= control target key end

     0   :  { %s1660_s1 = inlined_call_operand.vmem [shape: bf16[1152,128], index: 1, kind: input, shape index: {}]   ;;  %s1661_s0 = inlined_call_operand.vmem [shape: bf16[32,1152], index: 0, kind: input, shape index: {}]   ;;  %s1662_s2 = inlined_call_operand.vmem [shape: f32[1,128], index: 2, kind: input, shape index: {}]   ;;  %s1663_s3 = inlined_call_operand.vmem [shape: f32[1,128], index: 3, kind: input, shape index: {}]   ;;  %s1664_s4 = inlined_call_operand.vmem [shape: f32[32,128], index: 4, kind: output, shape index: {}]  }
   0x1   :  { %v1247_v0 = vld [vmem:[%s1660_s1 + $0x78] sm:$0xff]   ;;  %v1251_v4 = vld [vmem:[%s1660_s1 + $0x70] sm:$0xff]   ;;  %v1255_v8 = vld [vmem:[%s1660_s1 + $0x68] sm:$0xff]  }
   0x2   :  { %v1248_v1 = vld [vmem:[%s1660_s1 + $0xf8] sm:$0xff]   ;;  %1105 = vmatprep.subr.bf16.mxu0 %v1247_v0  ;;  %v1252_v5 = vld [vmem:[%s1660_s1 + $0xf0] sm:$0xff]   ;;  %v1256_v9 = vld [vmem:[%s1660_s1 + $0xe8] sm:$0xff]  }
   0x3   :  { %v1249_v2 = vld [vmem:[%s1660_s1 + $0x38] sm:$0xff]   ;;  %1133 = vmatprep.subr.bf16.mxu1 %v1248_v1  ;;  %v1253_v6 = vld [vmem:[%s1660_s1 + $0x30] sm:$0xff]   ;;  %v1257_v10 = vld [vmem:[%s1660_s1 + $0x28] sm:$0xff]  }
   0x4   :  { %v1250_v3 = vld [vmem:[%s1660_s1 + $0xb8] sm:$0xff]   ;;  %1106 = vmatpush3.bf16.msra.mxu0 %v1249_v2  ;;  %v1254_v7 = vld [vmem:[%s1660_s1 + $0xb0] sm:$0xff]   ;;  %v1258_v11 = vld [vmem:[%s1660_s1 + $0xa8] sm:$0xff]  }
   0x5   :  { %1134 = vmatpush3.bf16.msra.mxu1 %v1250_v3  ;;  %1107 = vmatprep.subr.bf16.mxu0 %v1251_v4  ;;  %v1259_v12 = vld [vmem:[%s1660_s1 + $0x60] sm:$0xff]   ;;  %v1263_v16 = vld [vmem:[%s1660_s1 + $0x58] sm:$0xff]   ;;  %v1267_v20 = vld [vmem:[%s1660_s1 + $0x50] sm:$0xff]  }
   0x6   :  { %1135 = vmatprep.subr.bf16.mxu1 %v1252_v5  ;;  %v1260_v13 = vld [vmem:[%s1660_s1 + $0xe0] sm:$0xff]   ;;  %v1264_v17 = vld [vmem:[%s1660_s1 + $0xd8] sm:$0xff]   ;;  %v1268_v21 = vld [vmem:[%s1660_s1 + $0xd0] sm:$0xff]  }
   0x7   :  { %v1261_v14 = vld [vmem:[%s1660_s1 + $0x20] sm:$0xff]   ;;  %v1265_v18 = vld [vmem:[%s1660_s1 + $0x18] sm:$0xff]   ;;  %v1269_v22 = vld [vmem:[%s1660_s1 + $0x10] sm:$0xff]  }
   0x8   :  { %1108 = vmatpush3.bf16.msra.mxu0 %v1253_v6  ;;  %v1262_v15 = vld [vmem:[%s1660_s1 + $0xa0] sm:$0xff]   ;;  %v1266_v19 = vld [vmem:[%s1660_s1 + $0x98] sm:$0xff]   ;;  %v1270_v23 = vld [vmem:[%s1660_s1 + $0x90] sm:$0xff]  }
   0x9   :  { %1136 = vmatpush3.bf16.msra.mxu1 %v1254_v7  ;;  %1109 = vmatprep.subr.bf16.mxu0 %v1255_v8  ;;  %v1271_v24 = vld [vmem:[%s1660_s1 + $0x48] sm:$0xff]   ;;  %v1275_v28 = vld [vmem:[%s1660_s1 + $0x40] sm:$0xff]   ;;  %v1285_v36 = vld [vmem:[%s1660_s1 + $0x178] sm:$0xff]  }
   0xa   :  { %1137 = vmatprep.subr.bf16.mxu1 %v1256_v9  ;;  %v1272_v25 = vld [vmem:[%s1660_s1 + $0xc8] sm:$0xff]   ;;  %v1276_v29 = vld [vmem:[%s1660_s1 + $0xc0] sm:$0xff]   ;;  %v1286_v37 = vld [vmem:[%s1660_s1 + $0x138] sm:$0xff]  }
   0xb   :  { %v1273_v26 = vld [vmem:[%s1660_s1 + $0x8] sm:$0xff]   ;;  %v1277_v30 = vld [vmem:[%s1660_s1] sm:$0xff]   ;;  %v1287_v38 = vld [vmem:[%s1660_s1 + $0x1f8] sm:$0xff]  }
   0xc   :  { %1110 = vmatpush3.bf16.msra.mxu0 %v1257_v10  ;;  %v1274_v27 = vld [vmem:[%s1660_s1 + $0x88] sm:$0xff]   ;;  %v1278_v31 = vld [vmem:[%s1660_s1 + $0x80] sm:$0xff]   ;;  %v1288_v39 = vld [vmem:[%s1660_s1 + $0x1b8] sm:$0xff]  }
   0xd   :  { %1138 = vmatpush3.bf16.msra.mxu1 %v1258_v11  ;;  %1111 = vmatprep.subr.bf16.mxu0 %v1259_v12  ;;  %v1279_v32 = vld [vmem:[%s1661_s0] ss:$36 sps:$4 sm:$0xff]   ;;  %v1282_v34 = vld [vmem:[%s1661_s0 + $0x8] ss:$36 sps:$4 sm:$0xff]   ;;  %v1289_v40 = vld [vmem:[%s1660_s1 + $0x170] sm:$0xff]  }
   0xe   :  { %1139 = vmatprep.subr.bf16.mxu1 %v1260_v13  ;;  %v1281_v33 = vld [vmem:[%s1661_s0 + $0x4] ss:$36 sps:$4 sm:$0xff]   ;;  %v1284_v35 = vld [vmem:[%s1661_s0 + $0xc] ss:$36 sps:$4 sm:$0xff]   ;;  %v1301_v52 = vld [vmem:[%s1660_s1 + $0x158] sm:$0xff]  }
   0xf   :  { %738 = vmatprep.mubr.bf16.mxu0 %v1281_v33  ;;  %787 = vmatprep.mubr.bf16.mxu1 %v1284_v35  ;;  %v1290_v41 = vld [vmem:[%s1660_s1 + $0x130] sm:$0xff]   ;;  %v1293_v44 = vld [vmem:[%s1660_s1 + $0x168] sm:$0xff]   ;;  %v1297_v48 = vld [vmem:[%s1660_s1 + $0x160] sm:$0xff]  }
  0x10   :  { %1112 = vmatpush3.bf16.msra.mxu0 %v1261_v14  ;;  %v1291_v42 = vld [vmem:[%s1660_s1 + $0x1f0] sm:$0xff]   ;;  %v1294_v45 = vld [vmem:[%s1660_s1 + $0x128] sm:$0xff]   ;;  %v1298_v49 = vld [vmem:[%s1660_s1 + $0x120] sm:$0xff]  }
  0x11   :  { %1140 = vmatpush3.bf16.msra.mxu1 %v1262_v15  ;;  %1113 = vmatprep.subr.bf16.mxu0 %v1263_v16  ;;  %v1292_v43 = vld [vmem:[%s1660_s1 + $0x1b0] sm:$0xff]   ;;  %v1295_v46 = vld [vmem:[%s1660_s1 + $0x1e8] sm:$0xff]   ;;  %v1299_v50 = vld [vmem:[%s1660_s1 + $0x1e0] sm:$0xff]  }
  0x12   :  { %1141 = vmatprep.subr.bf16.mxu1 %v1264_v17  ;;  %v1296_v47 = vld [vmem:[%s1660_s1 + $0x1a8] sm:$0xff]   ;;  %v1300_v51 = vld [vmem:[%s1660_s1 + $0x1a0] sm:$0xff]   ;;  %v1302_v53 = vld [vmem:[%s1660_s1 + $0x118] sm:$0xff]  }
  0x13   :  { %v1303_v54 = vld [vmem:[%s1661_s0 + $0x4c] ss:$36 sps:$4 sm:$0xff]   ;;  %v1305_v55 = vld [vmem:[%s1661_s0 + $0x54] ss:$36 sps:$4 sm:$0xff]   ;;  %v1319_v4 = vld [vmem:[%s1660_s1 + $0x140] sm:$0xff]  }
  0x14   :  { %1114 = vmatpush3.bf16.msra.mxu0 %v1265_v18  ;;  %v1307_v56 = vld [vmem:[%s1660_s1 + $0x1d8] sm:$0xff]   ;;  %v1308_v57 = vld [vmem:[%s1661_s0 + $0x48] ss:$36 sps:$4 sm:$0xff]   ;;  %v1309_v58 = vld [vmem:[%s1661_s0 + $0x50] ss:$36 sps:$4 sm:$0xff]  }
  0x15   :  { %1142 = vmatpush3.bf16.msra.mxu1 %v1266_v19  ;;  %1115 = vmatprep.subr.bf16.mxu0 %v1267_v20  ;;  %v1310_v59 = vld [vmem:[%s1660_s1 + $0x198] sm:$0xff]   ;;  %v1311_v60 = vld [vmem:[%s1660_s1 + $0x150] sm:$0xff]   ;;  %v1315_v0 = vld [vmem:[%s1660_s1 + $0x148] sm:$0xff]  }
  0x16   :  { %1143 = vmatprep.subr.bf16.mxu1 %v1268_v21  ;;  %v1312_v61 = vld [vmem:[%s1660_s1 + $0x110] sm:$0xff]   ;;  %v1316_v1 = vld [vmem:[%s1660_s1 + $0x108] sm:$0xff]   ;;  %v1320_v5 = vld [vmem:[%s1660_s1 + $0x100] sm:$0xff]  }
  0x17   :  { %v1313_v62 = vld [vmem:[%s1660_s1 + $0x1d0] sm:$0xff]   ;;  %v1317_v2 = vld [vmem:[%s1660_s1 + $0x1c8] sm:$0xff]   ;;  %v1321_v6 = vld [vmem:[%s1660_s1 + $0x1c0] sm:$0xff]  }
  0x18   :  { %1116 = vmatpush3.bf16.msra.mxu0 %v1269_v22  ;;  %v1314_v63 = vld [vmem:[%s1660_s1 + $0x190] sm:$0xff]   ;;  %v1318_v3 = vld [vmem:[%s1660_s1 + $0x188] sm:$0xff]   ;;  %v1325_v9 = vld [vmem:[%s1660_s1 + $0x180] sm:$0xff]  }
  0x19   :  { %1144 = vmatpush3.bf16.msra.mxu1 %v1270_v23  ;;  %1117 = vmatprep.subr.bf16.mxu0 %v1271_v24  ;;  %v1322_v7 = vld [vmem:[%s1661_s0 + $0x10] ss:$36 sps:$4 sm:$0xff]   ;;  %v1326_v10 = vld [vmem:[%s1660_s1 + $0x238] sm:$0xff]   ;;  %v1334_v16 = vld [vmem:[%s1660_s1 + $0x228] sm:$0xff]  }
  0x1a   :  { %1145 = vmatprep.subr.bf16.mxu1 %v1272_v25  ;;  %v1324_v8 = vld [vmem:[%s1661_s0 + $0x14] ss:$36 sps:$4 sm:$0xff]   ;;  %v1329_v12 = vld [vmem:[%s1661_s0 + $0x1c] ss:$36 sps:$4 sm:$0xff]   ;;  %v1335_v17 = vld [vmem:[%s1661_s0 + $0x64] ss:$36 sps:$4 sm:$0xff]  }
  0x1b   :  { %v1327_v11 = vld [vmem:[%s1661_s0 + $0x18] ss:$36 sps:$4 sm:$0xff]   ;;  %v1330_v13 = vld [vmem:[%s1660_s1 + $0x230] sm:$0xff]   ;;  %v1337_v18 = vld [vmem:[%s1661_s0 + $0x60] ss:$36 sps:$4 sm:$0xff]  }
  0x1c   :  { %1118 = vmatpush3.bf16.msra.mxu0 %v1273_v26  ;;  %v1331_v14 = vld [vmem:[%s1661_s0 + $0x5c] ss:$36 sps:$4 sm:$0xff]   ;;  %v1340_v22 = vld [vmem:[%s1660_s1 + $0x210] sm:$0xff]   ;;  %v1341_v23 = vld [vmem:[%s1660_s1 + $0x208] sm:$0xff]  }
  0x1d   :  { %1146 = vmatpush3.bf16.msra.mxu1 %v1274_v27  ;;  %1119 = vmatprep.subr.bf16.mxu0 %v1275_v28  ;;  %v1333_v15 = vld [vmem:[%s1661_s0 + $0x58] ss:$36 sps:$4 sm:$0xff]   ;;  %v1338_v19 = vld [vmem:[%s1660_s1 + $0x220] sm:$0xff]   ;;  %v1344_v25 = vld [vmem:[%s1661_s0 + $0x68] ss:$36 sps:$4 sm:$0xff]  }
  0x1e   :  { %1147 = vmatprep.subr.bf16.mxu1 %v1276_v29  ;;  %v1339_v20 = vld [vmem:[%s1660_s1 + $0x218] sm:$0xff]   ;;  %v1343_v21 = vld [vmem:[%s1661_s0 + $0x20] ss:$36 sps:$4 sm:$0xff]  }
  0x1f   :  { %v1342_v24 = vld [vmem:[%s1660_s1 + $0x200] sm:$0xff]  }
  0x20   :  { %1120 = vmatpush3.bf16.msra.mxu0 %v1277_v30 }
  0x21   :  { %1148 = vmatpush3.bf16.msra.mxu1 %v1278_v31  ;;  %1161 = vmatprep.subr.bf16.mxu0 %v1285_v36 }
  0x22   :  { %1189 = vmatprep.subr.bf16.mxu1 %v1287_v38 }
  0x23   :  { %739 = vmatmul.mubr.bf16.vlgmr.msra.gmra.mxu0 %v1279_v32 }
  0x24   :  { %788 = vmatmul.mubr.bf16.vlgmr.msra.gmra.mxu1 %v1282_v34  ;;  %1162 = vmatpush3.bf16.msra.mxu0 %v1286_v37 }
  0x25   :  { %1190 = vmatpush3.bf16.msra.mxu1 %v1288_v39  ;;  %1163 = vmatprep.subr.bf16.mxu0 %v1289_v40 }
  0x26   :  { %1191 = vmatprep.subr.bf16.mxu1 %v1291_v42  ;;  %746 = vmatprep.mubr.bf16.mxu0 %v1303_v54 }
  0x27   :  { %795 = vmatprep.mubr.bf16.mxu1 %v1305_v55 }
  0x28   :  { %1164 = vmatpush3.bf16.msra.mxu0 %v1290_v41 }
  0x29   :  { %1192 = vmatpush3.bf16.msra.mxu1 %v1292_v43  ;;  %1165 = vmatprep.subr.bf16.mxu0 %v1293_v44 }
  0x2a   :  { %1193 = vmatprep.subr.bf16.mxu1 %v1295_v46 }
  0x2b   :  { %747 = vmatmul.mubr.bf16.gmra.mxu0 %v1308_v57 }
  0x2c   :  { %1166 = vmatpush3.bf16.msra.mxu0 %v1294_v45  ;;  %796 = vmatmul.mubr.bf16.gmra.mxu1 %v1309_v58 }
  0x2d   :  { %1194 = vmatpush3.bf16.msra.mxu1 %v1296_v47  ;;  %1167 = vmatprep.subr.bf16.mxu0 %v1297_v48 }
  0x2e   :  { %1195 = vmatprep.subr.bf16.mxu1 %v1299_v50  ;;  %836 = vmatprep.mubr.bf16.mxu0 %v1324_v8 }
  0x2f   :  { %885 = vmatprep.mubr.bf16.mxu1 %v1329_v12 }
  0x30   :  { %1168 = vmatpush3.bf16.msra.mxu0 %v1298_v49 }
  0x31   :  { %1196 = vmatpush3.bf16.msra.mxu1 %v1300_v51  ;;  %1169 = vmatprep.subr.bf16.mxu0 %v1301_v52 }
  0x32   :  { %1197 = vmatprep.subr.bf16.mxu1 %v1307_v56 }
  0x34   :  { %1170 = vmatpush3.bf16.msra.mxu0 %v1302_v53 }
  0x35   :  { %1198 = vmatpush3.bf16.msra.mxu1 %v1310_v59  ;;  %1171 = vmatprep.subr.bf16.mxu0 %v1311_v60 }
  0x36   :  { %1199 = vmatprep.subr.bf16.mxu1 %v1313_v62 }
  0x38   :  { %1172 = vmatpush3.bf16.msra.mxu0 %v1312_v61 }
  0x39   :  { %1200 = vmatpush3.bf16.msra.mxu1 %v1314_v63  ;;  %1173 = vmatprep.subr.bf16.mxu0 %v1315_v0 }
  0x3a   :  { %1201 = vmatprep.subr.bf16.mxu1 %v1317_v2 }
  0x3c   :  { %1174 = vmatpush3.bf16.msra.mxu0 %v1316_v1 }
  0x3d   :  { %1202 = vmatpush3.bf16.msra.mxu1 %v1318_v3  ;;  %1175 = vmatprep.subr.bf16.mxu0 %v1319_v4 }
  0x3e   :  { %1203 = vmatprep.subr.bf16.mxu1 %v1321_v6 }
  0x40   :  { %1176 = vmatpush3.bf16.msra.mxu0 %v1320_v5 }
  0x41   :  { %1204 = vmatpush3.bf16.msra.mxu1 %v1325_v9  ;;  %1227 = vmatprep.subr.bf16.mxu0 %v1326_v10 }
  0x43   :  { %837 = vmatmul.mubr.bf16.vlgmr.msra.gmra.mxu0 %v1322_v7 }
  0x44   :  { %1228 = vmatpush3.bf16.msra.mxu0 %v1326_v10  ;;  %886 = vmatmul.mubr.bf16.vlgmr.msra.gmra.mxu1 %v1327_v11 }
  0x45   :  { %1229 = vmatprep.subr.bf16.mxu0 %v1330_v13  ;;  %844 = vmatprep.mubr.bf16.mxu0 %v1331_v14 }
  0x46   :  { %893 = vmatprep.mubr.bf16.mxu1 %v1335_v17 }
  0x48   :  { %1230 = vmatpush3.bf16.msra.mxu0 %v1330_v13 }
  0x49   :  { %1231 = vmatprep.subr.bf16.mxu0 %v1334_v16 }
  0x4b   :  { %845 = vmatmul.mubr.bf16.gmra.mxu0 %v1333_v15 }
  0x4c   :  { %1232 = vmatpush3.bf16.msra.mxu0 %v1334_v16  ;;  %894 = vmatmul.mubr.bf16.gmra.mxu1 %v1337_v18 }
  0x4d   :  { %1233 = vmatprep.subr.bf16.mxu0 %v1338_v19  ;;  %1243 = vmatprep.mubr.bf16.mxu0 %v1343_v21 }
  0x50   :  { %1234 = vmatpush3.bf16.msra.mxu0 %v1338_v19 }
  0x51   :  { %1235 = vmatprep.subr.bf16.mxu0 %v1339_v20 }
  0x54   :  { %1236 = vmatpush3.bf16.msra.mxu0 %v1339_v20 }
  0x55   :  { %1237 = vmatprep.subr.bf16.mxu0 %v1340_v22 }
  0x58   :  { %1238 = vmatpush3.bf16.msra.mxu0 %v1340_v22 }
  0x59   :  { %1239 = vmatprep.subr.bf16.mxu0 %v1341_v23 }
  0x5c   :  { %1240 = vmatpush3.bf16.msra.mxu0 %v1341_v23 }
  0x5d   :  { %1241 = vmatprep.subr.bf16.mxu0 %v1342_v24 }
  0x60   :  { %1242 = vmatpush3.bf16.msra.mxu0 %v1342_v24 }
  0x63   :  { %1244 = vmatmul.mubr.bf16.vlgmr.msra.gmra.mxu0 %v1344_v25 }
  0xe3   :  { %v1121_v26 = vpop.f32.mrf.mxu0 }
  0xe4   :  { %v1149_v27 = vpop.f32.mrf.mxu1 }
  0xe5   :  { %v1122_v28 = vpop.f32.mrf.mxu0 }
  0xe6   :  { %v1150_v29 = vpop.f32.mrf.mxu1  ;;  %v1123_v55 = vadd.f32 %v1122_v28, %v1121_v26 }
  0xe7   :  { %v1124_v30 = vpop.f32.mrf.mxu0  ;;  %v1151_v56 = vadd.f32 %v1150_v29, %v1149_v27 }
  0xe8   :  { %v1152_v31 = vpop.f32.mrf.mxu1 }
  0xe9   :  { %v1125_v32 = vpop.f32.mrf.mxu0  ;;  %v790_v2 = vadd.f32 %v1151_v56, %v1123_v55 }
  0xea   :  { %v1153_v34 = vpop.f32.mrf.mxu1  ;;  %v1126_v57 = vadd.f32 %v1125_v32, %v1124_v30 }
  0xeb   :  { %v1127_v33 = vpop.f32.mrf.mxu0  ;;  %v1154_v58 = vadd.f32 %v1153_v34, %v1152_v31 }
  0xec   :  { %v1155_v35 = vpop.f32.mrf.mxu1 }
  0xed   :  { %v1128_v36 = vpop.f32.mrf.mxu0  ;;  %v793_v5 = vadd.f32 %v1154_v58, %v1126_v57  ;;  %v985_v58 = vlaneseq }
  0xee   :  { %v1156_v37 = vpop.f32.mrf.mxu1  ;;  %v1129_v59 = vadd.f32 %v1128_v36, %v1127_v33 }
  0xef   :  { %v1130_v38 = vpop.f32.mrf.mxu0  ;;  %v1157_v60 = vadd.f32 %v1156_v37, %v1155_v35 }
  0xf0   :  { %v1158_v39 = vpop.f32.mrf.mxu1 }
  0xf1   :  { %v1131_v40 = vpop.f32.mrf.mxu0  ;;  %v798_v6 = vadd.f32 %v1157_v60, %v1129_v59  ;;  %v986_v59 = vshrl.u32 %v985_v58, 7  ;;  %v980_v60 = vld [vmem:[%s1662_s2] sm:$0x1] }
  0xf2   :  { %v1159_v42 = vpop.f32.mrf.mxu1  ;;  %v1132_v62 = vadd.f32 %v1131_v40, %v1130_v38 }
  0xf3   :  { %v1160_v63 = vadd.f32 %v1159_v42, %v1158_v39 }
  0xf5   :  { %v801_v10 = vadd.f32 %v1160_v63, %v1132_v62 }
 0x103   :  { %v1177_v41 = vpop.f32.mrf.mxu0 }
 0x104   :  { %v1205_v44 = vpop.f32.mrf.mxu1 }
 0x105   :  { %v1178_v43 = vpop.f32.mrf.mxu0 }
 0x106   :  { %v1206_v46 = vpop.f32.mrf.mxu1  ;;  %v1179_v61 = vadd.f32 %v1178_v43, %v1177_v41 }
 0x107   :  { %v1180_v45 = vpop.f32.mrf.mxu0  ;;  %v1207_v8 = vadd.f32 %v1206_v46, %v1205_v44 }
 0x108   :  { %v1208_v48 = vpop.f32.mrf.mxu1  ;;  %v839_v7 = vadd.f32 %v1179_v61, %v790_v2  ;;  %v987_v61 = vsub.s32 0, %v986_v59 }
 0x109   :  { %v1181_v47 = vpop.f32.mrf.mxu0 }
 0x10a   :  { %v1209_v50 = vpop.f32.mrf.mxu1  ;;  %v1182_v3 = vadd.f32 %v1181_v47, %v1180_v45  ;;  %v888_v20 = vadd.f32 %v1207_v8, %v839_v7 }
 0x10b   :  { %v1183_v49 = vpop.f32.mrf.mxu0  ;;  %v1210_v14 = vadd.f32 %v1209_v50, %v1208_v48 }
 0x10c   :  { %v1211_v52 = vpop.f32.mrf.mxu1  ;;  %v842_v13 = vadd.f32 %v1182_v3, %v793_v5 }
 0x10d   :  { %v1184_v51 = vpop.f32.mrf.mxu0 }
 0x10e   :  { %v1212_v54 = vpop.f32.mrf.mxu1  ;;  %v1185_v4 = vadd.f32 %v1184_v51, %v1183_v49  ;;  %v891_v24 = vadd.f32 %v1210_v14, %v842_v13 }
 0x10f   :  { %v1186_v53 = vpop.f32.mrf.mxu0  ;;  %v1213_v16 = vadd.f32 %v1212_v54, %v1211_v52 }
 0x110   :  { %v1214_v1 = vpop.f32.mrf.mxu1  ;;  %v847_v15 = vadd.f32 %v1185_v4, %v798_v6 }
 0x111   :  { %v1187_v0 = vpop.f32.mrf.mxu0 }
 0x112   :  { %v1188_v9 = vadd.f32 %v1187_v0, %v1186_v53  ;;  %v1215_v11 = vpop.f32.mrf.mxu1  ;;  %v896_v22 = vadd.f32 %v1213_v16, %v847_v15  ;;  %v982_v0 = vld [vmem:[%s1663_s3] sm:$0x1] }
 0x113   :  { %v1216_v19 = vadd.f32 %v1215_v11, %v1214_v1 }
 0x114   :  { %v850_v18 = vadd.f32 %v1188_v9, %v801_v10 }
 0x116   :  { %v899_v27 = vadd.f32 %v1216_v19, %v850_v18 }
 0x123   :  { %v1245_v12 = vpop.f32.mrf.mxu0 }
 0x124   :  { %v945_v26 = vadd.f32 %v1245_v12, %v896_v22 }
 0x125   :  { %v936_v17 = vpop.f32.mrf.mxu0 }
 0x126   :  { %v937_v23 = vadd.f32 %v936_v17, %v888_v20  ;;  %v962_v33 = vmul.f32 %v945_v26, %v945_v26 }
 0x127   :  { %v1246_v21 = vpop.f32.mrf.mxu0 }
 0x128   :  { %v960_v29 = vmul.f32 %v937_v23, %v937_v23  ;;  %v948_v30 = vadd.f32 %v1246_v21, %v899_v27 }
 0x129   :  { %v939_v25 = vpop.f32.mrf.mxu0 }
 0x12a   :  { %v940_v28 = vadd.f32 %v939_v25, %v891_v24  ;;  %v963_v36 = vmul.f32 %v948_v30, %v948_v30 }
 0x12c   :  { %v951_v31 = vadd.f32 %v940_v28, %v937_v23  ;;  %v961_v32 = vmul.f32 %v940_v28, %v940_v28 }
 0x12e   :  { %v952_v34 = vadd.f32 %v951_v31, %v945_v26  ;;  %v964_v35 = vadd.f32 %v961_v32, %v960_v29 }
 0x130   :  { %v953_v37 = vadd.f32 %v952_v34, %v948_v30  ;;  %v965_v38 = vadd.f32 %v964_v35, %v962_v33 }
 0x132   :  { %v954_v39 = vrot.slane %v953_v37, 4  ;;  %v966_v40 = vadd.f32 %v965_v38, %v963_v36 }
 0x134   :  { %v955_v41 = vadd.f32 %v954_v39, %v953_v37  ;;  %v967_v42 = vrot.slane %v966_v40, 4 }
 0x136   :  { %v956_v43 = vrot.slane %v955_v41, 2  ;;  %v968_v44 = vadd.f32 %v967_v42, %v966_v40 }
 0x138   :  { %v957_v45 = vadd.f32 %v956_v43, %v955_v41  ;;  %v969_v46 = vrot.slane %v968_v44, 2 }
 0x13a   :  { %v958_v47 = vrot.slane %v957_v45, 1  ;;  %v970_v48 = vadd.f32 %v969_v46, %v968_v44 }
 0x13c   :  { %v959_v49 = vadd.f32 %v958_v47, %v957_v45  ;;  %v971_v50 = vrot.slane %v970_v48, 1 }
 0x13e   :  { %v972_v51 = vadd.f32 %v971_v50, %v970_v48  ;;  %v973_v52 = vmul.f32 0.03125, %v959_v49 }
 0x140   :  { %v974_v53 = vmul.f32 0.03125, %v972_v51  ;;  %v975_v54 = vmul.f32 %v973_v52, %v973_v52 }
 0x142   :  { %v976_v55 = vsub.f32 %v974_v53, %v975_v54 }
 0x144   :  { %v977_v56 = vmax.f32 %v976_v55, 0.0 }
 0x146   :  { %v978_v57 = vadd.f32 1e-05, %v977_v56 }
 0x148   :  { %1345 = vrsqrt.f32 %v978_v57 }
 0x155   :  { %v1346_v62 = vpop.eup %1345 }
 0x156   :  { %v981_v63 = vmul.f32 %v1346_v62, %v980_v60 }
 0x158   :  { %v983_v1 = vmul.f32 %v981_v63, %v973_v52  ;;  %v988_v2 = vrot.slane %v981_v63, %v987_v61 }
 0x15a   :  { %v984_v3 = vsub.f32 %v982_v0, %v983_v1  ;;  %v989_v4 = vmul.f32 %v988_v2, %v937_v23  ;;  %v990_v5 = vmul.f32 %v988_v2, %v940_v28  ;;  %v991_v6 = vmul.f32 %v988_v2, %v945_v26 }
 0x15b   :  { %v992_v7 = vmul.f32 %v988_v2, %v948_v30 }
 0x15c   :  { %v997_v8 = vrot.slane %v984_v3, %v987_v61 }
 0x15e   :  { %v999_v9 = vadd.f32 %v997_v8, %v989_v4  ;;  %v1000_v10 = vadd.f32 %v997_v8, %v990_v5  ;;  %v1001_v11 = vadd.f32 %v997_v8, %v991_v6  ;;  %v1002_v12 = vadd.f32 %v997_v8, %v992_v7 }
 0x160   :  { %v1003_v13 = vmax.f32 %v999_v9, 0.0  ;;  %v1004_v14 = vmax.f32 %v1000_v10, 0.0  ;;  %v1005_v15 = vmax.f32 %v1001_v11, 0.0  ;;  %v1006_v16 = vmax.f32 %v1002_v12, 0.0 }
 0x162   :  { %1007 = vst [vmem:[%s1664_s4] sm:$0xff] %v1003_v13  ;;  %1008 = vst [vmem:[%s1664_s4 + $0x8] sm:$0xff] %v1004_v14 }
 0x163   :  { %1009 = vst [vmem:[%s1664_s4 + $0x10] sm:$0xff] %v1005_v15  ;;  %1010 = vst [vmem:[%s1664_s4 + $0x18] sm:$0xff] %v1006_v16 }

// kernel: resnet_forward.27
= control target key start
LH: loop header
LB: loop body
LE: loop exit
PB: predicated region body
PF: predicated region fallthrough
CT: control target
= control target key end

     0   :  { %s2138_s15 = smov 0   ;;  %s2140_s16 = smov 0   ;;  %s2603_s0 = inlined_call_operand.vmem [shape: bf16[8,1152], index: 0, kind: input, shape index: {}]   ;;  %s2604_s1 = inlined_call_operand.vmem [shape: bf16[1152,256], index: 1, kind: input, shape index: {}]   ;;  %s2605_s2 = inlined_call_operand.vmem [shape: f32[1,256], index: 2, kind: input, shape index: {}]   ;;  %s2606_s3 = inlined_call_operand.vmem [shape: f32[1,256], index: 3, kind: input, shape index: {}]   ;;  %s2607_s4 = inlined_call_operand.vmem [shape: f32[8,256], index: 4, kind: output, shape index: {}]  }
   0x1   :  { %s2142_s17 = smov 0  }
   0x2 LB: > { %s1769_s18 = sadd.s32 4294967295, %s2109_s17   ;;  %s2155_s19 = sadd.s32 1, %s2109_s17   ;;  %s2109_s17 = sphi %s2142_s17, %s2610_s17   ;;  %s2105_s16 = sphi %s2140_s16, %s2609_s16   ;;  %s2101_s15 = sphi %s2138_s15, %s2608_s15  }
   0x3   : > { %s39_s20 = ssub.s32 %s2109_s17, %s2155_s19  ;;  %s42_s21 = sadd.s32 1, %s2105_s16 }
   0x4   : > { %p40_p0 = scmp.eq.s32.totalorder %s39_s20, 0  ;;  %p49_p1 = scmp.ne.s32.totalorder %s2105_s16, %s2101_s15 }
   0x5   : > { %p50_p2 = scmp.eq.s32.totalorder %s2109_s17, 0  ;;  %p1772_p4 = scmp.ge.s32.totalorder %s2109_s17, 2 }
   0x6   : > { %s2164_s22 = scalar_select %p40_p0, %s2105_s16, %s42_s21  }
   0x7   : > { %p51_p3 = por %p50_p2, %p49_p1  ;;  %156 = sbr.rel (%p1772_p4) target bundleno = 112 (0x70), region = 20 }
   0xc   : > { %159 = sbr.rel (!%p51_p3) target bundleno = 112 (0x70), region = 24  ;;  %s161_s23 = sand.u32 (%p51_p3), 1, %s2105_s16  }
   0xd   : > { %s1773_s24 = sshll.u32 (%p51_p3), %s2109_s17, 2  ;;  %s1976_s25 = smul.u32 (%p51_p3), 576, %s161_s23 }
   0xe   : > { %s2172_s28 = scalar_lea.vmem (%p51_p3), %s2604_s1, %s1773_s24 }
   0xf   : > { %v182_v0 = vld [vmem:[%s2172_s28] sm:$0xf] (%p51_p3)  ;;  %v184_v1 = vld [vmem:[%s2172_s28 + $0x8] sm:$0xf] (%p51_p3)  ;;  %v186_v2 = vld [vmem:[%s2172_s28 + $0x10] sm:$0xf] (%p51_p3) }
  0x10   : > { %v188_v3 = vld [vmem:[%s2172_s28 + $0x18] sm:$0xf] (%p51_p3)  ;;  %v190_v4 = vld [vmem:[%s2172_s28 + $0x20] sm:$0xf] (%p51_p3)  ;;  %s2179_s29 = scalar_lea.vmem (%p51_p3), [#allocation2], %s1976_s25 }
  0x11   : > { %183 = vst [vmem:[%s2179_s29] sm:$0xf] %v182_v0  ;;  %185 = vst [vmem:[%s2179_s29 + $0x4] sm:$0xf] %v184_v1  ;;  %v192_v5 = vld [vmem:[%s2172_s28 + $0x28] sm:$0xf] }
  0x12   : > { %187 = vst [vmem:[%s2179_s29 + $0x8] sm:$0xf] %v186_v2  ;;  %189 = vst [vmem:[%s2179_s29 + $0xc] sm:$0xf] %v188_v3  ;;  %v194_v6 = vld [vmem:[%s2172_s28 + $0x30] sm:$0xf] }
  0x13   : > { %191 = vst [vmem:[%s2179_s29 + $0x10] sm:$0xf] %v190_v4  ;;  %v196_v7 = vld [vmem:[%s2172_s28 + $0x38] sm:$0xf]  ;;  %193 = vst [vmem:[%s2179_s29 + $0x14] sm:$0xf] %v192_v5 }
  0x14   : > { %195 = vst [vmem:[%s2179_s29 + $0x18] sm:$0xf] %v194_v6  ;;  %197 = vst [vmem:[%s2179_s29 + $0x1c] sm:$0xf] %v196_v7  ;;  %v198_v8 = vld [vmem:[%s2172_s28 + $0x40] sm:$0xf] }
  0x15   : > { %v200_v9 = vld [vmem:[%s2172_s28 + $0x48] sm:$0xf]  ;;  %v202_v10 = vld [vmem:[%s2172_s28 + $0x50] sm:$0xf]  ;;  %199 = vst [vmem:[%s2179_s29 + $0x20] sm:$0xf] %v198_v8 }
  0x16   : > { %201 = vst [vmem:[%s2179_s29 + $0x24] sm:$0xf] %v200_v9  ;;  %203 = vst [vmem:[%s2179_s29 + $0x28] sm:$0xf] %v202_v10  ;;  %v204_v11 = vld [vmem:[%s2172_s28 + $0x58] sm:$0xf] }
  0x17   : > { %v206_v12 = vld [vmem:[%s2172_s28 + $0x60] sm:$0xf]  ;;  %v208_v13 = vld [vmem:[%s2172_s28 + $0x68] sm:$0xf]  ;;  %205 = vst [vmem:[%s2179_s29 + $0x2c] sm:$0xf] %v204_v11 }
  0x18   : > { %207 = vst [vmem:[%s2179_s29 + $0x30] sm:$0xf] %v206_v12  ;;  %209 = vst [vmem:[%s2179_s29 + $0x34] sm:$0xf] %v208_v13  ;;  %v210_v14 = vld [vmem:[%s2172_s28 + $0x70] sm:$0xf] }
  0x19   : > { %v212_v15 = vld [vmem:[%s2172_s28 + $0x78] sm:$0xf]  ;;  %v214_v16 = vld [vmem:[%s2172_s28 + $0x80] sm:$0xf]  ;;  %211 = vst [vmem:[%s2179_s29 + $0x38] sm:$0xf] %v210_v14 }
  0x1a   : > { %213 = vst [vmem:[%s2179_s29 + $0x3c] sm:$0xf] %v212_v15  ;;  %215 = vst [vmem:[%s2179_s29 + $0x40] sm:$0xf] %v214_v16  ;;  %v216_v17 = vld [vmem:[%s2172_s28 + $0x88] sm:$0xf] }
  0x1b   : > { %v218_v18 = vld [vmem:[%s2172_s28 + $0x90] sm:$0xf]  ;;  %v220_v19 = vld [vmem:[%s2172_s28 + $0x98] sm:$0xf]  ;;  %217 = vst [vmem:[%s2179_s29 + $0x44] sm:$0xf] %v216_v17 }
  0x1c   : > { %219 = vst [vmem:[%s2179_s29 + $0x48] sm:$0xf] %v218_v18  ;;  %221 = vst [vmem:[%s2179_s29 + $0x4c] sm:$0xf] %v220_v19  ;;  %v222_v20 = vld [vmem:[%s2172_s28 + $0xa0] sm:$0xf] }
  0x1d   : > { %v224_v21 = vld [vmem:[%s2172_s28 + $0xa8] sm:$0xf]  ;;  %v226_v22 = vld [vmem:[%s2172_s28 + $0xb0] sm:$0xf]  ;;  %223 = vst [vmem:[%s2179_s29 + $0x50] sm:$0xf] %v222_v20 }
  0x1e   : > { %225 = vst [vmem:[%s2179_s29 + $0x54] sm:$0xf] %v224_v21  ;;  %227 = vst [vmem:[%s2179_s29 + $0x58] sm:$0xf] %v226_v22  ;;  %v228_v23 = vld [vmem:[%s2172_s28 + $0xb8] sm:$0xf] }
  0x1f   : > { %v230_v24 = vld [vmem:[%s2172_s28 + $0xc0] sm:$0xf]  ;;  %v232_v25 = vld [vmem:[%s2172_s28 + $0xc8] sm:$0xf]  ;;  %229 = vst [vmem:[%s2179_s29 + $0x5c] sm:$0xf] %v228_v23 }
  0x20   : > { %231 = vst [vmem:[%s2179_s29 + $0x60] sm:$0xf] %v230_v24  ;;  %233 = vst [vmem:[%s2179_s29 + $0x64] sm:$0xf] %v232_v25  ;;  %v234_v26 = vld [vmem:[%s2172_s28 + $0xd0] sm:$0xf] }
  0x21   : > { %v236_v27 = vld [vmem:[%s2172_s28 + $0xd8] sm:$0xf]  ;;  %v238_v28 = vld [vmem:[%s2172_s28 + $0xe0] sm:$0xf]  ;;  %235 = vst [vmem:[%s2179_s29 + $0x68] sm:$0xf] %v234_v26 }
  0x22   : > { %237 = vst [vmem:[%s2179_s29 + $0x6c] sm:$0xf] %v236_v27  ;;  %239 = vst [vmem:[%s2179_s29 + $0x70] sm:$0xf] %v238_v28  ;;  %v240_v29 = vld [vmem:[%s2172_s28 + $0xe8] sm:$0xf] }
  0x23   : > { %v242_v30 = vld [vmem:[%s2172_s28 + $0xf0] sm:$0xf]  ;;  %v244_v31 = vld [vmem:[%s2172_s28 + $0xf8] sm:$0xf]  ;;  %241 = vst [vmem:[%s2179_s29 + $0x74] sm:$0xf] %v240_v29 }
  0x24   : > { %243 = vst [vmem:[%s2179_s29 + $0x78] sm:$0xf] %v242_v30  ;;  %245 = vst [vmem:[%s2179_s29 + $0x7c] sm:$0xf] %v244_v31  ;;  %v246_v32 = vld [vmem:[%s2172_s28 + $0x100] sm:$0xf] }
  0x25   : > { %v248_v33 = vld [vmem:[%s2172_s28 + $0x108] sm:$0xf]  ;;  %v250_v34 = vld [vmem:[%s2172_s28 + $0x110] sm:$0xf]  ;;  %247 = vst [vmem:[%s2179_s29 + $0x80] sm:$0xf] %v246_v32 }
  0x26   : > { %249 = vst [vmem:[%s2179_s29 + $0x84] sm:$0xf] %v248_v33  ;;  %251 = vst [vmem:[%s2179_s29 + $0x88] sm:$0xf] %v250_v34  ;;  %v252_v35 = vld [vmem:[%s2172_s28 + $0x118] sm:$0xf] }
  0x27   : > { %v254_v36 = vld [vmem:[%s2172_s28 + $0x120] sm:$0xf]  ;;  %v256_v37 = vld [vmem:[%s2172_s28 + $0x128] sm:$0xf]  ;;  %253 = vst [vmem:[%s2179_s29 + $0x8c] sm:$0xf] %v252_v35 }
  0x28   : > { %255 = vst [vmem:[%s2179_s29 + $0x90] sm:$0xf] %v254_v36  ;;  %257 = vst [vmem:[%s2179_s29 + $0x94] sm:$0xf] %v256_v37  ;;  %v258_v38 = vld [vmem:[%s2172_s28 + $0x130] sm:$0xf] }
  0x29   : > { %v260_v39 = vld [vmem:[%s2172_s28 + $0x138] sm:$0xf]  ;;  %v262_v40 = vld [vmem:[%s2172_s28 + $0x140] sm:$0xf]  ;;  %259 = vst [vmem:[%s2179_s29 + $0x98] sm:$0xf] %v258_v38 }
  0x2a   : > { %261 = vst [vmem:[%s2179_s29 + $0x9c] sm:$0xf] %v260_v39  ;;  %263 = vst [vmem:[%s2179_s29 + $0xa0] sm:$0xf] %v262_v40  ;;  %v264_v41 = vld [vmem:[%s2172_s28 + $0x148] sm:$0xf] }
  0x2b   : > { %v266_v42 = vld [vmem:[%s2172_s28 + $0x150] sm:$0xf]  ;;  %v268_v43 = vld [vmem:[%s2172_s28 + $0x158] sm:$0xf]  ;;  %265 = vst [vmem:[%s2179_s29 + $0xa4] sm:$0xf] %v264_v41 }
  0x2c   : > { %267 = vst [vmem:[%s2179_s29 + $0xa8] sm:$0xf] %v266_v42  ;;  %269 = vst [vmem:[%s2179_s29 + $0xac] sm:$0xf] %v268_v43  ;;  %v270_v44 = vld [vmem:[%s2172_s28 + $0x160] sm:$0xf] }
  0x2d   : > { %v272_v45 = vld [vmem:[%s2172_s28 + $0x168] sm:$0xf]  ;;  %v274_v46 = vld [vmem:[%s2172_s28 + $0x170] sm:$0xf]  ;;  %271 = vst [vmem:[%s2179_s29 + $0xb0] sm:$0xf] %v270_v44 }
  0x2e   : > { %273 = vst [vmem:[%s2179_s29 + $0xb4] sm:$0xf] %v272_v45  ;;  %275 = vst [vmem:[%s2179_s29 + $0xb8] sm:$0xf] %v274_v46  ;;  %v276_v47 = vld [vmem:[%s2172_s28 + $0x178] sm:$0xf] }
  0x2f   : > { %v278_v48 = vld [vmem:[%s2172_s28 + $0x180] sm:$0xf]  ;;  %v280_v49 = vld [vmem:[%s2172_s28 + $0x188] sm:$0xf]  ;;  %277 = vst [vmem:[%s2179_s29 + $0xbc] sm:$0xf] %v276_v47 }
  0x30   : > { %279 = vst [vmem:[%s2179_s29 + $0xc0] sm:$0xf] %v278_v48  ;;  %281 = vst [vmem:[%s2179_s29 + $0xc4] sm:$0xf] %v280_v49  ;;  %v282_v50 = vld [vmem:[%s2172_s28 + $0x190] sm:$0xf] }
  0x31   : > { %v284_v51 = vld [vmem:[%s2172_s28 + $0x198] sm:$0xf]  ;;  %v286_v52 = vld [vmem:[%s2172_s28 + $0x1a0] sm:$0xf]  ;;  %283 = vst [vmem:[%s2179_s29 + $0xc8] sm:$0xf] %v282_v50 }
  0x32   : > { %285 = vst [vmem:[%s2179_s29 + $0xcc] sm:$0xf] %v284_v51  ;;  %287 = vst [vmem:[%s2179_s29 + $0xd0] sm:$0xf] %v286_v52  ;;  %v288_v53 = vld [vmem:[%s2172_s28 + $0x1a8] sm:$0xf] }
  0x33   : > { %v290_v54 = vld [vmem:[%s2172_s28 + $0x1b0] sm:$0xf]  ;;  %v292_v55 = vld [vmem:[%s2172_s28 + $0x1b8] sm:$0xf]  ;;  %289 = vst [vmem:[%s2179_s29 + $0xd4] sm:$0xf] %v288_v53 }
  0x34   : > { %291 = vst [vmem:[%s2179_s29 + $0xd8] sm:$0xf] %v290_v54  ;;  %293 = vst [vmem:[%s2179_s29 + $0xdc] sm:$0xf] %v292_v55  ;;  %v294_v56 = vld [vmem:[%s2172_s28 + $0x1c0] sm:$0xf] }
  0x35   : > { %v296_v57 = vld [vmem:[%s2172_s28 + $0x1c8] sm:$0xf]  ;;  %v298_v58 = vld [vmem:[%s2172_s28 + $0x1d0] sm:$0xf]  ;;  %295 = vst [vmem:[%s2179_s29 + $0xe0] sm:$0xf] %v294_v56 }
  0x36   : > { %297 = vst [vmem:[%s2179_s29 + $0xe4] sm:$0xf] %v296_v57  ;;  %299 = vst [vmem:[%s2179_s29 + $0xe8] sm:$0xf] %v298_v58  ;;  %v300_v59 = vld [vmem:[%s2172_s28 + $0x1d8] sm:$0xf] }
  0x37   : > { %v302_v60 = vld [vmem:[%s2172_s28 + $0x1e0] sm:$0xf]  ;;  %v304_v61 = vld [vmem:[%s2172_s28 + $0x1e8] sm:$0xf]  ;;  %301 = vst [vmem:[%s2179_s29 + $0xec] sm:$0xf] %v300_v59 }
  0x38   : > { %303 = vst [vmem:[%s2179_s29 + $0xf0] sm:$0xf] %v302_v60  ;;  %305 = vst [vmem:[%s2179_s29 + $0xf4] sm:$0xf] %v304_v61  ;;  %v306_v62 = vld [vmem:[%s2172_s28 + $0x1f0] sm:$0xf] }
  0x39   : > { %v308_v63 = vld [vmem:[%s2172_s28 + $0x1f8] sm:$0xf]  ;;  %v310_v0 = vld [vmem:[%s2172_s28 + $0x200] sm:$0xf]  ;;  %307 = vst [vmem:[%s2179_s29 + $0xf8] sm:$0xf] %v306_v62 }
  0x3a   : > { %309 = vst [vmem:[%s2179_s29 + $0xfc] sm:$0xf] %v308_v63  ;;  %311 = vst [vmem:[%s2179_s29 + $0x100] sm:$0xf] %v310_v0  ;;  %v312_v1 = vld [vmem:[%s2172_s28 + $0x208] sm:$0xf] }
  0x3b   : > { %v314_v2 = vld [vmem:[%s2172_s28 + $0x210] sm:$0xf]  ;;  %v316_v3 = vld [vmem:[%s2172_s28 + $0x218] sm:$0xf]  ;;  %313 = vst [vmem:[%s2179_s29 + $0x104] sm:$0xf] %v312_v1 }
  0x3c   : > { %315 = vst [vmem:[%s2179_s29 + $0x108] sm:$0xf] %v314_v2  ;;  %317 = vst [vmem:[%s2179_s29 + $0x10c] sm:$0xf] %v316_v3  ;;  %v318_v4 = vld [vmem:[%s2172_s28 + $0x220] sm:$0xf] }
  0x3d   : > { %v320_v5 = vld [vmem:[%s2172_s28 + $0x228] sm:$0xf]  ;;  %v322_v6 = vld [vmem:[%s2172_s28 + $0x230] sm:$0xf]  ;;  %319 = vst [vmem:[%s2179_s29 + $0x110] sm:$0xf] %v318_v4 }
  0x3e   : > { %321 = vst [vmem:[%s2179_s29 + $0x114] sm:$0xf] %v320_v5  ;;  %323 = vst [vmem:[%s2179_s29 + $0x118] sm:$0xf] %v322_v6  ;;  %v324_v7 = vld [vmem:[%s2172_s28 + $0x238] sm:$0xf] }
  0x3f   : > { %v326_v8 = vld [vmem:[%s2172_s28 + $0x240] sm:$0xf]  ;;  %v328_v9 = vld [vmem:[%s2172_s28 + $0x248] sm:$0xf]  ;;  %325 = vst [vmem:[%s2179_s29 + $0x11c] sm:$0xf] %v324_v7 }
  0x40   : > { %327 = vst [vmem:[%s2179_s29 + $0x120] sm:$0xf] %v326_v8  ;;  %329 = vst [vmem:[%s2179_s29 + $0x124] sm:$0xf] %v328_v9  ;;  %v330_v10 = vld [vmem:[%s2172_s28 + $0x250] sm:$0xf] }
  0x41   : > { %v332_v11 = vld [vmem:[%s2172_s28 + $0x258] sm:$0xf]  ;;  %v334_v12 = vld [vmem:[%s2172_s28 + $0x260] sm:$0xf]  ;;  %331 = vst [vmem:[%s2179_s29 + $0x128] sm:$0xf] %v330_v10 }
  0x42   : > { %333 = vst [vmem:[%s2179_s29 + $0x12c] sm:$0xf] %v332_v11  ;;  %335 = vst [vmem:[%s2179_s29 + $0x130] sm:$0xf] %v334_v12  ;;  %v336_v13 = vld [vmem:[%s2172_s28 + $0x268] sm:$0xf] }
  0x43   : > { %v338_v14 = vld [vmem:[%s2172_s28 + $0x270] sm:$0xf]  ;;  %v340_v15 = vld [vmem:[%s2172_s28 + $0x278] sm:$0xf]  ;;  %337 = vst [vmem:[%s2179_s29 + $0x134] sm:$0xf] %v336_v13 }
  0x44   : > { %339 = vst [vmem:[%s2179_s29 + $0x138] sm:$0xf] %v338_v14  ;;  %341 = vst [vmem:[%s2179_s29 + $0x13c] sm:$0xf] %v340_v15  ;;  %v342_v16 = vld [vmem:[%s2172_s28 + $0x280] sm:$0xf] }
  0x45   : > { %v344_v17 = vld [vmem:[%s2172_s28 + $0x288] sm:$0xf]  ;;  %v346_v18 = vld [vmem:[%s2172_s28 + $0x290] sm:$0xf]  ;;  %343 = vst [vmem:[%s2179_s29 + $0x140] sm:$0xf] %v342_v16 }
  0x46   : > { %345 = vst [vmem:[%s2179_s29 + $0x144] sm:$0xf] %v344_v17  ;;  %347 = vst [vmem:[%s2179_s29 + $0x148] sm:$0xf] %v346_v18  ;;  %v348_v19 = vld [vmem:[%s2172_s28 + $0x298] sm:$0xf] }
  0x47   : > { %v350_v20 = vld [vmem:[%s2172_s28 + $0x2a0] sm:$0xf]  ;;  %v352_v21 = vld [vmem:[%s2172_s28 + $0x2a8] sm:$0xf]  ;;  %349 = vst [vmem:[%s2179_s29 + $0x14c] sm:$0xf] %v348_v19 }
  0x48   : > { %351 = vst [vmem:[%s2179_s29 + $0x150] sm:$0xf] %v350_v20  ;;  %353 = vst [vmem:[%s2179_s29 + $0x154] sm:$0xf] %v352_v21  ;;  %v354_v22 = vld [vmem:[%s2172_s28 + $0x2b0] sm:$0xf] }
  0x49   : > { %v356_v23 = vld [vmem:[%s2172_s28 + $0x2b8] sm:$0xf]  ;;  %v358_v24 = vld [vmem:[%s2172_s28 + $0x2c0] sm:$0xf]  ;;  %355 = vst [vmem:[%s2179_s29 + $0x158] sm:$0xf] %v354_v22 }
  0x4a   : > { %357 = vst [vmem:[%s2179_s29 + $0x15c] sm:$0xf] %v356_v23  ;;  %359 = vst [vmem:[%s2179_s29 + $0x160] sm:$0xf] %v358_v24  ;;  %v360_v25 = vld [vmem:[%s2172_s28 + $0x2c8] sm:$0xf] }
  0x4b   : > { %v362_v26 = vld [vmem:[%s2172_s28 + $0x2d0] sm:$0xf]  ;;  %v364_v27 = vld [vmem:[%s2172_s28 + $0x2d8] sm:$0xf]  ;;  %361 = vst [vmem:[%s2179_s29 + $0x164] sm:$0xf] %v360_v25 }
  0x4c   : > { %363 = vst [vmem:[%s2179_s29 + $0x168] sm:$0xf] %v362_v26  ;;  %365 = vst [vmem:[%s2179_s29 + $0x16c] sm:$0xf] %v364_v27  ;;  %v366_v28 = vld [vmem:[%s2172_s28 + $0x2e0] sm:$0xf] }
  0x4d   : > { %v368_v29 = vld [vmem:[%s2172_s28 + $0x2e8] sm:$0xf]  ;;  %v370_v30 = vld [vmem:[%s2172_s28 + $0x2f0] sm:$0xf]  ;;  %367 = vst [vmem:[%s2179_s29 + $0x170] sm:$0xf] %v366_v28 }
  0x4e   : > { %369 = vst [vmem:[%s2179_s29 + $0x174] sm:$0xf] %v368_v29  ;;  %371 = vst [vmem:[%s2179_s29 + $0x178] sm:$0xf] %v370_v30  ;;  %v372_v31 = vld [vmem:[%s2172_s28 + $0x2f8] sm:$0xf] }
  0x4f   : > { %v374_v32 = vld [vmem:[%s2172_s28 + $0x300] sm:$0xf]  ;;  %v376_v33 = vld [vmem:[%s2172_s28 + $0x308] sm:$0xf]  ;;  %373 = vst [vmem:[%s2179_s29 + $0x17c] sm:$0xf] %v372_v31 }
  0x50   : > { %375 = vst [vmem:[%s2179_s29 + $0x180] sm:$0xf] %v374_v32  ;;  %377 = vst [vmem:[%s2179_s29 + $0x184] sm:$0xf] %v376_v33  ;;  %v378_v34 = vld [vmem:[%s2172_s28 + $0x310] sm:$0xf] }
  0x51   : > { %v380_v35 = vld [vmem:[%s2172_s28 + $0x318] sm:$0xf]  ;;  %v382_v36 = vld [vmem:[%s2172_s28 + $0x320] sm:$0xf]  ;;  %379 = vst [vmem:[%s2179_s29 + $0x188] sm:$0xf] %v378_v34 }
  0x52   : > { %381 = vst [vmem:[%s2179_s29 + $0x18c] sm:$0xf] %v380_v35  ;;  %383 = vst [vmem:[%s2179_s29 + $0x190] sm:$0xf] %v382_v36  ;;  %v384_v37 = vld [vmem:[%s2172_s28 + $0x328] sm:$0xf] }
  0x53   : > { %v386_v38 = vld [vmem:[%s2172_s28 + $0x330] sm:$0xf]  ;;  %v388_v39 = vld [vmem:[%s2172_s28 + $0x338] sm:$0xf]  ;;  %385 = vst [vmem:[%s2179_s29 + $0x194] sm:$0xf] %v384_v37 }
  0x54   : > { %387 = vst [vmem:[%s2179_s29 + $0x198] sm:$0xf] %v386_v38  ;;  %389 = vst [vmem:[%s2179_s29 + $0x19c] sm:$0xf] %v388_v39  ;;  %v390_v40 = vld [vmem:[%s2172_s28 + $0x340] sm:$0xf] }
  0x55   : > { %v392_v41 = vld [vmem:[%s2172_s28 + $0x348] sm:$0xf]  ;;  %v394_v42 = vld [vmem:[%s2172_s28 + $0x350] sm:$0xf]  ;;  %391 = vst [vmem:[%s2179_s29 + $0x1a0] sm:$0xf] %v390_v40 }
  0x56   : > { %393 = vst [vmem:[%s2179_s29 + $0x1a4] sm:$0xf] %v392_v41  ;;  %395 = vst [vmem:[%s2179_s29 + $0x1a8] sm:$0xf] %v394_v42  ;;  %v396_v43 = vld [vmem:[%s2172_s28 + $0x358] sm:$0xf] }
  0x57   : > { %v398_v44 = vld [vmem:[%s2172_s28 + $0x360] sm:$0xf]  ;;  %v400_v45 = vld [vmem:[%s2172_s28 + $0x368] sm:$0xf]  ;;  %397 = vst [vmem:[%s2179_s29 + $0x1ac] sm:$0xf] %v396_v43 }
  0x58   : > { %399 = vst [vmem:[%s2179_s29 + $0x1b0] sm:$0xf] %v398_v44  ;;  %401 = vst [vmem:[%s2179_s29 + $0x1b4] sm:$0xf] %v400_v45  ;;  %v402_v46 = vld [vmem:[%s2172_s28 + $0x370] sm:$0xf] }
  0x59   : > { %v404_v47 = vld [vmem:[%s2172_s28 + $0x378] sm:$0xf]  ;;  %v406_v48 = vld [vmem:[%s2172_s28 + $0x380] sm:$0xf]  ;;  %403 = vst [vmem:[%s2179_s29 + $0x1b8] sm:$0xf] %v402_v46 }
  0x5a   : > { %405 = vst [vmem:[%s2179_s29 + $0x1bc] sm:$0xf] %v404_v47  ;;  %407 = vst [vmem:[%s2179_s29 + $0x1c0] sm:$0xf] %v406_v48  ;;  %v408_v49 = vld [vmem:[%s2172_s28 + $0x388] sm:$0xf] }
  0x5b   : > { %v410_v50 = vld [vmem:[%s2172_s28 + $0x390] sm:$0xf]  ;;  %v412_v51 = vld [vmem:[%s2172_s28 + $0x398] sm:$0xf]  ;;  %409 = vst [vmem:[%s2179_s29 + $0x1c4] sm:$0xf] %v408_v49 }
  0x5c   : > { %411 = vst [vmem:[%s2179_s29 + $0x1c8] sm:$0xf] %v410_v50  ;;  %413 = vst [vmem:[%s2179_s29 + $0x1cc] sm:$0xf] %v412_v51  ;;  %v414_v52 = vld [vmem:[%s2172_s28 + $0x3a0] sm:$0xf] }
  0x5d   : > { %v416_v53 = vld [vmem:[%s2172_s28 + $0x3a8] sm:$0xf]  ;;  %v418_v54 = vld [vmem:[%s2172_s28 + $0x3b0] sm:$0xf]  ;;  %415 = vst [vmem:[%s2179_s29 + $0x1d0] sm:$0xf] %v414_v52 }
  0x5e   : > { %417 = vst [vmem:[%s2179_s29 + $0x1d4] sm:$0xf] %v416_v53  ;;  %419 = vst [vmem:[%s2179_s29 + $0x1d8] sm:$0xf] %v418_v54  ;;  %v420_v55 = vld [vmem:[%s2172_s28 + $0x3b8] sm:$0xf] }
  0x5f   : > { %v422_v56 = vld [vmem:[%s2172_s28 + $0x3c0] sm:$0xf]  ;;  %v424_v57 = vld [vmem:[%s2172_s28 + $0x3c8] sm:$0xf]  ;;  %421 = vst [vmem:[%s2179_s29 + $0x1dc] sm:$0xf] %v420_v55 }
  0x60   : > { %423 = vst [vmem:[%s2179_s29 + $0x1e0] sm:$0xf] %v422_v56  ;;  %425 = vst [vmem:[%s2179_s29 + $0x1e4] sm:$0xf] %v424_v57  ;;  %v426_v58 = vld [vmem:[%s2172_s28 + $0x3d0] sm:$0xf] }
  0x61   : > { %v428_v59 = vld [vmem:[%s2172_s28 + $0x3d8] sm:$0xf]  ;;  %v430_v60 = vld [vmem:[%s2172_s28 + $0x3e0] sm:$0xf]  ;;  %427 = vst [vmem:[%s2179_s29 + $0x1e8] sm:$0xf] %v426_v58 }
  0x62   : > { %429 = vst [vmem:[%s2179_s29 + $0x1ec] sm:$0xf] %v428_v59  ;;  %431 = vst [vmem:[%s2179_s29 + $0x1f0] sm:$0xf] %v430_v60  ;;  %v432_v61 = vld [vmem:[%s2172_s28 + $0x3e8] sm:$0xf] }
  0x63   : > { %v434_v62 = vld [vmem:[%s2172_s28 + $0x3f0] sm:$0xf]  ;;  %v436_v63 = vld [vmem:[%s2172_s28 + $0x3f8] sm:$0xf]  ;;  %433 = vst [vmem:[%s2179_s29 + $0x1f4] sm:$0xf] %v432_v61 }
  0x64   : > { %435 = vst [vmem:[%s2179_s29 + $0x1f8] sm:$0xf] %v434_v62  ;;  %437 = vst [vmem:[%s2179_s29 + $0x1fc] sm:$0xf] %v436_v63  ;;  %v438_v0 = vld [vmem:[%s2172_s28 + $0x400] sm:$0xf] }
  0x65   : > { %v440_v1 = vld [vmem:[%s2172_s28 + $0x408] sm:$0xf]  ;;  %v442_v2 = vld [vmem:[%s2172_s28 + $0x410] sm:$0xf]  ;;  %439 = vst [vmem:[%s2179_s29 + $0x200] sm:$0xf] %v438_v0 }
  0x66   : > { %441 = vst [vmem:[%s2179_s29 + $0x204] sm:$0xf] %v440_v1  ;;  %443 = vst [vmem:[%s2179_s29 + $0x208] sm:$0xf] %v442_v2  ;;  %v444_v3 = vld [vmem:[%s2172_s28 + $0x418] sm:$0xf] }
  0x67   : > { %v446_v4 = vld [vmem:[%s2172_s28 + $0x420] sm:$0xf]  ;;  %v448_v5 = vld [vmem:[%s2172_s28 + $0x428] sm:$0xf]  ;;  %445 = vst [vmem:[%s2179_s29 + $0x20c] sm:$0xf] %v444_v3 }
  0x68   : > { %447 = vst [vmem:[%s2179_s29 + $0x210] sm:$0xf] %v446_v4  ;;  %449 = vst [vmem:[%s2179_s29 + $0x214] sm:$0xf] %v448_v5  ;;  %v450_v6 = vld [vmem:[%s2172_s28 + $0x430] sm:$0xf] }
  0x69   : > { %v452_v7 = vld [vmem:[%s2172_s28 + $0x438] sm:$0xf]  ;;  %v454_v8 = vld [vmem:[%s2172_s28 + $0x440] sm:$0xf]  ;;  %451 = vst [vmem:[%s2179_s29 + $0x218] sm:$0xf] %v450_v6 }
  0x6a   : > { %453 = vst [vmem:[%s2179_s29 + $0x21c] sm:$0xf] %v452_v7  ;;  %455 = vst [vmem:[%s2179_s29 + $0x220] sm:$0xf] %v454_v8  ;;  %v456_v9 = vld [vmem:[%s2172_s28 + $0x448] sm:$0xf] }
  0x6b   : > { %v458_v10 = vld [vmem:[%s2172_s28 + $0x450] sm:$0xf]  ;;  %v460_v11 = vld [vmem:[%s2172_s28 + $0x458] sm:$0xf]  ;;  %457 = vst [vmem:[%s2179_s29 + $0x224] sm:$0xf] %v456_v9 }
  0x6c   : > { %459 = vst [vmem:[%s2179_s29 + $0x228] sm:$0xf] %v458_v10  ;;  %461 = vst [vmem:[%s2179_s29 + $0x22c] sm:$0xf] %v460_v11  ;;  %v462_v12 = vld [vmem:[%s2172_s28 + $0x460] sm:$0xf] }
  0x6d   : > { %v464_v13 = vld [vmem:[%s2172_s28 + $0x468] sm:$0xf]  ;;  %v466_v14 = vld [vmem:[%s2172_s28 + $0x470] sm:$0xf]  ;;  %463 = vst [vmem:[%s2179_s29 + $0x230] sm:$0xf] %v462_v12 }
  0x6e   : > { %465 = vst [vmem:[%s2179_s29 + $0x234] sm:$0xf] %v464_v13  ;;  %467 = vst [vmem:[%s2179_s29 + $0x238] sm:$0xf] %v466_v14  ;;  %v468_v15 = vld [vmem:[%s2172_s28 + $0x478] sm:$0xf] }
  0x6f   : > { %469 = vst [vmem:[%s2179_s29 + $0x23c] sm:$0xf] %v468_v15 }
  0x70 PF: > { %p1774_p5 = scmp.ge.s32.totalorder %s2109_s17, 1  ;;  %p792_p6 = scmp.lt.s32.totalorder %s2109_s17, 3 }
  0x72   : > { %p793_p7 = pnand %p1774_p5, %p792_p6 }
  0x73   : > { %s799_s30 = sand.u32 (!%p793_p7), 1, %s2101_s15   ;;  %p829_p8 = scmp.lt.s32.totalorder (!%p793_p7), %s1769_s18, 1 }
  0x74   : > { %796 = sbr.rel (%p793_p7) target bundleno = 464 (0x1d0), region = 73 }
  0x75   : > { %s1977_s9 = smul.u32 (!%p793_p7), 576, %s799_s30 }
  0x77   : > { %s2481_s10 = scalar_lea.vmem (!%p793_p7), [#allocation2], %s1977_s9 }
  0x79   : > { %v2470_v16 = vld [vmem:[%s2603_s0] sm:$0xff]  ;;  %v2475_v17 = vld [vmem:[%s2603_s0 + $0x8] sm:$0xff]  ;;  %v2004_v20 = vld [vmem:[%s2481_s10 + $0x78] sm:$0xff]   ;;  %vm2112_vm0 = vmmov 0   ;;  %s2612_s18 = smov (!%p829_p8, %s1769_s18), 1 }
  0x7a   : > { %v1777_v18 = vcombine.high %v2470_v16, %v2470_v16  ;;  %v1779_v19 = vcombine.high %v2475_v17, %v2475_v17  ;;  %v2005_v21 = vld [vmem:[%s2481_s10 + $0xf8] sm:$0xff]   ;;  %1859 = vmatprep.subr.bf16.mxu0 %v2004_v20  ;;  %v2008_v24 = vld [vmem:[%s2481_s10 + $0x70] sm:$0xff]   ;;  %v2012_v28 = vld [vmem:[%s2481_s10 + $0x68] sm:$0xff]   ;;  %v1776_v54 = vcombine.low %v2470_v16, %v2470_v16  ;;  %v1778_v55 = vcombine.low %v2475_v17, %v2475_v17  ;;  %s831_s24 = scalar_lea.vmem %s2605_s2, %s2612_s18  ;;  %s834_s27 = scalar_lea.vmem %s2606_s3, %s2612_s18 }
  0x7b   : > { %v2006_v22 = vld [vmem:[%s2481_s10 + $0x38] sm:$0xff]   ;;  %1881 = vmatprep.subr.bf16.mxu1 %v2005_v21  ;;  %v2009_v25 = vld [vmem:[%s2481_s10 + $0xf0] sm:$0xff]   ;;  %v2013_v29 = vld [vmem:[%s2481_s10 + $0xe8] sm:$0xff]   ;;  %s1775_s17 = sshll.u32 %s2612_s18, 3 }
  0x7c   : > { %1485 = vmatprep.mubr.bf16.mxu0 %v1777_v18  ;;  %1525 = vmatprep.mubr.bf16.mxu1 %v1779_v19  ;;  %v2007_v23 = vld [vmem:[%s2481_s10 + $0xb8] sm:$0xff]   ;;  %v2010_v26 = vld [vmem:[%s2481_s10 + $0x30] sm:$0xff]   ;;  %v2014_v30 = vld [vmem:[%s2481_s10 + $0x28] sm:$0xff]   ;;  %s838_s30 = scalar_lea.vmem %s2607_s4, %s1775_s17 }
  0x7d   : > { %1860 = vmatpush3.bf16.msra.mxu0 %v2006_v22  ;;  %1882 = vmatpush3.bf16.msra.mxu1 %v2007_v23  ;;  %v2011_v27 = vld [vmem:[%s2481_s10 + $0xb0] sm:$0xff]   ;;  %v2015_v31 = vld [vmem:[%s2481_s10 + $0xa8] sm:$0xff]   ;;  %v2016_v32 = vld [vmem:[%s2481_s10 + $0x60] sm:$0xff]  }
  0x7e   : > { %1861 = vmatprep.subr.bf16.mxu0 %v2008_v24  ;;  %1883 = vmatprep.subr.bf16.mxu1 %v2009_v25  ;;  %v2017_v33 = vld [vmem:[%s2481_s10 + $0xe0] sm:$0xff]   ;;  %v2020_v36 = vld [vmem:[%s2481_s10 + $0x58] sm:$0xff]   ;;  %v2024_v40 = vld [vmem:[%s2481_s10 + $0x50] sm:$0xff]  }
  0x7f   : > { %v2018_v34 = vld [vmem:[%s2481_s10 + $0x20] sm:$0xff]   ;;  %v2021_v37 = vld [vmem:[%s2481_s10 + $0xd8] sm:$0xff]   ;;  %v2025_v41 = vld [vmem:[%s2481_s10 + $0xd0] sm:$0xff]  }
  0x80   : > { %v2019_v35 = vld [vmem:[%s2481_s10 + $0xa0] sm:$0xff]   ;;  %v2022_v38 = vld [vmem:[%s2481_s10 + $0x18] sm:$0xff]   ;;  %v2026_v42 = vld [vmem:[%s2481_s10 + $0x10] sm:$0xff]  }
  0x81   : > { %1862 = vmatpush3.bf16.msra.mxu0 %v2010_v26  ;;  %1884 = vmatpush3.bf16.msra.mxu1 %v2011_v27  ;;  %v2023_v39 = vld [vmem:[%s2481_s10 + $0x98] sm:$0xff]   ;;  %v2027_v43 = vld [vmem:[%s2481_s10 + $0x90] sm:$0xff]   ;;  %v2028_v44 = vld [vmem:[%s2481_s10 + $0x48] sm:$0xff]  }
  0x82   : > { %1863 = vmatprep.subr.bf16.mxu0 %v2012_v28  ;;  %1885 = vmatprep.subr.bf16.mxu1 %v2013_v29  ;;  %v2029_v45 = vld [vmem:[%s2481_s10 + $0xc8] sm:$0xff]   ;;  %v2032_v48 = vld [vmem:[%s2481_s10 + $0x40] sm:$0xff]   ;;  %v2515_v49 = vld [vmem:[%s2603_s0 + $0x10] sm:$0xff]  ;;  %v2111_v28 = vmov 0.0  }
  0x83   : > { %v2030_v46 = vld [vmem:[%s2481_s10 + $0x8] sm:$0xff]   ;;  %v2033_v50 = vld [vmem:[%s2481_s10 + $0xc0] sm:$0xff]   ;;  %v2522_v52 = vld [vmem:[%s2603_s0 + $0x18] sm:$0xff]  ;;  %v1781_v58 = vcombine.high %v2515_v49, %v2515_v49  ;;  %v1780_v25 = vcombine.low %v2515_v49, %v2515_v49 }
  0x84   : > { %v2031_v47 = vld [vmem:[%s2481_s10 + $0x88] sm:$0xff]   ;;  %v2034_v51 = vld [vmem:[%s2481_s10] sm:$0xff]   ;;  %v2040_v56 = vld [vmem:[%s2481_s10 + $0x178] sm:$0xff]   ;;  %v1783_v61 = vcombine.high %v2522_v52, %v2522_v52  ;;  %v1782_v29 = vcombine.low %v2522_v52, %v2522_v52 }
  0x85   : > { %1864 = vmatpush3.bf16.msra.mxu0 %v2014_v30  ;;  %1886 = vmatpush3.bf16.msra.mxu1 %v2015_v31  ;;  %v2035_v53 = vld [vmem:[%s2481_s10 + $0x80] sm:$0xff]   ;;  %v2041_v57 = vld [vmem:[%s2481_s10 + $0x138] sm:$0xff]   ;;  %v2044_v62 = vld [vmem:[%s2481_s10 + $0x170] sm:$0xff]  }
  0x86   : > { %1865 = vmatprep.subr.bf16.mxu0 %v2016_v32  ;;  %1887 = vmatprep.subr.bf16.mxu1 %v2017_v33  ;;  %v2042_v59 = vld [vmem:[%s2481_s10 + $0x1f8] sm:$0xff]   ;;  %v2045_v63 = vld [vmem:[%s2481_s10 + $0x130] sm:$0xff]   ;;  %v2048_v2 = vld [vmem:[%s2481_s10 + $0x168] sm:$0xff]  }
  0x87   : > { %v2043_v60 = vld [vmem:[%s2481_s10 + $0x1b8] sm:$0xff]   ;;  %v2046_v0 = vld [vmem:[%s2481_s10 + $0x1f0] sm:$0xff]   ;;  %v2049_v3 = vld [vmem:[%s2481_s10 + $0x128] sm:$0xff]  }
  0x88   : > { %v2047_v1 = vld [vmem:[%s2481_s10 + $0x1b0] sm:$0xff]   ;;  %v2050_v4 = vld [vmem:[%s2481_s10 + $0x1e8] sm:$0xff]   ;;  %v2052_v6 = vld [vmem:[%s2481_s10 + $0x160] sm:$0xff]  }
  0x89   : > { %1866 = vmatpush3.bf16.msra.mxu0 %v2018_v34  ;;  %1888 = vmatpush3.bf16.msra.mxu1 %v2019_v35  ;;  %v2051_v5 = vld [vmem:[%s2481_s10 + $0x1a8] sm:$0xff]   ;;  %v2053_v7 = vld [vmem:[%s2481_s10 + $0x120] sm:$0xff]   ;;  %v2056_v10 = vld [vmem:[%s2481_s10 + $0x158] sm:$0xff]  }
  0x8a   : > { %1867 = vmatprep.subr.bf16.mxu0 %v2020_v36  ;;  %1889 = vmatprep.subr.bf16.mxu1 %v2021_v37  ;;  %v2054_v8 = vld [vmem:[%s2481_s10 + $0x1e0] sm:$0xff]   ;;  %v2057_v11 = vld [vmem:[%s2481_s10 + $0x118] sm:$0xff]   ;;  %v2060_v14 = vld [vmem:[%s2481_s10 + $0x150] sm:$0xff]  }
  0x8b   : > { %v2055_v9 = vld [vmem:[%s2481_s10 + $0x1a0] sm:$0xff]   ;;  %v2058_v12 = vld [vmem:[%s2481_s10 + $0x1d8] sm:$0xff]   ;;  %v2061_v15 = vld [vmem:[%s2481_s10 + $0x110] sm:$0xff]  }
  0x8c   : > { %v2059_v13 = vld [vmem:[%s2481_s10 + $0x198] sm:$0xff]   ;;  %v2062_v16 = vld [vmem:[%s2481_s10 + $0x1d0] sm:$0xff]   ;;  %v2064_v18 = vld [vmem:[%s2481_s10 + $0x148] sm:$0xff]  }
  0x8d   : > { %1868 = vmatpush3.bf16.msra.mxu0 %v2022_v38  ;;  %1890 = vmatpush3.bf16.msra.mxu1 %v2023_v39  ;;  %v2063_v17 = vld [vmem:[%s2481_s10 + $0x190] sm:$0xff]   ;;  %v2065_v19 = vld [vmem:[%s2481_s10 + $0x108] sm:$0xff]   ;;  %v2068_v22 = vld [vmem:[%s2481_s10 + $0x140] sm:$0xff]  }
  0x8e   : > { %1869 = vmatprep.subr.bf16.mxu0 %v2024_v40  ;;  %1891 = vmatprep.subr.bf16.mxu1 %v2025_v41  ;;  %v2066_v20 = vld [vmem:[%s2481_s10 + $0x1c8] sm:$0xff]   ;;  %v2069_v23 = vld [vmem:[%s2481_s10 + $0x100] sm:$0xff]   ;;  %v2076_v27 = vld [vmem:[%s2481_s10 + $0x238] sm:$0xff]  }
  0x8f   : > { %v2067_v21 = vld [vmem:[%s2481_s10 + $0x188] sm:$0xff]   ;;  %v2070_v24 = vld [vmem:[%s2481_s10 + $0x1c0] sm:$0xff]   ;;  %v2077_v30 = vld [vmem:[%s2481_s10 + $0x230] sm:$0xff]  }
  0x90   : > { %v2073_v26 = vld [vmem:[%s2481_s10 + $0x180] sm:$0xff]   ;;  %v2078_v31 = vld [vmem:[%s2481_s10 + $0x228] sm:$0xff]   ;;  %v2080_v33 = vld [vmem:[%s2481_s10 + $0x218] sm:$0xff]  }
  0x91   : > { %1870 = vmatpush3.bf16.msra.mxu0 %v2026_v42  ;;  %1892 = vmatpush3.bf16.msra.mxu1 %v2027_v43  ;;  %v2079_v32 = vld [vmem:[%s2481_s10 + $0x220] sm:$0xff]   ;;  %v2081_v34 = vld [vmem:[%s2481_s10 + $0x210] sm:$0xff]   ;;  %v2082_v35 = vld [vmem:[%s2481_s10 + $0x208] sm:$0xff]  }
  0x92   : > { %1871 = vmatprep.subr.bf16.mxu0 %v2028_v44  ;;  %1893 = vmatprep.subr.bf16.mxu1 %v2029_v45  ;;  %v2083_v36 = vld [vmem:[%s2481_s10 + $0x200] sm:$0xff]  }
  0x93   : > { %v2084_v37 = vld [vmem:[%s2603_s0 + $0x20] ss:$0 sps:$4 sm:$0xff]  }
  0x95   : > { %1872 = vmatpush3.bf16.msra.mxu0 %v2030_v46  ;;  %1894 = vmatpush3.bf16.msra.mxu1 %v2031_v47 }
  0x96   : > { %1873 = vmatprep.subr.bf16.mxu0 %v2032_v48  ;;  %1895 = vmatprep.subr.bf16.mxu1 %v2033_v50 }
  0x99   : > { %1874 = vmatpush3.bf16.msra.mxu0 %v2034_v51  ;;  %1896 = vmatpush3.bf16.msra.mxu1 %v2035_v53 }
  0x9a   : > { %1903 = vmatprep.subr.bf16.mxu0 %v2040_v56  ;;  %1925 = vmatprep.subr.bf16.mxu1 %v2042_v59 }
  0x9c   : > { %1486 = vmatmul.mubr.bf16.vlgmr.msra.gmra.mxu0 %v1776_v54  ;;  %1526 = vmatmul.mubr.bf16.vlgmr.msra.gmra.mxu1 %v1778_v55 }
  0x9d   : > { %1904 = vmatpush3.bf16.msra.mxu0 %v2041_v57  ;;  %1565 = vmatprep.mubr.bf16.mxu0 %v1781_v58 }
  0x9e   : > { %1926 = vmatpush3.bf16.msra.mxu1 %v2043_v60  ;;  %1905 = vmatprep.subr.bf16.mxu0 %v2044_v62 }
  0x9f   : > { %1605 = vmatprep.mubr.bf16.mxu1 %v1783_v61  ;;  %1927 = vmatprep.subr.bf16.mxu1 %v2046_v0 }
  0xa1   : > { %1906 = vmatpush3.bf16.msra.mxu0 %v2045_v63 }
  0xa2   : > { %1928 = vmatpush3.bf16.msra.mxu1 %v2047_v1  ;;  %1907 = vmatprep.subr.bf16.mxu0 %v2048_v2 }
  0xa3   : > { %1929 = vmatprep.subr.bf16.mxu1 %v2050_v4 }
  0xa5   : > { %1908 = vmatpush3.bf16.msra.mxu0 %v2049_v3 }
  0xa6   : > { %1930 = vmatpush3.bf16.msra.mxu1 %v2051_v5  ;;  %1909 = vmatprep.subr.bf16.mxu0 %v2052_v6 }
  0xa7   : > { %1931 = vmatprep.subr.bf16.mxu1 %v2054_v8 }
  0xa9   : > { %1910 = vmatpush3.bf16.msra.mxu0 %v2053_v7 }
  0xaa   : > { %1932 = vmatpush3.bf16.msra.mxu1 %v2055_v9  ;;  %1911 = vmatprep.subr.bf16.mxu0 %v2056_v10 }
  0xab   : > { %1933 = vmatprep.subr.bf16.mxu1 %v2058_v12 }
  0xad   : > { %1912 = vmatpush3.bf16.msra.mxu0 %v2057_v11 }
  0xae   : > { %1934 = vmatpush3.bf16.msra.mxu1 %v2059_v13  ;;  %1913 = vmatprep.subr.bf16.mxu0 %v2060_v14 }
  0xaf   : > { %1935 = vmatprep.subr.bf16.mxu1 %v2062_v16 }
  0xb1   : > { %1914 = vmatpush3.bf16.msra.mxu0 %v2061_v15 }
  0xb2   : > { %1936 = vmatpush3.bf16.msra.mxu1 %v2063_v17  ;;  %1915 = vmatprep.subr.bf16.mxu0 %v2064_v18 }
  0xb3   : > { %1937 = vmatprep.subr.bf16.mxu1 %v2066_v20 }
  0xb5   : > { %1916 = vmatpush3.bf16.msra.mxu0 %v2065_v19 }
  0xb6   : > { %1938 = vmatpush3.bf16.msra.mxu1 %v2067_v21  ;;  %1917 = vmatprep.subr.bf16.mxu0 %v2068_v22  ;;  %v1678_v21 = vlaneseq }
  0xb7   : > { %1939 = vmatprep.subr.bf16.mxu1 %v2070_v24 }
  0xb8   : > { %v1679_v22 = vshrl.u32 %v1678_v21, 7 }
  0xb9   : > { %1918 = vmatpush3.bf16.msra.mxu0 %v2069_v23  ;;  %v1673_v23 = vld [vmem:[%s831_s24] sm:$0x1] }
  0xba   : > { %1956 = vmatprep.subr.bf16.mxu0 %v2111_v28  ;;  %1940 = vmatpush3.bf16.msra.mxu1 %v2073_v26  ;;  %v1680_v24 = vsub.s32 0, %v1679_v22 }
  0xbc   : > { %1566 = vmatmul.mubr.bf16.vlgmr.msra.gmra.mxu0 %v1780_v25 }
  0xbd   : > { %1957 = vmatpush3.bf16.msra.mxu0 %v2076_v27  ;;  %1972 = vmatprep.mubr.msk.bf16.mxu0 %vm2112_vm0, %v2111_v28  ;;  %v1675_v27 = vld [vmem:[%s834_s27] sm:$0x1] }
  0xbe   : > { %1606 = vmatmul.mubr.bf16.vlgmr.msra.gmra.mxu1 %v1782_v29  ;;  %1958 = vmatprep.subr.bf16.mxu0 %v2111_v28 }
  0xc1   : > { %1959 = vmatpush3.bf16.msra.mxu0 %v2077_v30 }
  0xc2   : > { %1960 = vmatprep.subr.bf16.mxu0 %v2111_v28 }
  0xc5   : > { %1961 = vmatpush3.bf16.msra.mxu0 %v2078_v31 }
  0xc6   : > { %1962 = vmatprep.subr.bf16.mxu0 %v2111_v28 }
  0xc9   : > { %1963 = vmatpush3.bf16.msra.mxu0 %v2079_v32 }
  0xca   : > { %1964 = vmatprep.subr.bf16.mxu0 %v2111_v28 }
  0xcd   : > { %1965 = vmatpush3.bf16.msra.mxu0 %v2080_v33 }
  0xce   : > { %1966 = vmatprep.subr.bf16.mxu0 %v2111_v28 }
  0xd1   : > { %1967 = vmatpush3.bf16.msra.mxu0 %v2081_v34 }
  0xd2   : > { %1968 = vmatprep.subr.bf16.mxu0 %v2111_v28 }
  0xd5   : > { %1969 = vmatpush3.bf16.msra.mxu0 %v2082_v35 }
  0xd6   : > { %1970 = vmatprep.subr.bf16.mxu0 %v2111_v28 }
  0xd9   : > { %1971 = vmatpush3.bf16.msra.mxu0 %v2083_v36 }
  0xdc   : > { %1973 = vmatmul.mubr.bf16.vlgmr.msra.gmra.mxu0 %v2084_v37 }
 0x15c   : > { %v1875_v38 = vpop.f32.mrf.mxu0  ;;  %v1897_v39 = vpop.f32.mrf.mxu1 }
 0x15e   : > { %v1876_v40 = vpop.f32.mrf.mxu0  ;;  %v1898_v41 = vpop.f32.mrf.mxu1 }
 0x15f   : > { %v1877_v54 = vadd.f32 %v1876_v40, %v1875_v38  ;;  %v1899_v55 = vadd.f32 %v1898_v41, %v1897_v39 }
 0x160   : > { %v1878_v42 = vpop.f32.mrf.mxu0  ;;  %v1900_v43 = vpop.f32.mrf.mxu1 }
 0x161   : > { %v1528_v57 = vadd.f32 %v1899_v55, %v1877_v54 }
 0x162   : > { %v1879_v44 = vpop.f32.mrf.mxu0  ;;  %v1901_v45 = vpop.f32.mrf.mxu1 }
 0x17c   : > { %v1919_v46 = vpop.f32.mrf.mxu0 }
 0x17e   : > { %v1920_v47 = vpop.f32.mrf.mxu0  ;;  %v1941_v48 = vpop.f32.mrf.mxu1 }
 0x17f   : > { %v1921_v56 = vadd.f32 %v1920_v47, %v1919_v46 }
 0x180   : > { %v1922_v49 = vpop.f32.mrf.mxu0  ;;  %v1942_v50 = vpop.f32.mrf.mxu1 }
 0x181   : > { %v1568_v58 = vadd.f32 %v1921_v56, %v1528_v57  ;;  %v1943_v59 = vadd.f32 %v1942_v50, %v1941_v48 }
 0x182   : > { %v1923_v51 = vpop.f32.mrf.mxu0  ;;  %v1944_v52 = vpop.f32.mrf.mxu1 }
 0x183   : > { %v1608_v60 = vadd.f32 %v1943_v59, %v1568_v58 }
 0x184   : > { %v1945_v53 = vpop.f32.mrf.mxu1 }
 0x19c   : > { %v1647_v61 = vpop.f32.mrf.mxu0 }
 0x19d   : > { %v1648_v62 = vadd.f32 %v1647_v61, %v1608_v60 }
 0x19e   : > { %v1974_v63 = vpop.f32.mrf.mxu0 }
 0x19f   : > { %v1653_v0 = vrot.slane %v1648_v62, 4  ;;  %v1659_v1 = vmul.f32 %v1648_v62, %v1648_v62 }
 0x1a0   : > { %v1650_v2 = vpop.f32.mrf.mxu0 }
 0x1a1   : > { %v1654_v3 = vadd.f32 %v1653_v0, %v1648_v62  ;;  %v1660_v4 = vrot.slane %v1659_v1, 4 }
 0x1a2   : > { %v1975_v5 = vpop.f32.mrf.mxu0 }
 0x1a3   : > { %v1655_v6 = vrot.slane %v1654_v3, 2  ;;  %v1661_v7 = vadd.f32 %v1660_v4, %v1659_v1 }
 0x1a5   : > { %v1656_v8 = vadd.f32 %v1655_v6, %v1654_v3  ;;  %v1662_v9 = vrot.slane %v1661_v7, 2 }
 0x1a7   : > { %v1657_v10 = vrot.slane %v1656_v8, 1  ;;  %v1663_v11 = vadd.f32 %v1662_v9, %v1661_v7 }
 0x1a9   : > { %v1658_v12 = vadd.f32 %v1657_v10, %v1656_v8  ;;  %v1664_v13 = vrot.slane %v1663_v11, 1 }
 0x1ab   : > { %v1665_v14 = vadd.f32 %v1664_v13, %v1663_v11  ;;  %v1666_v15 = vmul.f32 0.125, %v1658_v12 }
 0x1ad   : > { %v1667_v16 = vmul.f32 0.125, %v1665_v14  ;;  %v1668_v17 = vmul.f32 %v1666_v15, %v1666_v15 }
 0x1af   : > { %v1669_v18 = vsub.f32 %v1667_v16, %v1668_v17 }
 0x1b1   : > { %v1670_v19 = vmax.f32 %v1669_v18, 0.0 }
 0x1b3   : > { %v1671_v20 = vadd.f32 1e-05, %v1670_v19 }
 0x1b5   : > { %2085 = vrsqrt.f32 %v1671_v20 }
 0x1c2   : > { %v2086_v25 = vpop.eup %2085 }
 0x1c3   : > { %v1674_v26 = vmul.f32 %v2086_v25, %v1673_v23 }
 0x1c5   : > { %v1676_v28 = vmul.f32 %v1674_v26, %v1666_v15  ;;  %v1681_v29 = vrot.slane %v1674_v26, %v1680_v24 }
 0x1c7   : > { %v1677_v30 = vsub.f32 %v1675_v27, %v1676_v28  ;;  %v1682_v31 = vmul.f32 %v1681_v29, %v1648_v62 }
 0x1c9   : > { %v1687_v32 = vrot.slane %v1677_v30, %v1680_v24 }
 0x1cb   : > { %v1689_v33 = vadd.f32 %v1687_v32, %v1682_v31 }
 0x1cd   : > { %v1690_v34 = vmax.f32 %v1689_v33, 0.0 }
 0x1cf   : > { %1691 = vst [vmem:[%s838_s30] sm:$0xff] %v1690_v34 }
 0x1d0 PF: > { %p11_p9 = scmp.ge.s32.totalorder %s2155_s19, 4   ;;  %s2608_s15 = smov %s2105_s16 }
 0x1d1   : > { %s2609_s16 = smov %s2164_s22  ;;  %s2610_s17 = smov %s2155_s19 }
 0x1d2   :  { %13 = sbr.rel (!%p11_p9) target bundleno = 2 (0x2), region = 118 }

// kernel: resnet_forward.30
= control target key start
LH: loop header
LB: loop body
LE: loop exit
PB: predicated region body
PF: predicated region fallthrough
CT: control target
= control target key end

     0   :  { %s3724_s15 = smov 0   ;;  %s3726_s16 = smov 0   ;;  %s4573_s0 = inlined_call_operand.vmem [shape: bf16[8,2304], index: 0, kind: input, shape index: {}]   ;;  %s4574_s1 = inlined_call_operand.vmem [shape: bf16[2304,256], index: 1, kind: input, shape index: {}]   ;;  %s4575_s2 = inlined_call_operand.vmem [shape: f32[1,256], index: 2, kind: input, shape index: {}]   ;;  %s4576_s3 = inlined_call_operand.vmem [shape: f32[1,256], index: 3, kind: input, shape index: {}]   ;;  %s4577_s4 = inlined_call_operand.vmem [shape: f32[8,256], index: 4, kind: output, shape index: {}]  }
   0x1   :  { %s3728_s17 = smov 0  }
   0x2 LB: > { %s3116_s18 = sadd.s32 4294967295, %s3697_s17   ;;  %s3741_s19 = sadd.s32 1, %s3697_s17   ;;  %s3697_s17 = sphi %s3728_s17, %s4580_s17   ;;  %s3693_s16 = sphi %s3726_s16, %s4579_s16   ;;  %s3689_s15 = sphi %s3724_s15, %s4578_s15  }
   0x3   : > { %s39_s20 = ssub.s32 %s3697_s17, %s3741_s19  ;;  %s42_s21 = sadd.s32 1, %s3693_s16 }
   0x4   : > { %p40_p0 = scmp.eq.s32.totalorder %s39_s20, 0  ;;  %p49_p1 = scmp.ne.s32.totalorder %s3693_s16, %s3689_s15 }
   0x5   : > { %p50_p2 = scmp.eq.s32.totalorder %s3697_s17, 0  ;;  %p3119_p4 = scmp.ge.s32.totalorder %s3697_s17, 2 }
   0x6   : > { %s3750_s22 = scalar_select %p40_p0, %s3693_s16, %s42_s21  }
   0x7   : > { %p51_p3 = por %p50_p2, %p49_p1  ;;  %156 = sbr.rel (%p3119_p4) target bundleno = 208 (0xd0), region = 20 }
   0xc   : > { %159 = sbr.rel (!%p51_p3) target bundleno = 208 (0xd0), region = 24  ;;  %s161_s23 = sand.u32 (%p51_p3), 1, %s3693_s16  }
   0xd   : > { %s3120_s24 = sshll.u32 (%p51_p3), %s3697_s17, 2  ;;  %s3485_s25 = smul.u32 (%p51_p3), 1152, %s161_s23 }
   0xe   : > { %s3758_s28 = scalar_lea.vmem (%p51_p3), %s4574_s1, %s3120_s24 }
   0xf   : > { %v182_v0 = vld [vmem:[%s3758_s28] sm:$0xf] (%p51_p3)  ;;  %v184_v1 = vld [vmem:[%s3758_s28 + $0x8] sm:$0xf] (%p51_p3)  ;;  %v186_v2 = vld [vmem:[%s3758_s28 + $0x10] sm:$0xf] (%p51_p3) }
  0x10   : > { %v188_v3 = vld [vmem:[%s3758_s28 + $0x18] sm:$0xf] (%p51_p3)  ;;  %v190_v4 = vld [vmem:[%s3758_s28 + $0x20] sm:$0xf] (%p51_p3)  ;;  %s3765_s29 = scalar_lea.vmem (%p51_p3), [#allocation2], %s3485_s25 }
  0x11   : > { %183 = vst [vmem:[%s3765_s29] sm:$0xf] %v182_v0  ;;  %185 = vst [vmem:[%s3765_s29 + $0x4] sm:$0xf] %v184_v1  ;;  %v192_v5 = vld [vmem:[%s3758_s28 + $0x28] sm:$0xf] }
  0x12   : > { %187 = vst [vmem:[%s3765_s29 + $0x8] sm:$0xf] %v186_v2  ;;  %189 = vst [vmem:[%s3765_s29 + $0xc] sm:$0xf] %v188_v3  ;;  %v194_v6 = vld [vmem:[%s3758_s28 + $0x30] sm:$0xf] }
  0x13   : > { %191 = vst [vmem:[%s3765_s29 + $0x10] sm:$0xf] %v190_v4  ;;  %v196_v7 = vld [vmem:[%s3758_s28 + $0x38] sm:$0xf]  ;;  %193 = vst [vmem:[%s3765_s29 + $0x14] sm:$0xf] %v192_v5 }
  0x14   : > { %195 = vst [vmem:[%s3765_s29 + $0x18] sm:$0xf] %v194_v6  ;;  %197 = vst [vmem:[%s3765_s29 + $0x1c] sm:$0xf] %v196_v7  ;;  %v198_v8 = vld [vmem:[%s3758_s28 + $0x40] sm:$0xf] }
  0x15   : > { %v200_v9 = vld [vmem:[%s3758_s28 + $0x48] sm:$0xf]  ;;  %v202_v10 = vld [vmem:[%s3758_s28 + $0x50] sm:$0xf]  ;;  %199 = vst [vmem:[%s3765_s29 + $0x20] sm:$0xf] %v198_v8 }
  0x16   : > { %201 = vst [vmem:[%s3765_s29 + $0x24] sm:$0xf] %v200_v9  ;;  %203 = vst [vmem:[%s3765_s29 + $0x28] sm:$0xf] %v202_v10  ;;  %v204_v11 = vld [vmem:[%s3758_s28 + $0x58] sm:$0xf] }
  0x17   : > { %v206_v12 = vld [vmem:[%s3758_s28 + $0x60] sm:$0xf]  ;;  %v208_v13 = vld [vmem:[%s3758_s28 + $0x68] sm:$0xf]  ;;  %205 = vst [vmem:[%s3765_s29 + $0x2c] sm:$0xf] %v204_v11 }
  0x18   : > { %207 = vst [vmem:[%s3765_s29 + $0x30] sm:$0xf] %v206_v12  ;;  %209 = vst [vmem:[%s3765_s29 + $0x34] sm:$0xf] %v208_v13  ;;  %v210_v14 = vld [vmem:[%s3758_s28 + $0x70] sm:$0xf] }
  0x19   : > { %v212_v15 = vld [vmem:[%s3758_s28 + $0x78] sm:$0xf]  ;;  %v214_v16 = vld [vmem:[%s3758_s28 + $0x80] sm:$0xf]  ;;  %211 = vst [vmem:[%s3765_s29 + $0x38] sm:$0xf] %v210_v14 }
  0x1a   : > { %213 = vst [vmem:[%s3765_s29 + $0x3c] sm:$0xf] %v212_v15  ;;  %215 = vst [vmem:[%s3765_s29 + $0x40] sm:$0xf] %v214_v16  ;;  %v216_v17 = vld [vmem:[%s3758_s28 + $0x88] sm:$0xf] }
  0x1b   : > { %v218_v18 = vld [vmem:[%s3758_s28 + $0x90] sm:$0xf]  ;;  %v220_v19 = vld [vmem:[%s3758_s28 + $0x98] sm:$0xf]  ;;  %217 = vst [vmem:[%s3765_s29 + $0x44] sm:$0xf] %v216_v17 }
  0x1c   : > { %219 = vst [vmem:[%s3765_s29 + $0x48] sm:$0xf] %v218_v18  ;;  %221 = vst [vmem:[%s3765_s29 + $0x4c] sm:$0xf] %v220_v19  ;;  %v222_v20 = vld [vmem:[%s3758_s28 + $0xa0] sm:$0xf] }
  0x1d   : > { %v224_v21 = vld [vmem:[%s3758_s28 + $0xa8] sm:$0xf]  ;;  %v226_v22 = vld [vmem:[%s3758_s28 + $0xb0] sm:$0xf]  ;;  %223 = vst [vmem:[%s3765_s29 + $0x50] sm:$0xf] %v222_v20 }
  0x1e   : > { %225 = vst [vmem:[%s3765_s29 + $0x54] sm:$0xf] %v224_v21  ;;  %227 = vst [vmem:[%s3765_s29 + $0x58] sm:$0xf] %v226_v22  ;;  %v228_v23 = vld [vmem:[%s3758_s28 + $0xb8] sm:$0xf] }
  0x1f   : > { %v230_v24 = vld [vmem:[%s3758_s28 + $0xc0] sm:$0xf]  ;;  %v232_v25 = vld [vmem:[%s3758_s28 + $0xc8] sm:$0xf]  ;;  %229 = vst [vmem:[%s3765_s29 + $0x5c] sm:$0xf] %v228_v23 }
  0x20   : > { %231 = vst [vmem:[%s3765_s29 + $0x60] sm:$0xf] %v230_v24  ;;  %233 = vst [vmem:[%s3765_s29 + $0x64] sm:$0xf] %v232_v25  ;;  %v234_v26 = vld [vmem:[%s3758_s28 + $0xd0] sm:$0xf] }
  0x21   : > { %v236_v27 = vld [vmem:[%s3758_s28 + $0xd8] sm:$0xf]  ;;  %v238_v28 = vld [vmem:[%s3758_s28 + $0xe0] sm:$0xf]  ;;  %235 = vst [vmem:[%s3765_s29 + $0x68] sm:$0xf] %v234_v26 }
  0x22   : > { %237 = vst [vmem:[%s3765_s29 + $0x6c] sm:$0xf] %v236_v27  ;;  %239 = vst [vmem:[%s3765_s29 + $0x70] sm:$0xf] %v238_v28  ;;  %v240_v29 = vld [vmem:[%s3758_s28 + $0xe8] sm:$0xf] }
  0x23   : > { %v242_v30 = vld [vmem:[%s3758_s28 + $0xf0] sm:$0xf]  ;;  %v244_v31 = vld [vmem:[%s3758_s28 + $0xf8] sm:$0xf]  ;;  %241 = vst [vmem:[%s3765_s29 + $0x74] sm:$0xf] %v240_v29 }
  0x24   : > { %243 = vst [vmem:[%s3765_s29 + $0x78] sm:$0xf] %v242_v30  ;;  %245 = vst [vmem:[%s3765_s29 + $0x7c] sm:$0xf] %v244_v31  ;;  %v246_v32 = vld [vmem:[%s3758_s28 + $0x100] sm:$0xf] }
  0x25   : > { %v248_v33 = vld [vmem:[%s3758_s28 + $0x108] sm:$0xf]  ;;  %v250_v34 = vld [vmem:[%s3758_s28 + $0x110] sm:$0xf]  ;;  %247 = vst [vmem:[%s3765_s29 + $0x80] sm:$0xf] %v246_v32 }
  0x26   : > { %249 = vst [vmem:[%s3765_s29 + $0x84] sm:$0xf] %v248_v33  ;;  %251 = vst [vmem:[%s3765_s29 + $0x88] sm:$0xf] %v250_v34  ;;  %v252_v35 = vld [vmem:[%s3758_s28 + $0x118] sm:$0xf] }
  0x27   : > { %v254_v36 = vld [vmem:[%s3758_s28 + $0x120] sm:$0xf]  ;;  %v256_v37 = vld [vmem:[%s3758_s28 + $0x128] sm:$0xf]  ;;  %253 = vst [vmem:[%s3765_s29 + $0x8c] sm:$0xf] %v252_v35 }
  0x28   : > { %255 = vst [vmem:[%s3765_s29 + $0x90] sm:$0xf] %v254_v36  ;;  %257 = vst [vmem:[%s3765_s29 + $0x94] sm:$0xf] %v256_v37  ;;  %v258_v38 = vld [vmem:[%s3758_s28 + $0x130] sm:$0xf] }
  0x29   : > { %v260_v39 = vld [vmem:[%s3758_s28 + $0x138] sm:$0xf]  ;;  %v262_v40 = vld [vmem:[%s3758_s28 + $0x140] sm:$0xf]  ;;  %259 = vst [vmem:[%s3765_s29 + $0x98] sm:$0xf] %v258_v38 }
  0x2a   : > { %261 = vst [vmem:[%s3765_s29 + $0x9c] sm:$0xf] %v260_v39  ;;  %263 = vst [vmem:[%s3765_s29 + $0xa0] sm:$0xf] %v262_v40  ;;  %v264_v41 = vld [vmem:[%s3758_s28 + $0x148] sm:$0xf] }
  0x2b   : > { %v266_v42 = vld [vmem:[%s3758_s28 + $0x150] sm:$0xf]  ;;  %v268_v43 = vld [vmem:[%s3758_s28 + $0x158] sm:$0xf]  ;;  %265 = vst [vmem:[%s3765_s29 + $0xa4] sm:$0xf] %v264_v41 }
  0x2c   : > { %267 = vst [vmem:[%s3765_s29 + $0xa8] sm:$0xf] %v266_v42  ;;  %269 = vst [vmem:[%s3765_s29 + $0xac] sm:$0xf] %v268_v43  ;;  %v270_v44 = vld [vmem:[%s3758_s28 + $0x160] sm:$0xf] }
  0x2d   : > { %v272_v45 = vld [vmem:[%s3758_s28 + $0x168] sm:$0xf]  ;;  %v274_v46 = vld [vmem:[%s3758_s28 + $0x170] sm:$0xf]  ;;  %271 = vst [vmem:[%s3765_s29 + $0xb0] sm:$0xf] %v270_v44 }
  0x2e   : > { %273 = vst [vmem:[%s3765_s29 + $0xb4] sm:$0xf] %v272_v45  ;;  %275 = vst [vmem:[%s3765_s29 + $0xb8] sm:$0xf] %v274_v46  ;;  %v276_v47 = vld [vmem:[%s3758_s28 + $0x178] sm:$0xf] }
  0x2f   : > { %v278_v48 = vld [vmem:[%s3758_s28 + $0x180] sm:$0xf]  ;;  %v280_v49 = vld [vmem:[%s3758_s28 + $0x188] sm:$0xf]  ;;  %277 = vst [vmem:[%s3765_s29 + $0xbc] sm:$0xf] %v276_v47 }
  0x30   : > { %279 = vst [vmem:[%s3765_s29 + $0xc0] sm:$0xf] %v278_v48  ;;  %281 = vst [vmem:[%s3765_s29 + $0xc4] sm:$0xf] %v280_v49  ;;  %v282_v50 = vld [vmem:[%s3758_s28 + $0x190] sm:$0xf] }
  0x31   : > { %v284_v51 = vld [vmem:[%s3758_s28 + $0x198] sm:$0xf]  ;;  %v286_v52 = vld [vmem:[%s3758_s28 + $0x1a0] sm:$0xf]  ;;  %283 = vst [vmem:[%s3765_s29 + $0xc8] sm:$0xf] %v282_v50 }
  0x32   : > { %285 = vst [vmem:[%s3765_s29 + $0xcc] sm:$0xf] %v284_v51  ;;  %287 = vst [vmem:[%s3765_s29 + $0xd0] sm:$0xf] %v286_v52  ;;  %v288_v53 = vld [vmem:[%s3758_s28 + $0x1a8] sm:$0xf] }
  0x33   : > { %v290_v54 = vld [vmem:[%s3758_s28 + $0x1b0] sm:$0xf]  ;;  %v292_v55 = vld [vmem:[%s3758_s28 + $0x1b8] sm:$0xf]  ;;  %289 = vst [vmem:[%s3765_s29 + $0xd4] sm:$0xf] %v288_v53 }
  0x34   : > { %291 = vst [vmem:[%s3765_s29 + $0xd8] sm:$0xf] %v290_v54  ;;  %293 = vst [vmem:[%s3765_s29 + $0xdc] sm:$0xf] %v292_v55  ;;  %v294_v56 = vld [vmem:[%s3758_s28 + $0x1c0] sm:$0xf] }
  0x35   : > { %v296_v57 = vld [vmem:[%s3758_s28 + $0x1c8] sm:$0xf]  ;;  %v298_v58 = vld [vmem:[%s3758_s28 + $0x1d0] sm:$0xf]  ;;  %295 = vst [vmem:[%s3765_s29 + $0xe0] sm:$0xf] %v294_v56 }
  0x36   : > { %297 = vst [vmem:[%s3765_s29 + $0xe4] sm:$0xf] %v296_v57  ;;  %299 = vst [vmem:[%s3765_s29 + $0xe8] sm:$0xf] %v298_v58  ;;  %v300_v59 = vld [vmem:[%s3758_s28 + $0x1d8] sm:$0xf] }
  0x37   : > { %v302_v60 = vld [vmem:[%s3758_s28 + $0x1e0] sm:$0xf]  ;;  %v304_v61 = vld [vmem:[%s3758_s28 + $0x1e8] sm:$0xf]  ;;  %301 = vst [vmem:[%s3765_s29 + $0xec] sm:$0xf] %v300_v59 }
  0x38   : > { %303 = vst [vmem:[%s3765_s29 + $0xf0] sm:$0xf] %v302_v60  ;;  %305 = vst [vmem:[%s3765_s29 + $0xf4] sm:$0xf] %v304_v61  ;;  %v306_v62 = vld [vmem:[%s3758_s28 + $0x1f0] sm:$0xf] }
  0x39   : > { %v308_v63 = vld [vmem:[%s3758_s28 + $0x1f8] sm:$0xf]  ;;  %v310_v0 = vld [vmem:[%s3758_s28 + $0x200] sm:$0xf]  ;;  %307 = vst [vmem:[%s3765_s29 + $0xf8] sm:$0xf] %v306_v62 }
  0x3a   : > { %309 = vst [vmem:[%s3765_s29 + $0xfc] sm:$0xf] %v308_v63  ;;  %311 = vst [vmem:[%s3765_s29 + $0x100] sm:$0xf] %v310_v0  ;;  %v312_v1 = vld [vmem:[%s3758_s28 + $0x208] sm:$0xf] }
  0x3b   : > { %v314_v2 = vld [vmem:[%s3758_s28 + $0x210] sm:$0xf]  ;;  %v316_v3 = vld [vmem:[%s3758_s28 + $0x218] sm:$0xf]  ;;  %313 = vst [vmem:[%s3765_s29 + $0x104] sm:$0xf] %v312_v1 }
  0x3c   : > { %315 = vst [vmem:[%s3765_s29 + $0x108] sm:$0xf] %v314_v2  ;;  %317 = vst [vmem:[%s3765_s29 + $0x10c] sm:$0xf] %v316_v3  ;;  %v318_v4 = vld [vmem:[%s3758_s28 + $0x220] sm:$0xf] }
  0x3d   : > { %v320_v5 = vld [vmem:[%s3758_s28 + $0x228] sm:$0xf]  ;;  %v322_v6 = vld [vmem:[%s3758_s28 + $0x230] sm:$0xf]  ;;  %319 = vst [vmem:[%s3765_s29 + $0x110] sm:$0xf] %v318_v4 }
  0x3e   : > { %321 = vst [vmem:[%s3765_s29 + $0x114] sm:$0xf] %v320_v5  ;;  %323 = vst [vmem:[%s3765_s29 + $0x118] sm:$0xf] %v322_v6  ;;  %v324_v7 = vld [vmem:[%s3758_s28 + $0x238] sm:$0xf] }
  0x3f   : > { %v326_v8 = vld [vmem:[%s3758_s28 + $0x240] sm:$0xf]  ;;  %v328_v9 = vld [vmem:[%s3758_s28 + $0x248] sm:$0xf]  ;;  %325 = vst [vmem:[%s3765_s29 + $0x11c] sm:$0xf] %v324_v7 }
  0x40   : > { %327 = vst [vmem:[%s3765_s29 + $0x120] sm:$0xf] %v326_v8  ;;  %329 = vst [vmem:[%s3765_s29 + $0x124] sm:$0xf] %v328_v9  ;;  %v330_v10 = vld [vmem:[%s3758_s28 + $0x250] sm:$0xf] }
  0x41   : > { %v332_v11 = vld [vmem:[%s3758_s28 + $0x258] sm:$0xf]  ;;  %v334_v12 = vld [vmem:[%s3758_s28 + $0x260] sm:$0xf]  ;;  %331 = vst [vmem:[%s3765_s29 + $0x128] sm:$0xf] %v330_v10 }
  0x42   : > { %333 = vst [vmem:[%s3765_s29 + $0x12c] sm:$0xf] %v332_v11  ;;  %335 = vst [vmem:[%s3765_s29 + $0x130] sm:$0xf] %v334_v12  ;;  %v336_v13 = vld [vmem:[%s3758_s28 + $0x268] sm:$0xf] }
  0x43   : > { %v338_v14 = vld [vmem:[%s3758_s28 + $0x270] sm:$0xf]  ;;  %v340_v15 = vld [vmem:[%s3758_s28 + $0x278] sm:$0xf]  ;;  %337 = vst [vmem:[%s3765_s29 + $0x134] sm:$0xf] %v336_v13 }
  0x44   : > { %339 = vst [vmem:[%s3765_s29 + $0x138] sm:$0xf] %v338_v14  ;;  %341 = vst [vmem:[%s3765_s29 + $0x13c] sm:$0xf] %v340_v15  ;;  %v342_v16 = vld [vmem:[%s3758_s28 + $0x280] sm:$0xf] }
  0x45   : > { %v344_v17 = vld [vmem:[%s3758_s28 + $0x288] sm:$0xf]  ;;  %v346_v18 = vld [vmem:[%s3758_s28 + $0x290] sm:$0xf]  ;;  %343 = vst [vmem:[%s3765_s29 + $0x140] sm:$0xf] %v342_v16 }
  0x46   : > { %345 = vst [vmem:[%s3765_s29 + $0x144] sm:$0xf] %v344_v17  ;;  %347 = vst [vmem:[%s3765_s29 + $0x148] sm:$0xf] %v346_v18  ;;  %v348_v19 = vld [vmem:[%s3758_s28 + $0x298] sm:$0xf] }
  0x47   : > { %v350_v20 = vld [vmem:[%s3758_s28 + $0x2a0] sm:$0xf]  ;;  %v352_v21 = vld [vmem:[%s3758_s28 + $0x2a8] sm:$0xf]  ;;  %349 = vst [vmem:[%s3765_s29 + $0x14c] sm:$0xf] %v348_v19 }
  0x48   : > { %351 = vst [vmem:[%s3765_s29 + $0x150] sm:$0xf] %v350_v20  ;;  %353 = vst [vmem:[%s3765_s29 + $0x154] sm:$0xf] %v352_v21  ;;  %v354_v22 = vld [vmem:[%s3758_s28 + $0x2b0] sm:$0xf] }
  0x49   : > { %v356_v23 = vld [vmem:[%s3758_s28 + $0x2b8] sm:$0xf]  ;;  %v358_v24 = vld [vmem:[%s3758_s28 + $0x2c0] sm:$0xf]  ;;  %355 = vst [vmem:[%s3765_s29 + $0x158] sm:$0xf] %v354_v22 }
  0x4a   : > { %357 = vst [vmem:[%s3765_s29 + $0x15c] sm:$0xf] %v356_v23  ;;  %359 = vst [vmem:[%s3765_s29 + $0x160] sm:$0xf] %v358_v24  ;;  %v360_v25 = vld [vmem:[%s3758_s28 + $0x2c8] sm:$0xf] }
  0x4b   : > { %v362_v26 = vld [vmem:[%s3758_s28 + $0x2d0] sm:$0xf]  ;;  %v364_v27 = vld [vmem:[%s3758_s28 + $0x2d8] sm:$0xf]  ;;  %361 = vst [vmem:[%s3765_s29 + $0x164] sm:$0xf] %v360_v25 }
  0x4c   : > { %363 = vst [vmem:[%s3765_s29 + $0x168] sm:$0xf] %v362_v26  ;;  %365 = vst [vmem:[%s3765_s29 + $0x16c] sm:$0xf] %v364_v27  ;;  %v366_v28 = vld [vmem:[%s3758_s28 + $0x2e0] sm:$0xf] }
  0x4d   : > { %v368_v29 = vld [vmem:[%s3758_s28 + $0x2e8] sm:$0xf]  ;;  %v370_v30 = vld [vmem:[%s3758_s28 + $0x2f0] sm:$0xf]  ;;  %367 = vst [vmem:[%s3765_s29 + $0x170] sm:$0xf] %v366_v28 }
  0x4e   : > { %369 = vst [vmem:[%s3765_s29 + $0x174] sm:$0xf] %v368_v29  ;;  %371 = vst [vmem:[%s3765_s29 + $0x178] sm:$0xf] %v370_v30  ;;  %v372_v31 = vld [vmem:[%s3758_s28 + $0x2f8] sm:$0xf] }
  0x4f   : > { %v374_v32 = vld [vmem:[%s3758_s28 + $0x300] sm:$0xf]  ;;  %v376_v33 = vld [vmem:[%s3758_s28 + $0x308] sm:$0xf]  ;;  %373 = vst [vmem:[%s3765_s29 + $0x17c] sm:$0xf] %v372_v31 }
  0x50   : > { %375 = vst [vmem:[%s3765_s29 + $0x180] sm:$0xf] %v374_v32  ;;  %377 = vst [vmem:[%s3765_s29 + $0x184] sm:$0xf] %v376_v33  ;;  %v378_v34 = vld [vmem:[%s3758_s28 + $0x310] sm:$0xf] }
  0x51   : > { %v380_v35 = vld [vmem:[%s3758_s28 + $0x318] sm:$0xf]  ;;  %v382_v36 = vld [vmem:[%s3758_s28 + $0x320] sm:$0xf]  ;;  %379 = vst [vmem:[%s3765_s29 + $0x188] sm:$0xf] %v378_v34 }
  0x52   : > { %381 = vst [vmem:[%s3765_s29 + $0x18c] sm:$0xf] %v380_v35  ;;  %383 = vst [vmem:[%s3765_s29 + $0x190] sm:$0xf] %v382_v36  ;;  %v384_v37 = vld [vmem:[%s3758_s28 + $0x328] sm:$0xf] }
  0x53   : > { %v386_v38 = vld [vmem:[%s3758_s28 + $0x330] sm:$0xf]  ;;  %v388_v39 = vld [vmem:[%s3758_s28 + $0x338] sm:$0xf]  ;;  %385 = vst [vmem:[%s3765_s29 + $0x194] sm:$0xf] %v384_v37 }
  0x54   : > { %387 = vst [vmem:[%s3765_s29 + $0x198] sm:$0xf] %v386_v38  ;;  %389 = vst [vmem:[%s3765_s29 + $0x19c] sm:$0xf] %v388_v39  ;;  %v390_v40 = vld [vmem:[%s3758_s28 + $0x340] sm:$0xf] }
  0x55   : > { %v392_v41 = vld [vmem:[%s3758_s28 + $0x348] sm:$0xf]  ;;  %v394_v42 = vld [vmem:[%s3758_s28 + $0x350] sm:$0xf]  ;;  %391 = vst [vmem:[%s3765_s29 + $0x1a0] sm:$0xf] %v390_v40 }
  0x56   : > { %393 = vst [vmem:[%s3765_s29 + $0x1a4] sm:$0xf] %v392_v41  ;;  %395 = vst [vmem:[%s3765_s29 + $0x1a8] sm:$0xf] %v394_v42  ;;  %v396_v43 = vld [vmem:[%s3758_s28 + $0x358] sm:$0xf] }
  0x57   : > { %v398_v44 = vld [vmem:[%s3758_s28 + $0x360] sm:$0xf]  ;;  %v400_v45 = vld [vmem:[%s3758_s28 + $0x368] sm:$0xf]  ;;  %397 = vst [vmem:[%s3765_s29 + $0x1ac] sm:$0xf] %v396_v43 }
  0x58   : > { %399 = vst [vmem:[%s3765_s29 + $0x1b0] sm:$0xf] %v398_v44  ;;  %401 = vst [vmem:[%s3765_s29 + $0x1b4] sm:$0xf] %v400_v45  ;;  %v402_v46 = vld [vmem:[%s3758_s28 + $0x370] sm:$0xf] }
  0x59   : > { %v404_v47 = vld [vmem:[%s3758_s28 + $0x378] sm:$0xf]  ;;  %v406_v48 = vld [vmem:[%s3758_s28 + $0x380] sm:$0xf]  ;;  %403 = vst [vmem:[%s3765_s29 + $0x1b8] sm:$0xf] %v402_v46 }
  0x5a   : > { %405 = vst [vmem:[%s3765_s29 + $0x1bc] sm:$0xf] %v404_v47  ;;  %407 = vst [vmem:[%s3765_s29 + $0x1c0] sm:$0xf] %v406_v48  ;;  %v408_v49 = vld [vmem:[%s3758_s28 + $0x388] sm:$0xf] }
  0x5b   : > { %v410_v50 = vld [vmem:[%s3758_s28 + $0x390] sm:$0xf]  ;;  %v412_v51 = vld [vmem:[%s3758_s28 + $0x398] sm:$0xf]  ;;  %409 = vst [vmem:[%s3765_s29 + $0x1c4] sm:$0xf] %v408_v49 }
  0x5c   : > { %411 = vst [vmem:[%s3765_s29 + $0x1c8] sm:$0xf] %v410_v50  ;;  %413 = vst [vmem:[%s3765_s29 + $0x1cc] sm:$0xf] %v412_v51  ;;  %v414_v52 = vld [vmem:[%s3758_s28 + $0x3a0] sm:$0xf] }
  0x5d   : > { %v416_v53 = vld [vmem:[%s3758_s28 + $0x3a8] sm:$0xf]  ;;  %v418_v54 = vld [vmem:[%s3758_s28 + $0x3b0] sm:$0xf]  ;;  %415 = vst [vmem:[%s3765_s29 + $0x1d0] sm:$0xf] %v414_v52 }
  0x5e   : > { %417 = vst [vmem:[%s3765_s29 + $0x1d4] sm:$0xf] %v416_v53  ;;  %419 = vst [vmem:[%s3765_s29 + $0x1d8] sm:$0xf] %v418_v54  ;;  %v420_v55 = vld [vmem:[%s3758_s28 + $0x3b8] sm:$0xf] }
  0x5f   : > { %v422_v56 = vld [vmem:[%s3758_s28 + $0x3c0] sm:$0xf]  ;;  %v424_v57 = vld [vmem:[%s3758_s28 + $0x3c8] sm:$0xf]  ;;  %421 = vst [vmem:[%s3765_s29 + $0x1dc] sm:$0xf] %v420_v55 }
  0x60   : > { %423 = vst [vmem:[%s3765_s29 + $0x1e0] sm:$0xf] %v422_v56  ;;  %425 = vst [vmem:[%s3765_s29 + $0x1e4] sm:$0xf] %v424_v57  ;;  %v426_v58 = vld [vmem:[%s3758_s28 + $0x3d0] sm:$0xf] }
  0x61   : > { %v428_v59 = vld [vmem:[%s3758_s28 + $0x3d8] sm:$0xf]  ;;  %v430_v60 = vld [vmem:[%s3758_s28 + $0x3e0] sm:$0xf]  ;;  %427 = vst [vmem:[%s3765_s29 + $0x1e8] sm:$0xf] %v426_v58 }
  0x62   : > { %429 = vst [vmem:[%s3765_s29 + $0x1ec] sm:$0xf] %v428_v59  ;;  %431 = vst [vmem:[%s3765_s29 + $0x1f0] sm:$0xf] %v430_v60  ;;  %v432_v61 = vld [vmem:[%s3758_s28 + $0x3e8] sm:$0xf] }
  0x63   : > { %v434_v62 = vld [vmem:[%s3758_s28 + $0x3f0] sm:$0xf]  ;;  %v436_v63 = vld [vmem:[%s3758_s28 + $0x3f8] sm:$0xf]  ;;  %433 = vst [vmem:[%s3765_s29 + $0x1f4] sm:$0xf] %v432_v61 }
  0x64   : > { %435 = vst [vmem:[%s3765_s29 + $0x1f8] sm:$0xf] %v434_v62  ;;  %437 = vst [vmem:[%s3765_s29 + $0x1fc] sm:$0xf] %v436_v63  ;;  %v438_v0 = vld [vmem:[%s3758_s28 + $0x400] sm:$0xf] }
  0x65   : > { %v440_v1 = vld [vmem:[%s3758_s28 + $0x408] sm:$0xf]  ;;  %v442_v2 = vld [vmem:[%s3758_s28 + $0x410] sm:$0xf]  ;;  %439 = vst [vmem:[%s3765_s29 + $0x200] sm:$0xf] %v438_v0 }
  0x66   : > { %441 = vst [vmem:[%s3765_s29 + $0x204] sm:$0xf] %v440_v1  ;;  %443 = vst [vmem:[%s3765_s29 + $0x208] sm:$0xf] %v442_v2  ;;  %v444_v3 = vld [vmem:[%s3758_s28 + $0x418] sm:$0xf] }
  0x67   : > { %v446_v4 = vld [vmem:[%s3758_s28 + $0x420] sm:$0xf]  ;;  %v448_v5 = vld [vmem:[%s3758_s28 + $0x428] sm:$0xf]  ;;  %445 = vst [vmem:[%s3765_s29 + $0x20c] sm:$0xf] %v444_v3 }
  0x68   : > { %447 = vst [vmem:[%s3765_s29 + $0x210] sm:$0xf] %v446_v4  ;;  %449 = vst [vmem:[%s3765_s29 + $0x214] sm:$0xf] %v448_v5  ;;  %v450_v6 = vld [vmem:[%s3758_s28 + $0x430] sm:$0xf] }
  0x69   : > { %v452_v7 = vld [vmem:[%s3758_s28 + $0x438] sm:$0xf]  ;;  %v454_v8 = vld [vmem:[%s3758_s28 + $0x440] sm:$0xf]  ;;  %451 = vst [vmem:[%s3765_s29 + $0x218] sm:$0xf] %v450_v6 }
  0x6a   : > { %453 = vst [vmem:[%s3765_s29 + $0x21c] sm:$0xf] %v452_v7  ;;  %455 = vst [vmem:[%s3765_s29 + $0x220] sm:$0xf] %v454_v8  ;;  %v456_v9 = vld [vmem:[%s3758_s28 + $0x448] sm:$0xf] }
  0x6b   : > { %v458_v10 = vld [vmem:[%s3758_s28 + $0x450] sm:$0xf]  ;;  %v460_v11 = vld [vmem:[%s3758_s28 + $0x458] sm:$0xf]  ;;  %457 = vst [vmem:[%s3765_s29 + $0x224] sm:$0xf] %v456_v9 }
  0x6c   : > { %459 = vst [vmem:[%s3765_s29 + $0x228] sm:$0xf] %v458_v10  ;;  %461 = vst [vmem:[%s3765_s29 + $0x22c] sm:$0xf] %v460_v11  ;;  %v462_v12 = vld [vmem:[%s3758_s28 + $0x460] sm:$0xf] }
  0x6d   : > { %v464_v13 = vld [vmem:[%s3758_s28 + $0x468] sm:$0xf]  ;;  %v466_v14 = vld [vmem:[%s3758_s28 + $0x470] sm:$0xf]  ;;  %463 = vst [vmem:[%s3765_s29 + $0x230] sm:$0xf] %v462_v12 }
  0x6e   : > { %465 = vst [vmem:[%s3765_s29 + $0x234] sm:$0xf] %v464_v13  ;;  %467 = vst [vmem:[%s3765_s29 + $0x238] sm:$0xf] %v466_v14  ;;  %v468_v15 = vld [vmem:[%s3758_s28 + $0x478] sm:$0xf] }
  0x6f   : > { %v470_v16 = vld [vmem:[%s3758_s28 + $0x480] sm:$0xf]  ;;  %v472_v17 = vld [vmem:[%s3758_s28 + $0x488] sm:$0xf]  ;;  %469 = vst [vmem:[%s3765_s29 + $0x23c] sm:$0xf] %v468_v15 }
  0x70   : > { %471 = vst [vmem:[%s3765_s29 + $0x240] sm:$0xf] %v470_v16  ;;  %473 = vst [vmem:[%s3765_s29 + $0x244] sm:$0xf] %v472_v17  ;;  %v474_v18 = vld [vmem:[%s3758_s28 + $0x490] sm:$0xf] }
  0x71   : > { %v476_v19 = vld [vmem:[%s3758_s28 + $0x498] sm:$0xf]  ;;  %v478_v20 = vld [vmem:[%s3758_s28 + $0x4a0] sm:$0xf]  ;;  %475 = vst [vmem:[%s3765_s29 + $0x248] sm:$0xf] %v474_v18 }
  0x72   : > { %477 = vst [vmem:[%s3765_s29 + $0x24c] sm:$0xf] %v476_v19  ;;  %479 = vst [vmem:[%s3765_s29 + $0x250] sm:$0xf] %v478_v20  ;;  %v480_v21 = vld [vmem:[%s3758_s28 + $0x4a8] sm:$0xf] }
  0x73   : > { %v482_v22 = vld [vmem:[%s3758_s28 + $0x4b0] sm:$0xf]  ;;  %v484_v23 = vld [vmem:[%s3758_s28 + $0x4b8] sm:$0xf]  ;;  %481 = vst [vmem:[%s3765_s29 + $0x254] sm:$0xf] %v480_v21 }
  0x74   : > { %483 = vst [vmem:[%s3765_s29 + $0x258] sm:$0xf] %v482_v22  ;;  %485 = vst [vmem:[%s3765_s29 + $0x25c] sm:$0xf] %v484_v23  ;;  %v486_v24 = vld [vmem:[%s3758_s28 + $0x4c0] sm:$0xf] }
  0x75   : > { %v488_v25 = vld [vmem:[%s3758_s28 + $0x4c8] sm:$0xf]  ;;  %v490_v26 = vld [vmem:[%s3758_s28 + $0x4d0] sm:$0xf]  ;;  %487 = vst [vmem:[%s3765_s29 + $0x260] sm:$0xf] %v486_v24 }
  0x76   : > { %489 = vst [vmem:[%s3765_s29 + $0x264] sm:$0xf] %v488_v25  ;;  %491 = vst [vmem:[%s3765_s29 + $0x268] sm:$0xf] %v490_v26  ;;  %v492_v27 = vld [vmem:[%s3758_s28 + $0x4d8] sm:$0xf] }
  0x77   : > { %v494_v28 = vld [vmem:[%s3758_s28 + $0x4e0] sm:$0xf]  ;;  %v496_v29 = vld [vmem:[%s3758_s28 + $0x4e8] sm:$0xf]  ;;  %493 = vst [vmem:[%s3765_s29 + $0x26c] sm:$0xf] %v492_v27 }
  0x78   : > { %495 = vst [vmem:[%s3765_s29 + $0x270] sm:$0xf] %v494_v28  ;;  %497 = vst [vmem:[%s3765_s29 + $0x274] sm:$0xf] %v496_v29  ;;  %v498_v30 = vld [vmem:[%s3758_s28 + $0x4f0] sm:$0xf] }
  0x79   : > { %v500_v31 = vld [vmem:[%s3758_s28 + $0x4f8] sm:$0xf]  ;;  %v502_v32 = vld [vmem:[%s3758_s28 + $0x500] sm:$0xf]  ;;  %499 = vst [vmem:[%s3765_s29 + $0x278] sm:$0xf] %v498_v30 }
  0x7a   : > { %501 = vst [vmem:[%s3765_s29 + $0x27c] sm:$0xf] %v500_v31  ;;  %503 = vst [vmem:[%s3765_s29 + $0x280] sm:$0xf] %v502_v32  ;;  %v504_v33 = vld [vmem:[%s3758_s28 + $0x508] sm:$0xf] }
  0x7b   : > { %v506_v34 = vld [vmem:[%s3758_s28 + $0x510] sm:$0xf]  ;;  %v508_v35 = vld [vmem:[%s3758_s28 + $0x518] sm:$0xf]  ;;  %505 = vst [vmem:[%s3765_s29 + $0x284] sm:$0xf] %v504_v33 }
  0x7c   : > { %507 = vst [vmem:[%s3765_s29 + $0x288] sm:$0xf] %v506_v34  ;;  %509 = vst [vmem:[%s3765_s29 + $0x28c] sm:$0xf] %v508_v35  ;;  %v510_v36 = vld [vmem:[%s3758_s28 + $0x520] sm:$0xf] }
  0x7d   : > { %v512_v37 = vld [vmem:[%s3758_s28 + $0x528] sm:$0xf]  ;;  %v514_v38 = vld [vmem:[%s3758_s28 + $0x530] sm:$0xf]  ;;  %511 = vst [vmem:[%s3765_s29 + $0x290] sm:$0xf] %v510_v36 }
  0x7e   : > { %513 = vst [vmem:[%s3765_s29 + $0x294] sm:$0xf] %v512_v37  ;;  %515 = vst [vmem:[%s3765_s29 + $0x298] sm:$0xf] %v514_v38  ;;  %v516_v39 = vld [vmem:[%s3758_s28 + $0x538] sm:$0xf] }
  0x7f   : > { %v518_v40 = vld [vmem:[%s3758_s28 + $0x540] sm:$0xf]  ;;  %v520_v41 = vld [vmem:[%s3758_s28 + $0x548] sm:$0xf]  ;;  %517 = vst [vmem:[%s3765_s29 + $0x29c] sm:$0xf] %v516_v39 }
  0x80   : > { %519 = vst [vmem:[%s3765_s29 + $0x2a0] sm:$0xf] %v518_v40  ;;  %521 = vst [vmem:[%s3765_s29 + $0x2a4] sm:$0xf] %v520_v41  ;;  %v522_v42 = vld [vmem:[%s3758_s28 + $0x550] sm:$0xf] }
  0x81   : > { %v524_v43 = vld [vmem:[%s3758_s28 + $0x558] sm:$0xf]  ;;  %v526_v44 = vld [vmem:[%s3758_s28 + $0x560] sm:$0xf]  ;;  %523 = vst [vmem:[%s3765_s29 + $0x2a8] sm:$0xf] %v522_v42 }
  0x82   : > { %525 = vst [vmem:[%s3765_s29 + $0x2ac] sm:$0xf] %v524_v43  ;;  %527 = vst [vmem:[%s3765_s29 + $0x2b0] sm:$0xf] %v526_v44  ;;  %v528_v45 = vld [vmem:[%s3758_s28 + $0x568] sm:$0xf] }
  0x83   : > { %v530_v46 = vld [vmem:[%s3758_s28 + $0x570] sm:$0xf]  ;;  %v532_v47 = vld [vmem:[%s3758_s28 + $0x578] sm:$0xf]  ;;  %529 = vst [vmem:[%s3765_s29 + $0x2b4] sm:$0xf] %v528_v45 }
  0x84   : > { %531 = vst [vmem:[%s3765_s29 + $0x2b8] sm:$0xf] %v530_v46  ;;  %533 = vst [vmem:[%s3765_s29 + $0x2bc] sm:$0xf] %v532_v47  ;;  %v534_v48 = vld [vmem:[%s3758_s28 + $0x580] sm:$0xf] }
  0x85   : > { %v536_v49 = vld [vmem:[%s3758_s28 + $0x588] sm:$0xf]  ;;  %v538_v50 = vld [vmem:[%s3758_s28 + $0x590] sm:$0xf]  ;;  %535 = vst [vmem:[%s3765_s29 + $0x2c0] sm:$0xf] %v534_v48 }
  0x86   : > { %537 = vst [vmem:[%s3765_s29 + $0x2c4] sm:$0xf] %v536_v49  ;;  %539 = vst [vmem:[%s3765_s29 + $0x2c8] sm:$0xf] %v538_v50  ;;  %v540_v51 = vld [vmem:[%s3758_s28 + $0x598] sm:$0xf] }
  0x87   : > { %v542_v52 = vld [vmem:[%s3758_s28 + $0x5a0] sm:$0xf]  ;;  %v544_v53 = vld [vmem:[%s3758_s28 + $0x5a8] sm:$0xf]  ;;  %541 = vst [vmem:[%s3765_s29 + $0x2cc] sm:$0xf] %v540_v51 }
  0x88   : > { %543 = vst [vmem:[%s3765_s29 + $0x2d0] sm:$0xf] %v542_v52  ;;  %545 = vst [vmem:[%s3765_s29 + $0x2d4] sm:$0xf] %v544_v53  ;;  %v546_v54 = vld [vmem:[%s3758_s28 + $0x5b0] sm:$0xf] }
  0x89   : > { %v548_v55 = vld [vmem:[%s3758_s28 + $0x5b8] sm:$0xf]  ;;  %v550_v56 = vld [vmem:[%s3758_s28 + $0x5c0] sm:$0xf]  ;;  %547 = vst [vmem:[%s3765_s29 + $0x2d8] sm:$0xf] %v546_v54 }
  0x8a   : > { %549 = vst [vmem:[%s3765_s29 + $0x2dc] sm:$0xf] %v548_v55  ;;  %551 = vst [vmem:[%s3765_s29 + $0x2e0] sm:$0xf] %v550_v56  ;;  %v552_v57 = vld [vmem:[%s3758_s28 + $0x5c8] sm:$0xf] }
  0x8b   : > { %v554_v58 = vld [vmem:[%s3758_s28 + $0x5d0] sm:$0xf]  ;;  %v556_v59 = vld [vmem:[%s3758_s28 + $0x5d8] sm:$0xf]  ;;  %553 = vst [vmem:[%s3765_s29 + $0x2e4] sm:$0xf] %v552_v57 }
  0x8c   : > { %555 = vst [vmem:[%s3765_s29 + $0x2e8] sm:$0xf] %v554_v58  ;;  %557 = vst [vmem:[%s3765_s29 + $0x2ec] sm:$0xf] %v556_v59  ;;  %v558_v60 = vld [vmem:[%s3758_s28 + $0x5e0] sm:$0xf] }
  0x8d   : > { %v560_v61 = vld [vmem:[%s3758_s28 + $0x5e8] sm:$0xf]  ;;  %v562_v62 = vld [vmem:[%s3758_s28 + $0x5f0] sm:$0xf]  ;;  %559 = vst [vmem:[%s3765_s29 + $0x2f0] sm:$0xf] %v558_v60 }
  0x8e   : > { %561 = vst [vmem:[%s3765_s29 + $0x2f4] sm:$0xf] %v560_v61  ;;  %563 = vst [vmem:[%s3765_s29 + $0x2f8] sm:$0xf] %v562_v62  ;;  %v564_v63 = vld [vmem:[%s3758_s28 + $0x5f8] sm:$0xf] }
  0x8f   : > { %v566_v0 = vld [vmem:[%s3758_s28 + $0x600] sm:$0xf]  ;;  %v568_v1 = vld [vmem:[%s3758_s28 + $0x608] sm:$0xf]  ;;  %565 = vst [vmem:[%s3765_s29 + $0x2fc] sm:$0xf] %v564_v63 }
  0x90   : > { %567 = vst [vmem:[%s3765_s29 + $0x300] sm:$0xf] %v566_v0  ;;  %569 = vst [vmem:[%s3765_s29 + $0x304] sm:$0xf] %v568_v1  ;;  %v570_v2 = vld [vmem:[%s3758_s28 + $0x610] sm:$0xf] }
  0x91   : > { %v572_v3 = vld [vmem:[%s3758_s28 + $0x618] sm:$0xf]  ;;  %v574_v4 = vld [vmem:[%s3758_s28 + $0x620] sm:$0xf]  ;;  %571 = vst [vmem:[%s3765_s29 + $0x308] sm:$0xf] %v570_v2 }
  0x92   : > { %573 = vst [vmem:[%s3765_s29 + $0x30c] sm:$0xf] %v572_v3  ;;  %575 = vst [vmem:[%s3765_s29 + $0x310] sm:$0xf] %v574_v4  ;;  %v576_v5 = vld [vmem:[%s3758_s28 + $0x628] sm:$0xf] }
  0x93   : > { %v578_v6 = vld [vmem:[%s3758_s28 + $0x630] sm:$0xf]  ;;  %v580_v7 = vld [vmem:[%s3758_s28 + $0x638] sm:$0xf]  ;;  %577 = vst [vmem:[%s3765_s29 + $0x314] sm:$0xf] %v576_v5 }
  0x94   : > { %579 = vst [vmem:[%s3765_s29 + $0x318] sm:$0xf] %v578_v6  ;;  %581 = vst [vmem:[%s3765_s29 + $0x31c] sm:$0xf] %v580_v7  ;;  %v582_v8 = vld [vmem:[%s3758_s28 + $0x640] sm:$0xf] }
  0x95   : > { %v584_v9 = vld [vmem:[%s3758_s28 + $0x648] sm:$0xf]  ;;  %v586_v10 = vld [vmem:[%s3758_s28 + $0x650] sm:$0xf]  ;;  %583 = vst [vmem:[%s3765_s29 + $0x320] sm:$0xf] %v582_v8 }
  0x96   : > { %585 = vst [vmem:[%s3765_s29 + $0x324] sm:$0xf] %v584_v9  ;;  %587 = vst [vmem:[%s3765_s29 + $0x328] sm:$0xf] %v586_v10  ;;  %v588_v11 = vld [vmem:[%s3758_s28 + $0x658] sm:$0xf] }
  0x97   : > { %v590_v12 = vld [vmem:[%s3758_s28 + $0x660] sm:$0xf]  ;;  %v592_v13 = vld [vmem:[%s3758_s28 + $0x668] sm:$0xf]  ;;  %589 = vst [vmem:[%s3765_s29 + $0x32c] sm:$0xf] %v588_v11 }
  0x98   : > { %591 = vst [vmem:[%s3765_s29 + $0x330] sm:$0xf] %v590_v12  ;;  %593 = vst [vmem:[%s3765_s29 + $0x334] sm:$0xf] %v592_v13  ;;  %v594_v14 = vld [vmem:[%s3758_s28 + $0x670] sm:$0xf] }
  0x99   : > { %v596_v15 = vld [vmem:[%s3758_s28 + $0x678] sm:$0xf]  ;;  %v598_v16 = vld [vmem:[%s3758_s28 + $0x680] sm:$0xf]  ;;  %595 = vst [vmem:[%s3765_s29 + $0x338] sm:$0xf] %v594_v14 }
  0x9a   : > { %597 = vst [vmem:[%s3765_s29 + $0x33c] sm:$0xf] %v596_v15  ;;  %599 = vst [vmem:[%s3765_s29 + $0x340] sm:$0xf] %v598_v16  ;;  %v600_v17 = vld [vmem:[%s3758_s28 + $0x688] sm:$0xf] }
  0x9b   : > { %v602_v18 = vld [vmem:[%s3758_s28 + $0x690] sm:$0xf]  ;;  %v604_v19 = vld [vmem:[%s3758_s28 + $0x698] sm:$0xf]  ;;  %601 = vst [vmem:[%s3765_s29 + $0x344] sm:$0xf] %v600_v17 }
  0x9c   : > { %603 = vst [vmem:[%s3765_s29 + $0x348] sm:$0xf] %v602_v18  ;;  %605 = vst [vmem:[%s3765_s29 + $0x34c] sm:$0xf] %v604_v19  ;;  %v606_v20 = vld [vmem:[%s3758_s28 + $0x6a0] sm:$0xf] }
  0x9d   : > { %v608_v21 = vld [vmem:[%s3758_s28 + $0x6a8] sm:$0xf]  ;;  %v610_v22 = vld [vmem:[%s3758_s28 + $0x6b0] sm:$0xf]  ;;  %607 = vst [vmem:[%s3765_s29 + $0x350] sm:$0xf] %v606_v20 }
  0x9e   : > { %609 = vst [vmem:[%s3765_s29 + $0x354] sm:$0xf] %v608_v21  ;;  %611 = vst [vmem:[%s3765_s29 + $0x358] sm:$0xf] %v610_v22  ;;  %v612_v23 = vld [vmem:[%s3758_s28 + $0x6b8] sm:$0xf] }
  0x9f   : > { %v614_v24 = vld [vmem:[%s3758_s28 + $0x6c0] sm:$0xf]  ;;  %v616_v25 = vld [vmem:[%s3758_s28 + $0x6c8] sm:$0xf]  ;;  %613 = vst [vmem:[%s3765_s29 + $0x35c] sm:$0xf] %v612_v23 }
  0xa0   : > { %615 = vst [vmem:[%s3765_s29 + $0x360] sm:$0xf] %v614_v24  ;;  %617 = vst [vmem:[%s3765_s29 + $0x364] sm:$0xf] %v616_v25  ;;  %v618_v26 = vld [vmem:[%s3758_s28 + $0x6d0] sm:$0xf] }
  0xa1   : > { %v620_v27 = vld [vmem:[%s3758_s28 + $0x6d8] sm:$0xf]  ;;  %v622_v28 = vld [vmem:[%s3758_s28 + $0x6e0] sm:$0xf]  ;;  %619 = vst [vmem:[%s3765_s29 + $0x368] sm:$0xf] %v618_v26 }
  0xa2   : > { %621 = vst [vmem:[%s3765_s29 + $0x36c] sm:$0xf] %v620_v27  ;;  %623 = vst [vmem:[%s3765_s29 + $0x370] sm:$0xf] %v622_v28  ;;  %v624_v29 = vld [vmem:[%s3758_s28 + $0x6e8] sm:$0xf] }
  0xa3   : > { %v626_v30 = vld [vmem:[%s3758_s28 + $0x6f0] sm:$0xf]  ;;  %v628_v31 = vld [vmem:[%s3758_s28 + $0x6f8] sm:$0xf]  ;;  %625 = vst [vmem:[%s3765_s29 + $0x374] sm:$0xf] %v624_v29 }
  0xa4   : > { %627 = vst [vmem:[%s3765_s29 + $0x378] sm:$0xf] %v626_v30  ;;  %629 = vst [vmem:[%s3765_s29 + $0x37c] sm:$0xf] %v628_v31  ;;  %v630_v32 = vld [vmem:[%s3758_s28 + $0x700] sm:$0xf] }
  0xa5   : > { %v632_v33 = vld [vmem:[%s3758_s28 + $0x708] sm:$0xf]  ;;  %v634_v34 = vld [vmem:[%s3758_s28 + $0x710] sm:$0xf]  ;;  %631 = vst [vmem:[%s3765_s29 + $0x380] sm:$0xf] %v630_v32 }
  0xa6   : > { %633 = vst [vmem:[%s3765_s29 + $0x384] sm:$0xf] %v632_v33  ;;  %635 = vst [vmem:[%s3765_s29 + $0x388] sm:$0xf] %v634_v34  ;;  %v636_v35 = vld [vmem:[%s3758_s28 + $0x718] sm:$0xf] }
  0xa7   : > { %v638_v36 = vld [vmem:[%s3758_s28 + $0x720] sm:$0xf]  ;;  %v640_v37 = vld [vmem:[%s3758_s28 + $0x728] sm:$0xf]  ;;  %637 = vst [vmem:[%s3765_s29 + $0x38c] sm:$0xf] %v636_v35 }
  0xa8   : > { %639 = vst [vmem:[%s3765_s29 + $0x390] sm:$0xf] %v638_v36  ;;  %641 = vst [vmem:[%s3765_s29 + $0x394] sm:$0xf] %v640_v37  ;;  %v642_v38 = vld [vmem:[%s3758_s28 + $0x730] sm:$0xf] }
  0xa9   : > { %v644_v39 = vld [vmem:[%s3758_s28 + $0x738] sm:$0xf]  ;;  %v646_v40 = vld [vmem:[%s3758_s28 + $0x740] sm:$0xf]  ;;  %643 = vst [vmem:[%s3765_s29 + $0x398] sm:$0xf] %v642_v38 }
  0xaa   : > { %645 = vst [vmem:[%s3765_s29 + $0x39c] sm:$0xf] %v644_v39  ;;  %647 = vst [vmem:[%s3765_s29 + $0x3a0] sm:$0xf] %v646_v40  ;;  %v648_v41 = vld [vmem:[%s3758_s28 + $0x748] sm:$0xf] }
  0xab   : > { %v650_v42 = vld [vmem:[%s3758_s28 + $0x750] sm:$0xf]  ;;  %v652_v43 = vld [vmem:[%s3758_s28 + $0x758] sm:$0xf]  ;;  %649 = vst [vmem:[%s3765_s29 + $0x3a4] sm:$0xf] %v648_v41 }
  0xac   : > { %651 = vst [vmem:[%s3765_s29 + $0x3a8] sm:$0xf] %v650_v42  ;;  %653 = vst [vmem:[%s3765_s29 + $0x3ac] sm:$0xf] %v652_v43  ;;  %v654_v44 = vld [vmem:[%s3758_s28 + $0x760] sm:$0xf] }
  0xad   : > { %v656_v45 = vld [vmem:[%s3758_s28 + $0x768] sm:$0xf]  ;;  %v658_v46 = vld [vmem:[%s3758_s28 + $0x770] sm:$0xf]  ;;  %655 = vst [vmem:[%s3765_s29 + $0x3b0] sm:$0xf] %v654_v44 }
  0xae   : > { %657 = vst [vmem:[%s3765_s29 + $0x3b4] sm:$0xf] %v656_v45  ;;  %659 = vst [vmem:[%s3765_s29 + $0x3b8] sm:$0xf] %v658_v46  ;;  %v660_v47 = vld [vmem:[%s3758_s28 + $0x778] sm:$0xf] }
  0xaf   : > { %v662_v48 = vld [vmem:[%s3758_s28 + $0x780] sm:$0xf]  ;;  %v664_v49 = vld [vmem:[%s3758_s28 + $0x788] sm:$0xf]  ;;  %661 = vst [vmem:[%s3765_s29 + $0x3bc] sm:$0xf] %v660_v47 }
  0xb0   : > { %663 = vst [vmem:[%s3765_s29 + $0x3c0] sm:$0xf] %v662_v48  ;;  %665 = vst [vmem:[%s3765_s29 + $0x3c4] sm:$0xf] %v664_v49  ;;  %v666_v50 = vld [vmem:[%s3758_s28 + $0x790] sm:$0xf] }
  0xb1   : > { %v668_v51 = vld [vmem:[%s3758_s28 + $0x798] sm:$0xf]  ;;  %v670_v52 = vld [vmem:[%s3758_s28 + $0x7a0] sm:$0xf]  ;;  %667 = vst [vmem:[%s3765_s29 + $0x3c8] sm:$0xf] %v666_v50 }
  0xb2   : > { %669 = vst [vmem:[%s3765_s29 + $0x3cc] sm:$0xf] %v668_v51  ;;  %671 = vst [vmem:[%s3765_s29 + $0x3d0] sm:$0xf] %v670_v52  ;;  %v672_v53 = vld [vmem:[%s3758_s28 + $0x7a8] sm:$0xf] }
  0xb3   : > { %v674_v54 = vld [vmem:[%s3758_s28 + $0x7b0] sm:$0xf]  ;;  %v676_v55 = vld [vmem:[%s3758_s28 + $0x7b8] sm:$0xf]  ;;  %673 = vst [vmem:[%s3765_s29 + $0x3d4] sm:$0xf] %v672_v53 }
  0xb4   : > { %675 = vst [vmem:[%s3765_s29 + $0x3d8] sm:$0xf] %v674_v54  ;;  %677 = vst [vmem:[%s3765_s29 + $0x3dc] sm:$0xf] %v676_v55  ;;  %v678_v56 = vld [vmem:[%s3758_s28 + $0x7c0] sm:$0xf] }
  0xb5   : > { %v680_v57 = vld [vmem:[%s3758_s28 + $0x7c8] sm:$0xf]  ;;  %v682_v58 = vld [vmem:[%s3758_s28 + $0x7d0] sm:$0xf]  ;;  %679 = vst [vmem:[%s3765_s29 + $0x3e0] sm:$0xf] %v678_v56 }
  0xb6   : > { %681 = vst [vmem:[%s3765_s29 + $0x3e4] sm:$0xf] %v680_v57  ;;  %683 = vst [vmem:[%s3765_s29 + $0x3e8] sm:$0xf] %v682_v58  ;;  %v684_v59 = vld [vmem:[%s3758_s28 + $0x7d8] sm:$0xf] }
  0xb7   : > { %v686_v60 = vld [vmem:[%s3758_s28 + $0x7e0] sm:$0xf]  ;;  %v688_v61 = vld [vmem:[%s3758_s28 + $0x7e8] sm:$0xf]  ;;  %685 = vst [vmem:[%s3765_s29 + $0x3ec] sm:$0xf] %v684_v59 }
  0xb8   : > { %687 = vst [vmem:[%s3765_s29 + $0x3f0] sm:$0xf] %v686_v60  ;;  %689 = vst [vmem:[%s3765_s29 + $0x3f4] sm:$0xf] %v688_v61  ;;  %v690_v62 = vld [vmem:[%s3758_s28 + $0x7f0] sm:$0xf] }
  0xb9   : > { %v692_v63 = vld [vmem:[%s3758_s28 + $0x7f8] sm:$0xf]  ;;  %v694_v0 = vld [vmem:[%s3758_s28 + $0x800] sm:$0xf]  ;;  %691 = vst [vmem:[%s3765_s29 + $0x3f8] sm:$0xf] %v690_v62 }
  0xba   : > { %693 = vst [vmem:[%s3765_s29 + $0x3fc] sm:$0xf] %v692_v63  ;;  %695 = vst [vmem:[%s3765_s29 + $0x400] sm:$0xf] %v694_v0  ;;  %v696_v1 = vld [vmem:[%s3758_s28 + $0x808] sm:$0xf] }
  0xbb   : > { %v698_v2 = vld [vmem:[%s3758_s28 + $0x810] sm:$0xf]  ;;  %v700_v3 = vld [vmem:[%s3758_s28 + $0x818] sm:$0xf]  ;;  %697 = vst [vmem:[%s3765_s29 + $0x404] sm:$0xf] %v696_v1 }
  0xbc   : > { %699 = vst [vmem:[%s3765_s29 + $0x408] sm:$0xf] %v698_v2  ;;  %701 = vst [vmem:[%s3765_s29 + $0x40c] sm:$0xf] %v700_v3  ;;  %v702_v4 = vld [vmem:[%s3758_s28 + $0x820] sm:$0xf] }
  0xbd   : > { %v704_v5 = vld [vmem:[%s3758_s28 + $0x828] sm:$0xf]  ;;  %v706_v6 = vld [vmem:[%s3758_s28 + $0x830] sm:$0xf]  ;;  %703 = vst [vmem:[%s3765_s29 + $0x410] sm:$0xf] %v702_v4 }
  0xbe   : > { %705 = vst [vmem:[%s3765_s29 + $0x414] sm:$0xf] %v704_v5  ;;  %707 = vst [vmem:[%s3765_s29 + $0x418] sm:$0xf] %v706_v6  ;;  %v708_v7 = vld [vmem:[%s3758_s28 + $0x838] sm:$0xf] }
  0xbf   : > { %v710_v8 = vld [vmem:[%s3758_s28 + $0x840] sm:$0xf]  ;;  %v712_v9 = vld [vmem:[%s3758_s28 + $0x848] sm:$0xf]  ;;  %709 = vst [vmem:[%s3765_s29 + $0x41c] sm:$0xf] %v708_v7 }
  0xc0   : > { %711 = vst [vmem:[%s3765_s29 + $0x420] sm:$0xf] %v710_v8  ;;  %713 = vst [vmem:[%s3765_s29 + $0x424] sm:$0xf] %v712_v9  ;;  %v714_v10 = vld [vmem:[%s3758_s28 + $0x850] sm:$0xf] }
  0xc1   : > { %v716_v11 = vld [vmem:[%s3758_s28 + $0x858] sm:$0xf]  ;;  %v718_v12 = vld [vmem:[%s3758_s28 + $0x860] sm:$0xf]  ;;  %715 = vst [vmem:[%s3765_s29 + $0x428] sm:$0xf] %v714_v10 }
  0xc2   : > { %717 = vst [vmem:[%s3765_s29 + $0x42c] sm:$0xf] %v716_v11  ;;  %719 = vst [vmem:[%s3765_s29 + $0x430] sm:$0xf] %v718_v12  ;;  %v720_v13 = vld [vmem:[%s3758_s28 + $0x868] sm:$0xf] }
  0xc3   : > { %v722_v14 = vld [vmem:[%s3758_s28 + $0x870] sm:$0xf]  ;;  %v724_v15 = vld [vmem:[%s3758_s28 + $0x878] sm:$0xf]  ;;  %721 = vst [vmem:[%s3765_s29 + $0x434] sm:$0xf] %v720_v13 }
  0xc4   : > { %723 = vst [vmem:[%s3765_s29 + $0x438] sm:$0xf] %v722_v14  ;;  %725 = vst [vmem:[%s3765_s29 + $0x43c] sm:$0xf] %v724_v15  ;;  %v726_v16 = vld [vmem:[%s3758_s28 + $0x880] sm:$0xf] }
  0xc5   : > { %v728_v17 = vld [vmem:[%s3758_s28 + $0x888] sm:$0xf]  ;;  %v730_v18 = vld [vmem:[%s3758_s28 + $0x890] sm:$0xf]  ;;  %727 = vst [vmem:[%s3765_s29 + $0x440] sm:$0xf] %v726_v16 }
  0xc6   : > { %729 = vst [vmem:[%s3765_s29 + $0x444] sm:$0xf] %v728_v17  ;;  %731 = vst [vmem:[%s3765_s29 + $0x448] sm:$0xf] %v730_v18  ;;  %v732_v19 = vld [vmem:[%s3758_s28 + $0x898] sm:$0xf] }
  0xc7   : > { %v734_v20 = vld [vmem:[%s3758_s28 + $0x8a0] sm:$0xf]  ;;  %v736_v21 = vld [vmem:[%s3758_s28 + $0x8a8] sm:$0xf]  ;;  %733 = vst [vmem:[%s3765_s29 + $0x44c] sm:$0xf] %v732_v19 }
  0xc8   : > { %735 = vst [vmem:[%s3765_s29 + $0x450] sm:$0xf] %v734_v20  ;;  %737 = vst [vmem:[%s3765_s29 + $0x454] sm:$0xf] %v736_v21  ;;  %v738_v22 = vld [vmem:[%s3758_s28 + $0x8b0] sm:$0xf] }
  0xc9   : > { %v740_v23 = vld [vmem:[%s3758_s28 + $0x8b8] sm:$0xf]  ;;  %v742_v24 = vld [vmem:[%s3758_s28 + $0x8c0] sm:$0xf]  ;;  %739 = vst [vmem:[%s3765_s29 + $0x458] sm:$0xf] %v738_v22 }
  0xca   : > { %741 = vst [vmem:[%s3765_s29 + $0x45c] sm:$0xf] %v740_v23  ;;  %743 = vst [vmem:[%s3765_s29 + $0x460] sm:$0xf] %v742_v24  ;;  %v744_v25 = vld [vmem:[%s3758_s28 + $0x8c8] sm:$0xf] }
  0xcb   : > { %v746_v26 = vld [vmem:[%s3758_s28 + $0x8d0] sm:$0xf]  ;;  %v748_v27 = vld [vmem:[%s3758_s28 + $0x8d8] sm:$0xf]  ;;  %745 = vst [vmem:[%s3765_s29 + $0x464] sm:$0xf] %v744_v25 }
  0xcc   : > { %747 = vst [vmem:[%s3765_s29 + $0x468] sm:$0xf] %v746_v26  ;;  %749 = vst [vmem:[%s3765_s29 + $0x46c] sm:$0xf] %v748_v27  ;;  %v750_v28 = vld [vmem:[%s3758_s28 + $0x8e0] sm:$0xf] }
  0xcd   : > { %v752_v29 = vld [vmem:[%s3758_s28 + $0x8e8] sm:$0xf]  ;;  %v754_v30 = vld [vmem:[%s3758_s28 + $0x8f0] sm:$0xf]  ;;  %751 = vst [vmem:[%s3765_s29 + $0x470] sm:$0xf] %v750_v28 }
  0xce   : > { %753 = vst [vmem:[%s3765_s29 + $0x474] sm:$0xf] %v752_v29  ;;  %755 = vst [vmem:[%s3765_s29 + $0x478] sm:$0xf] %v754_v30  ;;  %v756_v31 = vld [vmem:[%s3758_s28 + $0x8f8] sm:$0xf] }
  0xcf   : > { %757 = vst [vmem:[%s3765_s29 + $0x47c] sm:$0xf] %v756_v31 }
  0xd0 PF: > { %p3121_p5 = scmp.ge.s32.totalorder %s3697_s17, 1  ;;  %p1368_p6 = scmp.lt.s32.totalorder %s3697_s17, 3 }
  0xd2   : > { %p1369_p7 = pnand %p3121_p5, %p1368_p6 }
  0xd3   : > { %s1375_s30 = sand.u32 (!%p1369_p7), 1, %s3689_s15   ;;  %p1405_p8 = scmp.lt.s32.totalorder (!%p1369_p7), %s3116_s18, 1 }
  0xd4   : > { %1372 = sbr.rel (%p1369_p7) target bundleno = 628 (0x274), region = 73 }
  0xd5   : > { %s3486_s9 = smul.u32 (!%p1369_p7), 1152, %s1375_s30 }
  0xd7   : > { %s4355_s10 = scalar_lea.vmem (!%p1369_p7), [#allocation2], %s3486_s9 }
  0xd9   : > { %v4344_v32 = vld [vmem:[%s4573_s0] sm:$0xff]  ;;  %v4349_v33 = vld [vmem:[%s4573_s0 + $0x8] sm:$0xff]  ;;  %v3511_v36 = vld [vmem:[%s4355_s10 + $0x78] sm:$0xff]   ;;  %s4582_s18 = smov (!%p1405_p8, %s3116_s18), 1 }
  0xda   : > { %v3124_v34 = vcombine.high %v4344_v32, %v4344_v32  ;;  %v3126_v35 = vcombine.high %v4349_v33, %v4349_v33  ;;  %v3512_v37 = vld [vmem:[%s4355_s10 + $0xf8] sm:$0xff]   ;;  %3287 = vmatprep.subr.bf16.mxu0 %v3511_v36  ;;  %v3515_v40 = vld [vmem:[%s4355_s10 + $0x70] sm:$0xff]   ;;  %v3519_v44 = vld [vmem:[%s4355_s10 + $0x68] sm:$0xff]   ;;  %v3123_v6 = vcombine.low %v4344_v32, %v4344_v32  ;;  %v3125_v7 = vcombine.low %v4349_v33, %v4349_v33  ;;  %s1407_s6 = scalar_lea.vmem %s4575_s2, %s4582_s18  ;;  %s1410_s9 = scalar_lea.vmem %s4576_s3, %s4582_s18 }
  0xdb   : > { %v3513_v38 = vld [vmem:[%s4355_s10 + $0x38] sm:$0xff]   ;;  %3309 = vmatprep.subr.bf16.mxu1 %v3512_v37  ;;  %v3516_v41 = vld [vmem:[%s4355_s10 + $0xf0] sm:$0xff]   ;;  %v3520_v45 = vld [vmem:[%s4355_s10 + $0xe8] sm:$0xff]   ;;  %s3122_s17 = sshll.u32 %s4582_s18, 3 }
  0xdc   : > { %2672 = vmatprep.mubr.bf16.mxu0 %v3124_v34  ;;  %2712 = vmatprep.mubr.bf16.mxu1 %v3126_v35  ;;  %v3514_v39 = vld [vmem:[%s4355_s10 + $0xb8] sm:$0xff]   ;;  %v3517_v42 = vld [vmem:[%s4355_s10 + $0x30] sm:$0xff]   ;;  %v3521_v46 = vld [vmem:[%s4355_s10 + $0x28] sm:$0xff]   ;;  %s1414_s12 = scalar_lea.vmem %s4577_s4, %s3122_s17 }
  0xdd   : > { %3288 = vmatpush3.bf16.msra.mxu0 %v3513_v38  ;;  %3310 = vmatpush3.bf16.msra.mxu1 %v3514_v39  ;;  %v3518_v43 = vld [vmem:[%s4355_s10 + $0xb0] sm:$0xff]   ;;  %v3522_v47 = vld [vmem:[%s4355_s10 + $0xa8] sm:$0xff]   ;;  %v3523_v48 = vld [vmem:[%s4355_s10 + $0x60] sm:$0xff]  }
  0xde   : > { %3289 = vmatprep.subr.bf16.mxu0 %v3515_v40  ;;  %3311 = vmatprep.subr.bf16.mxu1 %v3516_v41  ;;  %v3524_v49 = vld [vmem:[%s4355_s10 + $0xe0] sm:$0xff]   ;;  %v3527_v52 = vld [vmem:[%s4355_s10 + $0x58] sm:$0xff]   ;;  %v3531_v56 = vld [vmem:[%s4355_s10 + $0x50] sm:$0xff]  }
  0xdf   : > { %v3525_v50 = vld [vmem:[%s4355_s10 + $0x20] sm:$0xff]   ;;  %v3528_v53 = vld [vmem:[%s4355_s10 + $0xd8] sm:$0xff]   ;;  %v3532_v57 = vld [vmem:[%s4355_s10 + $0xd0] sm:$0xff]  }
  0xe0   : > { %v3526_v51 = vld [vmem:[%s4355_s10 + $0xa0] sm:$0xff]   ;;  %v3529_v54 = vld [vmem:[%s4355_s10 + $0x18] sm:$0xff]   ;;  %v3533_v58 = vld [vmem:[%s4355_s10 + $0x10] sm:$0xff]  }
  0xe1   : > { %3290 = vmatpush3.bf16.msra.mxu0 %v3517_v42  ;;  %3312 = vmatpush3.bf16.msra.mxu1 %v3518_v43  ;;  %v3530_v55 = vld [vmem:[%s4355_s10 + $0x98] sm:$0xff]   ;;  %v3534_v59 = vld [vmem:[%s4355_s10 + $0x90] sm:$0xff]   ;;  %v3535_v60 = vld [vmem:[%s4355_s10 + $0x48] sm:$0xff]  }
  0xe2   : > { %3291 = vmatprep.subr.bf16.mxu0 %v3519_v44  ;;  %3313 = vmatprep.subr.bf16.mxu1 %v3520_v45  ;;  %v3536_v61 = vld [vmem:[%s4355_s10 + $0xc8] sm:$0xff]   ;;  %v3539_v0 = vld [vmem:[%s4355_s10 + $0x40] sm:$0xff]   ;;  %v4389_v1 = vld [vmem:[%s4573_s0 + $0x10] sm:$0xff] }
  0xe3   : > { %v3537_v62 = vld [vmem:[%s4355_s10 + $0x8] sm:$0xff]   ;;  %v3540_v2 = vld [vmem:[%s4355_s10 + $0xc0] sm:$0xff]   ;;  %v4396_v4 = vld [vmem:[%s4573_s0 + $0x18] sm:$0xff]  ;;  %v3128_v10 = vcombine.high %v4389_v1, %v4389_v1  ;;  %v3127_v43 = vcombine.low %v4389_v1, %v4389_v1 }
  0xe4   : > { %v3538_v63 = vld [vmem:[%s4355_s10 + $0x88] sm:$0xff]   ;;  %v3541_v3 = vld [vmem:[%s4355_s10] sm:$0xff]   ;;  %v3547_v8 = vld [vmem:[%s4355_s10 + $0x178] sm:$0xff]   ;;  %v3130_v13 = vcombine.high %v4396_v4, %v4396_v4 }
  0xe5   : > { %3292 = vmatpush3.bf16.msra.mxu0 %v3521_v46  ;;  %3314 = vmatpush3.bf16.msra.mxu1 %v3522_v47  ;;  %v3542_v5 = vld [vmem:[%s4355_s10 + $0x80] sm:$0xff]   ;;  %v3548_v9 = vld [vmem:[%s4355_s10 + $0x138] sm:$0xff]   ;;  %v3551_v14 = vld [vmem:[%s4355_s10 + $0x170] sm:$0xff]   ;;  %v3129_v46 = vcombine.low %v4396_v4, %v4396_v4 }
  0xe6   : > { %3293 = vmatprep.subr.bf16.mxu0 %v3523_v48  ;;  %3315 = vmatprep.subr.bf16.mxu1 %v3524_v49  ;;  %v3549_v11 = vld [vmem:[%s4355_s10 + $0x1f8] sm:$0xff]   ;;  %v3552_v15 = vld [vmem:[%s4355_s10 + $0x130] sm:$0xff]   ;;  %v3555_v18 = vld [vmem:[%s4355_s10 + $0x168] sm:$0xff]  }
  0xe7   : > { %v3550_v12 = vld [vmem:[%s4355_s10 + $0x1b8] sm:$0xff]   ;;  %v3553_v16 = vld [vmem:[%s4355_s10 + $0x1f0] sm:$0xff]   ;;  %v3556_v19 = vld [vmem:[%s4355_s10 + $0x128] sm:$0xff]  }
  0xe8   : > { %v3554_v17 = vld [vmem:[%s4355_s10 + $0x1b0] sm:$0xff]   ;;  %v3557_v20 = vld [vmem:[%s4355_s10 + $0x1e8] sm:$0xff]   ;;  %v3559_v22 = vld [vmem:[%s4355_s10 + $0x160] sm:$0xff]  }
  0xe9   : > { %3294 = vmatpush3.bf16.msra.mxu0 %v3525_v50  ;;  %3316 = vmatpush3.bf16.msra.mxu1 %v3526_v51  ;;  %v3558_v21 = vld [vmem:[%s4355_s10 + $0x1a8] sm:$0xff]   ;;  %v3560_v23 = vld [vmem:[%s4355_s10 + $0x120] sm:$0xff]   ;;  %v3563_v26 = vld [vmem:[%s4355_s10 + $0x158] sm:$0xff]  }
  0xea   : > { %3295 = vmatprep.subr.bf16.mxu0 %v3527_v52  ;;  %3317 = vmatprep.subr.bf16.mxu1 %v3528_v53  ;;  %v3561_v24 = vld [vmem:[%s4355_s10 + $0x1e0] sm:$0xff]   ;;  %v3564_v27 = vld [vmem:[%s4355_s10 + $0x118] sm:$0xff]   ;;  %v3567_v30 = vld [vmem:[%s4355_s10 + $0x150] sm:$0xff]  }
  0xeb   : > { %v3562_v25 = vld [vmem:[%s4355_s10 + $0x1a0] sm:$0xff]   ;;  %v3565_v28 = vld [vmem:[%s4355_s10 + $0x1d8] sm:$0xff]   ;;  %v3568_v31 = vld [vmem:[%s4355_s10 + $0x110] sm:$0xff]  }
  0xec   : > { %v3566_v29 = vld [vmem:[%s4355_s10 + $0x198] sm:$0xff]   ;;  %v3569_v32 = vld [vmem:[%s4355_s10 + $0x1d0] sm:$0xff]   ;;  %v3571_v34 = vld [vmem:[%s4355_s10 + $0x148] sm:$0xff]  }
  0xed   : > { %3296 = vmatpush3.bf16.msra.mxu0 %v3529_v54  ;;  %3318 = vmatpush3.bf16.msra.mxu1 %v3530_v55  ;;  %v3570_v33 = vld [vmem:[%s4355_s10 + $0x190] sm:$0xff]   ;;  %v3572_v35 = vld [vmem:[%s4355_s10 + $0x108] sm:$0xff]   ;;  %v3575_v38 = vld [vmem:[%s4355_s10 + $0x140] sm:$0xff]  }
  0xee   : > { %3297 = vmatprep.subr.bf16.mxu0 %v3531_v56  ;;  %3319 = vmatprep.subr.bf16.mxu1 %v3532_v57  ;;  %v3573_v36 = vld [vmem:[%s4355_s10 + $0x1c8] sm:$0xff]   ;;  %v4439_v39 = vld [vmem:[%s4573_s0 + $0x20] sm:$0xff]  ;;  %v3581_v45 = vld [vmem:[%s4355_s10 + $0x278] sm:$0xff]  }
  0xef   : > { %v3574_v37 = vld [vmem:[%s4355_s10 + $0x188] sm:$0xff]   ;;  %v3576_v40 = vld [vmem:[%s4355_s10 + $0x100] sm:$0xff]   ;;  %v3584_v47 = vld [vmem:[%s4355_s10 + $0x238] sm:$0xff]   ;;  %v3132_v48 = vcombine.high %v4439_v39, %v4439_v39 }
  0xf0   : > { %v3577_v41 = vld [vmem:[%s4355_s10 + $0x1c0] sm:$0xff]   ;;  %v4446_v42 = vld [vmem:[%s4573_s0 + $0x28] sm:$0xff]  ;;  %v3585_v49 = vld [vmem:[%s4355_s10 + $0x2f8] sm:$0xff]  }
  0xf1   : > { %3298 = vmatpush3.bf16.msra.mxu0 %v3533_v58  ;;  %3320 = vmatpush3.bf16.msra.mxu1 %v3534_v59  ;;  %v3580_v44 = vld [vmem:[%s4355_s10 + $0x180] sm:$0xff]   ;;  %v3586_v50 = vld [vmem:[%s4355_s10 + $0x2b8] sm:$0xff]   ;;  %v3134_v51 = vcombine.high %v4446_v42, %v4446_v42  ;;  %v3587_v52 = vld [vmem:[%s4355_s10 + $0x270] sm:$0xff]  }
  0xf2   : > { %3299 = vmatprep.subr.bf16.mxu0 %v3535_v60  ;;  %3321 = vmatprep.subr.bf16.mxu1 %v3536_v61  ;;  %v3588_v53 = vld [vmem:[%s4355_s10 + $0x230] sm:$0xff]   ;;  %v3591_v56 = vld [vmem:[%s4355_s10 + $0x268] sm:$0xff]   ;;  %v3595_v60 = vld [vmem:[%s4355_s10 + $0x260] sm:$0xff]  }
  0xf3   : > { %v3589_v54 = vld [vmem:[%s4355_s10 + $0x2f0] sm:$0xff]   ;;  %v3592_v57 = vld [vmem:[%s4355_s10 + $0x228] sm:$0xff]   ;;  %v3596_v61 = vld [vmem:[%s4355_s10 + $0x220] sm:$0xff]  }
  0xf4   : > { %v3590_v55 = vld [vmem:[%s4355_s10 + $0x2b0] sm:$0xff]   ;;  %v3593_v58 = vld [vmem:[%s4355_s10 + $0x2e8] sm:$0xff]   ;;  %v3600_v1 = vld [vmem:[%s4355_s10 + $0x218] sm:$0xff]  }
  0xf5   : > { %3300 = vmatpush3.bf16.msra.mxu0 %v3537_v62  ;;  %3322 = vmatpush3.bf16.msra.mxu1 %v3538_v63  ;;  %v3594_v59 = vld [vmem:[%s4355_s10 + $0x2a8] sm:$0xff]   ;;  %v3597_v62 = vld [vmem:[%s4355_s10 + $0x2e0] sm:$0xff]   ;;  %v3603_v4 = vld [vmem:[%s4355_s10 + $0x250] sm:$0xff]  }
  0xf6   : > { %3301 = vmatprep.subr.bf16.mxu0 %v3539_v0  ;;  %3323 = vmatprep.subr.bf16.mxu1 %v3540_v2  ;;  %v3598_v63 = vld [vmem:[%s4355_s10 + $0x2a0] sm:$0xff]   ;;  %v3599_v0 = vld [vmem:[%s4355_s10 + $0x258] sm:$0xff]  }
  0xf7   : > { %v3601_v2 = vld [vmem:[%s4355_s10 + $0x2d8] sm:$0xff]  }
  0xf9   : > { %3302 = vmatpush3.bf16.msra.mxu0 %v3541_v3  ;;  %3324 = vmatpush3.bf16.msra.mxu1 %v3542_v5  ;;  %v3602_v3 = vld [vmem:[%s4355_s10 + $0x298] sm:$0xff]   ;;  %v3604_v5 = vld [vmem:[%s4355_s10 + $0x210] sm:$0xff]  }
  0xfa   : > { %3331 = vmatprep.subr.bf16.mxu0 %v3547_v8  ;;  %3353 = vmatprep.subr.bf16.mxu1 %v3549_v11  ;;  %v3607_v8 = vld [vmem:[%s4355_s10 + $0x248] sm:$0xff]  }
  0xfb   : > { %v3610_v11 = vld [vmem:[%s4355_s10 + $0x288] sm:$0xff]  }
  0xfc   : > { %2673 = vmatmul.mubr.bf16.vlgmr.msra.gmra.mxu0 %v3123_v6  ;;  %2713 = vmatmul.mubr.bf16.vlgmr.msra.gmra.mxu1 %v3125_v7  ;;  %v3605_v6 = vld [vmem:[%s4355_s10 + $0x2d0] sm:$0xff]  }
  0xfd   : > { %3332 = vmatpush3.bf16.msra.mxu0 %v3548_v9  ;;  %2752 = vmatprep.mubr.bf16.mxu0 %v3128_v10  ;;  %v3606_v7 = vld [vmem:[%s4355_s10 + $0x290] sm:$0xff]   ;;  %v3608_v9 = vld [vmem:[%s4355_s10 + $0x208] sm:$0xff]  }
  0xfe   : > { %3354 = vmatpush3.bf16.msra.mxu1 %v3550_v12  ;;  %3333 = vmatprep.subr.bf16.mxu0 %v3551_v14  ;;  %v3609_v10 = vld [vmem:[%s4355_s10 + $0x2c8] sm:$0xff]   ;;  %v3611_v12 = vld [vmem:[%s4355_s10 + $0x240] sm:$0xff]  }
  0xff   : > { %2792 = vmatprep.mubr.bf16.mxu1 %v3130_v13  ;;  %3355 = vmatprep.subr.bf16.mxu1 %v3553_v16  ;;  %v3612_v13 = vld [vmem:[%s4355_s10 + $0x200] sm:$0xff]  }
 0x100   : > { %v3613_v14 = vld [vmem:[%s4355_s10 + $0x2c0] sm:$0xff]  }
 0x101   : > { %3334 = vmatpush3.bf16.msra.mxu0 %v3552_v15  ;;  %v3131_v15 = vcombine.low %v4439_v39, %v4439_v39  ;;  %v3616_v16 = vld [vmem:[%s4355_s10 + $0x280] sm:$0xff]   ;;  %v3640_v39 = vld [vmem:[%s4355_s10 + $0x310] sm:$0xff]  }
 0x102   : > { %3356 = vmatpush3.bf16.msra.mxu1 %v3554_v17  ;;  %3335 = vmatprep.subr.bf16.mxu0 %v3555_v18  ;;  %v3617_v17 = vld [vmem:[%s4355_s10 + $0x378] sm:$0xff]   ;;  %v3133_v18 = vcombine.low %v4446_v42, %v4446_v42  ;;  %v3643_v42 = vld [vmem:[%s4355_s10 + $0x348] sm:$0xff]  }
 0x103   : > { %3357 = vmatprep.subr.bf16.mxu1 %v3557_v20  ;;  %v3621_v20 = vld [vmem:[%s4355_s10 + $0x3f8] sm:$0xff]  }
 0x105   : > { %3336 = vmatpush3.bf16.msra.mxu0 %v3556_v19  ;;  %v3620_v19 = vld [vmem:[%s4355_s10 + $0x338] sm:$0xff]  }
 0x106   : > { %3358 = vmatpush3.bf16.msra.mxu1 %v3558_v21  ;;  %3337 = vmatprep.subr.bf16.mxu0 %v3559_v22  ;;  %v3622_v21 = vld [vmem:[%s4355_s10 + $0x3b8] sm:$0xff]   ;;  %v3623_v22 = vld [vmem:[%s4355_s10 + $0x370] sm:$0xff]  }
 0x107   : > { %3359 = vmatprep.subr.bf16.mxu1 %v3561_v24  ;;  %v3625_v24 = vld [vmem:[%s4355_s10 + $0x3f0] sm:$0xff]  }
 0x109   : > { %3338 = vmatpush3.bf16.msra.mxu0 %v3560_v23  ;;  %v3624_v23 = vld [vmem:[%s4355_s10 + $0x330] sm:$0xff]  }
 0x10a   : > { %3360 = vmatpush3.bf16.msra.mxu1 %v3562_v25  ;;  %3339 = vmatprep.subr.bf16.mxu0 %v3563_v26  ;;  %v3626_v25 = vld [vmem:[%s4355_s10 + $0x3b0] sm:$0xff]   ;;  %v3627_v26 = vld [vmem:[%s4355_s10 + $0x368] sm:$0xff]  }
 0x10b   : > { %3361 = vmatprep.subr.bf16.mxu1 %v3565_v28  ;;  %v3629_v28 = vld [vmem:[%s4355_s10 + $0x3e8] sm:$0xff]  }
 0x10d   : > { %3340 = vmatpush3.bf16.msra.mxu0 %v3564_v27  ;;  %v3628_v27 = vld [vmem:[%s4355_s10 + $0x328] sm:$0xff]  }
 0x10e   : > { %3362 = vmatpush3.bf16.msra.mxu1 %v3566_v29  ;;  %3341 = vmatprep.subr.bf16.mxu0 %v3567_v30  ;;  %v3630_v29 = vld [vmem:[%s4355_s10 + $0x3a8] sm:$0xff]   ;;  %v3631_v30 = vld [vmem:[%s4355_s10 + $0x360] sm:$0xff]  }
 0x10f   : > { %3363 = vmatprep.subr.bf16.mxu1 %v3569_v32  ;;  %v3633_v32 = vld [vmem:[%s4355_s10 + $0x3e0] sm:$0xff]  }
 0x111   : > { %3342 = vmatpush3.bf16.msra.mxu0 %v3568_v31  ;;  %v3632_v31 = vld [vmem:[%s4355_s10 + $0x320] sm:$0xff]  }
 0x112   : > { %3364 = vmatpush3.bf16.msra.mxu1 %v3570_v33  ;;  %3343 = vmatprep.subr.bf16.mxu0 %v3571_v34  ;;  %v3634_v33 = vld [vmem:[%s4355_s10 + $0x3a0] sm:$0xff]   ;;  %v3635_v34 = vld [vmem:[%s4355_s10 + $0x358] sm:$0xff]  }
 0x113   : > { %3365 = vmatprep.subr.bf16.mxu1 %v3573_v36  ;;  %v3637_v36 = vld [vmem:[%s4355_s10 + $0x3d8] sm:$0xff]  }
 0x115   : > { %3344 = vmatpush3.bf16.msra.mxu0 %v3572_v35  ;;  %v3636_v35 = vld [vmem:[%s4355_s10 + $0x318] sm:$0xff]  }
 0x116   : > { %3366 = vmatpush3.bf16.msra.mxu1 %v3574_v37  ;;  %3345 = vmatprep.subr.bf16.mxu0 %v3575_v38  ;;  %v3638_v37 = vld [vmem:[%s4355_s10 + $0x398] sm:$0xff]   ;;  %v3639_v38 = vld [vmem:[%s4355_s10 + $0x350] sm:$0xff]  }
 0x117   : > { %3367 = vmatprep.subr.bf16.mxu1 %v3577_v41  ;;  %v3642_v41 = vld [vmem:[%s4355_s10 + $0x390] sm:$0xff]  }
 0x119   : > { %3346 = vmatpush3.bf16.msra.mxu0 %v3576_v40  ;;  %v3641_v40 = vld [vmem:[%s4355_s10 + $0x3d0] sm:$0xff]  }
 0x11a   : > { %3368 = vmatpush3.bf16.msra.mxu1 %v3580_v44  ;;  %3375 = vmatprep.subr.bf16.mxu0 %v3581_v45  ;;  %v3645_v44 = vld [vmem:[%s4355_s10 + $0x3c8] sm:$0xff]  }
 0x11b   : > { %3397 = vmatprep.subr.bf16.mxu1 %v3585_v49  ;;  %v3646_v45 = vld [vmem:[%s4355_s10 + $0x388] sm:$0xff]   ;;  %v1422_v49 = vld [vmem:[%s4573_s0 + $0x30] sm:$0xff] }
 0x11c   : > { %2753 = vmatmul.mubr.bf16.vlgmr.msra.gmra.mxu0 %v3127_v43  ;;  %v3644_v43 = vld [vmem:[%s4355_s10 + $0x308] sm:$0xff]  }
 0x11d   : > { %3376 = vmatpush3.bf16.msra.mxu0 %v3584_v47  ;;  %2793 = vmatmul.mubr.bf16.vlgmr.msra.gmra.mxu1 %v3129_v46  ;;  %v3647_v46 = vld [vmem:[%s4355_s10 + $0x340] sm:$0xff]  }
 0x11e   : > { %2832 = vmatprep.mubr.bf16.mxu0 %v3132_v48  ;;  %3398 = vmatpush3.bf16.msra.mxu1 %v3586_v50  ;;  %v3648_v47 = vld [vmem:[%s4355_s10 + $0x300] sm:$0xff]   ;;  %v3135_v50 = vcombine.low %v1422_v49, %v1422_v49 }
 0x11f   : > { %3377 = vmatprep.subr.bf16.mxu0 %v3587_v52  ;;  %2872 = vmatprep.mubr.bf16.mxu1 %v3134_v51  ;;  %v3649_v48 = vld [vmem:[%s4355_s10 + $0x3c0] sm:$0xff]   ;;  %v3136_v51 = vcombine.high %v1422_v49, %v1422_v49 }
 0x120   : > { %3399 = vmatprep.subr.bf16.mxu1 %v3589_v54  ;;  %v3652_v52 = vld [vmem:[%s4355_s10 + $0x380] sm:$0xff]   ;;  %v1423_v54 = vld [vmem:[%s4573_s0 + $0x38] sm:$0xff] }
 0x121   : > { %3378 = vmatpush3.bf16.msra.mxu0 %v3588_v53  ;;  %v3653_v53 = vld [vmem:[%s4355_s10 + $0x478] sm:$0xff]  }
 0x122   : > { %3400 = vmatpush3.bf16.msra.mxu1 %v3590_v55  ;;  %3379 = vmatprep.subr.bf16.mxu0 %v3591_v56  ;;  %v3137_v55 = vcombine.low %v1423_v54, %v1423_v54  ;;  %v3138_v56 = vcombine.high %v1423_v54, %v1423_v54 }
 0x123   : > { %3401 = vmatprep.subr.bf16.mxu1 %v3593_v58  ;;  %v3657_v58 = vld [vmem:[%s4355_s10 + $0x470] sm:$0xff]  }
 0x125   : > { %3380 = vmatpush3.bf16.msra.mxu0 %v3592_v57  ;;  %v3656_v57 = vld [vmem:[%s4355_s10 + $0x438] sm:$0xff]  }
 0x126   : > { %3402 = vmatpush3.bf16.msra.mxu1 %v3594_v59  ;;  %3381 = vmatprep.subr.bf16.mxu0 %v3595_v60  ;;  %v3658_v59 = vld [vmem:[%s4355_s10 + $0x430] sm:$0xff]   ;;  %v3659_v60 = vld [vmem:[%s4355_s10 + $0x468] sm:$0xff]  }
 0x127   : > { %3403 = vmatprep.subr.bf16.mxu1 %v3597_v62  ;;  %v3661_v62 = vld [vmem:[%s4355_s10 + $0x460] sm:$0xff]  }
 0x129   : > { %3382 = vmatpush3.bf16.msra.mxu0 %v3596_v61  ;;  %v3660_v61 = vld [vmem:[%s4355_s10 + $0x428] sm:$0xff]  }
 0x12a   : > { %3404 = vmatpush3.bf16.msra.mxu1 %v3598_v63  ;;  %3383 = vmatprep.subr.bf16.mxu0 %v3599_v0  ;;  %v3662_v63 = vld [vmem:[%s4355_s10 + $0x420] sm:$0xff]   ;;  %v3663_v0 = vld [vmem:[%s4355_s10 + $0x458] sm:$0xff]  }
 0x12b   : > { %3405 = vmatprep.subr.bf16.mxu1 %v3601_v2  ;;  %v1424_v2 = vld [vmem:[%s4573_s0 + $0x40] sm:$0xff] }
 0x12d   : > { %3384 = vmatpush3.bf16.msra.mxu0 %v3600_v1  ;;  %v3664_v1 = vld [vmem:[%s4355_s10 + $0x418] sm:$0xff]  }
 0x12e   : > { %3406 = vmatpush3.bf16.msra.mxu1 %v3602_v3  ;;  %3385 = vmatprep.subr.bf16.mxu0 %v3603_v4  ;;  %v3665_v3 = vld [vmem:[%s4355_s10 + $0x450] sm:$0xff]   ;;  %v3140_v4 = vcombine.high %v1424_v2, %v1424_v2 }
 0x12f   : > { %3407 = vmatprep.subr.bf16.mxu1 %v3605_v6  ;;  %v3667_v6 = vld [vmem:[%s4355_s10 + $0x448] sm:$0xff]  }
 0x131   : > { %3386 = vmatpush3.bf16.msra.mxu0 %v3604_v5  ;;  %v3666_v5 = vld [vmem:[%s4355_s10 + $0x410] sm:$0xff]  }
 0x132   : > { %3408 = vmatpush3.bf16.msra.mxu1 %v3606_v7  ;;  %3387 = vmatprep.subr.bf16.mxu0 %v3607_v8  ;;  %v3668_v7 = vld [vmem:[%s4355_s10 + $0x408] sm:$0xff]   ;;  %v3669_v8 = vld [vmem:[%s4355_s10 + $0x440] sm:$0xff]  }
 0x133   : > { %3409 = vmatprep.subr.bf16.mxu1 %v3609_v10  ;;  %v3139_v10 = vcombine.low %v1424_v2, %v1424_v2 }
 0x135   : > { %3388 = vmatpush3.bf16.msra.mxu0 %v3608_v9  ;;  %v3670_v9 = vld [vmem:[%s4355_s10 + $0x400] sm:$0xff]  }
 0x136   : > { %3410 = vmatpush3.bf16.msra.mxu1 %v3610_v11  ;;  %3389 = vmatprep.subr.bf16.mxu0 %v3611_v12 }
 0x137   : > { %3411 = vmatprep.subr.bf16.mxu1 %v3613_v14 }
 0x139   : > { %3390 = vmatpush3.bf16.msra.mxu0 %v3612_v13 }
 0x13a   : > { %3412 = vmatpush3.bf16.msra.mxu1 %v3616_v16  ;;  %3419 = vmatprep.subr.bf16.mxu0 %v3617_v17 }
 0x13b   : > { %3441 = vmatprep.subr.bf16.mxu1 %v3621_v20 }
 0x13c   : > { %2833 = vmatmul.mubr.bf16.vlgmr.msra.gmra.mxu0 %v3131_v15 }
 0x13d   : > { %3420 = vmatpush3.bf16.msra.mxu0 %v3620_v19  ;;  %2873 = vmatmul.mubr.bf16.vlgmr.msra.gmra.mxu1 %v3133_v18 }
 0x13e   : > { %3442 = vmatpush3.bf16.msra.mxu1 %v3622_v21  ;;  %3421 = vmatprep.subr.bf16.mxu0 %v3623_v22 }
 0x13f   : > { %3443 = vmatprep.subr.bf16.mxu1 %v3625_v24  ;;  %2912 = vmatprep.mubr.bf16.mxu0 %v3136_v51 }
 0x140   : > { %2952 = vmatprep.mubr.bf16.mxu1 %v3138_v56 }
 0x141   : > { %3422 = vmatpush3.bf16.msra.mxu0 %v3624_v23 }
 0x142   : > { %3444 = vmatpush3.bf16.msra.mxu1 %v3626_v25  ;;  %3423 = vmatprep.subr.bf16.mxu0 %v3627_v26 }
 0x143   : > { %3445 = vmatprep.subr.bf16.mxu1 %v3629_v28 }
 0x145   : > { %3424 = vmatpush3.bf16.msra.mxu0 %v3628_v27 }
 0x146   : > { %3446 = vmatpush3.bf16.msra.mxu1 %v3630_v29  ;;  %3425 = vmatprep.subr.bf16.mxu0 %v3631_v30 }
 0x147   : > { %3447 = vmatprep.subr.bf16.mxu1 %v3633_v32 }
 0x149   : > { %3426 = vmatpush3.bf16.msra.mxu0 %v3632_v31 }
 0x14a   : > { %3448 = vmatpush3.bf16.msra.mxu1 %v3634_v33  ;;  %3427 = vmatprep.subr.bf16.mxu0 %v3635_v34 }
 0x14b   : > { %3449 = vmatprep.subr.bf16.mxu1 %v3637_v36 }
 0x14d   : > { %3428 = vmatpush3.bf16.msra.mxu0 %v3636_v35 }
 0x14e   : > { %3450 = vmatpush3.bf16.msra.mxu1 %v3638_v37  ;;  %3429 = vmatprep.subr.bf16.mxu0 %v3639_v38 }
 0x14f   : > { %3451 = vmatprep.subr.bf16.mxu1 %v3641_v40 }
 0x151   : > { %3430 = vmatpush3.bf16.msra.mxu0 %v3640_v39 }
 0x152   : > { %3452 = vmatpush3.bf16.msra.mxu1 %v3642_v41  ;;  %3431 = vmatprep.subr.bf16.mxu0 %v3643_v42 }
 0x153   : > { %3453 = vmatprep.subr.bf16.mxu1 %v3645_v44 }
 0x155   : > { %3432 = vmatpush3.bf16.msra.mxu0 %v3644_v43 }
 0x156   : > { %3454 = vmatpush3.bf16.msra.mxu1 %v3646_v45  ;;  %3433 = vmatprep.subr.bf16.mxu0 %v3647_v46 }
 0x157   : > { %3455 = vmatprep.subr.bf16.mxu1 %v3649_v48 }
 0x159   : > { %3434 = vmatpush3.bf16.msra.mxu0 %v3648_v47 }
 0x15a   : > { %3456 = vmatpush3.bf16.msra.mxu1 %v3652_v52  ;;  %3463 = vmatprep.subr.bf16.mxu0 %v3653_v53 }
 0x15c   : > { %2913 = vmatmul.mubr.bf16.vlgmr.msra.gmra.mxu0 %v3135_v50 }
 0x15d   : > { %3464 = vmatpush3.bf16.msra.mxu0 %v3656_v57  ;;  %2953 = vmatmul.mubr.bf16.vlgmr.msra.gmra.mxu1 %v3137_v55 }
 0x15e   : > { %3465 = vmatprep.subr.bf16.mxu0 %v3657_v58  ;;  %2992 = vmatprep.mubr.bf16.mxu0 %v3140_v4 }
 0x161   : > { %3466 = vmatpush3.bf16.msra.mxu0 %v3658_v59 }
 0x162   : > { %3467 = vmatprep.subr.bf16.mxu0 %v3659_v60 }
 0x165   : > { %3468 = vmatpush3.bf16.msra.mxu0 %v3660_v61 }
 0x166   : > { %3469 = vmatprep.subr.bf16.mxu0 %v3661_v62 }
 0x169   : > { %3470 = vmatpush3.bf16.msra.mxu0 %v3662_v63 }
 0x16a   : > { %3471 = vmatprep.subr.bf16.mxu0 %v3663_v0 }
 0x16d   : > { %3472 = vmatpush3.bf16.msra.mxu0 %v3664_v1 }
 0x16e   : > { %3473 = vmatprep.subr.bf16.mxu0 %v3665_v3 }
 0x171   : > { %3474 = vmatpush3.bf16.msra.mxu0 %v3666_v5 }
 0x172   : > { %3475 = vmatprep.subr.bf16.mxu0 %v3667_v6 }
 0x175   : > { %3476 = vmatpush3.bf16.msra.mxu0 %v3668_v7 }
 0x176   : > { %3477 = vmatprep.subr.bf16.mxu0 %v3669_v8 }
 0x179   : > { %3478 = vmatpush3.bf16.msra.mxu0 %v3670_v9 }
 0x17c   : > { %2993 = vmatmul.mubr.bf16.vlgmr.msra.gmra.mxu0 %v3139_v10 }
 0x1bc   : > { %v3303_v11 = vpop.f32.mrf.mxu0  ;;  %v3325_v12 = vpop.f32.mrf.mxu1 }
 0x1be   : > { %v3304_v13 = vpop.f32.mrf.mxu0  ;;  %v3326_v15 = vpop.f32.mrf.mxu1 }
 0x1bf   : > { %v3305_v14 = vadd.f32 %v3304_v13, %v3303_v11  ;;  %v3327_v16 = vadd.f32 %v3326_v15, %v3325_v12 }
 0x1c0   : > { %v3306_v17 = vpop.f32.mrf.mxu0  ;;  %v3328_v18 = vpop.f32.mrf.mxu1 }
 0x1c1   : > { %v2715_v19 = vadd.f32 %v3327_v16, %v3305_v14 }
 0x1c2   : > { %v3307_v20 = vpop.f32.mrf.mxu0  ;;  %v3329_v21 = vpop.f32.mrf.mxu1 }
 0x1c3   : > { %v3020_v21 = vld [vmem:[%s1407_s6] sm:$0x1] }
 0x1dc   : > { %v3347_v22 = vpop.f32.mrf.mxu0 }
 0x1dd   : > { %v3369_v24 = vpop.f32.mrf.mxu1 }
 0x1de   : > { %v3348_v23 = vpop.f32.mrf.mxu0 }
 0x1df   : > { %v3349_v25 = vadd.f32 %v3348_v23, %v3347_v22  ;;  %v3370_v27 = vpop.f32.mrf.mxu1 }
 0x1e0   : > { %v3350_v26 = vpop.f32.mrf.mxu0  ;;  %v3371_v29 = vadd.f32 %v3370_v27, %v3369_v24 }
 0x1e1   : > { %v2755_v28 = vadd.f32 %v3349_v25, %v2715_v19  ;;  %v3372_v31 = vpop.f32.mrf.mxu1  ;;  %v3025_v19 = vlaneseq  ;;  %v3022_v25 = vld [vmem:[%s1410_s9] sm:$0x1] }
 0x1e2   : > { %v3351_v30 = vpop.f32.mrf.mxu0 }
 0x1e3   : > { %v2795_v32 = vadd.f32 %v3371_v29, %v2755_v28  ;;  %v3373_v33 = vpop.f32.mrf.mxu1  ;;  %v3026_v20 = vshrl.u32 %v3025_v19, 7 }
 0x1e5   : > { %v3027_v22 = vsub.s32 0, %v3026_v20 }
 0x1fc   : > { %v3391_v34 = vpop.f32.mrf.mxu0 }
 0x1fd   : > { %v3413_v36 = vpop.f32.mrf.mxu1 }
 0x1fe   : > { %v3392_v35 = vpop.f32.mrf.mxu0 }
 0x1ff   : > { %v3414_v38 = vpop.f32.mrf.mxu1  ;;  %v3393_v50 = vadd.f32 %v3392_v35, %v3391_v34 }
 0x200   : > { %v3394_v37 = vpop.f32.mrf.mxu0  ;;  %v3415_v52 = vadd.f32 %v3414_v38, %v3413_v36 }
 0x201   : > { %v3416_v40 = vpop.f32.mrf.mxu1  ;;  %v2835_v51 = vadd.f32 %v3393_v50, %v2795_v32 }
 0x202   : > { %v3395_v39 = vpop.f32.mrf.mxu0 }
 0x203   : > { %v3417_v41 = vpop.f32.mrf.mxu1  ;;  %v2875_v54 = vadd.f32 %v3415_v52, %v2835_v51 }
 0x21c   : > { %v3435_v42 = vpop.f32.mrf.mxu0 }
 0x21d   : > { %v3457_v44 = vpop.f32.mrf.mxu1 }
 0x21e   : > { %v3436_v43 = vpop.f32.mrf.mxu0 }
 0x21f   : > { %v3458_v46 = vpop.f32.mrf.mxu1  ;;  %v3437_v53 = vadd.f32 %v3436_v43, %v3435_v42 }
 0x220   : > { %v3438_v45 = vpop.f32.mrf.mxu0  ;;  %v3459_v56 = vadd.f32 %v3458_v46, %v3457_v44 }
 0x221   : > { %v3460_v48 = vpop.f32.mrf.mxu1  ;;  %v2915_v55 = vadd.f32 %v3437_v53, %v2875_v54 }
 0x222   : > { %v3439_v47 = vpop.f32.mrf.mxu0 }
 0x223   : > { %v3461_v49 = vpop.f32.mrf.mxu1  ;;  %v2955_v59 = vadd.f32 %v3459_v56, %v2915_v55 }
 0x23c   : > { %v3479_v57 = vpop.f32.mrf.mxu0 }
 0x23e   : > { %v3480_v58 = vpop.f32.mrf.mxu0 }
 0x23f   : > { %v3481_v60 = vadd.f32 %v3480_v58, %v3479_v57 }
 0x240   : > { %v3482_v61 = vpop.f32.mrf.mxu0 }
 0x241   : > { %v2995_v62 = vadd.f32 %v3481_v60, %v2955_v59 }
 0x242   : > { %v3483_v63 = vpop.f32.mrf.mxu0 }
 0x243   : > { %v3000_v0 = vrot.slane %v2995_v62, 4  ;;  %v3006_v1 = vmul.f32 %v2995_v62, %v2995_v62 }
 0x245   : > { %v3001_v2 = vadd.f32 %v3000_v0, %v2995_v62  ;;  %v3007_v3 = vrot.slane %v3006_v1, 4 }
 0x247   : > { %v3002_v4 = vrot.slane %v3001_v2, 2  ;;  %v3008_v5 = vadd.f32 %v3007_v3, %v3006_v1 }
 0x249   : > { %v3003_v6 = vadd.f32 %v3002_v4, %v3001_v2  ;;  %v3009_v7 = vrot.slane %v3008_v5, 2 }
 0x24b   : > { %v3004_v8 = vrot.slane %v3003_v6, 1  ;;  %v3010_v9 = vadd.f32 %v3009_v7, %v3008_v5 }
 0x24d   : > { %v3005_v10 = vadd.f32 %v3004_v8, %v3003_v6  ;;  %v3011_v11 = vrot.slane %v3010_v9, 1 }
 0x24f   : > { %v3012_v12 = vadd.f32 %v3011_v11, %v3010_v9  ;;  %v3013_v13 = vmul.f32 0.125, %v3005_v10 }
 0x251   : > { %v3014_v14 = vmul.f32 0.125, %v3012_v12  ;;  %v3015_v15 = vmul.f32 %v3013_v13, %v3013_v13 }
 0x253   : > { %v3016_v16 = vsub.f32 %v3014_v14, %v3015_v15 }
 0x255   : > { %v3017_v17 = vmax.f32 %v3016_v16, 0.0 }
 0x257   : > { %v3018_v18 = vadd.f32 1e-05, %v3017_v17 }
 0x259   : > { %3673 = vrsqrt.f32 %v3018_v18 }
 0x266   : > { %v3674_v23 = vpop.eup %3673 }
 0x267   : > { %v3021_v24 = vmul.f32 %v3674_v23, %v3020_v21 }
 0x269   : > { %v3023_v26 = vmul.f32 %v3021_v24, %v3013_v13  ;;  %v3028_v27 = vrot.slane %v3021_v24, %v3027_v22 }
 0x26b   : > { %v3024_v28 = vsub.f32 %v3022_v25, %v3023_v26  ;;  %v3029_v29 = vmul.f32 %v3028_v27, %v2995_v62 }
 0x26d   : > { %v3034_v30 = vrot.slane %v3024_v28, %v3027_v22 }
 0x26f   : > { %v3036_v31 = vadd.f32 %v3034_v30, %v3029_v29 }
 0x271   : > { %v3037_v32 = vmax.f32 %v3036_v31, 0.0 }
 0x273   : > { %3038 = vst [vmem:[%s1414_s12] sm:$0xff] %v3037_v32 }
 0x274 PF: > { %p11_p9 = scmp.ge.s32.totalorder %s3741_s19, 4   ;;  %s4578_s15 = smov %s3693_s16 }
 0x275   : > { %s4579_s16 = smov %s3750_s22  ;;  %s4580_s17 = smov %s3741_s19 }
 0x276   :  { %13 = sbr.rel (!%p11_p9) target bundleno = 2 (0x2), region = 118 }

// kernel: resnet_forward.29
= control target key start
LH: loop header
LB: loop body
LE: loop exit
PB: predicated region body
PF: predicated region fallthrough
CT: control target
= control target key end

     0   :  { %s3788_s18 = smov 0   ;;  %s3790_s19 = smov 0   ;;  %s4640_s0 = inlined_call_operand.vmem [shape: bf16[8,2304], index: 0, kind: input, shape index: {}]   ;;  %s4641_s1 = inlined_call_operand.vmem [shape: bf16[2304,256], index: 1, kind: input, shape index: {}]   ;;  %s4642_s2 = inlined_call_operand.vmem [shape: f32[1,256], index: 2, kind: input, shape index: {}]   ;;  %s4643_s3 = inlined_call_operand.vmem [shape: f32[1,256], index: 3, kind: input, shape index: {}]   ;;  %s4644_s4 = inlined_call_operand.vmem [shape: f32[8,256], index: 4, kind: input, shape index: {}]   ;;  %s4645_s5 = inlined_call_operand.vmem [shape: f32[8,256], index: 5, kind: output, shape index: {}]  }
   0x1   :  { %s3792_s20 = smov 0  }
   0x2 LB: > { %s3174_s21 = sadd.s32 4294967295, %s3756_s20   ;;  %s3805_s22 = sadd.s32 1, %s3756_s20   ;;  %s3756_s20 = sphi %s3792_s20, %s4648_s20   ;;  %s3752_s19 = sphi %s3790_s19, %s4647_s19   ;;  %s3748_s18 = sphi %s3788_s18, %s4646_s18  }
   0x3   : > { %s40_s23 = ssub.s32 %s3756_s20, %s3805_s22  ;;  %s43_s24 = sadd.s32 1, %s3752_s19 }
   0x4   : > { %p41_p0 = scmp.eq.s32.totalorder %s40_s23, 0  ;;  %p50_p1 = scmp.ne.s32.totalorder %s3752_s19, %s3748_s18 }
   0x5   : > { %p51_p2 = scmp.eq.s32.totalorder %s3756_s20, 0  ;;  %p3177_p4 = scmp.ge.s32.totalorder %s3756_s20, 2 }
   0x6   : > { %s3814_s25 = scalar_select %p41_p0, %s3752_s19, %s43_s24  }
   0x7   : > { %p52_p3 = por %p51_p2, %p50_p1  ;;  %183 = sbr.rel (%p3177_p4) target bundleno = 208 (0xd0), region = 20 }
   0xc   : > { %186 = sbr.rel (!%p52_p3) target bundleno = 208 (0xd0), region = 24  ;;  %s188_s26 = sand.u32 (%p52_p3), 1, %s3752_s19  }
   0xd   : > { %s3178_s27 = sshll.u32 (%p52_p3), %s3756_s20, 2  ;;  %s3544_s28 = smul.u32 (%p52_p3), 1152, %s188_s26 }
   0xe   : > { %s3822_s6 = scalar_lea.vmem (%p52_p3), %s4641_s1, %s3178_s27 }
   0xf   : > { %v209_v0 = vld [vmem:[%s3822_s6] sm:$0xf] (%p52_p3)  ;;  %v211_v1 = vld [vmem:[%s3822_s6 + $0x8] sm:$0xf] (%p52_p3)  ;;  %v213_v2 = vld [vmem:[%s3822_s6 + $0x10] sm:$0xf] (%p52_p3) }
  0x10   : > { %v215_v3 = vld [vmem:[%s3822_s6 + $0x18] sm:$0xf] (%p52_p3)  ;;  %v217_v4 = vld [vmem:[%s3822_s6 + $0x20] sm:$0xf] (%p52_p3)  ;;  %s3829_s7 = scalar_lea.vmem (%p52_p3), [#allocation2], %s3544_s28 }
  0x11   : > { %210 = vst [vmem:[%s3829_s7] sm:$0xf] %v209_v0  ;;  %212 = vst [vmem:[%s3829_s7 + $0x4] sm:$0xf] %v211_v1  ;;  %v219_v5 = vld [vmem:[%s3822_s6 + $0x28] sm:$0xf] }
  0x12   : > { %214 = vst [vmem:[%s3829_s7 + $0x8] sm:$0xf] %v213_v2  ;;  %216 = vst [vmem:[%s3829_s7 + $0xc] sm:$0xf] %v215_v3  ;;  %v221_v6 = vld [vmem:[%s3822_s6 + $0x30] sm:$0xf] }
  0x13   : > { %218 = vst [vmem:[%s3829_s7 + $0x10] sm:$0xf] %v217_v4  ;;  %v223_v7 = vld [vmem:[%s3822_s6 + $0x38] sm:$0xf]  ;;  %220 = vst [vmem:[%s3829_s7 + $0x14] sm:$0xf] %v219_v5 }
  0x14   : > { %222 = vst [vmem:[%s3829_s7 + $0x18] sm:$0xf] %v221_v6  ;;  %224 = vst [vmem:[%s3829_s7 + $0x1c] sm:$0xf] %v223_v7  ;;  %v225_v8 = vld [vmem:[%s3822_s6 + $0x40] sm:$0xf] }
  0x15   : > { %v227_v9 = vld [vmem:[%s3822_s6 + $0x48] sm:$0xf]  ;;  %v229_v10 = vld [vmem:[%s3822_s6 + $0x50] sm:$0xf]  ;;  %226 = vst [vmem:[%s3829_s7 + $0x20] sm:$0xf] %v225_v8 }
  0x16   : > { %228 = vst [vmem:[%s3829_s7 + $0x24] sm:$0xf] %v227_v9  ;;  %230 = vst [vmem:[%s3829_s7 + $0x28] sm:$0xf] %v229_v10  ;;  %v231_v11 = vld [vmem:[%s3822_s6 + $0x58] sm:$0xf] }
  0x17   : > { %v233_v12 = vld [vmem:[%s3822_s6 + $0x60] sm:$0xf]  ;;  %v235_v13 = vld [vmem:[%s3822_s6 + $0x68] sm:$0xf]  ;;  %232 = vst [vmem:[%s3829_s7 + $0x2c] sm:$0xf] %v231_v11 }
  0x18   : > { %234 = vst [vmem:[%s3829_s7 + $0x30] sm:$0xf] %v233_v12  ;;  %236 = vst [vmem:[%s3829_s7 + $0x34] sm:$0xf] %v235_v13  ;;  %v237_v14 = vld [vmem:[%s3822_s6 + $0x70] sm:$0xf] }
  0x19   : > { %v239_v15 = vld [vmem:[%s3822_s6 + $0x78] sm:$0xf]  ;;  %v241_v16 = vld [vmem:[%s3822_s6 + $0x80] sm:$0xf]  ;;  %238 = vst [vmem:[%s3829_s7 + $0x38] sm:$0xf] %v237_v14 }
  0x1a   : > { %240 = vst [vmem:[%s3829_s7 + $0x3c] sm:$0xf] %v239_v15  ;;  %242 = vst [vmem:[%s3829_s7 + $0x40] sm:$0xf] %v241_v16  ;;  %v243_v17 = vld [vmem:[%s3822_s6 + $0x88] sm:$0xf] }
  0x1b   : > { %v245_v18 = vld [vmem:[%s3822_s6 + $0x90] sm:$0xf]  ;;  %v247_v19 = vld [vmem:[%s3822_s6 + $0x98] sm:$0xf]  ;;  %244 = vst [vmem:[%s3829_s7 + $0x44] sm:$0xf] %v243_v17 }
  0x1c   : > { %246 = vst [vmem:[%s3829_s7 + $0x48] sm:$0xf] %v245_v18  ;;  %248 = vst [vmem:[%s3829_s7 + $0x4c] sm:$0xf] %v247_v19  ;;  %v249_v20 = vld [vmem:[%s3822_s6 + $0xa0] sm:$0xf] }
  0x1d   : > { %v251_v21 = vld [vmem:[%s3822_s6 + $0xa8] sm:$0xf]  ;;  %v253_v22 = vld [vmem:[%s3822_s6 + $0xb0] sm:$0xf]  ;;  %250 = vst [vmem:[%s3829_s7 + $0x50] sm:$0xf] %v249_v20 }
  0x1e   : > { %252 = vst [vmem:[%s3829_s7 + $0x54] sm:$0xf] %v251_v21  ;;  %254 = vst [vmem:[%s3829_s7 + $0x58] sm:$0xf] %v253_v22  ;;  %v255_v23 = vld [vmem:[%s3822_s6 + $0xb8] sm:$0xf] }
  0x1f   : > { %v257_v24 = vld [vmem:[%s3822_s6 + $0xc0] sm:$0xf]  ;;  %v259_v25 = vld [vmem:[%s3822_s6 + $0xc8] sm:$0xf]  ;;  %256 = vst [vmem:[%s3829_s7 + $0x5c] sm:$0xf] %v255_v23 }
  0x20   : > { %258 = vst [vmem:[%s3829_s7 + $0x60] sm:$0xf] %v257_v24  ;;  %260 = vst [vmem:[%s3829_s7 + $0x64] sm:$0xf] %v259_v25  ;;  %v261_v26 = vld [vmem:[%s3822_s6 + $0xd0] sm:$0xf] }
  0x21   : > { %v263_v27 = vld [vmem:[%s3822_s6 + $0xd8] sm:$0xf]  ;;  %v265_v28 = vld [vmem:[%s3822_s6 + $0xe0] sm:$0xf]  ;;  %262 = vst [vmem:[%s3829_s7 + $0x68] sm:$0xf] %v261_v26 }
  0x22   : > { %264 = vst [vmem:[%s3829_s7 + $0x6c] sm:$0xf] %v263_v27  ;;  %266 = vst [vmem:[%s3829_s7 + $0x70] sm:$0xf] %v265_v28  ;;  %v267_v29 = vld [vmem:[%s3822_s6 + $0xe8] sm:$0xf] }
  0x23   : > { %v269_v30 = vld [vmem:[%s3822_s6 + $0xf0] sm:$0xf]  ;;  %v271_v31 = vld [vmem:[%s3822_s6 + $0xf8] sm:$0xf]  ;;  %268 = vst [vmem:[%s3829_s7 + $0x74] sm:$0xf] %v267_v29 }
  0x24   : > { %270 = vst [vmem:[%s3829_s7 + $0x78] sm:$0xf] %v269_v30  ;;  %272 = vst [vmem:[%s3829_s7 + $0x7c] sm:$0xf] %v271_v31  ;;  %v273_v32 = vld [vmem:[%s3822_s6 + $0x100] sm:$0xf] }
  0x25   : > { %v275_v33 = vld [vmem:[%s3822_s6 + $0x108] sm:$0xf]  ;;  %v277_v34 = vld [vmem:[%s3822_s6 + $0x110] sm:$0xf]  ;;  %274 = vst [vmem:[%s3829_s7 + $0x80] sm:$0xf] %v273_v32 }
  0x26   : > { %276 = vst [vmem:[%s3829_s7 + $0x84] sm:$0xf] %v275_v33  ;;  %278 = vst [vmem:[%s3829_s7 + $0x88] sm:$0xf] %v277_v34  ;;  %v279_v35 = vld [vmem:[%s3822_s6 + $0x118] sm:$0xf] }
  0x27   : > { %v281_v36 = vld [vmem:[%s3822_s6 + $0x120] sm:$0xf]  ;;  %v283_v37 = vld [vmem:[%s3822_s6 + $0x128] sm:$0xf]  ;;  %280 = vst [vmem:[%s3829_s7 + $0x8c] sm:$0xf] %v279_v35 }
  0x28   : > { %282 = vst [vmem:[%s3829_s7 + $0x90] sm:$0xf] %v281_v36  ;;  %284 = vst [vmem:[%s3829_s7 + $0x94] sm:$0xf] %v283_v37  ;;  %v285_v38 = vld [vmem:[%s3822_s6 + $0x130] sm:$0xf] }
  0x29   : > { %v287_v39 = vld [vmem:[%s3822_s6 + $0x138] sm:$0xf]  ;;  %v289_v40 = vld [vmem:[%s3822_s6 + $0x140] sm:$0xf]  ;;  %286 = vst [vmem:[%s3829_s7 + $0x98] sm:$0xf] %v285_v38 }
  0x2a   : > { %288 = vst [vmem:[%s3829_s7 + $0x9c] sm:$0xf] %v287_v39  ;;  %290 = vst [vmem:[%s3829_s7 + $0xa0] sm:$0xf] %v289_v40  ;;  %v291_v41 = vld [vmem:[%s3822_s6 + $0x148] sm:$0xf] }
  0x2b   : > { %v293_v42 = vld [vmem:[%s3822_s6 + $0x150] sm:$0xf]  ;;  %v295_v43 = vld [vmem:[%s3822_s6 + $0x158] sm:$0xf]  ;;  %292 = vst [vmem:[%s3829_s7 + $0xa4] sm:$0xf] %v291_v41 }
  0x2c   : > { %294 = vst [vmem:[%s3829_s7 + $0xa8] sm:$0xf] %v293_v42  ;;  %296 = vst [vmem:[%s3829_s7 + $0xac] sm:$0xf] %v295_v43  ;;  %v297_v44 = vld [vmem:[%s3822_s6 + $0x160] sm:$0xf] }
  0x2d   : > { %v299_v45 = vld [vmem:[%s3822_s6 + $0x168] sm:$0xf]  ;;  %v301_v46 = vld [vmem:[%s3822_s6 + $0x170] sm:$0xf]  ;;  %298 = vst [vmem:[%s3829_s7 + $0xb0] sm:$0xf] %v297_v44 }
  0x2e   : > { %300 = vst [vmem:[%s3829_s7 + $0xb4] sm:$0xf] %v299_v45  ;;  %302 = vst [vmem:[%s3829_s7 + $0xb8] sm:$0xf] %v301_v46  ;;  %v303_v47 = vld [vmem:[%s3822_s6 + $0x178] sm:$0xf] }
  0x2f   : > { %v305_v48 = vld [vmem:[%s3822_s6 + $0x180] sm:$0xf]  ;;  %v307_v49 = vld [vmem:[%s3822_s6 + $0x188] sm:$0xf]  ;;  %304 = vst [vmem:[%s3829_s7 + $0xbc] sm:$0xf] %v303_v47 }
  0x30   : > { %306 = vst [vmem:[%s3829_s7 + $0xc0] sm:$0xf] %v305_v48  ;;  %308 = vst [vmem:[%s3829_s7 + $0xc4] sm:$0xf] %v307_v49  ;;  %v309_v50 = vld [vmem:[%s3822_s6 + $0x190] sm:$0xf] }
  0x31   : > { %v311_v51 = vld [vmem:[%s3822_s6 + $0x198] sm:$0xf]  ;;  %v313_v52 = vld [vmem:[%s3822_s6 + $0x1a0] sm:$0xf]  ;;  %310 = vst [vmem:[%s3829_s7 + $0xc8] sm:$0xf] %v309_v50 }
  0x32   : > { %312 = vst [vmem:[%s3829_s7 + $0xcc] sm:$0xf] %v311_v51  ;;  %314 = vst [vmem:[%s3829_s7 + $0xd0] sm:$0xf] %v313_v52  ;;  %v315_v53 = vld [vmem:[%s3822_s6 + $0x1a8] sm:$0xf] }
  0x33   : > { %v317_v54 = vld [vmem:[%s3822_s6 + $0x1b0] sm:$0xf]  ;;  %v319_v55 = vld [vmem:[%s3822_s6 + $0x1b8] sm:$0xf]  ;;  %316 = vst [vmem:[%s3829_s7 + $0xd4] sm:$0xf] %v315_v53 }
  0x34   : > { %318 = vst [vmem:[%s3829_s7 + $0xd8] sm:$0xf] %v317_v54  ;;  %320 = vst [vmem:[%s3829_s7 + $0xdc] sm:$0xf] %v319_v55  ;;  %v321_v56 = vld [vmem:[%s3822_s6 + $0x1c0] sm:$0xf] }
  0x35   : > { %v323_v57 = vld [vmem:[%s3822_s6 + $0x1c8] sm:$0xf]  ;;  %v325_v58 = vld [vmem:[%s3822_s6 + $0x1d0] sm:$0xf]  ;;  %322 = vst [vmem:[%s3829_s7 + $0xe0] sm:$0xf] %v321_v56 }
  0x36   : > { %324 = vst [vmem:[%s3829_s7 + $0xe4] sm:$0xf] %v323_v57  ;;  %326 = vst [vmem:[%s3829_s7 + $0xe8] sm:$0xf] %v325_v58  ;;  %v327_v59 = vld [vmem:[%s3822_s6 + $0x1d8] sm:$0xf] }
  0x37   : > { %v329_v60 = vld [vmem:[%s3822_s6 + $0x1e0] sm:$0xf]  ;;  %v331_v61 = vld [vmem:[%s3822_s6 + $0x1e8] sm:$0xf]  ;;  %328 = vst [vmem:[%s3829_s7 + $0xec] sm:$0xf] %v327_v59 }
  0x38   : > { %330 = vst [vmem:[%s3829_s7 + $0xf0] sm:$0xf] %v329_v60  ;;  %332 = vst [vmem:[%s3829_s7 + $0xf4] sm:$0xf] %v331_v61  ;;  %v333_v62 = vld [vmem:[%s3822_s6 + $0x1f0] sm:$0xf] }
  0x39   : > { %v335_v63 = vld [vmem:[%s3822_s6 + $0x1f8] sm:$0xf]  ;;  %v337_v0 = vld [vmem:[%s3822_s6 + $0x200] sm:$0xf]  ;;  %334 = vst [vmem:[%s3829_s7 + $0xf8] sm:$0xf] %v333_v62 }
  0x3a   : > { %336 = vst [vmem:[%s3829_s7 + $0xfc] sm:$0xf] %v335_v63  ;;  %338 = vst [vmem:[%s3829_s7 + $0x100] sm:$0xf] %v337_v0  ;;  %v339_v1 = vld [vmem:[%s3822_s6 + $0x208] sm:$0xf] }
  0x3b   : > { %v341_v2 = vld [vmem:[%s3822_s6 + $0x210] sm:$0xf]  ;;  %v343_v3 = vld [vmem:[%s3822_s6 + $0x218] sm:$0xf]  ;;  %340 = vst [vmem:[%s3829_s7 + $0x104] sm:$0xf] %v339_v1 }
  0x3c   : > { %342 = vst [vmem:[%s3829_s7 + $0x108] sm:$0xf] %v341_v2  ;;  %344 = vst [vmem:[%s3829_s7 + $0x10c] sm:$0xf] %v343_v3  ;;  %v345_v4 = vld [vmem:[%s3822_s6 + $0x220] sm:$0xf] }
  0x3d   : > { %v347_v5 = vld [vmem:[%s3822_s6 + $0x228] sm:$0xf]  ;;  %v349_v6 = vld [vmem:[%s3822_s6 + $0x230] sm:$0xf]  ;;  %346 = vst [vmem:[%s3829_s7 + $0x110] sm:$0xf] %v345_v4 }
  0x3e   : > { %348 = vst [vmem:[%s3829_s7 + $0x114] sm:$0xf] %v347_v5  ;;  %350 = vst [vmem:[%s3829_s7 + $0x118] sm:$0xf] %v349_v6  ;;  %v351_v7 = vld [vmem:[%s3822_s6 + $0x238] sm:$0xf] }
  0x3f   : > { %v353_v8 = vld [vmem:[%s3822_s6 + $0x240] sm:$0xf]  ;;  %v355_v9 = vld [vmem:[%s3822_s6 + $0x248] sm:$0xf]  ;;  %352 = vst [vmem:[%s3829_s7 + $0x11c] sm:$0xf] %v351_v7 }
  0x40   : > { %354 = vst [vmem:[%s3829_s7 + $0x120] sm:$0xf] %v353_v8  ;;  %356 = vst [vmem:[%s3829_s7 + $0x124] sm:$0xf] %v355_v9  ;;  %v357_v10 = vld [vmem:[%s3822_s6 + $0x250] sm:$0xf] }
  0x41   : > { %v359_v11 = vld [vmem:[%s3822_s6 + $0x258] sm:$0xf]  ;;  %v361_v12 = vld [vmem:[%s3822_s6 + $0x260] sm:$0xf]  ;;  %358 = vst [vmem:[%s3829_s7 + $0x128] sm:$0xf] %v357_v10 }
  0x42   : > { %360 = vst [vmem:[%s3829_s7 + $0x12c] sm:$0xf] %v359_v11  ;;  %362 = vst [vmem:[%s3829_s7 + $0x130] sm:$0xf] %v361_v12  ;;  %v363_v13 = vld [vmem:[%s3822_s6 + $0x268] sm:$0xf] }
  0x43   : > { %v365_v14 = vld [vmem:[%s3822_s6 + $0x270] sm:$0xf]  ;;  %v367_v15 = vld [vmem:[%s3822_s6 + $0x278] sm:$0xf]  ;;  %364 = vst [vmem:[%s3829_s7 + $0x134] sm:$0xf] %v363_v13 }
  0x44   : > { %366 = vst [vmem:[%s3829_s7 + $0x138] sm:$0xf] %v365_v14  ;;  %368 = vst [vmem:[%s3829_s7 + $0x13c] sm:$0xf] %v367_v15  ;;  %v369_v16 = vld [vmem:[%s3822_s6 + $0x280] sm:$0xf] }
  0x45   : > { %v371_v17 = vld [vmem:[%s3822_s6 + $0x288] sm:$0xf]  ;;  %v373_v18 = vld [vmem:[%s3822_s6 + $0x290] sm:$0xf]  ;;  %370 = vst [vmem:[%s3829_s7 + $0x140] sm:$0xf] %v369_v16 }
  0x46   : > { %372 = vst [vmem:[%s3829_s7 + $0x144] sm:$0xf] %v371_v17  ;;  %374 = vst [vmem:[%s3829_s7 + $0x148] sm:$0xf] %v373_v18  ;;  %v375_v19 = vld [vmem:[%s3822_s6 + $0x298] sm:$0xf] }
  0x47   : > { %v377_v20 = vld [vmem:[%s3822_s6 + $0x2a0] sm:$0xf]  ;;  %v379_v21 = vld [vmem:[%s3822_s6 + $0x2a8] sm:$0xf]  ;;  %376 = vst [vmem:[%s3829_s7 + $0x14c] sm:$0xf] %v375_v19 }
  0x48   : > { %378 = vst [vmem:[%s3829_s7 + $0x150] sm:$0xf] %v377_v20  ;;  %380 = vst [vmem:[%s3829_s7 + $0x154] sm:$0xf] %v379_v21  ;;  %v381_v22 = vld [vmem:[%s3822_s6 + $0x2b0] sm:$0xf] }
  0x49   : > { %v383_v23 = vld [vmem:[%s3822_s6 + $0x2b8] sm:$0xf]  ;;  %v385_v24 = vld [vmem:[%s3822_s6 + $0x2c0] sm:$0xf]  ;;  %382 = vst [vmem:[%s3829_s7 + $0x158] sm:$0xf] %v381_v22 }
  0x4a   : > { %384 = vst [vmem:[%s3829_s7 + $0x15c] sm:$0xf] %v383_v23  ;;  %386 = vst [vmem:[%s3829_s7 + $0x160] sm:$0xf] %v385_v24  ;;  %v387_v25 = vld [vmem:[%s3822_s6 + $0x2c8] sm:$0xf] }
  0x4b   : > { %v389_v26 = vld [vmem:[%s3822_s6 + $0x2d0] sm:$0xf]  ;;  %v391_v27 = vld [vmem:[%s3822_s6 + $0x2d8] sm:$0xf]  ;;  %388 = vst [vmem:[%s3829_s7 + $0x164] sm:$0xf] %v387_v25 }
  0x4c   : > { %390 = vst [vmem:[%s3829_s7 + $0x168] sm:$0xf] %v389_v26  ;;  %392 = vst [vmem:[%s3829_s7 + $0x16c] sm:$0xf] %v391_v27  ;;  %v393_v28 = vld [vmem:[%s3822_s6 + $0x2e0] sm:$0xf] }
  0x4d   : > { %v395_v29 = vld [vmem:[%s3822_s6 + $0x2e8] sm:$0xf]  ;;  %v397_v30 = vld [vmem:[%s3822_s6 + $0x2f0] sm:$0xf]  ;;  %394 = vst [vmem:[%s3829_s7 + $0x170] sm:$0xf] %v393_v28 }
  0x4e   : > { %396 = vst [vmem:[%s3829_s7 + $0x174] sm:$0xf] %v395_v29  ;;  %398 = vst [vmem:[%s3829_s7 + $0x178] sm:$0xf] %v397_v30  ;;  %v399_v31 = vld [vmem:[%s3822_s6 + $0x2f8] sm:$0xf] }
  0x4f   : > { %v401_v32 = vld [vmem:[%s3822_s6 + $0x300] sm:$0xf]  ;;  %v403_v33 = vld [vmem:[%s3822_s6 + $0x308] sm:$0xf]  ;;  %400 = vst [vmem:[%s3829_s7 + $0x17c] sm:$0xf] %v399_v31 }
  0x50   : > { %402 = vst [vmem:[%s3829_s7 + $0x180] sm:$0xf] %v401_v32  ;;  %404 = vst [vmem:[%s3829_s7 + $0x184] sm:$0xf] %v403_v33  ;;  %v405_v34 = vld [vmem:[%s3822_s6 + $0x310] sm:$0xf] }
  0x51   : > { %v407_v35 = vld [vmem:[%s3822_s6 + $0x318] sm:$0xf]  ;;  %v409_v36 = vld [vmem:[%s3822_s6 + $0x320] sm:$0xf]  ;;  %406 = vst [vmem:[%s3829_s7 + $0x188] sm:$0xf] %v405_v34 }
  0x52   : > { %408 = vst [vmem:[%s3829_s7 + $0x18c] sm:$0xf] %v407_v35  ;;  %410 = vst [vmem:[%s3829_s7 + $0x190] sm:$0xf] %v409_v36  ;;  %v411_v37 = vld [vmem:[%s3822_s6 + $0x328] sm:$0xf] }
  0x53   : > { %v413_v38 = vld [vmem:[%s3822_s6 + $0x330] sm:$0xf]  ;;  %v415_v39 = vld [vmem:[%s3822_s6 + $0x338] sm:$0xf]  ;;  %412 = vst [vmem:[%s3829_s7 + $0x194] sm:$0xf] %v411_v37 }
  0x54   : > { %414 = vst [vmem:[%s3829_s7 + $0x198] sm:$0xf] %v413_v38  ;;  %416 = vst [vmem:[%s3829_s7 + $0x19c] sm:$0xf] %v415_v39  ;;  %v417_v40 = vld [vmem:[%s3822_s6 + $0x340] sm:$0xf] }
  0x55   : > { %v419_v41 = vld [vmem:[%s3822_s6 + $0x348] sm:$0xf]  ;;  %v421_v42 = vld [vmem:[%s3822_s6 + $0x350] sm:$0xf]  ;;  %418 = vst [vmem:[%s3829_s7 + $0x1a0] sm:$0xf] %v417_v40 }
  0x56   : > { %420 = vst [vmem:[%s3829_s7 + $0x1a4] sm:$0xf] %v419_v41  ;;  %422 = vst [vmem:[%s3829_s7 + $0x1a8] sm:$0xf] %v421_v42  ;;  %v423_v43 = vld [vmem:[%s3822_s6 + $0x358] sm:$0xf] }
  0x57   : > { %v425_v44 = vld [vmem:[%s3822_s6 + $0x360] sm:$0xf]  ;;  %v427_v45 = vld [vmem:[%s3822_s6 + $0x368] sm:$0xf]  ;;  %424 = vst [vmem:[%s3829_s7 + $0x1ac] sm:$0xf] %v423_v43 }
  0x58   : > { %426 = vst [vmem:[%s3829_s7 + $0x1b0] sm:$0xf] %v425_v44  ;;  %428 = vst [vmem:[%s3829_s7 + $0x1b4] sm:$0xf] %v427_v45  ;;  %v429_v46 = vld [vmem:[%s3822_s6 + $0x370] sm:$0xf] }
  0x59   : > { %v431_v47 = vld [vmem:[%s3822_s6 + $0x378] sm:$0xf]  ;;  %v433_v48 = vld [vmem:[%s3822_s6 + $0x380] sm:$0xf]  ;;  %430 = vst [vmem:[%s3829_s7 + $0x1b8] sm:$0xf] %v429_v46 }
  0x5a   : > { %432 = vst [vmem:[%s3829_s7 + $0x1bc] sm:$0xf] %v431_v47  ;;  %434 = vst [vmem:[%s3829_s7 + $0x1c0] sm:$0xf] %v433_v48  ;;  %v435_v49 = vld [vmem:[%s3822_s6 + $0x388] sm:$0xf] }
  0x5b   : > { %v437_v50 = vld [vmem:[%s3822_s6 + $0x390] sm:$0xf]  ;;  %v439_v51 = vld [vmem:[%s3822_s6 + $0x398] sm:$0xf]  ;;  %436 = vst [vmem:[%s3829_s7 + $0x1c4] sm:$0xf] %v435_v49 }
  0x5c   : > { %438 = vst [vmem:[%s3829_s7 + $0x1c8] sm:$0xf] %v437_v50  ;;  %440 = vst [vmem:[%s3829_s7 + $0x1cc] sm:$0xf] %v439_v51  ;;  %v441_v52 = vld [vmem:[%s3822_s6 + $0x3a0] sm:$0xf] }
  0x5d   : > { %v443_v53 = vld [vmem:[%s3822_s6 + $0x3a8] sm:$0xf]  ;;  %v445_v54 = vld [vmem:[%s3822_s6 + $0x3b0] sm:$0xf]  ;;  %442 = vst [vmem:[%s3829_s7 + $0x1d0] sm:$0xf] %v441_v52 }
  0x5e   : > { %444 = vst [vmem:[%s3829_s7 + $0x1d4] sm:$0xf] %v443_v53  ;;  %446 = vst [vmem:[%s3829_s7 + $0x1d8] sm:$0xf] %v445_v54  ;;  %v447_v55 = vld [vmem:[%s3822_s6 + $0x3b8] sm:$0xf] }
  0x5f   : > { %v449_v56 = vld [vmem:[%s3822_s6 + $0x3c0] sm:$0xf]  ;;  %v451_v57 = vld [vmem:[%s3822_s6 + $0x3c8] sm:$0xf]  ;;  %448 = vst [vmem:[%s3829_s7 + $0x1dc] sm:$0xf] %v447_v55 }
  0x60   : > { %450 = vst [vmem:[%s3829_s7 + $0x1e0] sm:$0xf] %v449_v56  ;;  %452 = vst [vmem:[%s3829_s7 + $0x1e4] sm:$0xf] %v451_v57  ;;  %v453_v58 = vld [vmem:[%s3822_s6 + $0x3d0] sm:$0xf] }
  0x61   : > { %v455_v59 = vld [vmem:[%s3822_s6 + $0x3d8] sm:$0xf]  ;;  %v457_v60 = vld [vmem:[%s3822_s6 + $0x3e0] sm:$0xf]  ;;  %454 = vst [vmem:[%s3829_s7 + $0x1e8] sm:$0xf] %v453_v58 }
  0x62   : > { %456 = vst [vmem:[%s3829_s7 + $0x1ec] sm:$0xf] %v455_v59  ;;  %458 = vst [vmem:[%s3829_s7 + $0x1f0] sm:$0xf] %v457_v60  ;;  %v459_v61 = vld [vmem:[%s3822_s6 + $0x3e8] sm:$0xf] }
  0x63   : > { %v461_v62 = vld [vmem:[%s3822_s6 + $0x3f0] sm:$0xf]  ;;  %v463_v63 = vld [vmem:[%s3822_s6 + $0x3f8] sm:$0xf]  ;;  %460 = vst [vmem:[%s3829_s7 + $0x1f4] sm:$0xf] %v459_v61 }
  0x64   : > { %462 = vst [vmem:[%s3829_s7 + $0x1f8] sm:$0xf] %v461_v62  ;;  %464 = vst [vmem:[%s3829_s7 + $0x1fc] sm:$0xf] %v463_v63  ;;  %v465_v0 = vld [vmem:[%s3822_s6 + $0x400] sm:$0xf] }
  0x65   : > { %v467_v1 = vld [vmem:[%s3822_s6 + $0x408] sm:$0xf]  ;;  %v469_v2 = vld [vmem:[%s3822_s6 + $0x410] sm:$0xf]  ;;  %466 = vst [vmem:[%s3829_s7 + $0x200] sm:$0xf] %v465_v0 }
  0x66   : > { %468 = vst [vmem:[%s3829_s7 + $0x204] sm:$0xf] %v467_v1  ;;  %470 = vst [vmem:[%s3829_s7 + $0x208] sm:$0xf] %v469_v2  ;;  %v471_v3 = vld [vmem:[%s3822_s6 + $0x418] sm:$0xf] }
  0x67   : > { %v473_v4 = vld [vmem:[%s3822_s6 + $0x420] sm:$0xf]  ;;  %v475_v5 = vld [vmem:[%s3822_s6 + $0x428] sm:$0xf]  ;;  %472 = vst [vmem:[%s3829_s7 + $0x20c] sm:$0xf] %v471_v3 }
  0x68   : > { %474 = vst [vmem:[%s3829_s7 + $0x210] sm:$0xf] %v473_v4  ;;  %476 = vst [vmem:[%s3829_s7 + $0x214] sm:$0xf] %v475_v5  ;;  %v477_v6 = vld [vmem:[%s3822_s6 + $0x430] sm:$0xf] }
  0x69   : > { %v479_v7 = vld [vmem:[%s3822_s6 + $0x438] sm:$0xf]  ;;  %v481_v8 = vld [vmem:[%s3822_s6 + $0x440] sm:$0xf]  ;;  %478 = vst [vmem:[%s3829_s7 + $0x218] sm:$0xf] %v477_v6 }
  0x6a   : > { %480 = vst [vmem:[%s3829_s7 + $0x21c] sm:$0xf] %v479_v7  ;;  %482 = vst [vmem:[%s3829_s7 + $0x220] sm:$0xf] %v481_v8  ;;  %v483_v9 = vld [vmem:[%s3822_s6 + $0x448] sm:$0xf] }
  0x6b   : > { %v485_v10 = vld [vmem:[%s3822_s6 + $0x450] sm:$0xf]  ;;  %v487_v11 = vld [vmem:[%s3822_s6 + $0x458] sm:$0xf]  ;;  %484 = vst [vmem:[%s3829_s7 + $0x224] sm:$0xf] %v483_v9 }
  0x6c   : > { %486 = vst [vmem:[%s3829_s7 + $0x228] sm:$0xf] %v485_v10  ;;  %488 = vst [vmem:[%s3829_s7 + $0x22c] sm:$0xf] %v487_v11  ;;  %v489_v12 = vld [vmem:[%s3822_s6 + $0x460] sm:$0xf] }
  0x6d   : > { %v491_v13 = vld [vmem:[%s3822_s6 + $0x468] sm:$0xf]  ;;  %v493_v14 = vld [vmem:[%s3822_s6 + $0x470] sm:$0xf]  ;;  %490 = vst [vmem:[%s3829_s7 + $0x230] sm:$0xf] %v489_v12 }
  0x6e   : > { %492 = vst [vmem:[%s3829_s7 + $0x234] sm:$0xf] %v491_v13  ;;  %494 = vst [vmem:[%s3829_s7 + $0x238] sm:$0xf] %v493_v14  ;;  %v495_v15 = vld [vmem:[%s3822_s6 + $0x478] sm:$0xf] }
  0x6f   : > { %v497_v16 = vld [vmem:[%s3822_s6 + $0x480] sm:$0xf]  ;;  %v499_v17 = vld [vmem:[%s3822_s6 + $0x488] sm:$0xf]  ;;  %496 = vst [vmem:[%s3829_s7 + $0x23c] sm:$0xf] %v495_v15 }
  0x70   : > { %498 = vst [vmem:[%s3829_s7 + $0x240] sm:$0xf] %v497_v16  ;;  %500 = vst [vmem:[%s3829_s7 + $0x244] sm:$0xf] %v499_v17  ;;  %v501_v18 = vld [vmem:[%s3822_s6 + $0x490] sm:$0xf] }
  0x71   : > { %v503_v19 = vld [vmem:[%s3822_s6 + $0x498] sm:$0xf]  ;;  %v505_v20 = vld [vmem:[%s3822_s6 + $0x4a0] sm:$0xf]  ;;  %502 = vst [vmem:[%s3829_s7 + $0x248] sm:$0xf] %v501_v18 }
  0x72   : > { %504 = vst [vmem:[%s3829_s7 + $0x24c] sm:$0xf] %v503_v19  ;;  %506 = vst [vmem:[%s3829_s7 + $0x250] sm:$0xf] %v505_v20  ;;  %v507_v21 = vld [vmem:[%s3822_s6 + $0x4a8] sm:$0xf] }
  0x73   : > { %v509_v22 = vld [vmem:[%s3822_s6 + $0x4b0] sm:$0xf]  ;;  %v511_v23 = vld [vmem:[%s3822_s6 + $0x4b8] sm:$0xf]  ;;  %508 = vst [vmem:[%s3829_s7 + $0x254] sm:$0xf] %v507_v21 }
  0x74   : > { %510 = vst [vmem:[%s3829_s7 + $0x258] sm:$0xf] %v509_v22  ;;  %512 = vst [vmem:[%s3829_s7 + $0x25c] sm:$0xf] %v511_v23  ;;  %v513_v24 = vld [vmem:[%s3822_s6 + $0x4c0] sm:$0xf] }
  0x75   : > { %v515_v25 = vld [vmem:[%s3822_s6 + $0x4c8] sm:$0xf]  ;;  %v517_v26 = vld [vmem:[%s3822_s6 + $0x4d0] sm:$0xf]  ;;  %514 = vst [vmem:[%s3829_s7 + $0x260] sm:$0xf] %v513_v24 }
  0x76   : > { %516 = vst [vmem:[%s3829_s7 + $0x264] sm:$0xf] %v515_v25  ;;  %518 = vst [vmem:[%s3829_s7 + $0x268] sm:$0xf] %v517_v26  ;;  %v519_v27 = vld [vmem:[%s3822_s6 + $0x4d8] sm:$0xf] }
  0x77   : > { %v521_v28 = vld [vmem:[%s3822_s6 + $0x4e0] sm:$0xf]  ;;  %v523_v29 = vld [vmem:[%s3822_s6 + $0x4e8] sm:$0xf]  ;;  %520 = vst [vmem:[%s3829_s7 + $0x26c] sm:$0xf] %v519_v27 }
  0x78   : > { %522 = vst [vmem:[%s3829_s7 + $0x270] sm:$0xf] %v521_v28  ;;  %524 = vst [vmem:[%s3829_s7 + $0x274] sm:$0xf] %v523_v29  ;;  %v525_v30 = vld [vmem:[%s3822_s6 + $0x4f0] sm:$0xf] }
  0x79   : > { %v527_v31 = vld [vmem:[%s3822_s6 + $0x4f8] sm:$0xf]  ;;  %v529_v32 = vld [vmem:[%s3822_s6 + $0x500] sm:$0xf]  ;;  %526 = vst [vmem:[%s3829_s7 + $0x278] sm:$0xf] %v525_v30 }
  0x7a   : > { %528 = vst [vmem:[%s3829_s7 + $0x27c] sm:$0xf] %v527_v31  ;;  %530 = vst [vmem:[%s3829_s7 + $0x280] sm:$0xf] %v529_v32  ;;  %v531_v33 = vld [vmem:[%s3822_s6 + $0x508] sm:$0xf] }
  0x7b   : > { %v533_v34 = vld [vmem:[%s3822_s6 + $0x510] sm:$0xf]  ;;  %v535_v35 = vld [vmem:[%s3822_s6 + $0x518] sm:$0xf]  ;;  %532 = vst [vmem:[%s3829_s7 + $0x284] sm:$0xf] %v531_v33 }
  0x7c   : > { %534 = vst [vmem:[%s3829_s7 + $0x288] sm:$0xf] %v533_v34  ;;  %536 = vst [vmem:[%s3829_s7 + $0x28c] sm:$0xf] %v535_v35  ;;  %v537_v36 = vld [vmem:[%s3822_s6 + $0x520] sm:$0xf] }
  0x7d   : > { %v539_v37 = vld [vmem:[%s3822_s6 + $0x528] sm:$0xf]  ;;  %v541_v38 = vld [vmem:[%s3822_s6 + $0x530] sm:$0xf]  ;;  %538 = vst [vmem:[%s3829_s7 + $0x290] sm:$0xf] %v537_v36 }
  0x7e   : > { %540 = vst [vmem:[%s3829_s7 + $0x294] sm:$0xf] %v539_v37  ;;  %542 = vst [vmem:[%s3829_s7 + $0x298] sm:$0xf] %v541_v38  ;;  %v543_v39 = vld [vmem:[%s3822_s6 + $0x538] sm:$0xf] }
  0x7f   : > { %v545_v40 = vld [vmem:[%s3822_s6 + $0x540] sm:$0xf]  ;;  %v547_v41 = vld [vmem:[%s3822_s6 + $0x548] sm:$0xf]  ;;  %544 = vst [vmem:[%s3829_s7 + $0x29c] sm:$0xf] %v543_v39 }
  0x80   : > { %546 = vst [vmem:[%s3829_s7 + $0x2a0] sm:$0xf] %v545_v40  ;;  %548 = vst [vmem:[%s3829_s7 + $0x2a4] sm:$0xf] %v547_v41  ;;  %v549_v42 = vld [vmem:[%s3822_s6 + $0x550] sm:$0xf] }
  0x81   : > { %v551_v43 = vld [vmem:[%s3822_s6 + $0x558] sm:$0xf]  ;;  %v553_v44 = vld [vmem:[%s3822_s6 + $0x560] sm:$0xf]  ;;  %550 = vst [vmem:[%s3829_s7 + $0x2a8] sm:$0xf] %v549_v42 }
  0x82   : > { %552 = vst [vmem:[%s3829_s7 + $0x2ac] sm:$0xf] %v551_v43  ;;  %554 = vst [vmem:[%s3829_s7 + $0x2b0] sm:$0xf] %v553_v44  ;;  %v555_v45 = vld [vmem:[%s3822_s6 + $0x568] sm:$0xf] }
  0x83   : > { %v557_v46 = vld [vmem:[%s3822_s6 + $0x570] sm:$0xf]  ;;  %v559_v47 = vld [vmem:[%s3822_s6 + $0x578] sm:$0xf]  ;;  %556 = vst [vmem:[%s3829_s7 + $0x2b4] sm:$0xf] %v555_v45 }
  0x84   : > { %558 = vst [vmem:[%s3829_s7 + $0x2b8] sm:$0xf] %v557_v46  ;;  %560 = vst [vmem:[%s3829_s7 + $0x2bc] sm:$0xf] %v559_v47  ;;  %v561_v48 = vld [vmem:[%s3822_s6 + $0x580] sm:$0xf] }
  0x85   : > { %v563_v49 = vld [vmem:[%s3822_s6 + $0x588] sm:$0xf]  ;;  %v565_v50 = vld [vmem:[%s3822_s6 + $0x590] sm:$0xf]  ;;  %562 = vst [vmem:[%s3829_s7 + $0x2c0] sm:$0xf] %v561_v48 }
  0x86   : > { %564 = vst [vmem:[%s3829_s7 + $0x2c4] sm:$0xf] %v563_v49  ;;  %566 = vst [vmem:[%s3829_s7 + $0x2c8] sm:$0xf] %v565_v50  ;;  %v567_v51 = vld [vmem:[%s3822_s6 + $0x598] sm:$0xf] }
  0x87   : > { %v569_v52 = vld [vmem:[%s3822_s6 + $0x5a0] sm:$0xf]  ;;  %v571_v53 = vld [vmem:[%s3822_s6 + $0x5a8] sm:$0xf]  ;;  %568 = vst [vmem:[%s3829_s7 + $0x2cc] sm:$0xf] %v567_v51 }
  0x88   : > { %570 = vst [vmem:[%s3829_s7 + $0x2d0] sm:$0xf] %v569_v52  ;;  %572 = vst [vmem:[%s3829_s7 + $0x2d4] sm:$0xf] %v571_v53  ;;  %v573_v54 = vld [vmem:[%s3822_s6 + $0x5b0] sm:$0xf] }
  0x89   : > { %v575_v55 = vld [vmem:[%s3822_s6 + $0x5b8] sm:$0xf]  ;;  %v577_v56 = vld [vmem:[%s3822_s6 + $0x5c0] sm:$0xf]  ;;  %574 = vst [vmem:[%s3829_s7 + $0x2d8] sm:$0xf] %v573_v54 }
  0x8a   : > { %576 = vst [vmem:[%s3829_s7 + $0x2dc] sm:$0xf] %v575_v55  ;;  %578 = vst [vmem:[%s3829_s7 + $0x2e0] sm:$0xf] %v577_v56  ;;  %v579_v57 = vld [vmem:[%s3822_s6 + $0x5c8] sm:$0xf] }
  0x8b   : > { %v581_v58 = vld [vmem:[%s3822_s6 + $0x5d0] sm:$0xf]  ;;  %v583_v59 = vld [vmem:[%s3822_s6 + $0x5d8] sm:$0xf]  ;;  %580 = vst [vmem:[%s3829_s7 + $0x2e4] sm:$0xf] %v579_v57 }
  0x8c   : > { %582 = vst [vmem:[%s3829_s7 + $0x2e8] sm:$0xf] %v581_v58  ;;  %584 = vst [vmem:[%s3829_s7 + $0x2ec] sm:$0xf] %v583_v59  ;;  %v585_v60 = vld [vmem:[%s3822_s6 + $0x5e0] sm:$0xf] }
  0x8d   : > { %v587_v61 = vld [vmem:[%s3822_s6 + $0x5e8] sm:$0xf]  ;;  %v589_v62 = vld [vmem:[%s3822_s6 + $0x5f0] sm:$0xf]  ;;  %586 = vst [vmem:[%s3829_s7 + $0x2f0] sm:$0xf] %v585_v60 }
  0x8e   : > { %588 = vst [vmem:[%s3829_s7 + $0x2f4] sm:$0xf] %v587_v61  ;;  %590 = vst [vmem:[%s3829_s7 + $0x2f8] sm:$0xf] %v589_v62  ;;  %v591_v63 = vld [vmem:[%s3822_s6 + $0x5f8] sm:$0xf] }
  0x8f   : > { %v593_v0 = vld [vmem:[%s3822_s6 + $0x600] sm:$0xf]  ;;  %v595_v1 = vld [vmem:[%s3822_s6 + $0x608] sm:$0xf]  ;;  %592 = vst [vmem:[%s3829_s7 + $0x2fc] sm:$0xf] %v591_v63 }
  0x90   : > { %594 = vst [vmem:[%s3829_s7 + $0x300] sm:$0xf] %v593_v0  ;;  %596 = vst [vmem:[%s3829_s7 + $0x304] sm:$0xf] %v595_v1  ;;  %v597_v2 = vld [vmem:[%s3822_s6 + $0x610] sm:$0xf] }
  0x91   : > { %v599_v3 = vld [vmem:[%s3822_s6 + $0x618] sm:$0xf]  ;;  %v601_v4 = vld [vmem:[%s3822_s6 + $0x620] sm:$0xf]  ;;  %598 = vst [vmem:[%s3829_s7 + $0x308] sm:$0xf] %v597_v2 }
  0x92   : > { %600 = vst [vmem:[%s3829_s7 + $0x30c] sm:$0xf] %v599_v3  ;;  %602 = vst [vmem:[%s3829_s7 + $0x310] sm:$0xf] %v601_v4  ;;  %v603_v5 = vld [vmem:[%s3822_s6 + $0x628] sm:$0xf] }
  0x93   : > { %v605_v6 = vld [vmem:[%s3822_s6 + $0x630] sm:$0xf]  ;;  %v607_v7 = vld [vmem:[%s3822_s6 + $0x638] sm:$0xf]  ;;  %604 = vst [vmem:[%s3829_s7 + $0x314] sm:$0xf] %v603_v5 }
  0x94   : > { %606 = vst [vmem:[%s3829_s7 + $0x318] sm:$0xf] %v605_v6  ;;  %608 = vst [vmem:[%s3829_s7 + $0x31c] sm:$0xf] %v607_v7  ;;  %v609_v8 = vld [vmem:[%s3822_s6 + $0x640] sm:$0xf] }
  0x95   : > { %v611_v9 = vld [vmem:[%s3822_s6 + $0x648] sm:$0xf]  ;;  %v613_v10 = vld [vmem:[%s3822_s6 + $0x650] sm:$0xf]  ;;  %610 = vst [vmem:[%s3829_s7 + $0x320] sm:$0xf] %v609_v8 }
  0x96   : > { %612 = vst [vmem:[%s3829_s7 + $0x324] sm:$0xf] %v611_v9  ;;  %614 = vst [vmem:[%s3829_s7 + $0x328] sm:$0xf] %v613_v10  ;;  %v615_v11 = vld [vmem:[%s3822_s6 + $0x658] sm:$0xf] }
  0x97   : > { %v617_v12 = vld [vmem:[%s3822_s6 + $0x660] sm:$0xf]  ;;  %v619_v13 = vld [vmem:[%s3822_s6 + $0x668] sm:$0xf]  ;;  %616 = vst [vmem:[%s3829_s7 + $0x32c] sm:$0xf] %v615_v11 }
  0x98   : > { %618 = vst [vmem:[%s3829_s7 + $0x330] sm:$0xf] %v617_v12  ;;  %620 = vst [vmem:[%s3829_s7 + $0x334] sm:$0xf] %v619_v13  ;;  %v621_v14 = vld [vmem:[%s3822_s6 + $0x670] sm:$0xf] }
  0x99   : > { %v623_v15 = vld [vmem:[%s3822_s6 + $0x678] sm:$0xf]  ;;  %v625_v16 = vld [vmem:[%s3822_s6 + $0x680] sm:$0xf]  ;;  %622 = vst [vmem:[%s3829_s7 + $0x338] sm:$0xf] %v621_v14 }
  0x9a   : > { %624 = vst [vmem:[%s3829_s7 + $0x33c] sm:$0xf] %v623_v15  ;;  %626 = vst [vmem:[%s3829_s7 + $0x340] sm:$0xf] %v625_v16  ;;  %v627_v17 = vld [vmem:[%s3822_s6 + $0x688] sm:$0xf] }
  0x9b   : > { %v629_v18 = vld [vmem:[%s3822_s6 + $0x690] sm:$0xf]  ;;  %v631_v19 = vld [vmem:[%s3822_s6 + $0x698] sm:$0xf]  ;;  %628 = vst [vmem:[%s3829_s7 + $0x344] sm:$0xf] %v627_v17 }
  0x9c   : > { %630 = vst [vmem:[%s3829_s7 + $0x348] sm:$0xf] %v629_v18  ;;  %632 = vst [vmem:[%s3829_s7 + $0x34c] sm:$0xf] %v631_v19  ;;  %v633_v20 = vld [vmem:[%s3822_s6 + $0x6a0] sm:$0xf] }
  0x9d   : > { %v635_v21 = vld [vmem:[%s3822_s6 + $0x6a8] sm:$0xf]  ;;  %v637_v22 = vld [vmem:[%s3822_s6 + $0x6b0] sm:$0xf]  ;;  %634 = vst [vmem:[%s3829_s7 + $0x350] sm:$0xf] %v633_v20 }
  0x9e   : > { %636 = vst [vmem:[%s3829_s7 + $0x354] sm:$0xf] %v635_v21  ;;  %638 = vst [vmem:[%s3829_s7 + $0x358] sm:$0xf] %v637_v22  ;;  %v639_v23 = vld [vmem:[%s3822_s6 + $0x6b8] sm:$0xf] }
  0x9f   : > { %v641_v24 = vld [vmem:[%s3822_s6 + $0x6c0] sm:$0xf]  ;;  %v643_v25 = vld [vmem:[%s3822_s6 + $0x6c8] sm:$0xf]  ;;  %640 = vst [vmem:[%s3829_s7 + $0x35c] sm:$0xf] %v639_v23 }
  0xa0   : > { %642 = vst [vmem:[%s3829_s7 + $0x360] sm:$0xf] %v641_v24  ;;  %644 = vst [vmem:[%s3829_s7 + $0x364] sm:$0xf] %v643_v25  ;;  %v645_v26 = vld [vmem:[%s3822_s6 + $0x6d0] sm:$0xf] }
  0xa1   : > { %v647_v27 = vld [vmem:[%s3822_s6 + $0x6d8] sm:$0xf]  ;;  %v649_v28 = vld [vmem:[%s3822_s6 + $0x6e0] sm:$0xf]  ;;  %646 = vst [vmem:[%s3829_s7 + $0x368] sm:$0xf] %v645_v26 }
  0xa2   : > { %648 = vst [vmem:[%s3829_s7 + $0x36c] sm:$0xf] %v647_v27  ;;  %650 = vst [vmem:[%s3829_s7 + $0x370] sm:$0xf] %v649_v28  ;;  %v651_v29 = vld [vmem:[%s3822_s6 + $0x6e8] sm:$0xf] }
  0xa3   : > { %v653_v30 = vld [vmem:[%s3822_s6 + $0x6f0] sm:$0xf]  ;;  %v655_v31 = vld [vmem:[%s3822_s6 + $0x6f8] sm:$0xf]  ;;  %652 = vst [vmem:[%s3829_s7 + $0x374] sm:$0xf] %v651_v29 }
  0xa4   : > { %654 = vst [vmem:[%s3829_s7 + $0x378] sm:$0xf] %v653_v30  ;;  %656 = vst [vmem:[%s3829_s7 + $0x37c] sm:$0xf] %v655_v31  ;;  %v657_v32 = vld [vmem:[%s3822_s6 + $0x700] sm:$0xf] }
  0xa5   : > { %v659_v33 = vld [vmem:[%s3822_s6 + $0x708] sm:$0xf]  ;;  %v661_v34 = vld [vmem:[%s3822_s6 + $0x710] sm:$0xf]  ;;  %658 = vst [vmem:[%s3829_s7 + $0x380] sm:$0xf] %v657_v32 }
  0xa6   : > { %660 = vst [vmem:[%s3829_s7 + $0x384] sm:$0xf] %v659_v33  ;;  %662 = vst [vmem:[%s3829_s7 + $0x388] sm:$0xf] %v661_v34  ;;  %v663_v35 = vld [vmem:[%s3822_s6 + $0x718] sm:$0xf] }
  0xa7   : > { %v665_v36 = vld [vmem:[%s3822_s6 + $0x720] sm:$0xf]  ;;  %v667_v37 = vld [vmem:[%s3822_s6 + $0x728] sm:$0xf]  ;;  %664 = vst [vmem:[%s3829_s7 + $0x38c] sm:$0xf] %v663_v35 }
  0xa8   : > { %666 = vst [vmem:[%s3829_s7 + $0x390] sm:$0xf] %v665_v36  ;;  %668 = vst [vmem:[%s3829_s7 + $0x394] sm:$0xf] %v667_v37  ;;  %v669_v38 = vld [vmem:[%s3822_s6 + $0x730] sm:$0xf] }
  0xa9   : > { %v671_v39 = vld [vmem:[%s3822_s6 + $0x738] sm:$0xf]  ;;  %v673_v40 = vld [vmem:[%s3822_s6 + $0x740] sm:$0xf]  ;;  %670 = vst [vmem:[%s3829_s7 + $0x398] sm:$0xf] %v669_v38 }
  0xaa   : > { %672 = vst [vmem:[%s3829_s7 + $0x39c] sm:$0xf] %v671_v39  ;;  %674 = vst [vmem:[%s3829_s7 + $0x3a0] sm:$0xf] %v673_v40  ;;  %v675_v41 = vld [vmem:[%s3822_s6 + $0x748] sm:$0xf] }
  0xab   : > { %v677_v42 = vld [vmem:[%s3822_s6 + $0x750] sm:$0xf]  ;;  %v679_v43 = vld [vmem:[%s3822_s6 + $0x758] sm:$0xf]  ;;  %676 = vst [vmem:[%s3829_s7 + $0x3a4] sm:$0xf] %v675_v41 }
  0xac   : > { %678 = vst [vmem:[%s3829_s7 + $0x3a8] sm:$0xf] %v677_v42  ;;  %680 = vst [vmem:[%s3829_s7 + $0x3ac] sm:$0xf] %v679_v43  ;;  %v681_v44 = vld [vmem:[%s3822_s6 + $0x760] sm:$0xf] }
  0xad   : > { %v683_v45 = vld [vmem:[%s3822_s6 + $0x768] sm:$0xf]  ;;  %v685_v46 = vld [vmem:[%s3822_s6 + $0x770] sm:$0xf]  ;;  %682 = vst [vmem:[%s3829_s7 + $0x3b0] sm:$0xf] %v681_v44 }
  0xae   : > { %684 = vst [vmem:[%s3829_s7 + $0x3b4] sm:$0xf] %v683_v45  ;;  %686 = vst [vmem:[%s3829_s7 + $0x3b8] sm:$0xf] %v685_v46  ;;  %v687_v47 = vld [vmem:[%s3822_s6 + $0x778] sm:$0xf] }
  0xaf   : > { %v689_v48 = vld [vmem:[%s3822_s6 + $0x780] sm:$0xf]  ;;  %v691_v49 = vld [vmem:[%s3822_s6 + $0x788] sm:$0xf]  ;;  %688 = vst [vmem:[%s3829_s7 + $0x3bc] sm:$0xf] %v687_v47 }
  0xb0   : > { %690 = vst [vmem:[%s3829_s7 + $0x3c0] sm:$0xf] %v689_v48  ;;  %692 = vst [vmem:[%s3829_s7 + $0x3c4] sm:$0xf] %v691_v49  ;;  %v693_v50 = vld [vmem:[%s3822_s6 + $0x790] sm:$0xf] }
  0xb1   : > { %v695_v51 = vld [vmem:[%s3822_s6 + $0x798] sm:$0xf]  ;;  %v697_v52 = vld [vmem:[%s3822_s6 + $0x7a0] sm:$0xf]  ;;  %694 = vst [vmem:[%s3829_s7 + $0x3c8] sm:$0xf] %v693_v50 }
  0xb2   : > { %696 = vst [vmem:[%s3829_s7 + $0x3cc] sm:$0xf] %v695_v51  ;;  %698 = vst [vmem:[%s3829_s7 + $0x3d0] sm:$0xf] %v697_v52  ;;  %v699_v53 = vld [vmem:[%s3822_s6 + $0x7a8] sm:$0xf] }
  0xb3   : > { %v701_v54 = vld [vmem:[%s3822_s6 + $0x7b0] sm:$0xf]  ;;  %v703_v55 = vld [vmem:[%s3822_s6 + $0x7b8] sm:$0xf]  ;;  %700 = vst [vmem:[%s3829_s7 + $0x3d4] sm:$0xf] %v699_v53 }
  0xb4   : > { %702 = vst [vmem:[%s3829_s7 + $0x3d8] sm:$0xf] %v701_v54  ;;  %704 = vst [vmem:[%s3829_s7 + $0x3dc] sm:$0xf] %v703_v55  ;;  %v705_v56 = vld [vmem:[%s3822_s6 + $0x7c0] sm:$0xf] }
  0xb5   : > { %v707_v57 = vld [vmem:[%s3822_s6 + $0x7c8] sm:$0xf]  ;;  %v709_v58 = vld [vmem:[%s3822_s6 + $0x7d0] sm:$0xf]  ;;  %706 = vst [vmem:[%s3829_s7 + $0x3e0] sm:$0xf] %v705_v56 }
  0xb6   : > { %708 = vst [vmem:[%s3829_s7 + $0x3e4] sm:$0xf] %v707_v57  ;;  %710 = vst [vmem:[%s3829_s7 + $0x3e8] sm:$0xf] %v709_v58  ;;  %v711_v59 = vld [vmem:[%s3822_s6 + $0x7d8] sm:$0xf] }
  0xb7   : > { %v713_v60 = vld [vmem:[%s3822_s6 + $0x7e0] sm:$0xf]  ;;  %v715_v61 = vld [vmem:[%s3822_s6 + $0x7e8] sm:$0xf]  ;;  %712 = vst [vmem:[%s3829_s7 + $0x3ec] sm:$0xf] %v711_v59 }
  0xb8   : > { %714 = vst [vmem:[%s3829_s7 + $0x3f0] sm:$0xf] %v713_v60  ;;  %716 = vst [vmem:[%s3829_s7 + $0x3f4] sm:$0xf] %v715_v61  ;;  %v717_v62 = vld [vmem:[%s3822_s6 + $0x7f0] sm:$0xf] }
  0xb9   : > { %v719_v63 = vld [vmem:[%s3822_s6 + $0x7f8] sm:$0xf]  ;;  %v721_v0 = vld [vmem:[%s3822_s6 + $0x800] sm:$0xf]  ;;  %718 = vst [vmem:[%s3829_s7 + $0x3f8] sm:$0xf] %v717_v62 }
  0xba   : > { %720 = vst [vmem:[%s3829_s7 + $0x3fc] sm:$0xf] %v719_v63  ;;  %722 = vst [vmem:[%s3829_s7 + $0x400] sm:$0xf] %v721_v0  ;;  %v723_v1 = vld [vmem:[%s3822_s6 + $0x808] sm:$0xf] }
  0xbb   : > { %v725_v2 = vld [vmem:[%s3822_s6 + $0x810] sm:$0xf]  ;;  %v727_v3 = vld [vmem:[%s3822_s6 + $0x818] sm:$0xf]  ;;  %724 = vst [vmem:[%s3829_s7 + $0x404] sm:$0xf] %v723_v1 }
  0xbc   : > { %726 = vst [vmem:[%s3829_s7 + $0x408] sm:$0xf] %v725_v2  ;;  %728 = vst [vmem:[%s3829_s7 + $0x40c] sm:$0xf] %v727_v3  ;;  %v729_v4 = vld [vmem:[%s3822_s6 + $0x820] sm:$0xf] }
  0xbd   : > { %v731_v5 = vld [vmem:[%s3822_s6 + $0x828] sm:$0xf]  ;;  %v733_v6 = vld [vmem:[%s3822_s6 + $0x830] sm:$0xf]  ;;  %730 = vst [vmem:[%s3829_s7 + $0x410] sm:$0xf] %v729_v4 }
  0xbe   : > { %732 = vst [vmem:[%s3829_s7 + $0x414] sm:$0xf] %v731_v5  ;;  %734 = vst [vmem:[%s3829_s7 + $0x418] sm:$0xf] %v733_v6  ;;  %v735_v7 = vld [vmem:[%s3822_s6 + $0x838] sm:$0xf] }
  0xbf   : > { %v737_v8 = vld [vmem:[%s3822_s6 + $0x840] sm:$0xf]  ;;  %v739_v9 = vld [vmem:[%s3822_s6 + $0x848] sm:$0xf]  ;;  %736 = vst [vmem:[%s3829_s7 + $0x41c] sm:$0xf] %v735_v7 }
  0xc0   : > { %738 = vst [vmem:[%s3829_s7 + $0x420] sm:$0xf] %v737_v8  ;;  %740 = vst [vmem:[%s3829_s7 + $0x424] sm:$0xf] %v739_v9  ;;  %v741_v10 = vld [vmem:[%s3822_s6 + $0x850] sm:$0xf] }
  0xc1   : > { %v743_v11 = vld [vmem:[%s3822_s6 + $0x858] sm:$0xf]  ;;  %v745_v12 = vld [vmem:[%s3822_s6 + $0x860] sm:$0xf]  ;;  %742 = vst [vmem:[%s3829_s7 + $0x428] sm:$0xf] %v741_v10 }
  0xc2   : > { %744 = vst [vmem:[%s3829_s7 + $0x42c] sm:$0xf] %v743_v11  ;;  %746 = vst [vmem:[%s3829_s7 + $0x430] sm:$0xf] %v745_v12  ;;  %v747_v13 = vld [vmem:[%s3822_s6 + $0x868] sm:$0xf] }
  0xc3   : > { %v749_v14 = vld [vmem:[%s3822_s6 + $0x870] sm:$0xf]  ;;  %v751_v15 = vld [vmem:[%s3822_s6 + $0x878] sm:$0xf]  ;;  %748 = vst [vmem:[%s3829_s7 + $0x434] sm:$0xf] %v747_v13 }
  0xc4   : > { %750 = vst [vmem:[%s3829_s7 + $0x438] sm:$0xf] %v749_v14  ;;  %752 = vst [vmem:[%s3829_s7 + $0x43c] sm:$0xf] %v751_v15  ;;  %v753_v16 = vld [vmem:[%s3822_s6 + $0x880] sm:$0xf] }
  0xc5   : > { %v755_v17 = vld [vmem:[%s3822_s6 + $0x888] sm:$0xf]  ;;  %v757_v18 = vld [vmem:[%s3822_s6 + $0x890] sm:$0xf]  ;;  %754 = vst [vmem:[%s3829_s7 + $0x440] sm:$0xf] %v753_v16 }
  0xc6   : > { %756 = vst [vmem:[%s3829_s7 + $0x444] sm:$0xf] %v755_v17  ;;  %758 = vst [vmem:[%s3829_s7 + $0x448] sm:$0xf] %v757_v18  ;;  %v759_v19 = vld [vmem:[%s3822_s6 + $0x898] sm:$0xf] }
  0xc7   : > { %v761_v20 = vld [vmem:[%s3822_s6 + $0x8a0] sm:$0xf]  ;;  %v763_v21 = vld [vmem:[%s3822_s6 + $0x8a8] sm:$0xf]  ;;  %760 = vst [vmem:[%s3829_s7 + $0x44c] sm:$0xf] %v759_v19 }
  0xc8   : > { %762 = vst [vmem:[%s3829_s7 + $0x450] sm:$0xf] %v761_v20  ;;  %764 = vst [vmem:[%s3829_s7 + $0x454] sm:$0xf] %v763_v21  ;;  %v765_v22 = vld [vmem:[%s3822_s6 + $0x8b0] sm:$0xf] }
  0xc9   : > { %v767_v23 = vld [vmem:[%s3822_s6 + $0x8b8] sm:$0xf]  ;;  %v769_v24 = vld [vmem:[%s3822_s6 + $0x8c0] sm:$0xf]  ;;  %766 = vst [vmem:[%s3829_s7 + $0x458] sm:$0xf] %v765_v22 }
  0xca   : > { %768 = vst [vmem:[%s3829_s7 + $0x45c] sm:$0xf] %v767_v23  ;;  %770 = vst [vmem:[%s3829_s7 + $0x460] sm:$0xf] %v769_v24  ;;  %v771_v25 = vld [vmem:[%s3822_s6 + $0x8c8] sm:$0xf] }
  0xcb   : > { %v773_v26 = vld [vmem:[%s3822_s6 + $0x8d0] sm:$0xf]  ;;  %v775_v27 = vld [vmem:[%s3822_s6 + $0x8d8] sm:$0xf]  ;;  %772 = vst [vmem:[%s3829_s7 + $0x464] sm:$0xf] %v771_v25 }
  0xcc   : > { %774 = vst [vmem:[%s3829_s7 + $0x468] sm:$0xf] %v773_v26  ;;  %776 = vst [vmem:[%s3829_s7 + $0x46c] sm:$0xf] %v775_v27  ;;  %v777_v28 = vld [vmem:[%s3822_s6 + $0x8e0] sm:$0xf] }
  0xcd   : > { %v779_v29 = vld [vmem:[%s3822_s6 + $0x8e8] sm:$0xf]  ;;  %v781_v30 = vld [vmem:[%s3822_s6 + $0x8f0] sm:$0xf]  ;;  %778 = vst [vmem:[%s3829_s7 + $0x470] sm:$0xf] %v777_v28 }
  0xce   : > { %780 = vst [vmem:[%s3829_s7 + $0x474] sm:$0xf] %v779_v29  ;;  %782 = vst [vmem:[%s3829_s7 + $0x478] sm:$0xf] %v781_v30  ;;  %v783_v31 = vld [vmem:[%s3822_s6 + $0x8f8] sm:$0xf] }
  0xcf   : > { %784 = vst [vmem:[%s3829_s7 + $0x47c] sm:$0xf] %v783_v31 }
  0xd0 PF: > { %p3179_p5 = scmp.ge.s32.totalorder %s3756_s20, 1  ;;  %p1402_p6 = scmp.lt.s32.totalorder %s3756_s20, 3 }
  0xd2   : > { %p1403_p7 = pnand %p3179_p5, %p1402_p6 }
  0xd3   : > { %s1409_s8 = sand.u32 (!%p1403_p7), 1, %s3748_s18   ;;  %p1445_p8 = scmp.lt.s32.totalorder (!%p1403_p7), %s3174_s21, 1 }
  0xd4   : > { %1406 = sbr.rel (%p1403_p7) target bundleno = 630 (0x276), region = 77 }
  0xd5   : > { %s3545_s13 = smul.u32 (!%p1403_p7), 1152, %s1409_s8 }
  0xd7   : > { %s4419_s14 = scalar_lea.vmem (!%p1403_p7), [#allocation2], %s3545_s13 }
  0xd9   : > { %v4408_v32 = vld [vmem:[%s4640_s0] sm:$0xff]  ;;  %v4413_v33 = vld [vmem:[%s4640_s0 + $0x8] sm:$0xff]  ;;  %v3570_v36 = vld [vmem:[%s4419_s14 + $0x78] sm:$0xff]   ;;  %s4650_s21 = smov (!%p1445_p8, %s3174_s21), 1 }
  0xda   : > { %v3183_v34 = vcombine.high %v4408_v32, %v4408_v32  ;;  %v3185_v35 = vcombine.high %v4413_v33, %v4413_v33  ;;  %v3571_v37 = vld [vmem:[%s4419_s14 + $0xf8] sm:$0xff]   ;;  %3346 = vmatprep.subr.bf16.mxu0 %v3570_v36  ;;  %v3574_v40 = vld [vmem:[%s4419_s14 + $0x70] sm:$0xff]   ;;  %v3578_v44 = vld [vmem:[%s4419_s14 + $0x68] sm:$0xff]   ;;  %v3182_v6 = vcombine.low %v4408_v32, %v4408_v32  ;;  %v3184_v7 = vcombine.low %v4413_v33, %v4413_v33  ;;  %s1447_s11 = scalar_lea.vmem %s4642_s2, %s4650_s21  ;;  %s3180_s15 = sshll.u32 %s4650_s21, 3 }
  0xdb   : > { %v3572_v38 = vld [vmem:[%s4419_s14 + $0x38] sm:$0xff]   ;;  %3368 = vmatprep.subr.bf16.mxu1 %v3571_v37  ;;  %v3575_v41 = vld [vmem:[%s4419_s14 + $0xf0] sm:$0xff]   ;;  %v3579_v45 = vld [vmem:[%s4419_s14 + $0xe8] sm:$0xff]   ;;  %s1454_s17 = scalar_lea.vmem %s4644_s4, %s3180_s15  ;;  %s1458_s24 = scalar_lea.vmem %s4645_s5, %s3180_s15 }
  0xdc   : > { %2716 = vmatprep.mubr.bf16.mxu0 %v3183_v34  ;;  %2756 = vmatprep.mubr.bf16.mxu1 %v3185_v35  ;;  %v3573_v39 = vld [vmem:[%s4419_s14 + $0xb8] sm:$0xff]   ;;  %v3576_v42 = vld [vmem:[%s4419_s14 + $0x30] sm:$0xff]   ;;  %v3580_v46 = vld [vmem:[%s4419_s14 + $0x28] sm:$0xff]  }
  0xdd   : > { %3347 = vmatpush3.bf16.msra.mxu0 %v3572_v38  ;;  %3369 = vmatpush3.bf16.msra.mxu1 %v3573_v39  ;;  %v3577_v43 = vld [vmem:[%s4419_s14 + $0xb0] sm:$0xff]   ;;  %v3581_v47 = vld [vmem:[%s4419_s14 + $0xa8] sm:$0xff]   ;;  %v3582_v48 = vld [vmem:[%s4419_s14 + $0x60] sm:$0xff]  }
  0xde   : > { %3348 = vmatprep.subr.bf16.mxu0 %v3574_v40  ;;  %3370 = vmatprep.subr.bf16.mxu1 %v3575_v41  ;;  %v3583_v49 = vld [vmem:[%s4419_s14 + $0xe0] sm:$0xff]   ;;  %v3586_v52 = vld [vmem:[%s4419_s14 + $0x58] sm:$0xff]   ;;  %v3590_v56 = vld [vmem:[%s4419_s14 + $0x50] sm:$0xff]  }
  0xdf   : > { %v3584_v50 = vld [vmem:[%s4419_s14 + $0x20] sm:$0xff]   ;;  %v3587_v53 = vld [vmem:[%s4419_s14 + $0xd8] sm:$0xff]   ;;  %v3591_v57 = vld [vmem:[%s4419_s14 + $0xd0] sm:$0xff]  }
  0xe0   : > { %v3585_v51 = vld [vmem:[%s4419_s14 + $0xa0] sm:$0xff]   ;;  %v3588_v54 = vld [vmem:[%s4419_s14 + $0x18] sm:$0xff]   ;;  %v3592_v58 = vld [vmem:[%s4419_s14 + $0x10] sm:$0xff]  }
  0xe1   : > { %3349 = vmatpush3.bf16.msra.mxu0 %v3576_v42  ;;  %3371 = vmatpush3.bf16.msra.mxu1 %v3577_v43  ;;  %v3589_v55 = vld [vmem:[%s4419_s14 + $0x98] sm:$0xff]   ;;  %v3593_v59 = vld [vmem:[%s4419_s14 + $0x90] sm:$0xff]   ;;  %v3594_v60 = vld [vmem:[%s4419_s14 + $0x48] sm:$0xff]  }
  0xe2   : > { %3350 = vmatprep.subr.bf16.mxu0 %v3578_v44  ;;  %3372 = vmatprep.subr.bf16.mxu1 %v3579_v45  ;;  %v3595_v61 = vld [vmem:[%s4419_s14 + $0xc8] sm:$0xff]   ;;  %v3598_v0 = vld [vmem:[%s4419_s14 + $0x40] sm:$0xff]   ;;  %v4453_v1 = vld [vmem:[%s4640_s0 + $0x10] sm:$0xff] }
  0xe3   : > { %v3596_v62 = vld [vmem:[%s4419_s14 + $0x8] sm:$0xff]   ;;  %v3599_v2 = vld [vmem:[%s4419_s14 + $0xc0] sm:$0xff]   ;;  %v4460_v4 = vld [vmem:[%s4640_s0 + $0x18] sm:$0xff]  ;;  %v3187_v10 = vcombine.high %v4453_v1, %v4453_v1  ;;  %v3186_v43 = vcombine.low %v4453_v1, %v4453_v1 }
  0xe4   : > { %v3597_v63 = vld [vmem:[%s4419_s14 + $0x88] sm:$0xff]   ;;  %v3600_v3 = vld [vmem:[%s4419_s14] sm:$0xff]   ;;  %v3606_v8 = vld [vmem:[%s4419_s14 + $0x178] sm:$0xff]   ;;  %v3189_v13 = vcombine.high %v4460_v4, %v4460_v4 }
  0xe5   : > { %3351 = vmatpush3.bf16.msra.mxu0 %v3580_v46  ;;  %3373 = vmatpush3.bf16.msra.mxu1 %v3581_v47  ;;  %v3601_v5 = vld [vmem:[%s4419_s14 + $0x80] sm:$0xff]   ;;  %v3607_v9 = vld [vmem:[%s4419_s14 + $0x138] sm:$0xff]   ;;  %v3610_v14 = vld [vmem:[%s4419_s14 + $0x170] sm:$0xff]   ;;  %v3188_v46 = vcombine.low %v4460_v4, %v4460_v4 }
  0xe6   : > { %3352 = vmatprep.subr.bf16.mxu0 %v3582_v48  ;;  %3374 = vmatprep.subr.bf16.mxu1 %v3583_v49  ;;  %v3608_v11 = vld [vmem:[%s4419_s14 + $0x1f8] sm:$0xff]   ;;  %v3611_v15 = vld [vmem:[%s4419_s14 + $0x130] sm:$0xff]   ;;  %v3614_v18 = vld [vmem:[%s4419_s14 + $0x168] sm:$0xff]  }
  0xe7   : > { %v3609_v12 = vld [vmem:[%s4419_s14 + $0x1b8] sm:$0xff]   ;;  %v3612_v16 = vld [vmem:[%s4419_s14 + $0x1f0] sm:$0xff]   ;;  %v3615_v19 = vld [vmem:[%s4419_s14 + $0x128] sm:$0xff]  }
  0xe8   : > { %v3613_v17 = vld [vmem:[%s4419_s14 + $0x1b0] sm:$0xff]   ;;  %v3616_v20 = vld [vmem:[%s4419_s14 + $0x1e8] sm:$0xff]   ;;  %v3618_v22 = vld [vmem:[%s4419_s14 + $0x160] sm:$0xff]  }
  0xe9   : > { %3353 = vmatpush3.bf16.msra.mxu0 %v3584_v50  ;;  %3375 = vmatpush3.bf16.msra.mxu1 %v3585_v51  ;;  %v3617_v21 = vld [vmem:[%s4419_s14 + $0x1a8] sm:$0xff]   ;;  %v3619_v23 = vld [vmem:[%s4419_s14 + $0x120] sm:$0xff]   ;;  %v3622_v26 = vld [vmem:[%s4419_s14 + $0x158] sm:$0xff]  }
  0xea   : > { %3354 = vmatprep.subr.bf16.mxu0 %v3586_v52  ;;  %3376 = vmatprep.subr.bf16.mxu1 %v3587_v53  ;;  %v3620_v24 = vld [vmem:[%s4419_s14 + $0x1e0] sm:$0xff]   ;;  %v3623_v27 = vld [vmem:[%s4419_s14 + $0x118] sm:$0xff]   ;;  %v3626_v30 = vld [vmem:[%s4419_s14 + $0x150] sm:$0xff]  }
  0xeb   : > { %v3621_v25 = vld [vmem:[%s4419_s14 + $0x1a0] sm:$0xff]   ;;  %v3624_v28 = vld [vmem:[%s4419_s14 + $0x1d8] sm:$0xff]   ;;  %v3627_v31 = vld [vmem:[%s4419_s14 + $0x110] sm:$0xff]  }
  0xec   : > { %v3625_v29 = vld [vmem:[%s4419_s14 + $0x198] sm:$0xff]   ;;  %v3628_v32 = vld [vmem:[%s4419_s14 + $0x1d0] sm:$0xff]   ;;  %v3630_v34 = vld [vmem:[%s4419_s14 + $0x148] sm:$0xff]  }
  0xed   : > { %3355 = vmatpush3.bf16.msra.mxu0 %v3588_v54  ;;  %3377 = vmatpush3.bf16.msra.mxu1 %v3589_v55  ;;  %v3629_v33 = vld [vmem:[%s4419_s14 + $0x190] sm:$0xff]   ;;  %v3631_v35 = vld [vmem:[%s4419_s14 + $0x108] sm:$0xff]   ;;  %v3634_v38 = vld [vmem:[%s4419_s14 + $0x140] sm:$0xff]  }
  0xee   : > { %3356 = vmatprep.subr.bf16.mxu0 %v3590_v56  ;;  %3378 = vmatprep.subr.bf16.mxu1 %v3591_v57  ;;  %v3632_v36 = vld [vmem:[%s4419_s14 + $0x1c8] sm:$0xff]   ;;  %v4503_v39 = vld [vmem:[%s4640_s0 + $0x20] sm:$0xff]  ;;  %v3640_v45 = vld [vmem:[%s4419_s14 + $0x278] sm:$0xff]  }
  0xef   : > { %v3633_v37 = vld [vmem:[%s4419_s14 + $0x188] sm:$0xff]   ;;  %v3635_v40 = vld [vmem:[%s4419_s14 + $0x100] sm:$0xff]   ;;  %v3643_v47 = vld [vmem:[%s4419_s14 + $0x238] sm:$0xff]   ;;  %v3191_v48 = vcombine.high %v4503_v39, %v4503_v39 }
  0xf0   : > { %v3636_v41 = vld [vmem:[%s4419_s14 + $0x1c0] sm:$0xff]   ;;  %v4510_v42 = vld [vmem:[%s4640_s0 + $0x28] sm:$0xff]  ;;  %v3644_v49 = vld [vmem:[%s4419_s14 + $0x2f8] sm:$0xff]  }
  0xf1   : > { %3357 = vmatpush3.bf16.msra.mxu0 %v3592_v58  ;;  %3379 = vmatpush3.bf16.msra.mxu1 %v3593_v59  ;;  %v3639_v44 = vld [vmem:[%s4419_s14 + $0x180] sm:$0xff]   ;;  %v3645_v50 = vld [vmem:[%s4419_s14 + $0x2b8] sm:$0xff]   ;;  %v3193_v51 = vcombine.high %v4510_v42, %v4510_v42  ;;  %v3646_v52 = vld [vmem:[%s4419_s14 + $0x270] sm:$0xff]  }
  0xf2   : > { %3358 = vmatprep.subr.bf16.mxu0 %v3594_v60  ;;  %3380 = vmatprep.subr.bf16.mxu1 %v3595_v61  ;;  %v3647_v53 = vld [vmem:[%s4419_s14 + $0x230] sm:$0xff]   ;;  %v3650_v56 = vld [vmem:[%s4419_s14 + $0x268] sm:$0xff]   ;;  %v3654_v60 = vld [vmem:[%s4419_s14 + $0x260] sm:$0xff]  }
  0xf3   : > { %v3648_v54 = vld [vmem:[%s4419_s14 + $0x2f0] sm:$0xff]   ;;  %v3651_v57 = vld [vmem:[%s4419_s14 + $0x228] sm:$0xff]   ;;  %v3655_v61 = vld [vmem:[%s4419_s14 + $0x220] sm:$0xff]  }
  0xf4   : > { %v3649_v55 = vld [vmem:[%s4419_s14 + $0x2b0] sm:$0xff]   ;;  %v3652_v58 = vld [vmem:[%s4419_s14 + $0x2e8] sm:$0xff]   ;;  %v3659_v1 = vld [vmem:[%s4419_s14 + $0x218] sm:$0xff]  }
  0xf5   : > { %3359 = vmatpush3.bf16.msra.mxu0 %v3596_v62  ;;  %3381 = vmatpush3.bf16.msra.mxu1 %v3597_v63  ;;  %v3653_v59 = vld [vmem:[%s4419_s14 + $0x2a8] sm:$0xff]   ;;  %v3656_v62 = vld [vmem:[%s4419_s14 + $0x2e0] sm:$0xff]   ;;  %v3662_v4 = vld [vmem:[%s4419_s14 + $0x250] sm:$0xff]  }
  0xf6   : > { %3360 = vmatprep.subr.bf16.mxu0 %v3598_v0  ;;  %3382 = vmatprep.subr.bf16.mxu1 %v3599_v2  ;;  %v3657_v63 = vld [vmem:[%s4419_s14 + $0x2a0] sm:$0xff]   ;;  %v3658_v0 = vld [vmem:[%s4419_s14 + $0x258] sm:$0xff]  }
  0xf7   : > { %v3660_v2 = vld [vmem:[%s4419_s14 + $0x2d8] sm:$0xff]  }
  0xf9   : > { %3361 = vmatpush3.bf16.msra.mxu0 %v3600_v3  ;;  %3383 = vmatpush3.bf16.msra.mxu1 %v3601_v5  ;;  %v3661_v3 = vld [vmem:[%s4419_s14 + $0x298] sm:$0xff]   ;;  %v3663_v5 = vld [vmem:[%s4419_s14 + $0x210] sm:$0xff]  }
  0xfa   : > { %3390 = vmatprep.subr.bf16.mxu0 %v3606_v8  ;;  %3412 = vmatprep.subr.bf16.mxu1 %v3608_v11  ;;  %v3666_v8 = vld [vmem:[%s4419_s14 + $0x248] sm:$0xff]  }
  0xfb   : > { %v3669_v11 = vld [vmem:[%s4419_s14 + $0x288] sm:$0xff]  }
  0xfc   : > { %2717 = vmatmul.mubr.bf16.vlgmr.msra.gmra.mxu0 %v3182_v6  ;;  %2757 = vmatmul.mubr.bf16.vlgmr.msra.gmra.mxu1 %v3184_v7  ;;  %v3664_v6 = vld [vmem:[%s4419_s14 + $0x2d0] sm:$0xff]  }
  0xfd   : > { %3391 = vmatpush3.bf16.msra.mxu0 %v3607_v9  ;;  %2796 = vmatprep.mubr.bf16.mxu0 %v3187_v10  ;;  %v3665_v7 = vld [vmem:[%s4419_s14 + $0x290] sm:$0xff]   ;;  %v3667_v9 = vld [vmem:[%s4419_s14 + $0x208] sm:$0xff]  }
  0xfe   : > { %3413 = vmatpush3.bf16.msra.mxu1 %v3609_v12  ;;  %3392 = vmatprep.subr.bf16.mxu0 %v3610_v14  ;;  %v3668_v10 = vld [vmem:[%s4419_s14 + $0x2c8] sm:$0xff]   ;;  %v3670_v12 = vld [vmem:[%s4419_s14 + $0x240] sm:$0xff]  }
  0xff   : > { %2836 = vmatprep.mubr.bf16.mxu1 %v3189_v13  ;;  %3414 = vmatprep.subr.bf16.mxu1 %v3612_v16  ;;  %v3671_v13 = vld [vmem:[%s4419_s14 + $0x200] sm:$0xff]  }
 0x100   : > { %v3672_v14 = vld [vmem:[%s4419_s14 + $0x2c0] sm:$0xff]  }
 0x101   : > { %3393 = vmatpush3.bf16.msra.mxu0 %v3611_v15  ;;  %v3190_v15 = vcombine.low %v4503_v39, %v4503_v39  ;;  %v3675_v16 = vld [vmem:[%s4419_s14 + $0x280] sm:$0xff]   ;;  %v3699_v39 = vld [vmem:[%s4419_s14 + $0x310] sm:$0xff]  }
 0x102   : > { %3415 = vmatpush3.bf16.msra.mxu1 %v3613_v17  ;;  %3394 = vmatprep.subr.bf16.mxu0 %v3614_v18  ;;  %v3676_v17 = vld [vmem:[%s4419_s14 + $0x378] sm:$0xff]   ;;  %v3192_v18 = vcombine.low %v4510_v42, %v4510_v42  ;;  %v3702_v42 = vld [vmem:[%s4419_s14 + $0x348] sm:$0xff]  }
 0x103   : > { %3416 = vmatprep.subr.bf16.mxu1 %v3616_v20  ;;  %v3680_v20 = vld [vmem:[%s4419_s14 + $0x3f8] sm:$0xff]  }
 0x105   : > { %3395 = vmatpush3.bf16.msra.mxu0 %v3615_v19  ;;  %v3679_v19 = vld [vmem:[%s4419_s14 + $0x338] sm:$0xff]  }
 0x106   : > { %3417 = vmatpush3.bf16.msra.mxu1 %v3617_v21  ;;  %3396 = vmatprep.subr.bf16.mxu0 %v3618_v22  ;;  %v3681_v21 = vld [vmem:[%s4419_s14 + $0x3b8] sm:$0xff]   ;;  %v3682_v22 = vld [vmem:[%s4419_s14 + $0x370] sm:$0xff]  }
 0x107   : > { %3418 = vmatprep.subr.bf16.mxu1 %v3620_v24  ;;  %v3684_v24 = vld [vmem:[%s4419_s14 + $0x3f0] sm:$0xff]  }
 0x109   : > { %3397 = vmatpush3.bf16.msra.mxu0 %v3619_v23  ;;  %v3683_v23 = vld [vmem:[%s4419_s14 + $0x330] sm:$0xff]  }
 0x10a   : > { %3419 = vmatpush3.bf16.msra.mxu1 %v3621_v25  ;;  %3398 = vmatprep.subr.bf16.mxu0 %v3622_v26  ;;  %v3685_v25 = vld [vmem:[%s4419_s14 + $0x3b0] sm:$0xff]   ;;  %v3686_v26 = vld [vmem:[%s4419_s14 + $0x368] sm:$0xff]  }
 0x10b   : > { %3420 = vmatprep.subr.bf16.mxu1 %v3624_v28  ;;  %v3688_v28 = vld [vmem:[%s4419_s14 + $0x3e8] sm:$0xff]  }
 0x10d   : > { %3399 = vmatpush3.bf16.msra.mxu0 %v3623_v27  ;;  %v3687_v27 = vld [vmem:[%s4419_s14 + $0x328] sm:$0xff]  }
 0x10e   : > { %3421 = vmatpush3.bf16.msra.mxu1 %v3625_v29  ;;  %3400 = vmatprep.subr.bf16.mxu0 %v3626_v30  ;;  %v3689_v29 = vld [vmem:[%s4419_s14 + $0x3a8] sm:$0xff]   ;;  %v3690_v30 = vld [vmem:[%s4419_s14 + $0x360] sm:$0xff]  }
 0x10f   : > { %3422 = vmatprep.subr.bf16.mxu1 %v3628_v32  ;;  %v3692_v32 = vld [vmem:[%s4419_s14 + $0x3e0] sm:$0xff]  }
 0x111   : > { %3401 = vmatpush3.bf16.msra.mxu0 %v3627_v31  ;;  %v3691_v31 = vld [vmem:[%s4419_s14 + $0x320] sm:$0xff]  }
 0x112   : > { %3423 = vmatpush3.bf16.msra.mxu1 %v3629_v33  ;;  %3402 = vmatprep.subr.bf16.mxu0 %v3630_v34  ;;  %v3693_v33 = vld [vmem:[%s4419_s14 + $0x3a0] sm:$0xff]   ;;  %v3694_v34 = vld [vmem:[%s4419_s14 + $0x358] sm:$0xff]  }
 0x113   : > { %3424 = vmatprep.subr.bf16.mxu1 %v3632_v36  ;;  %v3696_v36 = vld [vmem:[%s4419_s14 + $0x3d8] sm:$0xff]  }
 0x115   : > { %3403 = vmatpush3.bf16.msra.mxu0 %v3631_v35  ;;  %v3695_v35 = vld [vmem:[%s4419_s14 + $0x318] sm:$0xff]  }
 0x116   : > { %3425 = vmatpush3.bf16.msra.mxu1 %v3633_v37  ;;  %3404 = vmatprep.subr.bf16.mxu0 %v3634_v38  ;;  %v3697_v37 = vld [vmem:[%s4419_s14 + $0x398] sm:$0xff]   ;;  %v3698_v38 = vld [vmem:[%s4419_s14 + $0x350] sm:$0xff]  }
 0x117   : > { %3426 = vmatprep.subr.bf16.mxu1 %v3636_v41  ;;  %v3701_v41 = vld [vmem:[%s4419_s14 + $0x390] sm:$0xff]  }
 0x119   : > { %3405 = vmatpush3.bf16.msra.mxu0 %v3635_v40  ;;  %v3700_v40 = vld [vmem:[%s4419_s14 + $0x3d0] sm:$0xff]  }
 0x11a   : > { %3427 = vmatpush3.bf16.msra.mxu1 %v3639_v44  ;;  %3434 = vmatprep.subr.bf16.mxu0 %v3640_v45  ;;  %v3704_v44 = vld [vmem:[%s4419_s14 + $0x3c8] sm:$0xff]  }
 0x11b   : > { %3456 = vmatprep.subr.bf16.mxu1 %v3644_v49  ;;  %v3705_v45 = vld [vmem:[%s4419_s14 + $0x388] sm:$0xff]   ;;  %v1466_v49 = vld [vmem:[%s4640_s0 + $0x30] sm:$0xff] }
 0x11c   : > { %2797 = vmatmul.mubr.bf16.vlgmr.msra.gmra.mxu0 %v3186_v43  ;;  %v3703_v43 = vld [vmem:[%s4419_s14 + $0x308] sm:$0xff]  }
 0x11d   : > { %3435 = vmatpush3.bf16.msra.mxu0 %v3643_v47  ;;  %2837 = vmatmul.mubr.bf16.vlgmr.msra.gmra.mxu1 %v3188_v46  ;;  %v3706_v46 = vld [vmem:[%s4419_s14 + $0x340] sm:$0xff]  }
 0x11e   : > { %2876 = vmatprep.mubr.bf16.mxu0 %v3191_v48  ;;  %3457 = vmatpush3.bf16.msra.mxu1 %v3645_v50  ;;  %v3707_v47 = vld [vmem:[%s4419_s14 + $0x300] sm:$0xff]   ;;  %v3194_v50 = vcombine.low %v1466_v49, %v1466_v49 }
 0x11f   : > { %3436 = vmatprep.subr.bf16.mxu0 %v3646_v52  ;;  %2916 = vmatprep.mubr.bf16.mxu1 %v3193_v51  ;;  %v3708_v48 = vld [vmem:[%s4419_s14 + $0x3c0] sm:$0xff]   ;;  %v3195_v51 = vcombine.high %v1466_v49, %v1466_v49 }
 0x120   : > { %3458 = vmatprep.subr.bf16.mxu1 %v3648_v54  ;;  %v3711_v52 = vld [vmem:[%s4419_s14 + $0x380] sm:$0xff]   ;;  %v1467_v54 = vld [vmem:[%s4640_s0 + $0x38] sm:$0xff] }
 0x121   : > { %3437 = vmatpush3.bf16.msra.mxu0 %v3647_v53  ;;  %v3712_v53 = vld [vmem:[%s4419_s14 + $0x478] sm:$0xff]  }
 0x122   : > { %3459 = vmatpush3.bf16.msra.mxu1 %v3649_v55  ;;  %3438 = vmatprep.subr.bf16.mxu0 %v3650_v56  ;;  %v3196_v55 = vcombine.low %v1467_v54, %v1467_v54  ;;  %v3197_v56 = vcombine.high %v1467_v54, %v1467_v54 }
 0x123   : > { %3460 = vmatprep.subr.bf16.mxu1 %v3652_v58  ;;  %v3716_v58 = vld [vmem:[%s4419_s14 + $0x470] sm:$0xff]  }
 0x125   : > { %3439 = vmatpush3.bf16.msra.mxu0 %v3651_v57  ;;  %v3715_v57 = vld [vmem:[%s4419_s14 + $0x438] sm:$0xff]  }
 0x126   : > { %3461 = vmatpush3.bf16.msra.mxu1 %v3653_v59  ;;  %3440 = vmatprep.subr.bf16.mxu0 %v3654_v60  ;;  %v3717_v59 = vld [vmem:[%s4419_s14 + $0x430] sm:$0xff]   ;;  %v3718_v60 = vld [vmem:[%s4419_s14 + $0x468] sm:$0xff]  }
 0x127   : > { %3462 = vmatprep.subr.bf16.mxu1 %v3656_v62  ;;  %v3720_v62 = vld [vmem:[%s4419_s14 + $0x460] sm:$0xff]  }
 0x129   : > { %3441 = vmatpush3.bf16.msra.mxu0 %v3655_v61  ;;  %v3719_v61 = vld [vmem:[%s4419_s14 + $0x428] sm:$0xff]  }
 0x12a   : > { %3463 = vmatpush3.bf16.msra.mxu1 %v3657_v63  ;;  %3442 = vmatprep.subr.bf16.mxu0 %v3658_v0  ;;  %v3721_v63 = vld [vmem:[%s4419_s14 + $0x420] sm:$0xff]   ;;  %v3722_v0 = vld [vmem:[%s4419_s14 + $0x458] sm:$0xff]  }
 0x12b   : > { %3464 = vmatprep.subr.bf16.mxu1 %v3660_v2  ;;  %v1468_v2 = vld [vmem:[%s4640_s0 + $0x40] sm:$0xff] }
 0x12d   : > { %3443 = vmatpush3.bf16.msra.mxu0 %v3659_v1  ;;  %v3723_v1 = vld [vmem:[%s4419_s14 + $0x418] sm:$0xff]  }
 0x12e   : > { %3465 = vmatpush3.bf16.msra.mxu1 %v3661_v3  ;;  %3444 = vmatprep.subr.bf16.mxu0 %v3662_v4  ;;  %v3724_v3 = vld [vmem:[%s4419_s14 + $0x450] sm:$0xff]   ;;  %v3199_v4 = vcombine.high %v1468_v2, %v1468_v2 }
 0x12f   : > { %3466 = vmatprep.subr.bf16.mxu1 %v3664_v6  ;;  %v3726_v6 = vld [vmem:[%s4419_s14 + $0x448] sm:$0xff]  }
 0x131   : > { %3445 = vmatpush3.bf16.msra.mxu0 %v3663_v5  ;;  %v3725_v5 = vld [vmem:[%s4419_s14 + $0x410] sm:$0xff]  }
 0x132   : > { %3467 = vmatpush3.bf16.msra.mxu1 %v3665_v7  ;;  %3446 = vmatprep.subr.bf16.mxu0 %v3666_v8  ;;  %v3727_v7 = vld [vmem:[%s4419_s14 + $0x408] sm:$0xff]   ;;  %v3728_v8 = vld [vmem:[%s4419_s14 + $0x440] sm:$0xff]  }
 0x133   : > { %3468 = vmatprep.subr.bf16.mxu1 %v3668_v10  ;;  %v3198_v10 = vcombine.low %v1468_v2, %v1468_v2 }
 0x135   : > { %3447 = vmatpush3.bf16.msra.mxu0 %v3667_v9  ;;  %v3729_v9 = vld [vmem:[%s4419_s14 + $0x400] sm:$0xff]   ;;  %s1450_s14 = scalar_lea.vmem %s4643_s3, %s4650_s21 }
 0x136   : > { %3469 = vmatpush3.bf16.msra.mxu1 %v3669_v11  ;;  %3448 = vmatprep.subr.bf16.mxu0 %v3670_v12 }
 0x137   : > { %3470 = vmatprep.subr.bf16.mxu1 %v3672_v14 }
 0x139   : > { %3449 = vmatpush3.bf16.msra.mxu0 %v3671_v13 }
 0x13a   : > { %3471 = vmatpush3.bf16.msra.mxu1 %v3675_v16  ;;  %3478 = vmatprep.subr.bf16.mxu0 %v3676_v17 }
 0x13b   : > { %3500 = vmatprep.subr.bf16.mxu1 %v3680_v20 }
 0x13c   : > { %2877 = vmatmul.mubr.bf16.vlgmr.msra.gmra.mxu0 %v3190_v15 }
 0x13d   : > { %3479 = vmatpush3.bf16.msra.mxu0 %v3679_v19  ;;  %2917 = vmatmul.mubr.bf16.vlgmr.msra.gmra.mxu1 %v3192_v18 }
 0x13e   : > { %3501 = vmatpush3.bf16.msra.mxu1 %v3681_v21  ;;  %3480 = vmatprep.subr.bf16.mxu0 %v3682_v22 }
 0x13f   : > { %3502 = vmatprep.subr.bf16.mxu1 %v3684_v24  ;;  %2956 = vmatprep.mubr.bf16.mxu0 %v3195_v51 }
 0x140   : > { %2996 = vmatprep.mubr.bf16.mxu1 %v3197_v56 }
 0x141   : > { %3481 = vmatpush3.bf16.msra.mxu0 %v3683_v23 }
 0x142   : > { %3503 = vmatpush3.bf16.msra.mxu1 %v3685_v25  ;;  %3482 = vmatprep.subr.bf16.mxu0 %v3686_v26 }
 0x143   : > { %3504 = vmatprep.subr.bf16.mxu1 %v3688_v28 }
 0x145   : > { %3483 = vmatpush3.bf16.msra.mxu0 %v3687_v27 }
 0x146   : > { %3505 = vmatpush3.bf16.msra.mxu1 %v3689_v29  ;;  %3484 = vmatprep.subr.bf16.mxu0 %v3690_v30 }
 0x147   : > { %3506 = vmatprep.subr.bf16.mxu1 %v3692_v32 }
 0x149   : > { %3485 = vmatpush3.bf16.msra.mxu0 %v3691_v31 }
 0x14a   : > { %3507 = vmatpush3.bf16.msra.mxu1 %v3693_v33  ;;  %3486 = vmatprep.subr.bf16.mxu0 %v3694_v34 }
 0x14b   : > { %3508 = vmatprep.subr.bf16.mxu1 %v3696_v36 }
 0x14d   : > { %3487 = vmatpush3.bf16.msra.mxu0 %v3695_v35 }
 0x14e   : > { %3509 = vmatpush3.bf16.msra.mxu1 %v3697_v37  ;;  %3488 = vmatprep.subr.bf16.mxu0 %v3698_v38 }
 0x14f   : > { %3510 = vmatprep.subr.bf16.mxu1 %v3700_v40 }
 0x151   : > { %3489 = vmatpush3.bf16.msra.mxu0 %v3699_v39 }
 0x152   : > { %3511 = vmatpush3.bf16.msra.mxu1 %v3701_v41  ;;  %3490 = vmatprep.subr.bf16.mxu0 %v3702_v42 }
 0x153   : > { %3512 = vmatprep.subr.bf16.mxu1 %v3704_v44 }
 0x155   : > { %3491 = vmatpush3.bf16.msra.mxu0 %v3703_v43 }
 0x156   : > { %3513 = vmatpush3.bf16.msra.mxu1 %v3705_v45  ;;  %3492 = vmatprep.subr.bf16.mxu0 %v3706_v46 }
 0x157   : > { %3514 = vmatprep.subr.bf16.mxu1 %v3708_v48 }
 0x159   : > { %3493 = vmatpush3.bf16.msra.mxu0 %v3707_v47 }
 0x15a   : > { %3515 = vmatpush3.bf16.msra.mxu1 %v3711_v52  ;;  %3522 = vmatprep.subr.bf16.mxu0 %v3712_v53 }
 0x15c   : > { %2957 = vmatmul.mubr.bf16.vlgmr.msra.gmra.mxu0 %v3194_v50 }
 0x15d   : > { %3523 = vmatpush3.bf16.msra.mxu0 %v3715_v57  ;;  %2997 = vmatmul.mubr.bf16.vlgmr.msra.gmra.mxu1 %v3196_v55 }
 0x15e   : > { %3524 = vmatprep.subr.bf16.mxu0 %v3716_v58  ;;  %3036 = vmatprep.mubr.bf16.mxu0 %v3199_v4 }
 0x161   : > { %3525 = vmatpush3.bf16.msra.mxu0 %v3717_v59 }
 0x162   : > { %3526 = vmatprep.subr.bf16.mxu0 %v3718_v60 }
 0x165   : > { %3527 = vmatpush3.bf16.msra.mxu0 %v3719_v61 }
 0x166   : > { %3528 = vmatprep.subr.bf16.mxu0 %v3720_v62 }
 0x169   : > { %3529 = vmatpush3.bf16.msra.mxu0 %v3721_v63 }
 0x16a   : > { %3530 = vmatprep.subr.bf16.mxu0 %v3722_v0 }
 0x16d   : > { %3531 = vmatpush3.bf16.msra.mxu0 %v3723_v1 }
 0x16e   : > { %3532 = vmatprep.subr.bf16.mxu0 %v3724_v3 }
 0x171   : > { %3533 = vmatpush3.bf16.msra.mxu0 %v3725_v5 }
 0x172   : > { %3534 = vmatprep.subr.bf16.mxu0 %v3726_v6 }
 0x175   : > { %3535 = vmatpush3.bf16.msra.mxu0 %v3727_v7 }
 0x176   : > { %3536 = vmatprep.subr.bf16.mxu0 %v3728_v8 }
 0x179   : > { %3537 = vmatpush3.bf16.msra.mxu0 %v3729_v9 }
 0x17c   : > { %3037 = vmatmul.mubr.bf16.vlgmr.msra.gmra.mxu0 %v3198_v10 }
 0x1bc   : > { %v3362_v11 = vpop.f32.mrf.mxu0  ;;  %v3384_v12 = vpop.f32.mrf.mxu1 }
 0x1be   : > { %v3363_v13 = vpop.f32.mrf.mxu0  ;;  %v3385_v15 = vpop.f32.mrf.mxu1 }
 0x1bf   : > { %v3364_v14 = vadd.f32 %v3363_v13, %v3362_v11  ;;  %v3386_v16 = vadd.f32 %v3385_v15, %v3384_v12 }
 0x1c0   : > { %v3365_v17 = vpop.f32.mrf.mxu0  ;;  %v3387_v18 = vpop.f32.mrf.mxu1 }
 0x1c1   : > { %v2759_v19 = vadd.f32 %v3386_v16, %v3364_v14 }
 0x1c2   : > { %v3366_v20 = vpop.f32.mrf.mxu0  ;;  %v3388_v21 = vpop.f32.mrf.mxu1 }
 0x1c3   : > { %v3064_v21 = vld [vmem:[%s1447_s11] sm:$0x1] }
 0x1dc   : > { %v3406_v22 = vpop.f32.mrf.mxu0 }
 0x1dd   : > { %v3428_v24 = vpop.f32.mrf.mxu1 }
 0x1de   : > { %v3407_v23 = vpop.f32.mrf.mxu0 }
 0x1df   : > { %v3408_v25 = vadd.f32 %v3407_v23, %v3406_v22  ;;  %v3429_v27 = vpop.f32.mrf.mxu1 }
 0x1e0   : > { %v3409_v26 = vpop.f32.mrf.mxu0  ;;  %v3430_v29 = vadd.f32 %v3429_v27, %v3428_v24 }
 0x1e1   : > { %v2799_v28 = vadd.f32 %v3408_v25, %v2759_v19  ;;  %v3431_v31 = vpop.f32.mrf.mxu1  ;;  %v3069_v19 = vlaneseq  ;;  %v3066_v25 = vld [vmem:[%s1450_s14] sm:$0x1] }
 0x1e2   : > { %v3410_v30 = vpop.f32.mrf.mxu0  ;;  %v3081_v31 = vld [vmem:[%s1454_s17] sm:$0xff] }
 0x1e3   : > { %v2839_v32 = vadd.f32 %v3430_v29, %v2799_v28  ;;  %v3432_v33 = vpop.f32.mrf.mxu1  ;;  %v3070_v20 = vshrl.u32 %v3069_v19, 7 }
 0x1e5   : > { %v3071_v22 = vsub.s32 0, %v3070_v20 }
 0x1fc   : > { %v3450_v34 = vpop.f32.mrf.mxu0 }
 0x1fd   : > { %v3472_v36 = vpop.f32.mrf.mxu1 }
 0x1fe   : > { %v3451_v35 = vpop.f32.mrf.mxu0 }
 0x1ff   : > { %v3473_v38 = vpop.f32.mrf.mxu1  ;;  %v3452_v50 = vadd.f32 %v3451_v35, %v3450_v34 }
 0x200   : > { %v3453_v37 = vpop.f32.mrf.mxu0  ;;  %v3474_v52 = vadd.f32 %v3473_v38, %v3472_v36 }
 0x201   : > { %v3475_v40 = vpop.f32.mrf.mxu1  ;;  %v2879_v51 = vadd.f32 %v3452_v50, %v2839_v32 }
 0x202   : > { %v3454_v39 = vpop.f32.mrf.mxu0 }
 0x203   : > { %v3476_v41 = vpop.f32.mrf.mxu1  ;;  %v2919_v54 = vadd.f32 %v3474_v52, %v2879_v51 }
 0x21c   : > { %v3494_v42 = vpop.f32.mrf.mxu0 }
 0x21d   : > { %v3516_v44 = vpop.f32.mrf.mxu1 }
 0x21e   : > { %v3495_v43 = vpop.f32.mrf.mxu0 }
 0x21f   : > { %v3517_v46 = vpop.f32.mrf.mxu1  ;;  %v3496_v53 = vadd.f32 %v3495_v43, %v3494_v42 }
 0x220   : > { %v3497_v45 = vpop.f32.mrf.mxu0  ;;  %v3518_v56 = vadd.f32 %v3517_v46, %v3516_v44 }
 0x221   : > { %v3519_v48 = vpop.f32.mrf.mxu1  ;;  %v2959_v55 = vadd.f32 %v3496_v53, %v2919_v54 }
 0x222   : > { %v3498_v47 = vpop.f32.mrf.mxu0 }
 0x223   : > { %v3520_v49 = vpop.f32.mrf.mxu1  ;;  %v2999_v59 = vadd.f32 %v3518_v56, %v2959_v55 }
 0x23c   : > { %v3538_v57 = vpop.f32.mrf.mxu0 }
 0x23e   : > { %v3539_v58 = vpop.f32.mrf.mxu0 }
 0x23f   : > { %v3540_v60 = vadd.f32 %v3539_v58, %v3538_v57 }
 0x240   : > { %v3541_v61 = vpop.f32.mrf.mxu0 }
 0x241   : > { %v3039_v62 = vadd.f32 %v3540_v60, %v2999_v59 }
 0x242   : > { %v3542_v63 = vpop.f32.mrf.mxu0 }
 0x243   : > { %v3044_v0 = vrot.slane %v3039_v62, 4  ;;  %v3050_v1 = vmul.f32 %v3039_v62, %v3039_v62 }
 0x245   : > { %v3045_v2 = vadd.f32 %v3044_v0, %v3039_v62  ;;  %v3051_v3 = vrot.slane %v3050_v1, 4 }
 0x247   : > { %v3046_v4 = vrot.slane %v3045_v2, 2  ;;  %v3052_v5 = vadd.f32 %v3051_v3, %v3050_v1 }
 0x249   : > { %v3047_v6 = vadd.f32 %v3046_v4, %v3045_v2  ;;  %v3053_v7 = vrot.slane %v3052_v5, 2 }
 0x24b   : > { %v3048_v8 = vrot.slane %v3047_v6, 1  ;;  %v3054_v9 = vadd.f32 %v3053_v7, %v3052_v5 }
 0x24d   : > { %v3049_v10 = vadd.f32 %v3048_v8, %v3047_v6  ;;  %v3055_v11 = vrot.slane %v3054_v9, 1 }
 0x24f   : > { %v3056_v12 = vadd.f32 %v3055_v11, %v3054_v9  ;;  %v3057_v13 = vmul.f32 0.125, %v3049_v10 }
 0x251   : > { %v3058_v14 = vmul.f32 0.125, %v3056_v12  ;;  %v3059_v15 = vmul.f32 %v3057_v13, %v3057_v13 }
 0x253   : > { %v3060_v16 = vsub.f32 %v3058_v14, %v3059_v15 }
 0x255   : > { %v3061_v17 = vmax.f32 %v3060_v16, 0.0 }
 0x257   : > { %v3062_v18 = vadd.f32 1e-05, %v3061_v17 }
 0x259   : > { %3732 = vrsqrt.f32 %v3062_v18 }
 0x266   : > { %v3733_v23 = vpop.eup %3732 }
 0x267   : > { %v3065_v24 = vmul.f32 %v3733_v23, %v3064_v21 }
 0x269   : > { %v3067_v26 = vmul.f32 %v3065_v24, %v3057_v13  ;;  %v3072_v27 = vrot.slane %v3065_v24, %v3071_v22 }
 0x26b   : > { %v3068_v28 = vsub.f32 %v3066_v25, %v3067_v26  ;;  %v3073_v29 = vmul.f32 %v3072_v27, %v3039_v62 }
 0x26d   : > { %v3078_v30 = vrot.slane %v3068_v28, %v3071_v22 }
 0x26f   : > { %v3080_v32 = vadd.f32 %v3078_v30, %v3073_v29 }
 0x271   : > { %v3082_v33 = vadd.f32 %v3081_v31, %v3080_v32 }
 0x273   : > { %v3083_v34 = vmax.f32 %v3082_v33, 0.0 }
 0x275   : > { %3084 = vst [vmem:[%s1458_s24] sm:$0xff] %v3083_v34 }
 0x276 PF: > { %p12_p9 = scmp.ge.s32.totalorder %s3805_s22, 4   ;;  %s4646_s18 = smov %s3752_s19 }
 0x277   : > { %s4647_s19 = smov %s3814_s25  ;;  %s4648_s20 = smov %s3805_s22 }
 0x278   :  { %14 = sbr.rel (!%p12_p9) target bundleno = 2 (0x2), region = 125 }

</bundles_post_ra>
